<compile_context>
chip_gen: v5e
topology: v5e:2x2
jax: 0.10.0
libtpu: 0.0.40
codegen_flags: <defaults>
</compile_context>

<pallas_src>
import numpy as np
import jax
import jax.numpy as jnp
from jax.experimental import pallas as pl
from jax.experimental.pallas import tpu as pltpu

_VMEM = pl.BlockSpec(memory_space=pltpu.MemorySpace.VMEM)


def _round_up(x, m):
    return (x + m - 1) // m * m


# ----------------------------- Pallas kernels ------------------------------

def _matmul_bn_relu_kernel(x_ref, w_ref, s_ref, b_ref, o_ref):
    # out = relu((x @ w) * scale + bias) -- conv-as-matmul + folded BN + ReLU.
    # x/w are bf16 (MXU-native), accumulation in f32.
    acc = jnp.dot(x_ref[...], w_ref[...], preferred_element_type=jnp.float32)
    o_ref[...] = jnp.maximum(acc * s_ref[...] + b_ref[...], 0.0)


def _dwt_haar_kernel(a_ref, b_ref, c_ref, d_ref, ll_ref, d1_ref, d2_ref, d3_ref):
    # a,b,c,d are the 4 phases of each 2x2 block (even/even, even/odd, ...).
    a, b, c, d = a_ref[...], b_ref[...], c_ref[...], d_ref[...]
    ll_ref[...] = (a + b + c + d) * 0.5            # LL
    d1_ref[...] = (a + b - c - d) * 0.5            # low-W  / high-H
    d2_ref[...] = (a - b + c - d) * 0.5            # high-W / low-H
    d3_ref[...] = (a - b - c + d) * 0.5            # high-W / high-H


def _bilinear_kernel(g00_ref, g01_ref, g10_ref, g11_ref,
                     w00_ref, w01_ref, w10_ref, w11_ref, o_ref):
    o_ref[...] = (g00_ref[...] * w00_ref[...] + g01_ref[...] * w01_ref[...]
                  + g10_ref[...] * w10_ref[...] + g11_ref[...] * w11_ref[...])


def _maxpool_kernel(a_ref, b_ref, c_ref, d_ref, o_ref):
    o_ref[...] = jnp.maximum(jnp.maximum(a_ref[...], b_ref[...]),
                             jnp.maximum(c_ref[...], d_ref[...]))


def _avgpool_kernel(x_ref, o_ref):
    o_ref[...] = jnp.mean(x_ref[...], axis=1, keepdims=True)


# ------------------------------- op wrappers --------------------------------

def matmul_bn_relu(x2d, w2d, scale, bias, use_pallas=True):
    """relu((x2d @ w2d) * scale + bias), bf16 operands / f32 accumulation."""
    M, K = x2d.shape
    N = w2d.shape[1]
    xb = x2d.astype(jnp.bfloat16)
    wb = w2d.astype(jnp.bfloat16)
    s = scale.reshape(1, N).astype(jnp.float32)
    b = bias.reshape(1, N).astype(jnp.float32)

    if not use_pallas:
        acc = jnp.dot(xb, wb, preferred_element_type=jnp.float32)
        return jnp.maximum(acc * s + b, 0.0)

    # Lane-dense output: pad N to a multiple of 128 (unmasked vector stores).
    Np = _round_up(N, 128)
    if Np != N:
        wb = jnp.pad(wb, ((0, 0), (0, Np - N)))
        s = jnp.pad(s, ((0, 0), (0, Np - N)))
        b = jnp.pad(b, ((0, 0), (0, Np - N)))

    # 1-D grid over M.  tm multiple of 8, capped at 256 so double-buffered
    # (tm,K)+(K,Np)+(tm,Np) tiles stay well under the v7x 64 MiB VMEM.
    tm = min(256, _round_up(M, 8))
    Mp = _round_up(M, tm)
    if Mp != M:
        xb = jnp.pad(xb, ((0, Mp - M), (0, 0)))

    out = pl.pallas_call(
        _matmul_bn_relu_kernel,
        out_shape=jax.ShapeDtypeStruct((Mp, Np), jnp.float32),
        grid=(Mp // tm,),
        in_specs=[pl.BlockSpec((tm, K), lambda i: (i, 0)),
                  pl.BlockSpec((K, Np), lambda i: (0, 0)),
                  pl.BlockSpec((1, Np), lambda i: (0, 0)),
                  pl.BlockSpec((1, Np), lambda i: (0, 0))],
        out_specs=pl.BlockSpec((tm, Np), lambda i: (i, 0)),
        compiler_params=pltpu.CompilerParams(
            dimension_semantics=("parallel",),
            vmem_limit_bytes=32 * 1024 * 1024),
    )(xb, wb, s, b)

    if Mp != M or Np != N:
        out = out[:M, :N]
    return out


def conv3x3_bn_relu(x, w, scale, bias, stride=1, use_pallas=True):
    """3x3 'same' conv (stride 1 or 2) + BN(eval) + ReLU.

    x: [B,H,W,Cin], w: [3,3,Cin,Cout] (or already-flattened [9*Cin, Cout]).
    For stride=2 the im2col patches are built only at strided output
    positions (no wasted MXU work).
    """
    B, H, W, Cin = x.shape
    Cout = w.shape[-1]
    Ho = (H - 1) // stride + 1
    Wo = (W - 1) // stride + 1
    xb = x.astype(jnp.bfloat16)                          # patches built in bf16
    xp = jnp.pad(xb, ((0, 0), (1, 1), (1, 1), (0, 0)))
    patches = jnp.concatenate(
        [xp[:, kh:kh + stride * (Ho - 1) + 1:stride,
             kw:kw + stride * (Wo - 1) + 1:stride, :]
         for kh in range(3) for kw in range(3)],
        axis=-1).reshape(B * Ho * Wo, 9 * Cin)
    out = matmul_bn_relu(patches, w.reshape(9 * Cin, Cout), scale, bias,
                         use_pallas)
    return out.reshape(B, Ho, Wo, Cout)


def dwt_haar(x, use_pallas=True):
    """Haar DWTForward(J=1, mode='zero') on even-sized NHWC input."""
    B, H, W, C = x.shape
    h, w = H // 2, W // 2
    a = x[:, 0::2, 0::2, :]
    b = x[:, 0::2, 1::2, :]
    c = x[:, 1::2, 0::2, :]
    d = x[:, 1::2, 1::2, :]
    if use_pallas:
        sh = jax.ShapeDtypeStruct((B, h, w, C), jnp.float32)
        ll, d1, d2, d3 = pl.pallas_call(
            _dwt_haar_kernel,
            out_shape=(sh, sh, sh, sh),
            in_specs=[_VMEM] * 4,
            out_specs=(_VMEM, _VMEM, _VMEM, _VMEM),
        )(a, b, c, d)
    else:
        ll = (a + b + c + d) * 0.5
        d1 = (a + b - c - d) * 0.5
        d2 = (a - b + c - d) * 0.5
        d3 = (a - b - c + d) * 0.5
    # channel order matches torch: hf[0].reshape(B, 3*C, h, w) -> c-major, band-minor
    hf = jnp.stack([d1, d2, d3], axis=-1).reshape(B, h, w, 3 * C)
    return ll, hf


def _bilinear_idx(in_size, out_size):
    # PyTorch F.interpolate(mode='bilinear', align_corners=False) semantics.
    scale = in_size / out_size
    dst = np.arange(out_size, dtype=np.float64)
    src = np.maximum((dst + 0.5) * scale - 0.5, 0.0)
    i0 = np.minimum(np.floor(src).astype(np.int64), in_size - 1)
    i1 = np.minimum(i0 + 1, in_size - 1)
    w1 = (src - i0).astype(np.float32)
    w0 = (1.0 - w1).astype(np.float32)
    return i0, i1, w0, w1


def bilinear_resize(x, out_h, out_w, use_pallas=True):
    B, H, W, C = x.shape
    if (H, W) == (out_h, out_w):
        return x            # identity under align_corners=False; skip launch
    r0, r1, wr0, wr1 = _bilinear_idx(H, out_h)
    c0, c1, wc0, wc1 = _bilinear_idx(W, out_w)
    g00 = x[:, r0][:, :, c0]
    g01 = x[:, r0][:, :, c1]
    g10 = x[:, r1][:, :, c0]
    g11 = x[:, r1][:, :, c1]

    def wgt(wr, wc):
        return jnp.asarray((wr[:, None] * wc[None, :]).reshape(1, out_h, out_w, 1),
                           dtype=jnp.float32)

    w00, w01, w10, w11 = wgt(wr0, wc0), wgt(wr0, wc1), wgt(wr1, wc0), wgt(wr1, wc1)
    if not use_pallas:
        return g00 * w00 + g01 * w01 + g10 * w10 + g11 * w11
    return pl.pallas_call(
        _bilinear_kernel,
        out_shape=jax.ShapeDtypeStruct((B, out_h, out_w, C), jnp.float32),
        in_specs=[_VMEM] * 8,
        out_specs=_VMEM,
    )(g00, g01, g10, g11, w00, w01, w10, w11)


def maxpool2x2(x, use_pallas=True):
    B, H, W, C = x.shape
    h, w = H // 2, W // 2
    a = x[:, 0:2 * h:2, 0:2 * w:2, :]
    b = x[:, 0:2 * h:2, 1:2 * w:2, :]
    c = x[:, 1:2 * h:2, 0:2 * w:2, :]
    d = x[:, 1:2 * h:2, 1:2 * w:2, :]
    if not use_pallas:
        return jnp.maximum(jnp.maximum(a, b), jnp.maximum(c, d))
    return pl.pallas_call(
        _maxpool_kernel,
        out_shape=jax.ShapeDtypeStruct((B, h, w, C), jnp.float32),
        in_specs=[_VMEM] * 4,
        out_specs=_VMEM,
    )(a, b, c, d)


def global_avgpool(x, use_pallas=True):
    B, H, W, C = x.shape
    xf = x.reshape(B, H * W, C)
    if not use_pallas:
        out = jnp.mean(xf, axis=1, keepdims=True)
    else:
        out = pl.pallas_call(
            _avgpool_kernel,
            out_shape=jax.ShapeDtypeStruct((B, 1, C), jnp.float32),
            in_specs=[_VMEM],
            out_specs=_VMEM,
        )(xf)
    return out.reshape(B, 1, 1, C)


# ------------------------------ parameters ----------------------------------

def init_conv_bn_params(key, cin, cout):
    k1, k2, k3, k4, k5, k6 = jax.random.split(key, 6)
    fan_in = cin * 9
    bound = 1.0 / np.sqrt(fan_in)
    w = jax.random.uniform(k1, (3, 3, cin, cout), jnp.float32, -bound, bound)
    conv_b = jax.random.uniform(k2, (cout,), jnp.float32, -bound, bound)
    # Non-trivial BatchNorm2d eval stats, folded into scale/bias.
    gamma = jax.random.uniform(k3, (cout,), jnp.float32, 0.5, 1.5)
    beta = 0.1 * jax.random.normal(k4, (cout,), jnp.float32)
    rmean = 0.1 * jax.random.normal(k5, (cout,), jnp.float32)
    rvar = jax.random.uniform(k6, (cout,), jnp.float32, 0.5, 1.5)
    eps = 1e-5
    scale = gamma / jnp.sqrt(rvar + eps)
    bias = scale * (conv_b - rmean) + beta
    return w, scale, bias


def init_mwt_params(key, in_channels=3, dama_dim=128, levels=3):
    keys = jax.random.split(key, 8)
    return {
        "hf_sep": [init_conv_bn_params(keys[i], in_channels, 6 * in_channels)
                   for i in range(3)],
        "hf_fusion": init_conv_bn_params(keys[3], 18 * in_channels, dama_dim),
        "ms_fusion": init_conv_bn_params(keys[4], levels * dama_dim, dama_dim),
        "freq_conv": init_conv_bn_params(keys[5], dama_dim, dama_dim),
        "freq_pool_conv": init_conv_bn_params(keys[6], dama_dim, dama_dim),
    }


def build_fused_hfsep(params, C):
    """Fuse the 3 separate hf convs into one block-structured matmul weight.

    Group i only reads hf channels [i*C,(i+1)*C) and writes output channels
    [6C*i, 6C*(i+1)), exactly matching the per-group convs + torch.cat.
    """
    blocks = []
    for i in range(3):
        w_i = params["hf_sep"][i][0].reshape(9, C, 6 * C)      # (taps, Cin, Cout_i)
        zl = jnp.zeros((9, C, 6 * C * i), jnp.float32)
        zr = jnp.zeros((9, C, 6 * C * (2 - i)), jnp.float32)
        blocks.append(jnp.concatenate([zl, w_i, zr], axis=-1))  # (9, C, 18C)
    W = jnp.concatenate(blocks, axis=1).reshape(9 * 3 * C, 18 * C)
    s = jnp.concatenate([params["hf_sep"][i][1] for i in range(3)])
    b = jnp.concatenate([params["hf_sep"][i][2] for i in range(3)])
    return W, s, b


# ------------------------------ MWT forward ----------------------------------

def wavelet_transform(x, params, fused_hfsep, target_size, levels,
                      use_pallas=True):
    ll, hf = dwt_haar(x, use_pallas)
    if levels > 1:
        hf = bilinear_resize(hf, target_size[0], target_size[1], use_pallas)
    w, s, b = fused_hfsep
    ph = conv3x3_bn_relu(hf, w, s, b, use_pallas=use_pallas)   # (B,h,w,18C)
    w, s, b = params["hf_fusion"]
    hf_c = conv3x3_bn_relu(ph, w, s, b, use_pallas=use_pallas)
    return ll, hf_c


def mwt_forward(x_nchw, params, in_channels=3, levels=3, use_pallas=True):
    x = jnp.transpose(x_nchw, (0, 2, 3, 1)).astype(jnp.float32)   # NCHW -> NHWC
    B, H, W, _ = x.shape
    target = (H // 2, W // 2)
    fused_hfsep = build_fused_hfsep(params, in_channels)
    cur = x
    hfs = []
    for _ in range(levels):
        ll, hf = wavelet_transform(cur, params, fused_hfsep, target, levels,
                                   use_pallas)
        hfs.append(hf)
        cur = ll
    ms = jnp.concatenate(hfs, axis=-1)
    w, s, b = params["ms_fusion"]
    fused = conv3x3_bn_relu(ms, w, s, b, use_pallas=use_pallas)
    w, s, b = params["freq_conv"]
    f = conv3x3_bn_relu(fused, w, s, b, stride=2, use_pallas=use_pallas)
    f = maxpool2x2(f, use_pallas)
    w, s, b = params["freq_pool_conv"]
    f = conv3x3_bn_relu(f, w, s, b, stride=2, use_pallas=use_pallas)
    f = global_avgpool(f, use_pallas)
    return jnp.transpose(f, (0, 3, 1, 2))                         # NHWC -> NCHW


# ---------------------------------- main -------------------------------------

if __name__ == "__main__":
    key = jax.random.PRNGKey(0)
    kx, kp = jax.random.split(key)

    B, C, H, W = 2, 3, 16, 16        # input video frames [B, C, H, W]
    dama_dim, levels = 128, 3        # module defaults (N lane-aligned at 128)

    x = jax.random.normal(kx, (B, C, H, W), jnp.float32)
    params = init_mwt_params(kp, in_channels=C, dama_dim=dama_dim, levels=levels)

    fwd = jax.jit(lambda a: mwt_forward(a, params, in_channels=C, levels=levels,
                                        use_pallas=True))
    ref_fwd = jax.jit(lambda a: mwt_forward(a, params, in_channels=C,
                                            levels=levels, use_pallas=False))

    out = jax.block_until_ready(fwd(x))

    # sanity-check against a pure-JAX reference of the same (bf16-MXU) graph
    ref = jax.block_until_ready(ref_fwd(x))
    assert out.shape == (B, dama_dim, 1, 1), out.shape
    assert bool(jnp.all(jnp.isfinite(out)))
    assert bool(jnp.allclose(out, ref, rtol=1e-2, atol=1e-2)), \
        float(jnp.max(jnp.abs(out - ref)))

    print("KERNEL_OK")
</pallas_src>

<mosaic_0001>
module attributes {stable_mosaic.version = 11 : i64} {
  func.func @_dwt_haar_kernel(%arg0: memref<2x8x8x3xf32, #tpu.memory_space<vmem>>, %arg1: memref<2x8x8x3xf32, #tpu.memory_space<vmem>>, %arg2: memref<2x8x8x3xf32, #tpu.memory_space<vmem>>, %arg3: memref<2x8x8x3xf32, #tpu.memory_space<vmem>>, %arg4: memref<2x8x8x3xf32, #tpu.memory_space<vmem>>, %arg5: memref<2x8x8x3xf32, #tpu.memory_space<vmem>>, %arg6: memref<2x8x8x3xf32, #tpu.memory_space<vmem>>, %arg7: memref<2x8x8x3xf32, #tpu.memory_space<vmem>>) attributes {dimension_semantics = [], scalar_prefetch = 0 : i64, scratch_operands = 0 : i64, tpu.core_type = #tpu.core_type<tc>} {
    %c0 = arith.constant 0 : index
    %c0_0 = arith.constant 0 : index
    %c0_1 = arith.constant 0 : index
    %c0_2 = arith.constant 0 : index
    %0 = vector.load %arg0[%c0, %c0_0, %c0_1, %c0_2] : memref<2x8x8x3xf32, #tpu.memory_space<vmem>>, vector<2x8x8x3xf32>
    %c0_3 = arith.constant 0 : index
    %c0_4 = arith.constant 0 : index
    %c0_5 = arith.constant 0 : index
    %c0_6 = arith.constant 0 : index
    %1 = vector.load %arg1[%c0_3, %c0_4, %c0_5, %c0_6] : memref<2x8x8x3xf32, #tpu.memory_space<vmem>>, vector<2x8x8x3xf32>
    %c0_7 = arith.constant 0 : index
    %c0_8 = arith.constant 0 : index
    %c0_9 = arith.constant 0 : index
    %c0_10 = arith.constant 0 : index
    %2 = vector.load %arg2[%c0_7, %c0_8, %c0_9, %c0_10] : memref<2x8x8x3xf32, #tpu.memory_space<vmem>>, vector<2x8x8x3xf32>
    %c0_11 = arith.constant 0 : index
    %c0_12 = arith.constant 0 : index
    %c0_13 = arith.constant 0 : index
    %c0_14 = arith.constant 0 : index
    %3 = vector.load %arg3[%c0_11, %c0_12, %c0_13, %c0_14] : memref<2x8x8x3xf32, #tpu.memory_space<vmem>>, vector<2x8x8x3xf32>
    %4 = arith.addf %0, %1 : vector<2x8x8x3xf32>
    %5 = arith.addf %4, %2 : vector<2x8x8x3xf32>
    %6 = arith.addf %5, %3 : vector<2x8x8x3xf32>
    %cst = arith.constant 5.000000e-01 : f32
    %7 = vector.broadcast %cst : f32 to vector<2x8x8x3xf32>
    %8 = arith.mulf %6, %7 : vector<2x8x8x3xf32>
    %c0_15 = arith.constant 0 : index
    %c0_16 = arith.constant 0 : index
    %c0_17 = arith.constant 0 : index
    %c0_18 = arith.constant 0 : index
    %9 = vector.load %arg4[%c0_15, %c0_16, %c0_17, %c0_18] : memref<2x8x8x3xf32, #tpu.memory_space<vmem>>, vector<2x8x8x3xf32>
    tpu.vector_store %arg4[%c0_15, %c0_16, %c0_17, %c0_18], %8 {strides = array<i32>} : memref<2x8x8x3xf32, #tpu.memory_space<vmem>>, vector<2x8x8x3xf32>,
    %10 = arith.addf %0, %1 : vector<2x8x8x3xf32>
    %11 = arith.subf %10, %2 : vector<2x8x8x3xf32>
    %12 = arith.subf %11, %3 : vector<2x8x8x3xf32>
    %cst_19 = arith.constant 5.000000e-01 : f32
    %13 = vector.broadcast %cst_19 : f32 to vector<2x8x8x3xf32>
    %14 = arith.mulf %12, %13 : vector<2x8x8x3xf32>
    %c0_20 = arith.constant 0 : index
    %c0_21 = arith.constant 0 : index
    %c0_22 = arith.constant 0 : index
    %c0_23 = arith.constant 0 : index
    %15 = vector.load %arg5[%c0_20, %c0_21, %c0_22, %c0_23] : memref<2x8x8x3xf32, #tpu.memory_space<vmem>>, vector<2x8x8x3xf32>
    tpu.vector_store %arg5[%c0_20, %c0_21, %c0_22, %c0_23], %14 {strides = array<i32>} : memref<2x8x8x3xf32, #tpu.memory_space<vmem>>, vector<2x8x8x3xf32>,
    %16 = arith.subf %0, %1 : vector<2x8x8x3xf32>
    %17 = arith.addf %16, %2 : vector<2x8x8x3xf32>
    %18 = arith.subf %17, %3 : vector<2x8x8x3xf32>
    %cst_24 = arith.constant 5.000000e-01 : f32
    %19 = vector.broadcast %cst_24 : f32 to vector<2x8x8x3xf32>
    %20 = arith.mulf %18, %19 : vector<2x8x8x3xf32>
    %c0_25 = arith.constant 0 : index
    %c0_26 = arith.constant 0 : index
    %c0_27 = arith.constant 0 : index
    %c0_28 = arith.constant 0 : index
    %21 = vector.load %arg6[%c0_25, %c0_26, %c0_27, %c0_28] : memref<2x8x8x3xf32, #tpu.memory_space<vmem>>, vector<2x8x8x3xf32>
    tpu.vector_store %arg6[%c0_25, %c0_26, %c0_27, %c0_28], %20 {strides = array<i32>} : memref<2x8x8x3xf32, #tpu.memory_space<vmem>>, vector<2x8x8x3xf32>,
    %22 = arith.subf %0, %1 : vector<2x8x8x3xf32>
    %23 = arith.subf %22, %2 : vector<2x8x8x3xf32>
    %24 = arith.addf %23, %3 : vector<2x8x8x3xf32>
    %cst_29 = arith.constant 5.000000e-01 : f32
    %25 = vector.broadcast %cst_29 : f32 to vector<2x8x8x3xf32>
    %26 = arith.mulf %24, %25 : vector<2x8x8x3xf32>
    %c0_30 = arith.constant 0 : index
    %c0_31 = arith.constant 0 : index
    %c0_32 = arith.constant 0 : index
    %c0_33 = arith.constant 0 : index
    %27 = vector.load %arg7[%c0_30, %c0_31, %c0_32, %c0_33] : memref<2x8x8x3xf32, #tpu.memory_space<vmem>>, vector<2x8x8x3xf32>
    tpu.vector_store %arg7[%c0_30, %c0_31, %c0_32, %c0_33], %26 {strides = array<i32>} : memref<2x8x8x3xf32, #tpu.memory_space<vmem>>, vector<2x8x8x3xf32>,
    return
  }
}

module attributes {stable_mosaic.version = 11 : i64} {
  func.func @_matmul_bn_relu_kernel(%arg0: i32, %arg1: memref<128x81xbf16, #tpu.memory_space<vmem>>, %arg2: memref<81x128xbf16, #tpu.memory_space<vmem>>, %arg3: memref<1x128xf32, #tpu.memory_space<vmem>>, %arg4: memref<1x128xf32, #tpu.memory_space<vmem>>, %arg5: memref<128x128xf32, #tpu.memory_space<vmem>>) attributes {dimension_semantics = [#tpu.dimension_semantics<parallel>], iteration_bounds = array<i64: 1>, scalar_prefetch = 0 : i64, scratch_operands = 0 : i64, tpu.core_type = #tpu.core_type<tc>, window_params = [{transform_indices = @transform_0, window_bounds = array<i64: 128, 81>}, {pipeline_mode = #tpu.pipeline_mode<synchronous>, transform_indices = @transform_1, window_bounds = array<i64: 81, 128>}, {pipeline_mode = #tpu.pipeline_mode<synchronous>, transform_indices = @transform_2, window_bounds = array<i64: 1, 128>}, {pipeline_mode = #tpu.pipeline_mode<synchronous>, transform_indices = @transform_3, window_bounds = array<i64: 1, 128>}, {transform_indices = @transform_4, window_bounds = array<i64: 128, 128>}]} {
    %c0 = arith.constant 0 : index
    %c0_0 = arith.constant 0 : index
    %0 = vector.load %arg1[%c0, %c0_0] : memref<128x81xbf16, #tpu.memory_space<vmem>>, vector<128x81xbf16>
    %c0_1 = arith.constant 0 : index
    %c0_2 = arith.constant 0 : index
    %1 = vector.load %arg2[%c0_1, %c0_2] : memref<81x128xbf16, #tpu.memory_space<vmem>>, vector<81x128xbf16>
    %cst = arith.constant dense<0.000000e+00> : vector<128x128xf32>
    %2 = tpu.matmul %0, %1, %cst {dimension_numbers = #tpu.dot_dimension_numbers<[1], [0], [0], [1], [0, 0, 1, 1], [], []>} : vector<128x81xbf16>, vector<81x128xbf16>, vector<128x128xf32> -> vector<128x128xf32>
    %c0_3 = arith.constant 0 : index
    %c0_4 = arith.constant 0 : index
    %3 = vector.load %arg3[%c0_3, %c0_4] : memref<1x128xf32, #tpu.memory_space<vmem>>, vector<1x128xf32>
    %4 = vector.broadcast %3 : vector<1x128xf32> to vector<128x128xf32>
    %5 = arith.mulf %2, %4 : vector<128x128xf32>
    %c0_5 = arith.constant 0 : index
    %c0_6 = arith.constant 0 : index
    %6 = vector.load %arg4[%c0_5, %c0_6] : memref<1x128xf32, #tpu.memory_space<vmem>>, vector<1x128xf32>
    %7 = vector.broadcast %6 : vector<1x128xf32> to vector<128x128xf32>
    %8 = arith.addf %5, %7 : vector<128x128xf32>
    %cst_7 = arith.constant 0.000000e+00 : f32
    %9 = vector.broadcast %cst_7 : f32 to vector<128x128xf32>
    %10 = arith.maximumf %8, %9 : vector<128x128xf32>
    %c0_8 = arith.constant 0 : index
    %c0_9 = arith.constant 0 : index
    %11 = vector.load %arg5[%c0_8, %c0_9] : memref<128x128xf32, #tpu.memory_space<vmem>>, vector<128x128xf32>
    tpu.vector_store %arg5[%c0_8, %c0_9], %10 {strides = array<i32>} : memref<128x128xf32, #tpu.memory_space<vmem>>, vector<128x128xf32>,
    return
  }
  func.func @transform_0(%arg0: i32) -> (i32, i32) {
    %c0_i32 = arith.constant 0 : i32
    %c0_i32_0 = arith.constant 0 : i32
    return %arg0, %c0_i32 : i32, i32
  }
  func.func @transform_1(%arg0: i32) -> (i32, i32) {
    %c0_i32 = arith.constant 0 : i32
    %c0_i32_0 = arith.constant 0 : i32
    %c0_i32_1 = arith.constant 0 : i32
    return %c0_i32, %c0_i32_0 : i32, i32
  }
  func.func @transform_2(%arg0: i32) -> (i32, i32) {
    %c0_i32 = arith.constant 0 : i32
    %c0_i32_0 = arith.constant 0 : i32
    %c0_i32_1 = arith.constant 0 : i32
    return %c0_i32, %c0_i32_0 : i32, i32
  }
  func.func @transform_3(%arg0: i32) -> (i32, i32) {
    %c0_i32 = arith.constant 0 : i32
    %c0_i32_0 = arith.constant 0 : i32
    %c0_i32_1 = arith.constant 0 : i32
    return %c0_i32, %c0_i32_0 : i32, i32
  }
  func.func @transform_4(%arg0: i32) -> (i32, i32) {
    %c0_i32 = arith.constant 0 : i32
    %c0_i32_0 = arith.constant 0 : i32
    return %arg0, %c0_i32 : i32, i32
  }
}

module attributes {stable_mosaic.version = 11 : i64} {
  func.func @_matmul_bn_relu_kernel(%arg0: i32, %arg1: memref<128x486xbf16, #tpu.memory_space<vmem>>, %arg2: memref<486x128xbf16, #tpu.memory_space<vmem>>, %arg3: memref<1x128xf32, #tpu.memory_space<vmem>>, %arg4: memref<1x128xf32, #tpu.memory_space<vmem>>, %arg5: memref<128x128xf32, #tpu.memory_space<vmem>>) attributes {dimension_semantics = [#tpu.dimension_semantics<parallel>], iteration_bounds = array<i64: 1>, scalar_prefetch = 0 : i64, scratch_operands = 0 : i64, tpu.core_type = #tpu.core_type<tc>, window_params = [{transform_indices = @transform_0, window_bounds = array<i64: 128, 486>}, {pipeline_mode = #tpu.pipeline_mode<synchronous>, transform_indices = @transform_1, window_bounds = array<i64: 486, 128>}, {pipeline_mode = #tpu.pipeline_mode<synchronous>, transform_indices = @transform_2, window_bounds = array<i64: 1, 128>}, {pipeline_mode = #tpu.pipeline_mode<synchronous>, transform_indices = @transform_3, window_bounds = array<i64: 1, 128>}, {transform_indices = @transform_4, window_bounds = array<i64: 128, 128>}]} {
    %c0 = arith.constant 0 : index
    %c0_0 = arith.constant 0 : index
    %0 = vector.load %arg1[%c0, %c0_0] : memref<128x486xbf16, #tpu.memory_space<vmem>>, vector<128x486xbf16>
    %c0_1 = arith.constant 0 : index
    %c0_2 = arith.constant 0 : index
    %1 = vector.load %arg2[%c0_1, %c0_2] : memref<486x128xbf16, #tpu.memory_space<vmem>>, vector<486x128xbf16>
    %cst = arith.constant dense<0.000000e+00> : vector<128x128xf32>
    %2 = tpu.matmul %0, %1, %cst {dimension_numbers = #tpu.dot_dimension_numbers<[1], [0], [0], [1], [0, 0, 1, 1], [], []>} : vector<128x486xbf16>, vector<486x128xbf16>, vector<128x128xf32> -> vector<128x128xf32>
    %c0_3 = arith.constant 0 : index
    %c0_4 = arith.constant 0 : index
    %3 = vector.load %arg3[%c0_3, %c0_4] : memref<1x128xf32, #tpu.memory_space<vmem>>, vector<1x128xf32>
    %4 = vector.broadcast %3 : vector<1x128xf32> to vector<128x128xf32>
    %5 = arith.mulf %2, %4 : vector<128x128xf32>
    %c0_5 = arith.constant 0 : index
    %c0_6 = arith.constant 0 : index
    %6 = vector.load %arg4[%c0_5, %c0_6] : memref<1x128xf32, #tpu.memory_space<vmem>>, vector<1x128xf32>
    %7 = vector.broadcast %6 : vector<1x128xf32> to vector<128x128xf32>
    %8 = arith.addf %5, %7 : vector<128x128xf32>
    %cst_7 = arith.constant 0.000000e+00 : f32
    %9 = vector.broadcast %cst_7 : f32 to vector<128x128xf32>
    %10 = arith.maximumf %8, %9 : vector<128x128xf32>
    %c0_8 = arith.constant 0 : index
    %c0_9 = arith.constant 0 : index
    %11 = vector.load %arg5[%c0_8, %c0_9] : memref<128x128xf32, #tpu.memory_space<vmem>>, vector<128x128xf32>
    tpu.vector_store %arg5[%c0_8, %c0_9], %10 {strides = array<i32>} : memref<128x128xf32, #tpu.memory_space<vmem>>, vector<128x128xf32>,
    return
  }
  func.func @transform_0(%arg0: i32) -> (i32, i32) {
    %c0_i32 = arith.constant 0 : i32
    %c0_i32_0 = arith.constant 0 : i32
    return %arg0, %c0_i32 : i32, i32
  }
  func.func @transform_1(%arg0: i32) -> (i32, i32) {
    %c0_i32 = arith.constant 0 : i32
    %c0_i32_0 = arith.constant 0 : i32
    %c0_i32_1 = arith.constant 0 : i32
    return %c0_i32, %c0_i32_0 : i32, i32
  }
  func.func @transform_2(%arg0: i32) -> (i32, i32) {
    %c0_i32 = arith.constant 0 : i32
    %c0_i32_0 = arith.constant 0 : i32
    %c0_i32_1 = arith.constant 0 : i32
    return %c0_i32, %c0_i32_0 : i32, i32
  }
  func.func @transform_3(%arg0: i32) -> (i32, i32) {
    %c0_i32 = arith.constant 0 : i32
    %c0_i32_0 = arith.constant 0 : i32
    %c0_i32_1 = arith.constant 0 : i32
    return %c0_i32, %c0_i32_0 : i32, i32
  }
  func.func @transform_4(%arg0: i32) -> (i32, i32) {
    %c0_i32 = arith.constant 0 : i32
    %c0_i32_0 = arith.constant 0 : i32
    return %arg0, %c0_i32 : i32, i32
  }
}

module attributes {stable_mosaic.version = 11 : i64} {
  func.func @_dwt_haar_kernel(%arg0: memref<2x4x4x3xf32, #tpu.memory_space<vmem>>, %arg1: memref<2x4x4x3xf32, #tpu.memory_space<vmem>>, %arg2: memref<2x4x4x3xf32, #tpu.memory_space<vmem>>, %arg3: memref<2x4x4x3xf32, #tpu.memory_space<vmem>>, %arg4: memref<2x4x4x3xf32, #tpu.memory_space<vmem>>, %arg5: memref<2x4x4x3xf32, #tpu.memory_space<vmem>>, %arg6: memref<2x4x4x3xf32, #tpu.memory_space<vmem>>, %arg7: memref<2x4x4x3xf32, #tpu.memory_space<vmem>>) attributes {dimension_semantics = [], scalar_prefetch = 0 : i64, scratch_operands = 0 : i64, tpu.core_type = #tpu.core_type<tc>} {
    %c0 = arith.constant 0 : index
    %c0_0 = arith.constant 0 : index
    %c0_1 = arith.constant 0 : index
    %c0_2 = arith.constant 0 : index
    %0 = vector.load %arg0[%c0, %c0_0, %c0_1, %c0_2] : memref<2x4x4x3xf32, #tpu.memory_space<vmem>>, vector<2x4x4x3xf32>
    %c0_3 = arith.constant 0 : index
    %c0_4 = arith.constant 0 : index
    %c0_5 = arith.constant 0 : index
    %c0_6 = arith.constant 0 : index
    %1 = vector.load %arg1[%c0_3, %c0_4, %c0_5, %c0_6] : memref<2x4x4x3xf32, #tpu.memory_space<vmem>>, vector<2x4x4x3xf32>
    %c0_7 = arith.constant 0 : index
    %c0_8 = arith.constant 0 : index
    %c0_9 = arith.constant 0 : index
    %c0_10 = arith.constant 0 : index
    %2 = vector.load %arg2[%c0_7, %c0_8, %c0_9, %c0_10] : memref<2x4x4x3xf32, #tpu.memory_space<vmem>>, vector<2x4x4x3xf32>
    %c0_11 = arith.constant 0 : index
    %c0_12 = arith.constant 0 : index
    %c0_13 = arith.constant 0 : index
    %c0_14 = arith.constant 0 : index
    %3 = vector.load %arg3[%c0_11, %c0_12, %c0_13, %c0_14] : memref<2x4x4x3xf32, #tpu.memory_space<vmem>>, vector<2x4x4x3xf32>
    %4 = arith.addf %0, %1 : vector<2x4x4x3xf32>
    %5 = arith.addf %4, %2 : vector<2x4x4x3xf32>
    %6 = arith.addf %5, %3 : vector<2x4x4x3xf32>
    %cst = arith.constant 5.000000e-01 : f32
    %7 = vector.broadcast %cst : f32 to vector<2x4x4x3xf32>
    %8 = arith.mulf %6, %7 : vector<2x4x4x3xf32>
    %c0_15 = arith.constant 0 : index
    %c0_16 = arith.constant 0 : index
    %c0_17 = arith.constant 0 : index
    %c0_18 = arith.constant 0 : index
    %9 = vector.load %arg4[%c0_15, %c0_16, %c0_17, %c0_18] : memref<2x4x4x3xf32, #tpu.memory_space<vmem>>, vector<2x4x4x3xf32>
    tpu.vector_store %arg4[%c0_15, %c0_16, %c0_17, %c0_18], %8 {strides = array<i32>} : memref<2x4x4x3xf32, #tpu.memory_space<vmem>>, vector<2x4x4x3xf32>,
    %10 = arith.addf %0, %1 : vector<2x4x4x3xf32>
    %11 = arith.subf %10, %2 : vector<2x4x4x3xf32>
    %12 = arith.subf %11, %3 : vector<2x4x4x3xf32>
    %cst_19 = arith.constant 5.000000e-01 : f32
    %13 = vector.broadcast %cst_19 : f32 to vector<2x4x4x3xf32>
    %14 = arith.mulf %12, %13 : vector<2x4x4x3xf32>
    %c0_20 = arith.constant 0 : index
    %c0_21 = arith.constant 0 : index
    %c0_22 = arith.constant 0 : index
    %c0_23 = arith.constant 0 : index
    %15 = vector.load %arg5[%c0_20, %c0_21, %c0_22, %c0_23] : memref<2x4x4x3xf32, #tpu.memory_space<vmem>>, vector<2x4x4x3xf32>
    tpu.vector_store %arg5[%c0_20, %c0_21, %c0_22, %c0_23], %14 {strides = array<i32>} : memref<2x4x4x3xf32, #tpu.memory_space<vmem>>, vector<2x4x4x3xf32>,
    %16 = arith.subf %0, %1 : vector<2x4x4x3xf32>
    %17 = arith.addf %16, %2 : vector<2x4x4x3xf32>
    %18 = arith.subf %17, %3 : vector<2x4x4x3xf32>
    %cst_24 = arith.constant 5.000000e-01 : f32
    %19 = vector.broadcast %cst_24 : f32 to vector<2x4x4x3xf32>
    %20 = arith.mulf %18, %19 : vector<2x4x4x3xf32>
    %c0_25 = arith.constant 0 : index
    %c0_26 = arith.constant 0 : index
    %c0_27 = arith.constant 0 : index
    %c0_28 = arith.constant 0 : index
    %21 = vector.load %arg6[%c0_25, %c0_26, %c0_27, %c0_28] : memref<2x4x4x3xf32, #tpu.memory_space<vmem>>, vector<2x4x4x3xf32>
    tpu.vector_store %arg6[%c0_25, %c0_26, %c0_27, %c0_28], %20 {strides = array<i32>} : memref<2x4x4x3xf32, #tpu.memory_space<vmem>>, vector<2x4x4x3xf32>,
    %22 = arith.subf %0, %1 : vector<2x4x4x3xf32>
    %23 = arith.subf %22, %2 : vector<2x4x4x3xf32>
    %24 = arith.addf %23, %3 : vector<2x4x4x3xf32>
    %cst_29 = arith.constant 5.000000e-01 : f32
    %25 = vector.broadcast %cst_29 : f32 to vector<2x4x4x3xf32>
    %26 = arith.mulf %24, %25 : vector<2x4x4x3xf32>
    %c0_30 = arith.constant 0 : index
    %c0_31 = arith.constant 0 : index
    %c0_32 = arith.constant 0 : index
    %c0_33 = arith.constant 0 : index
    %27 = vector.load %arg7[%c0_30, %c0_31, %c0_32, %c0_33] : memref<2x4x4x3xf32, #tpu.memory_space<vmem>>, vector<2x4x4x3xf32>
    tpu.vector_store %arg7[%c0_30, %c0_31, %c0_32, %c0_33], %26 {strides = array<i32>} : memref<2x4x4x3xf32, #tpu.memory_space<vmem>>, vector<2x4x4x3xf32>,
    return
  }
}

module attributes {stable_mosaic.version = 11 : i64} {
  func.func @_bilinear_kernel(%arg0: memref<2x8x8x9xf32, #tpu.memory_space<vmem>>, %arg1: memref<2x8x8x9xf32, #tpu.memory_space<vmem>>, %arg2: memref<2x8x8x9xf32, #tpu.memory_space<vmem>>, %arg3: memref<2x8x8x9xf32, #tpu.memory_space<vmem>>, %arg4: memref<1x8x8x1xf32, #tpu.memory_space<vmem>>, %arg5: memref<1x8x8x1xf32, #tpu.memory_space<vmem>>, %arg6: memref<1x8x8x1xf32, #tpu.memory_space<vmem>>, %arg7: memref<1x8x8x1xf32, #tpu.memory_space<vmem>>, %arg8: memref<2x8x8x9xf32, #tpu.memory_space<vmem>>) attributes {dimension_semantics = [], scalar_prefetch = 0 : i64, scratch_operands = 0 : i64, tpu.core_type = #tpu.core_type<tc>} {
    %c0 = arith.constant 0 : index
    %c0_0 = arith.constant 0 : index
    %c0_1 = arith.constant 0 : index
    %c0_2 = arith.constant 0 : index
    %0 = vector.load %arg0[%c0, %c0_0, %c0_1, %c0_2] : memref<2x8x8x9xf32, #tpu.memory_space<vmem>>, vector<2x8x8x9xf32>
    %c0_3 = arith.constant 0 : index
    %c0_4 = arith.constant 0 : index
    %c0_5 = arith.constant 0 : index
    %c0_6 = arith.constant 0 : index
    %1 = vector.load %arg4[%c0_3, %c0_4, %c0_5, %c0_6] : memref<1x8x8x1xf32, #tpu.memory_space<vmem>>, vector<1x8x8x1xf32>
    %2 = vector.broadcast %1 : vector<1x8x8x1xf32> to vector<2x8x8x9xf32>
    %3 = arith.mulf %0, %2 : vector<2x8x8x9xf32>
    %c0_7 = arith.constant 0 : index
    %c0_8 = arith.constant 0 : index
    %c0_9 = arith.constant 0 : index
    %c0_10 = arith.constant 0 : index
    %4 = vector.load %arg1[%c0_7, %c0_8, %c0_9, %c0_10] : memref<2x8x8x9xf32, #tpu.memory_space<vmem>>, vector<2x8x8x9xf32>
    %c0_11 = arith.constant 0 : index
    %c0_12 = arith.constant 0 : index
    %c0_13 = arith.constant 0 : index
    %c0_14 = arith.constant 0 : index
    %5 = vector.load %arg5[%c0_11, %c0_12, %c0_13, %c0_14] : memref<1x8x8x1xf32, #tpu.memory_space<vmem>>, vector<1x8x8x1xf32>
    %6 = vector.broadcast %5 : vector<1x8x8x1xf32> to vector<2x8x8x9xf32>
    %7 = arith.mulf %4, %6 : vector<2x8x8x9xf32>
    %8 = arith.addf %3, %7 : vector<2x8x8x9xf32>
    %c0_15 = arith.constant 0 : index
    %c0_16 = arith.constant 0 : index
    %c0_17 = arith.constant 0 : index
    %c0_18 = arith.constant 0 : index
    %9 = vector.load %arg2[%c0_15, %c0_16, %c0_17, %c0_18] : memref<2x8x8x9xf32, #tpu.memory_space<vmem>>, vector<2x8x8x9xf32>
    %c0_19 = arith.constant 0 : index
    %c0_20 = arith.constant 0 : index
    %c0_21 = arith.constant 0 : index
    %c0_22 = arith.constant 0 : index
    %10 = vector.load %arg6[%c0_19, %c0_20, %c0_21, %c0_22] : memref<1x8x8x1xf32, #tpu.memory_space<vmem>>, vector<1x8x8x1xf32>
    %11 = vector.broadcast %10 : vector<1x8x8x1xf32> to vector<2x8x8x9xf32>
    %12 = arith.mulf %9, %11 : vector<2x8x8x9xf32>
    %13 = arith.addf %8, %12 : vector<2x8x8x9xf32>
    %c0_23 = arith.constant 0 : index
    %c0_24 = arith.constant 0 : index
    %c0_25 = arith.constant 0 : index
    %c0_26 = arith.constant 0 : index
    %14 = vector.load %arg3[%c0_23, %c0_24, %c0_25, %c0_26] : memref<2x8x8x9xf32, #tpu.memory_space<vmem>>, vector<2x8x8x9xf32>
    %c0_27 = arith.constant 0 : index
    %c0_28 = arith.constant 0 : index
    %c0_29 = arith.constant 0 : index
    %c0_30 = arith.constant 0 : index
    %15 = vector.load %arg7[%c0_27, %c0_28, %c0_29, %c0_30] : memref<1x8x8x1xf32, #tpu.memory_space<vmem>>, vector<1x8x8x1xf32>
    %16 = vector.broadcast %15 : vector<1x8x8x1xf32> to vector<2x8x8x9xf32>
    %17 = arith.mulf %14, %16 : vector<2x8x8x9xf32>
    %18 = arith.addf %13, %17 : vector<2x8x8x9xf32>
    %c0_31 = arith.constant 0 : index
    %c0_32 = arith.constant 0 : index
    %c0_33 = arith.constant 0 : index
    %c0_34 = arith.constant 0 : index
    %19 = vector.load %arg8[%c0_31, %c0_32, %c0_33, %c0_34] : memref<2x8x8x9xf32, #tpu.memory_space<vmem>>, vector<2x8x8x9xf32>
    tpu.vector_store %arg8[%c0_31, %c0_32, %c0_33, %c0_34], %18 {strides = array<i32>} : memref<2x8x8x9xf32, #tpu.memory_space<vmem>>, vector<2x8x8x9xf32>,
    return
  }
}

module attributes {stable_mosaic.version = 11 : i64} {
  func.func @_dwt_haar_kernel(%arg0: memref<2x2x2x3xf32, #tpu.memory_space<vmem>>, %arg1: memref<2x2x2x3xf32, #tpu.memory_space<vmem>>, %arg2: memref<2x2x2x3xf32, #tpu.memory_space<vmem>>, %arg3: memref<2x2x2x3xf32, #tpu.memory_space<vmem>>, %arg4: memref<2x2x2x3xf32, #tpu.memory_space<vmem>>, %arg5: memref<2x2x2x3xf32, #tpu.memory_space<vmem>>, %arg6: memref<2x2x2x3xf32, #tpu.memory_space<vmem>>, %arg7: memref<2x2x2x3xf32, #tpu.memory_space<vmem>>) attributes {dimension_semantics = [], scalar_prefetch = 0 : i64, scratch_operands = 0 : i64, tpu.core_type = #tpu.core_type<tc>} {
    %c0 = arith.constant 0 : index
    %c0_0 = arith.constant 0 : index
    %c0_1 = arith.constant 0 : index
    %c0_2 = arith.constant 0 : index
    %0 = vector.load %arg0[%c0, %c0_0, %c0_1, %c0_2] : memref<2x2x2x3xf32, #tpu.memory_space<vmem>>, vector<2x2x2x3xf32>
    %c0_3 = arith.constant 0 : index
    %c0_4 = arith.constant 0 : index
    %c0_5 = arith.constant 0 : index
    %c0_6 = arith.constant 0 : index
    %1 = vector.load %arg1[%c0_3, %c0_4, %c0_5, %c0_6] : memref<2x2x2x3xf32, #tpu.memory_space<vmem>>, vector<2x2x2x3xf32>
    %c0_7 = arith.constant 0 : index
    %c0_8 = arith.constant 0 : index
    %c0_9 = arith.constant 0 : index
    %c0_10 = arith.constant 0 : index
    %2 = vector.load %arg2[%c0_7, %c0_8, %c0_9, %c0_10] : memref<2x2x2x3xf32, #tpu.memory_space<vmem>>, vector<2x2x2x3xf32>
    %c0_11 = arith.constant 0 : index
    %c0_12 = arith.constant 0 : index
    %c0_13 = arith.constant 0 : index
    %c0_14 = arith.constant 0 : index
    %3 = vector.load %arg3[%c0_11, %c0_12, %c0_13, %c0_14] : memref<2x2x2x3xf32, #tpu.memory_space<vmem>>, vector<2x2x2x3xf32>
    %4 = arith.addf %0, %1 : vector<2x2x2x3xf32>
    %5 = arith.addf %4, %2 : vector<2x2x2x3xf32>
    %6 = arith.addf %5, %3 : vector<2x2x2x3xf32>
    %cst = arith.constant 5.000000e-01 : f32
    %7 = vector.broadcast %cst : f32 to vector<2x2x2x3xf32>
    %8 = arith.mulf %6, %7 : vector<2x2x2x3xf32>
    %c0_15 = arith.constant 0 : index
    %c0_16 = arith.constant 0 : index
    %c0_17 = arith.constant 0 : index
    %c0_18 = arith.constant 0 : index
    %9 = vector.load %arg4[%c0_15, %c0_16, %c0_17, %c0_18] : memref<2x2x2x3xf32, #tpu.memory_space<vmem>>, vector<2x2x2x3xf32>
    tpu.vector_store %arg4[%c0_15, %c0_16, %c0_17, %c0_18], %8 {strides = array<i32>} : memref<2x2x2x3xf32, #tpu.memory_space<vmem>>, vector<2x2x2x3xf32>,
    %10 = arith.addf %0, %1 : vector<2x2x2x3xf32>
    %11 = arith.subf %10, %2 : vector<2x2x2x3xf32>
    %12 = arith.subf %11, %3 : vector<2x2x2x3xf32>
    %cst_19 = arith.constant 5.000000e-01 : f32
    %13 = vector.broadcast %cst_19 : f32 to vector<2x2x2x3xf32>
    %14 = arith.mulf %12, %13 : vector<2x2x2x3xf32>
    %c0_20 = arith.constant 0 : index
    %c0_21 = arith.constant 0 : index
    %c0_22 = arith.constant 0 : index
    %c0_23 = arith.constant 0 : index
    %15 = vector.load %arg5[%c0_20, %c0_21, %c0_22, %c0_23] : memref<2x2x2x3xf32, #tpu.memory_space<vmem>>, vector<2x2x2x3xf32>
    tpu.vector_store %arg5[%c0_20, %c0_21, %c0_22, %c0_23], %14 {strides = array<i32>} : memref<2x2x2x3xf32, #tpu.memory_space<vmem>>, vector<2x2x2x3xf32>,
    %16 = arith.subf %0, %1 : vector<2x2x2x3xf32>
    %17 = arith.addf %16, %2 : vector<2x2x2x3xf32>
    %18 = arith.subf %17, %3 : vector<2x2x2x3xf32>
    %cst_24 = arith.constant 5.000000e-01 : f32
    %19 = vector.broadcast %cst_24 : f32 to vector<2x2x2x3xf32>
    %20 = arith.mulf %18, %19 : vector<2x2x2x3xf32>
    %c0_25 = arith.constant 0 : index
    %c0_26 = arith.constant 0 : index
    %c0_27 = arith.constant 0 : index
    %c0_28 = arith.constant 0 : index
    %21 = vector.load %arg6[%c0_25, %c0_26, %c0_27, %c0_28] : memref<2x2x2x3xf32, #tpu.memory_space<vmem>>, vector<2x2x2x3xf32>
    tpu.vector_store %arg6[%c0_25, %c0_26, %c0_27, %c0_28], %20 {strides = array<i32>} : memref<2x2x2x3xf32, #tpu.memory_space<vmem>>, vector<2x2x2x3xf32>,
    %22 = arith.subf %0, %1 : vector<2x2x2x3xf32>
    %23 = arith.subf %22, %2 : vector<2x2x2x3xf32>
    %24 = arith.addf %23, %3 : vector<2x2x2x3xf32>
    %cst_29 = arith.constant 5.000000e-01 : f32
    %25 = vector.broadcast %cst_29 : f32 to vector<2x2x2x3xf32>
    %26 = arith.mulf %24, %25 : vector<2x2x2x3xf32>
    %c0_30 = arith.constant 0 : index
    %c0_31 = arith.constant 0 : index
    %c0_32 = arith.constant 0 : index
    %c0_33 = arith.constant 0 : index
    %27 = vector.load %arg7[%c0_30, %c0_31, %c0_32, %c0_33] : memref<2x2x2x3xf32, #tpu.memory_space<vmem>>, vector<2x2x2x3xf32>
    tpu.vector_store %arg7[%c0_30, %c0_31, %c0_32, %c0_33], %26 {strides = array<i32>} : memref<2x2x2x3xf32, #tpu.memory_space<vmem>>, vector<2x2x2x3xf32>,
    return
  }
}

module attributes {stable_mosaic.version = 11 : i64} {
  func.func @_matmul_bn_relu_kernel(%arg0: i32, %arg1: memref<128x3456xbf16, #tpu.memory_space<vmem>>, %arg2: memref<3456x128xbf16, #tpu.memory_space<vmem>>, %arg3: memref<1x128xf32, #tpu.memory_space<vmem>>, %arg4: memref<1x128xf32, #tpu.memory_space<vmem>>, %arg5: memref<128x128xf32, #tpu.memory_space<vmem>>) attributes {dimension_semantics = [#tpu.dimension_semantics<parallel>], iteration_bounds = array<i64: 1>, scalar_prefetch = 0 : i64, scratch_operands = 0 : i64, tpu.core_type = #tpu.core_type<tc>, window_params = [{transform_indices = @transform_0, window_bounds = array<i64: 128, 3456>}, {pipeline_mode = #tpu.pipeline_mode<synchronous>, transform_indices = @transform_1, window_bounds = array<i64: 3456, 128>}, {pipeline_mode = #tpu.pipeline_mode<synchronous>, transform_indices = @transform_2, window_bounds = array<i64: 1, 128>}, {pipeline_mode = #tpu.pipeline_mode<synchronous>, transform_indices = @transform_3, window_bounds = array<i64: 1, 128>}, {transform_indices = @transform_4, window_bounds = array<i64: 128, 128>}]} {
    %c0 = arith.constant 0 : index
    %c0_0 = arith.constant 0 : index
    %0 = vector.load %arg1[%c0, %c0_0] : memref<128x3456xbf16, #tpu.memory_space<vmem>>, vector<128x3456xbf16>
    %c0_1 = arith.constant 0 : index
    %c0_2 = arith.constant 0 : index
    %1 = vector.load %arg2[%c0_1, %c0_2] : memref<3456x128xbf16, #tpu.memory_space<vmem>>, vector<3456x128xbf16>
    %cst = arith.constant dense<0.000000e+00> : vector<128x128xf32>
    %2 = tpu.matmul %0, %1, %cst {dimension_numbers = #tpu.dot_dimension_numbers<[1], [0], [0], [1], [0, 0, 1, 1], [], []>} : vector<128x3456xbf16>, vector<3456x128xbf16>, vector<128x128xf32> -> vector<128x128xf32>
    %c0_3 = arith.constant 0 : index
    %c0_4 = arith.constant 0 : index
    %3 = vector.load %arg3[%c0_3, %c0_4] : memref<1x128xf32, #tpu.memory_space<vmem>>, vector<1x128xf32>
    %4 = vector.broadcast %3 : vector<1x128xf32> to vector<128x128xf32>
    %5 = arith.mulf %2, %4 : vector<128x128xf32>
    %c0_5 = arith.constant 0 : index
    %c0_6 = arith.constant 0 : index
    %6 = vector.load %arg4[%c0_5, %c0_6] : memref<1x128xf32, #tpu.memory_space<vmem>>, vector<1x128xf32>
    %7 = vector.broadcast %6 : vector<1x128xf32> to vector<128x128xf32>
    %8 = arith.addf %5, %7 : vector<128x128xf32>
    %cst_7 = arith.constant 0.000000e+00 : f32
    %9 = vector.broadcast %cst_7 : f32 to vector<128x128xf32>
    %10 = arith.maximumf %8, %9 : vector<128x128xf32>
    %c0_8 = arith.constant 0 : index
    %c0_9 = arith.constant 0 : index
    %11 = vector.load %arg5[%c0_8, %c0_9] : memref<128x128xf32, #tpu.memory_space<vmem>>, vector<128x128xf32>
    tpu.vector_store %arg5[%c0_8, %c0_9], %10 {strides = array<i32>} : memref<128x128xf32, #tpu.memory_space<vmem>>, vector<128x128xf32>,
    return
  }
  func.func @transform_0(%arg0: i32) -> (i32, i32) {
    %c0_i32 = arith.constant 0 : i32
    %c0_i32_0 = arith.constant 0 : i32
    return %arg0, %c0_i32 : i32, i32
  }
  func.func @transform_1(%arg0: i32) -> (i32, i32) {
    %c0_i32 = arith.constant 0 : i32
    %c0_i32_0 = arith.constant 0 : i32
    %c0_i32_1 = arith.constant 0 : i32
    return %c0_i32, %c0_i32_0 : i32, i32
  }
  func.func @transform_2(%arg0: i32) -> (i32, i32) {
    %c0_i32 = arith.constant 0 : i32
    %c0_i32_0 = arith.constant 0 : i32
    %c0_i32_1 = arith.constant 0 : i32
    return %c0_i32, %c0_i32_0 : i32, i32
  }
  func.func @transform_3(%arg0: i32) -> (i32, i32) {
    %c0_i32 = arith.constant 0 : i32
    %c0_i32_0 = arith.constant 0 : i32
    %c0_i32_1 = arith.constant 0 : i32
    return %c0_i32, %c0_i32_0 : i32, i32
  }
  func.func @transform_4(%arg0: i32) -> (i32, i32) {
    %c0_i32 = arith.constant 0 : i32
    %c0_i32_0 = arith.constant 0 : i32
    return %arg0, %c0_i32 : i32, i32
  }
}

module attributes {stable_mosaic.version = 11 : i64} {
  func.func @_matmul_bn_relu_kernel(%arg0: i32, %arg1: memref<32x1152xbf16, #tpu.memory_space<vmem>>, %arg2: memref<1152x128xbf16, #tpu.memory_space<vmem>>, %arg3: memref<1x128xf32, #tpu.memory_space<vmem>>, %arg4: memref<1x128xf32, #tpu.memory_space<vmem>>, %arg5: memref<32x128xf32, #tpu.memory_space<vmem>>) attributes {dimension_semantics = [#tpu.dimension_semantics<parallel>], iteration_bounds = array<i64: 1>, scalar_prefetch = 0 : i64, scratch_operands = 0 : i64, tpu.core_type = #tpu.core_type<tc>, window_params = [{transform_indices = @transform_0, window_bounds = array<i64: 32, 1152>}, {pipeline_mode = #tpu.pipeline_mode<synchronous>, transform_indices = @transform_1, window_bounds = array<i64: 1152, 128>}, {pipeline_mode = #tpu.pipeline_mode<synchronous>, transform_indices = @transform_2, window_bounds = array<i64: 1, 128>}, {pipeline_mode = #tpu.pipeline_mode<synchronous>, transform_indices = @transform_3, window_bounds = array<i64: 1, 128>}, {transform_indices = @transform_4, window_bounds = array<i64: 32, 128>}]} {
    %c0 = arith.constant 0 : index
    %c0_0 = arith.constant 0 : index
    %0 = vector.load %arg1[%c0, %c0_0] : memref<32x1152xbf16, #tpu.memory_space<vmem>>, vector<32x1152xbf16>
    %c0_1 = arith.constant 0 : index
    %c0_2 = arith.constant 0 : index
    %1 = vector.load %arg2[%c0_1, %c0_2] : memref<1152x128xbf16, #tpu.memory_space<vmem>>, vector<1152x128xbf16>
    %cst = arith.constant dense<0.000000e+00> : vector<32x128xf32>
    %2 = tpu.matmul %0, %1, %cst {dimension_numbers = #tpu.dot_dimension_numbers<[1], [0], [0], [1], [0, 0, 1, 1], [], []>} : vector<32x1152xbf16>, vector<1152x128xbf16>, vector<32x128xf32> -> vector<32x128xf32>
    %c0_3 = arith.constant 0 : index
    %c0_4 = arith.constant 0 : index
    %3 = vector.load %arg3[%c0_3, %c0_4] : memref<1x128xf32, #tpu.memory_space<vmem>>, vector<1x128xf32>
    %4 = vector.broadcast %3 : vector<1x128xf32> to vector<32x128xf32>
    %5 = arith.mulf %2, %4 : vector<32x128xf32>
    %c0_5 = arith.constant 0 : index
    %c0_6 = arith.constant 0 : index
    %6 = vector.load %arg4[%c0_5, %c0_6] : memref<1x128xf32, #tpu.memory_space<vmem>>, vector<1x128xf32>
    %7 = vector.broadcast %6 : vector<1x128xf32> to vector<32x128xf32>
    %8 = arith.addf %5, %7 : vector<32x128xf32>
    %cst_7 = arith.constant 0.000000e+00 : f32
    %9 = vector.broadcast %cst_7 : f32 to vector<32x128xf32>
    %10 = arith.maximumf %8, %9 : vector<32x128xf32>
    %c0_8 = arith.constant 0 : index
    %c0_9 = arith.constant 0 : index
    %11 = vector.load %arg5[%c0_8, %c0_9] : memref<32x128xf32, #tpu.memory_space<vmem>>, vector<32x128xf32>
    tpu.vector_store %arg5[%c0_8, %c0_9], %10 {strides = array<i32>} : memref<32x128xf32, #tpu.memory_space<vmem>>, vector<32x128xf32>,
    return
  }
  func.func @transform_0(%arg0: i32) -> (i32, i32) {
    %c0_i32 = arith.constant 0 : i32
    %c0_i32_0 = arith.constant 0 : i32
    return %arg0, %c0_i32 : i32, i32
  }
  func.func @transform_1(%arg0: i32) -> (i32, i32) {
    %c0_i32 = arith.constant 0 : i32
    %c0_i32_0 = arith.constant 0 : i32
    %c0_i32_1 = arith.constant 0 : i32
    return %c0_i32, %c0_i32_0 : i32, i32
  }
  func.func @transform_2(%arg0: i32) -> (i32, i32) {
    %c0_i32 = arith.constant 0 : i32
    %c0_i32_0 = arith.constant 0 : i32
    %c0_i32_1 = arith.constant 0 : i32
    return %c0_i32, %c0_i32_0 : i32, i32
  }
  func.func @transform_3(%arg0: i32) -> (i32, i32) {
    %c0_i32 = arith.constant 0 : i32
    %c0_i32_0 = arith.constant 0 : i32
    %c0_i32_1 = arith.constant 0 : i32
    return %c0_i32, %c0_i32_0 : i32, i32
  }
  func.func @transform_4(%arg0: i32) -> (i32, i32) {
    %c0_i32 = arith.constant 0 : i32
    %c0_i32_0 = arith.constant 0 : i32
    return %arg0, %c0_i32 : i32, i32
  }
}

module attributes {stable_mosaic.version = 11 : i64} {
  func.func @_maxpool_kernel(%arg0: memref<2x2x2x128xf32, #tpu.memory_space<vmem>>, %arg1: memref<2x2x2x128xf32, #tpu.memory_space<vmem>>, %arg2: memref<2x2x2x128xf32, #tpu.memory_space<vmem>>, %arg3: memref<2x2x2x128xf32, #tpu.memory_space<vmem>>, %arg4: memref<2x2x2x128xf32, #tpu.memory_space<vmem>>) attributes {dimension_semantics = [], scalar_prefetch = 0 : i64, scratch_operands = 0 : i64, tpu.core_type = #tpu.core_type<tc>} {
    %c0 = arith.constant 0 : index
    %c0_0 = arith.constant 0 : index
    %c0_1 = arith.constant 0 : index
    %c0_2 = arith.constant 0 : index
    %0 = vector.load %arg0[%c0, %c0_0, %c0_1, %c0_2] : memref<2x2x2x128xf32, #tpu.memory_space<vmem>>, vector<2x2x2x128xf32>
    %c0_3 = arith.constant 0 : index
    %c0_4 = arith.constant 0 : index
    %c0_5 = arith.constant 0 : index
    %c0_6 = arith.constant 0 : index
    %1 = vector.load %arg1[%c0_3, %c0_4, %c0_5, %c0_6] : memref<2x2x2x128xf32, #tpu.memory_space<vmem>>, vector<2x2x2x128xf32>
    %2 = arith.maximumf %0, %1 : vector<2x2x2x128xf32>
    %c0_7 = arith.constant 0 : index
    %c0_8 = arith.constant 0 : index
    %c0_9 = arith.constant 0 : index
    %c0_10 = arith.constant 0 : index
    %3 = vector.load %arg2[%c0_7, %c0_8, %c0_9, %c0_10] : memref<2x2x2x128xf32, #tpu.memory_space<vmem>>, vector<2x2x2x128xf32>
    %c0_11 = arith.constant 0 : index
    %c0_12 = arith.constant 0 : index
    %c0_13 = arith.constant 0 : index
    %c0_14 = arith.constant 0 : index
    %4 = vector.load %arg3[%c0_11, %c0_12, %c0_13, %c0_14] : memref<2x2x2x128xf32, #tpu.memory_space<vmem>>, vector<2x2x2x128xf32>
    %5 = arith.maximumf %3, %4 : vector<2x2x2x128xf32>
    %6 = arith.maximumf %2, %5 : vector<2x2x2x128xf32>
    %c0_15 = arith.constant 0 : index
    %c0_16 = arith.constant 0 : index
    %c0_17 = arith.constant 0 : index
    %c0_18 = arith.constant 0 : index
    %7 = vector.load %arg4[%c0_15, %c0_16, %c0_17, %c0_18] : memref<2x2x2x128xf32, #tpu.memory_space<vmem>>, vector<2x2x2x128xf32>
    tpu.vector_store %arg4[%c0_15, %c0_16, %c0_17, %c0_18], %6 {strides = array<i32>} : memref<2x2x2x128xf32, #tpu.memory_space<vmem>>, vector<2x2x2x128xf32>,
    return
  }
}

module attributes {stable_mosaic.version = 11 : i64} {
  func.func @_avgpool_kernel(%arg0: memref<2x1x128xf32, #tpu.memory_space<vmem>>, %arg1: memref<2x1x128xf32, #tpu.memory_space<vmem>>) attributes {dimension_semantics = [], scalar_prefetch = 0 : i64, scratch_operands = 0 : i64, tpu.core_type = #tpu.core_type<tc>} {
    %c0 = arith.constant 0 : index
    %c0_0 = arith.constant 0 : index
    %c0_1 = arith.constant 0 : index
    %0 = vector.load %arg0[%c0, %c0_0, %c0_1] : memref<2x1x128xf32, #tpu.memory_space<vmem>>, vector<2x1x128xf32>
    %cst = arith.constant dense<0.000000e+00> : vector<2x128xf32>
    %1 = vector.multi_reduction <add>, %0, %cst [1] : vector<2x1x128xf32> to vector<2x128xf32>
    %2 = vector.shape_cast %1 : vector<2x128xf32> to vector<2x1x128xf32>
    %cst_2 = arith.constant 1.000000e+00 : f32
    %3 = vector.broadcast %cst_2 : f32 to vector<2x1x128xf32>
    %4 = arith.divf %2, %3 : vector<2x1x128xf32>
    %c0_3 = arith.constant 0 : index
    %c0_4 = arith.constant 0 : index
    %c0_5 = arith.constant 0 : index
    %5 = vector.load %arg1[%c0_3, %c0_4, %c0_5] : memref<2x1x128xf32, #tpu.memory_space<vmem>>, vector<2x1x128xf32>
    tpu.vector_store %arg1[%c0_3, %c0_4, %c0_5], %4 {strides = array<i32>} : memref<2x1x128xf32, #tpu.memory_space<vmem>>, vector<2x1x128xf32>,
    return
  }
}

module attributes {stable_mosaic.version = 11 : i64} {
  func.func @_matmul_bn_relu_kernel(%arg0: i32, %arg1: memref<8x1152xbf16, #tpu.memory_space<vmem>>, %arg2: memref<1152x128xbf16, #tpu.memory_space<vmem>>, %arg3: memref<1x128xf32, #tpu.memory_space<vmem>>, %arg4: memref<1x128xf32, #tpu.memory_space<vmem>>, %arg5: memref<8x128xf32, #tpu.memory_space<vmem>>) attributes {dimension_semantics = [#tpu.dimension_semantics<parallel>], iteration_bounds = array<i64: 1>, scalar_prefetch = 0 : i64, scratch_operands = 0 : i64, tpu.core_type = #tpu.core_type<tc>, window_params = [{transform_indices = @transform_0, window_bounds = array<i64: 8, 1152>}, {pipeline_mode = #tpu.pipeline_mode<synchronous>, transform_indices = @transform_1, window_bounds = array<i64: 1152, 128>}, {pipeline_mode = #tpu.pipeline_mode<synchronous>, transform_indices = @transform_2, window_bounds = array<i64: 1, 128>}, {pipeline_mode = #tpu.pipeline_mode<synchronous>, transform_indices = @transform_3, window_bounds = array<i64: 1, 128>}, {transform_indices = @transform_4, window_bounds = array<i64: 8, 128>}]} {
    %c0 = arith.constant 0 : index
    %c0_0 = arith.constant 0 : index
    %0 = vector.load %arg1[%c0, %c0_0] : memref<8x1152xbf16, #tpu.memory_space<vmem>>, vector<8x1152xbf16>
    %c0_1 = arith.constant 0 : index
    %c0_2 = arith.constant 0 : index
    %1 = vector.load %arg2[%c0_1, %c0_2] : memref<1152x128xbf16, #tpu.memory_space<vmem>>, vector<1152x128xbf16>
    %cst = arith.constant dense<0.000000e+00> : vector<8x128xf32>
    %2 = tpu.matmul %0, %1, %cst {dimension_numbers = #tpu.dot_dimension_numbers<[1], [0], [0], [1], [0, 0, 1, 1], [], []>} : vector<8x1152xbf16>, vector<1152x128xbf16>, vector<8x128xf32> -> vector<8x128xf32>
    %c0_3 = arith.constant 0 : index
    %c0_4 = arith.constant 0 : index
    %3 = vector.load %arg3[%c0_3, %c0_4] : memref<1x128xf32, #tpu.memory_space<vmem>>, vector<1x128xf32>
    %4 = vector.broadcast %3 : vector<1x128xf32> to vector<8x128xf32>
    %5 = arith.mulf %2, %4 : vector<8x128xf32>
    %c0_5 = arith.constant 0 : index
    %c0_6 = arith.constant 0 : index
    %6 = vector.load %arg4[%c0_5, %c0_6] : memref<1x128xf32, #tpu.memory_space<vmem>>, vector<1x128xf32>
    %7 = vector.broadcast %6 : vector<1x128xf32> to vector<8x128xf32>
    %8 = arith.addf %5, %7 : vector<8x128xf32>
    %cst_7 = arith.constant 0.000000e+00 : f32
    %9 = vector.broadcast %cst_7 : f32 to vector<8x128xf32>
    %10 = arith.maximumf %8, %9 : vector<8x128xf32>
    %c0_8 = arith.constant 0 : index
    %c0_9 = arith.constant 0 : index
    %11 = vector.load %arg5[%c0_8, %c0_9] : memref<8x128xf32, #tpu.memory_space<vmem>>, vector<8x128xf32>
    tpu.vector_store %arg5[%c0_8, %c0_9], %10 {strides = array<i32>} : memref<8x128xf32, #tpu.memory_space<vmem>>, vector<8x128xf32>,
    return
  }
  func.func @transform_0(%arg0: i32) -> (i32, i32) {
    %c0_i32 = arith.constant 0 : i32
    %c0_i32_0 = arith.constant 0 : i32
    return %arg0, %c0_i32 : i32, i32
  }
  func.func @transform_1(%arg0: i32) -> (i32, i32) {
    %c0_i32 = arith.constant 0 : i32
    %c0_i32_0 = arith.constant 0 : i32
    %c0_i32_1 = arith.constant 0 : i32
    return %c0_i32, %c0_i32_0 : i32, i32
  }
  func.func @transform_2(%arg0: i32) -> (i32, i32) {
    %c0_i32 = arith.constant 0 : i32
    %c0_i32_0 = arith.constant 0 : i32
    %c0_i32_1 = arith.constant 0 : i32
    return %c0_i32, %c0_i32_0 : i32, i32
  }
  func.func @transform_3(%arg0: i32) -> (i32, i32) {
    %c0_i32 = arith.constant 0 : i32
    %c0_i32_0 = arith.constant 0 : i32
    %c0_i32_1 = arith.constant 0 : i32
    return %c0_i32, %c0_i32_0 : i32, i32
  }
  func.func @transform_4(%arg0: i32) -> (i32, i32) {
    %c0_i32 = arith.constant 0 : i32
    %c0_i32_0 = arith.constant 0 : i32
    return %arg0, %c0_i32 : i32, i32
  }
}

</mosaic_0001>

<bundles_post_ra>
// kernel: _lambda_.16
= control target key start
LH: loop header
LB: loop body
LE: loop exit
PB: predicated region body
PF: predicated region fallthrough
CT: control target
= control target key end

     0   :  { %vm149_vm0 = vcmask 23552   ;;  %s1296_s0 = inlined_call_operand.vmem [shape: f32[2,8,8,3], index: 0, kind: input, shape index: {}]   ;;  %s1297_s1 = inlined_call_operand.vmem [shape: f32[2,8,8,3], index: 1, kind: input, shape index: {}]   ;;  %s1298_s2 = inlined_call_operand.vmem [shape: f32[2,8,8,3], index: 2, kind: input, shape index: {}]   ;;  %s1299_s3 = inlined_call_operand.vmem [shape: f32[2,8,8,3], index: 3, kind: input, shape index: {}]   ;;  %s1300_s4 = inlined_call_operand.vmem [shape: f32[2,8,8,3], index: 4, kind: output, shape index: {0}]   ;;  %s1301_s5 = inlined_call_operand.vmem [shape: f32[2,8,8,3], index: 5, kind: output, shape index: {1}]   ;;  %s1302_s6 = inlined_call_operand.vmem [shape: f32[2,8,8,3], index: 6, kind: output, shape index: {2}]   ;;  %s1303_s7 = inlined_call_operand.vmem [shape: f32[2,8,8,3], index: 7, kind: output, shape index: {3}]  }
   0x1   :  { %v21_v0 = vld [vmem:[%s1296_s0] sm:$0xff]  ;;  %v22_v4 = vld [vmem:[%s1296_s0 + $0x8] sm:$0xff]  ;;  %v460_v9 = vld [vmem:[%s1296_s0 + $0x10] sm:$0xff] }
   0x2   :  { %v37_v1 = vld [vmem:[%s1297_s1] sm:$0xff]  ;;  %v38_v5 = vld [vmem:[%s1297_s1 + $0x8] sm:$0xff]  ;;  %v471_v12 = vld [vmem:[%s1297_s1 + $0x10] sm:$0xff] }
   0x3   :  { %v439_v2 = vld [vmem:[%s1298_s2] sm:$0xff]  ;;  %v85_v3 = vadd.f32 %v37_v1, %v21_v0  ;;  %v455_v7 = vld [vmem:[%s1298_s2 + $0x8] sm:$0xff]  ;;  %v86_v8 = vadd.f32 %v38_v5, %v22_v4  ;;  %v476_v13 = vld [vmem:[%s1298_s2 + $0x10] sm:$0xff]  ;;  %v87_v16 = vadd.f32 %v471_v12, %v460_v9  ;;  %v498_v21 = vsub.f32 %v21_v0, %v37_v1 }
   0x4   :  { %1334 = vst [vmem:[#allocation2_spill] sm:$0xff] %v439_v2  ;;  %v450_v6 = vld [vmem:[%s1299_s3] sm:$0xff]  ;;  %v466_v11 = vld [vmem:[%s1299_s3 + $0x8] sm:$0xff]  ;;  %v485_v17 = vld [vmem:[%s1296_s0 + $0x18] sm:$0xff]  ;;  %v521_v28 = vsub.f32 %v22_v4, %v38_v5 }
   0x5   :  { %1335 = vst [vmem:[#allocation3_spill] sm:$0xff] %v455_v7  ;;  %v101_v10 = vadd.f32 %v85_v3, %v439_v2  ;;  %v166_v14 = vsub.f32 %v85_v3, %v439_v2  ;;  %v102_v15 = vadd.f32 %v86_v8, %v455_v7  ;;  %v490_v18 = vld [vmem:[%s1297_s1 + $0x18] sm:$0xff]  ;;  %v167_v20 = vsub.f32 %v86_v8, %v455_v7  ;;  %v504_v23 = vld [vmem:[%s1299_s3 + $0x10] sm:$0xff]  ;;  %v513_v25 = vld [vmem:[%s1296_s0 + $0x20] sm:$0xff] }
   0x6   :  { %v495_v19 = vld [vmem:[%s1298_s2 + $0x18] sm:$0xff]  ;;  %1336 = vst [vmem:[#allocation4_spill] sm:$0xff] %v498_v21  ;;  %v508_v24 = vadd.f32 %v490_v18, %v485_v17  ;;  %v518_v26 = vld [vmem:[%s1297_s1 + $0x20] sm:$0xff]  ;;  %v103_v30 = vadd.f32 %v87_v16, %v476_v13  ;;  %v542_v34 = vld [vmem:[%s1296_s0 + $0x28] sm:$0xff]  ;;  %v168_v42 = vsub.f32 %v87_v16, %v476_v13  ;;  %v611_v56 = vadd.f32 %v498_v21, %v439_v2 }
   0x7   :  { %v117_v22 = vadd.f32 %v101_v10, %v450_v6  ;;  %1337 = vst [vmem:[#allocation5_spill] sm:$0xff] %v504_v23  ;;  %v182_v27 = vsub.f32 %v166_v14, %v450_v6  ;;  %v118_v29 = vadd.f32 %v102_v15, %v466_v11  ;;  %v528_v31 = vld [vmem:[%s1299_s3 + $0x18] sm:$0xff]  ;;  %v533_v32 = vld [vmem:[%s1298_s2 + $0x20] sm:$0xff]  ;;  %v537_v33 = vadd.f32 %v518_v26, %v513_v25  ;;  %v555_v39 = vld [vmem:[%s1297_s1 + $0x28] sm:$0xff] }
   0x8   :  { %1338 = vst [vmem:[#allocation6_spill] sm:$0xff] %v521_v28  ;;  %v183_v35 = vsub.f32 %v167_v20, %v466_v11  ;;  %v104_v37 = vadd.f32 %v508_v24, %v495_v19  ;;  %v550_v38 = vld [vmem:[%s1299_s3 + $0x20] sm:$0xff]  ;;  %v560_v40 = vld [vmem:[%s1298_s2 + $0x28] sm:$0xff]  ;;  %v119_v44 = vadd.f32 %v103_v30, %v504_v23  ;;  %v568_v46 = vadd.f32 %v555_v39, %v542_v34  ;;  %v573_v47 = vld [vmem:[%s1296_s0 + $0x30] sm:$0xff] }
   0x9   :  { %1339 = vst [vmem:[#allocation7_spill] sm:$0xff] %v528_v31  ;;  %v133_v36 = vmul.f32 0.5, %v117_v22  ;;  %v198_v41 = vmul.f32 0.5, %v182_v27  ;;  %v134_v43 = vmul.f32 0.5, %v118_v29  ;;  %v105_v45 = vadd.f32 %v537_v33, %v533_v32  ;;  %v578_v48 = vld [vmem:[%s1297_s1 + $0x30] sm:$0xff]  ;;  %v593_v51 = vld [vmem:[%s1299_s3 + $0x28] sm:$0xff] }
   0xa   :  { %1340 = vst [vmem:[#allocation8_spill] sm:$0xff] %v550_v38  ;;  %v583_v49 = vld [vmem:[%s1298_s2 + $0x30] sm:$0xff]  ;;  %v120_v50 = vadd.f32 %v104_v37, %v528_v31  ;;  %v597_v52 = vadd.f32 %v578_v48, %v573_v47  ;;  %v602_v53 = vld [vmem:[%s1296_s0 + $0x38] sm:$0xff]  ;;  %v199_v55 = vmul.f32 0.5, %v183_v35  ;;  %v135_v57 = vmul.f32 0.5, %v119_v44  ;;  %v637_v63 = vld [vmem:[%s1296_s0 + $0x40] sm:$0xff] }
   0xb   :  { %1341 = vst [vmem:[#allocation9_spill] sm:$0xff] %v583_v49  ;;  %v607_v54 = vld [vmem:[%s1297_s1 + $0x38] sm:$0xff]  ;;  %v121_v58 = vadd.f32 %v105_v45, %v550_v38  ;;  %v106_v59 = vadd.f32 %v568_v46, %v560_v40  ;;  %v623_v60 = vld [vmem:[%s1299_s3 + $0x30] sm:$0xff]  ;;  %v649_v4 = vld [vmem:[%s1297_s1 + $0x40] sm:$0xff]  ;;  %v184_v8 = vsub.f32 %v168_v42, %v504_v23  ;;  %v169_v10 = vsub.f32 %v508_v24, %v495_v19 }
   0xc   :  { %150 = vst.msk [vmem:[%s1300_s4] sm:$0xff] %vm149_vm0, %v133_v36  ;;  %v628_v61 = vld [vmem:[%s1298_s2 + $0x38] sm:$0xff]  ;;  %v632_v62 = vadd.f32 %v607_v54, %v602_v53  ;;  %v136_v0 = vmul.f32 0.5, %v120_v50  ;;  %v107_v1 = vadd.f32 %v597_v52, %v583_v49  ;;  %v654_v5 = vld [vmem:[%s1298_s2 + $0x40] sm:$0xff]  ;;  %v672_v20 = vadd.f32 %v649_v4, %v637_v63  ;;  %v677_v22 = vld [vmem:[%s1296_s0 + $0x48] sm:$0xff] }
   0xd   :  { %151 = vst.msk [vmem:[%s1300_s4 + $0x8] sm:$0xff] %vm149_vm0, %v134_v43  ;;  %v644_v3 = vld [vmem:[%s1299_s3 + $0x38] sm:$0xff]  ;;  %v137_v14 = vmul.f32 0.5, %v121_v58  ;;  %v122_v15 = vadd.f32 %v106_v59, %v593_v51  ;;  %v682_v24 = vld [vmem:[%s1297_s1 + $0x48] sm:$0xff]  ;;  %v697_v30 = vld [vmem:[%s1299_s3 + $0x40] sm:$0xff]  ;;  %v717_v42 = vadd.f32 %v521_v28, %v455_v7 }
   0xe   :  { %1342 = vst [vmem:[#allocation10_spill] sm:$0xff] %v637_v63  ;;  %v108_v16 = vadd.f32 %v632_v62, %v628_v61  ;;  %v687_v27 = vld [vmem:[%s1298_s2 + $0x48] sm:$0xff]  ;;  %v123_v29 = vadd.f32 %v107_v1, %v623_v60  ;;  %v701_v35 = vadd.f32 %v682_v24, %v677_v22  ;;  %v706_v36 = vld [vmem:[%s1296_s0 + $0x50] sm:$0xff]  ;;  %v109_v45 = vadd.f32 %v672_v20, %v654_v5  ;;  %v743_v58 = vld [vmem:[%s1296_s0 + $0x58] sm:$0xff] }
   0xf   :  { %1343 = vst [vmem:[#allocation11_spill] sm:$0xff] %v649_v4  ;;  %v711_v37 = vld [vmem:[%s1297_s1 + $0x50] sm:$0xff]  ;;  %v138_v43 = vmul.f32 0.5, %v122_v15  ;;  %v729_v50 = vld [vmem:[%s1299_s3 + $0x48] sm:$0xff]  ;;  %v760_v15 = vld [vmem:[%s1298_s2 + $0x58] sm:$0xff] }
  0x10   :  { %214 = vst.msk [vmem:[%s1301_s5] sm:$0xff] %vm149_vm0, %v198_v41  ;;  %v170_v41 = vsub.f32 %v537_v33, %v533_v32  ;;  %v124_v44 = vadd.f32 %v108_v16, %v644_v3  ;;  %v734_v33 = vld [vmem:[%s1298_s2 + $0x50] sm:$0xff]  ;;  %v139_v59 = vmul.f32 0.5, %v123_v29  ;;  %v200_v16 = vmul.f32 0.5, %v184_v8  ;;  %v786_v8 = vld [vmem:[%s1297_s1 + $0x60] sm:$0xff]  ;;  %v915_v4 = vld [vmem:[%s1299_s3 + $0x78] sm:$0xff] }
  0x11   :  { %152 = vst.msk [vmem:[%s1300_s4 + $0x10] sm:$0xff] %vm149_vm0, %v135_v57  ;;  %v738_v57 = vadd.f32 %v711_v37, %v706_v36  ;;  %v750_v1 = vld [vmem:[%s1299_s3 + $0x50] sm:$0xff]  ;;  %v185_v29 = vsub.f32 %v169_v10, %v528_v31  ;;  %v125_v7 = vadd.f32 %v109_v45, %v697_v30  ;;  %v791_v10 = vld [vmem:[%s1298_s2 + $0x60] sm:$0xff] }
  0x12   :  { %1344 = vst [vmem:[#allocation12_spill] sm:$0xff] %v677_v22  ;;  %v140_v28 = vmul.f32 0.5, %v124_v44  ;;  %v801_v44 = vld [vmem:[%s1299_s3 + $0x58] sm:$0xff]  ;;  %v856_v22 = vld [vmem:[%s1297_s1 + $0x70] sm:$0xff] }
  0x13   :  { %1345 = vst [vmem:[#allocation13_spill] sm:$0xff] %v682_v24  ;;  %v111_v21 = vadd.f32 %v738_v57, %v734_v33 }
  0x14   :  { %153 = vst.msk [vmem:[%s1300_s4 + $0x18] sm:$0xff] %vm149_vm0, %v136_v0  ;;  %v110_v0 = vadd.f32 %v701_v35, %v687_v27 }
  0x15   :  { %1346 = vst [vmem:[#allocation14_spill] sm:$0xff] %v706_v36 }
  0x16   :  { %1347 = vst [vmem:[#allocation15_spill] sm:$0xff] %v711_v37  ;;  %v830_v37 = vld [vmem:[%s1299_s3 + $0x60] sm:$0xff] }
  0x17   :  { %154 = vst.msk [vmem:[%s1300_s4 + $0x20] sm:$0xff] %vm149_vm0, %v137_v14  ;;  %v755_v14 = vld [vmem:[%s1297_s1 + $0x58] sm:$0xff] }
  0x18   :  { %1348 = vst [vmem:[#allocation16_spill] sm:$0xff] %v743_v58  ;;  %v776_v2 = vadd.f32 %v755_v14, %v743_v58  ;;  %v810_v58 = vld [vmem:[%s1296_s0 + $0x68] sm:$0xff] }
  0x19   :  { %1349 = vst [vmem:[#allocation17_spill] sm:$0xff] %v755_v14  ;;  %v171_v14 = vsub.f32 %v568_v46, %v560_v40  ;;  %v835_v46 = vld [vmem:[%s1298_s2 + $0x68] sm:$0xff] }
  0x1a   :  { %215 = vst.msk [vmem:[%s1301_s5 + $0x8] sm:$0xff] %vm149_vm0, %v199_v55  ;;  %v781_v55 = vld [vmem:[%s1296_s0 + $0x60] sm:$0xff]  ;;  %v112_v36 = vadd.f32 %v776_v2, %v760_v15 }
  0x1b   :  { %155 = vst.msk [vmem:[%s1300_s4 + $0x28] sm:$0xff] %vm149_vm0, %v138_v43  ;;  %v126_v43 = vadd.f32 %v110_v0, %v729_v50  ;;  %v805_v45 = vadd.f32 %v786_v8, %v781_v55  ;;  %v186_v0 = vsub.f32 %v170_v41, %v550_v38  ;;  %v851_v38 = vld [vmem:[%s1299_s3 + $0x68] sm:$0xff] }
  0x1c   :  { %1350 = vst [vmem:[#allocation18_spill] sm:$0xff] %v781_v55  ;;  %v141_v55 = vmul.f32 0.5, %v125_v7  ;;  %v844_v7 = vld [vmem:[%s1296_s0 + $0x70] sm:$0xff]  ;;  %v128_v31 = vadd.f32 %v112_v36, %v801_v44  ;;  %v891_v36 = vld [vmem:[%s1298_s2 + $0x78] sm:$0xff] }
  0x1d   :  { %1351 = vst [vmem:[#allocation19_spill] sm:$0xff] %v786_v8  ;;  %v127_v8 = vadd.f32 %v111_v21, %v750_v1  ;;  %v142_v21 = vmul.f32 0.5, %v126_v43  ;;  %v201_v43 = vmul.f32 0.5, %v185_v29  ;;  %v99_v63 = vadd.f32 %v856_v22, %v844_v7 }
  0x1e   :  { %156 = vst.msk [vmem:[%s1300_s4 + $0x30] sm:$0xff] %vm149_vm0, %v139_v59  ;;  %v815_v59 = vld [vmem:[%s1297_s1 + $0x68] sm:$0xff] }
  0x1f   :  { %1352 = vst [vmem:[#allocation20_spill] sm:$0xff] %v810_v58  ;;  %v839_v41 = vadd.f32 %v815_v59, %v810_v58  ;;  %v861_v58 = vld [vmem:[%s1298_s2 + $0x70] sm:$0xff]  ;;  %v143_v24 = vmul.f32 0.5, %v127_v8 }
  0x20   :  { %1353 = vst [vmem:[#allocation21_spill] sm:$0xff] %v815_v59  ;;  %v172_v59 = vsub.f32 %v597_v52, %v583_v49  ;;  %v886_v52 = vld [vmem:[%s1297_s1 + $0x78] sm:$0xff]  ;;  %v144_v49 = vmul.f32 0.5, %v128_v31  ;;  %v174_v31 = vsub.f32 %v672_v20, %v654_v5 }
  0x21   :  { %157 = vst.msk [vmem:[%s1300_s4 + $0x38] sm:$0xff] %vm149_vm0, %v140_v28  ;;  %v113_v28 = vadd.f32 %v805_v45, %v791_v10  ;;  %v114_v23 = vadd.f32 %v839_v41, %v835_v46 }
  0x22   :  { %1354 = vst [vmem:[#allocation22_spill] sm:$0xff] %v844_v7  ;;  %v202_v7 = vmul.f32 0.5, %v186_v0  ;;  %v173_v0 = vsub.f32 %v632_v62, %v628_v61 }
  0x23   :  { %1355 = vst [vmem:[#allocation23_spill] sm:$0xff] %v856_v22  ;;  %v129_v29 = vadd.f32 %v113_v28, %v830_v37  ;;  %v187_v22 = vsub.f32 %v171_v14, %v593_v51  ;;  %v115_v28 = vadd.f32 %v99_v63, %v861_v58 }
  0x24   :  { %216 = vst.msk [vmem:[%s1301_s5 + $0x10] sm:$0xff] %vm149_vm0, %v200_v16  ;;  %v881_v16 = vld [vmem:[%s1296_s0 + $0x78] sm:$0xff] }
  0x25   :  { %158 = vst.msk [vmem:[%s1300_s4 + $0x40] sm:$0xff] %vm149_vm0, %v141_v55  ;;  %v901_v55 = vld [vmem:[%s1299_s3 + $0x70] sm:$0xff]  ;;  %v100_v8 = vadd.f32 %v886_v52, %v881_v16 }
  0x26   :  { %1356 = vst [vmem:[#allocation24_spill] sm:$0xff] %v881_v16  ;;  %v145_v16 = vmul.f32 0.5, %v129_v29  ;;  %v131_v62 = vadd.f32 %v115_v28, %v901_v55  ;;  %v189_v29 = vsub.f32 %v173_v0, %v644_v3 }
  0x27   :  { %1357 = vst [vmem:[#allocation25_spill] sm:$0xff] %v886_v52  ;;  %v116_v14 = vadd.f32 %v100_v8, %v891_v36  ;;  %v175_v52 = vsub.f32 %v701_v35, %v687_v27 }
  0x28   :  { %1358 = vst [vmem:[#allocation26_spill] sm:$0xff] %v891_v36  ;;  %v147_v35 = vmul.f32 0.5, %v131_v62  ;;  %v262_v62 = vsub.f32 %v611_v56, %v450_v6  ;;  %v986_v56 = vsub.f32 %v460_v9, %v471_v12  ;;  %v1004_v9 = vsub.f32 %v542_v34, %v555_v39 }
  0x29   :  { %159 = vst.msk [vmem:[%s1300_s4 + $0x48] sm:$0xff] %vm149_vm0, %v142_v21  ;;  %v130_v21 = vadd.f32 %v114_v23, %v851_v38  ;;  %v188_v23 = vsub.f32 %v172_v59, %v623_v60  ;;  %v132_v20 = vadd.f32 %v116_v14, %v915_v4  ;;  %v190_v59 = vsub.f32 %v174_v31, %v697_v30 }
  0x2a   :  { %160 = vst.msk [vmem:[%s1300_s4 + $0x50] sm:$0xff] %vm149_vm0, %v143_v24  ;;  %v191_v28 = vsub.f32 %v175_v52, %v729_v50  ;;  %v180_v31 = vsub.f32 %v99_v63, %v861_v58  ;;  %v1024_v34 = vsub.f32 %v573_v47, %v578_v48  ;;  %v1028_v39 = vsub.f32 %v602_v53, %v607_v54  ;;  %v1363_v47 = vld [vmem:[#allocation13_spill] sm:$0xff]  ;;  %v1364_v48 = vld [vmem:[#allocation12_spill] sm:$0xff] }
  0x2b   :  { %217 = vst.msk [vmem:[%s1301_s5 + $0x18] sm:$0xff] %vm149_vm0, %v201_v43  ;;  %v146_v24 = vmul.f32 0.5, %v130_v21  ;;  %v177_v43 = vsub.f32 %v776_v2, %v760_v15  ;;  %v203_v21 = vmul.f32 0.5, %v187_v22  ;;  %v148_v0 = vmul.f32 0.5, %v132_v20  ;;  %v1365_v53 = vld [vmem:[#allocation8_spill] sm:$0xff] }
  0x2c   :  { %161 = vst.msk [vmem:[%s1300_s4 + $0x58] sm:$0xff] %vm149_vm0, %v144_v49  ;;  %v176_v49 = vsub.f32 %v738_v57, %v734_v33  ;;  %v204_v57 = vmul.f32 0.5, %v188_v23  ;;  %v205_v22 = vmul.f32 0.5, %v189_v29  ;;  %v207_v23 = vmul.f32 0.5, %v191_v28  ;;  %v1360_v28 = vld [vmem:[#allocation10_spill] sm:$0xff] }
  0x2d   :  { %162 = vst.msk [vmem:[%s1300_s4 + $0x60] sm:$0xff] %vm149_vm0, %v145_v16  ;;  %v178_v16 = vsub.f32 %v805_v45, %v791_v10  ;;  %v193_v14 = vsub.f32 %v177_v43, %v801_v44  ;;  %v179_v45 = vsub.f32 %v839_v41, %v835_v46  ;;  %v196_v20 = vsub.f32 %v180_v31, %v901_v55  ;;  %v1366_v31 = vld [vmem:[#allocation9_spill] sm:$0xff] }
  0x2e   :  { %163 = vst.msk [vmem:[%s1300_s4 + $0x68] sm:$0xff] %vm149_vm0, %v146_v24  ;;  %v192_v2 = vsub.f32 %v176_v49, %v750_v1  ;;  %v181_v24 = vsub.f32 %v100_v8, %v891_v36  ;;  %v994_v49 = vsub.f32 %v513_v25, %v518_v26  ;;  %v251_v26 = vadd.f32 %v1004_v9, %v560_v40 }
  0x2f   :  { %218 = vst.msk [vmem:[%s1301_s5 + $0x20] sm:$0xff] %vm149_vm0, %v202_v7  ;;  %v194_v52 = vsub.f32 %v178_v16, %v830_v37  ;;  %v206_v7 = vmul.f32 0.5, %v190_v59  ;;  %v209_v29 = vmul.f32 0.5, %v193_v14  ;;  %v195_v63 = vsub.f32 %v179_v45, %v851_v38  ;;  %v1362_v14 = vld [vmem:[#allocation7_spill] sm:$0xff] }
  0x30   :  { %164 = vst.msk [vmem:[%s1300_s4 + $0x70] sm:$0xff] %vm149_vm0, %v147_v35  ;;  %v208_v41 = vmul.f32 0.5, %v192_v2  ;;  %v197_v8 = vsub.f32 %v181_v24, %v915_v4  ;;  %v990_v59 = vsub.f32 %v485_v17, %v490_v18  ;;  %v212_v12 = vmul.f32 0.5, %v196_v20 }
  0x31   :  { %165 = vst.msk [vmem:[%s1300_s4 + $0x78] sm:$0xff] %vm149_vm0, %v148_v0  ;;  %v210_v43 = vmul.f32 0.5, %v194_v52  ;;  %v211_v35 = vmul.f32 0.5, %v195_v63  ;;  %v248_v17 = vadd.f32 %v986_v56, %v476_v13  ;;  %v250_v25 = vadd.f32 %v994_v49, %v533_v32 }
  0x32   :  { %219 = vst.msk [vmem:[%s1301_s5 + $0x28] sm:$0xff] %vm149_vm0, %v203_v21  ;;  %v263_v21 = vsub.f32 %v717_v42, %v466_v11  ;;  %v249_v18 = vadd.f32 %v990_v59, %v495_v19  ;;  %v1359_v42 = vld [vmem:[#allocation11_spill] sm:$0xff]  ;;  %v213_v0 = vmul.f32 0.5, %v197_v8  ;;  %v1042_v52 = vsub.f32 %v1364_v48, %v1363_v47  ;;  %v1373_v47 = vld [vmem:[#allocation21_spill] sm:$0xff]  ;;  %v1374_v48 = vld [vmem:[#allocation20_spill] sm:$0xff] }
  0x33   :  { %220 = vst.msk [vmem:[%s1301_s5 + $0x30] sm:$0xff] %vm149_vm0, %v204_v57  ;;  %v1032_v16 = vsub.f32 %v1360_v28, %v1359_v42  ;;  %v1361_v57 = vld [vmem:[#allocation5_spill] sm:$0xff]  ;;  %v266_v54 = vsub.f32 %v250_v25, %v1365_v53  ;;  %v267_v45 = vsub.f32 %v251_v26, %v593_v51  ;;  %v278_v24 = vmul.f32 0.5, %v262_v62  ;;  %v1370_v26 = vld [vmem:[#allocation16_spill] sm:$0xff]  ;;  %v1372_v42 = vld [vmem:[#allocation18_spill] sm:$0xff] }
  0x34   :  { %221 = vst.msk [vmem:[%s1301_s5 + $0x38] sm:$0xff] %vm149_vm0, %v205_v22  ;;  %v264_v2 = vsub.f32 %v248_v17, %v1361_v57  ;;  %v265_v22 = vsub.f32 %v249_v18, %v1362_v14  ;;  %v255_v8 = vadd.f32 %v1042_v52, %v687_v27  ;;  %v1368_v17 = vld [vmem:[#allocation14_spill] sm:$0xff]  ;;  %v1369_v25 = vld [vmem:[#allocation17_spill] sm:$0xff] }
  0x35   :  { %222 = vst.msk [vmem:[%s1301_s5 + $0x40] sm:$0xff] %vm149_vm0, %v206_v7  ;;  %v252_v7 = vadd.f32 %v1024_v34, %v1366_v31 }
  0x36   :  { %223 = vst.msk [vmem:[%s1301_s5 + $0x48] sm:$0xff] %vm149_vm0, %v207_v23  ;;  %v253_v23 = vadd.f32 %v1028_v39, %v628_v61  ;;  %v280_v63 = vmul.f32 0.5, %v264_v2  ;;  %v281_v20 = vmul.f32 0.5, %v265_v22  ;;  %v283_v2 = vmul.f32 0.5, %v267_v45 }
  0x37   :  { %224 = vst.msk [vmem:[%s1301_s5 + $0x50] sm:$0xff] %vm149_vm0, %v208_v41  ;;  %v254_v41 = vadd.f32 %v1032_v16, %v654_v5  ;;  %v268_v62 = vsub.f32 %v252_v7, %v623_v60  ;;  %v1090_v7 = vsub.f32 %v1374_v48, %v1373_v47  ;;  %v271_v45 = vsub.f32 %v255_v8, %v729_v50 }
  0x38   :  { %225 = vst.msk [vmem:[%s1301_s5 + $0x58] sm:$0xff] %vm149_vm0, %v209_v29  ;;  %v279_v29 = vmul.f32 0.5, %v263_v21  ;;  %v1371_v21 = vld [vmem:[#allocation19_spill] sm:$0xff]  ;;  %v269_v22 = vsub.f32 %v253_v23, %v644_v3 }
  0x39   :  { %226 = vst.msk [vmem:[%s1301_s5 + $0x60] sm:$0xff] %vm149_vm0, %v210_v43  ;;  %v1367_v43 = vld [vmem:[#allocation15_spill] sm:$0xff]  ;;  %v1081_v28 = vsub.f32 %v1372_v42, %v1371_v21  ;;  %v259_v23 = vadd.f32 %v1090_v7, %v835_v46  ;;  %v1378_v21 = vld [vmem:[#allocation24_spill] sm:$0xff]  ;;  %v284_v47 = vmul.f32 0.5, %v268_v62 }
  0x3a   :  { %227 = vst.msk [vmem:[%s1301_s5 + $0x68] sm:$0xff] %vm149_vm0, %v211_v35  ;;  %v1073_v18 = vsub.f32 %v1368_v17, %v1367_v43  ;;  %v1077_v35 = vsub.f32 %v1370_v26, %v1369_v25  ;;  %v270_v43 = vsub.f32 %v254_v41, %v697_v30  ;;  %v1376_v41 = vld [vmem:[#allocation22_spill] sm:$0xff]  ;;  %v1377_v26 = vld [vmem:[#allocation25_spill] sm:$0xff]  ;;  %v285_v8 = vmul.f32 0.5, %v269_v22 }
  0x3b   :  { %228 = vst.msk [vmem:[%s1301_s5 + $0x70] sm:$0xff] %vm149_vm0, %v212_v12  ;;  %v282_v12 = vmul.f32 0.5, %v266_v54  ;;  %v258_v54 = vadd.f32 %v1081_v28, %v791_v10  ;;  %v1116_v42 = vsub.f32 %v1378_v21, %v1377_v26  ;;  %v1381_v26 = vld [vmem:[#allocation4_spill] sm:$0xff]  ;;  %v287_v22 = vmul.f32 0.5, %v271_v45  ;;  %v1382_v21 = vld [vmem:[#allocation3_spill] sm:$0xff] }
  0x3c   :  { %229 = vst.msk [vmem:[%s1301_s5 + $0x78] sm:$0xff] %vm149_vm0, %v213_v0  ;;  %v256_v17 = vadd.f32 %v1073_v18, %v734_v33  ;;  %v257_v0 = vadd.f32 %v1077_v35, %v760_v15 }
  0x3d   :  { %294 = vst.msk [vmem:[%s1302_s6] sm:$0xff] %vm149_vm0, %v278_v24  ;;  %v1375_v24 = vld [vmem:[#allocation23_spill] sm:$0xff]  ;;  %v274_v62 = vsub.f32 %v258_v54, %v830_v37  ;;  %v312_v54 = vsub.f32 %v986_v56, %v476_v13  ;;  %v314_v13 = vsub.f32 %v994_v49, %v533_v32  ;;  %v316_v32 = vsub.f32 %v1024_v34, %v1366_v31 }
  0x3e   :  { %295 = vst.msk [vmem:[%s1302_s6 + $0x8] sm:$0xff] %vm149_vm0, %v279_v29  ;;  %v1112_v25 = vsub.f32 %v1376_v41, %v1375_v24  ;;  %v272_v29 = vsub.f32 %v256_v17, %v750_v1  ;;  %v273_v48 = vsub.f32 %v257_v0, %v801_v44  ;;  %v261_v41 = vadd.f32 %v1116_v42, %v891_v36  ;;  %v1380_v17 = vld [vmem:[#allocation2_spill] sm:$0xff] }
  0x3f   :  { %1379 = vst [vmem:[#allocation11_spill] sm:$0xff] %v1116_v42  ;;  %v275_v0 = vsub.f32 %v259_v23, %v851_v38  ;;  %v1383_v42 = vld [vmem:[#allocation6_spill] sm:$0xff]  ;;  %v313_v23 = vsub.f32 %v990_v59, %v495_v19  ;;  %v315_v19 = vsub.f32 %v1004_v9, %v560_v40  ;;  %v328_v59 = vadd.f32 %v312_v54, %v1361_v57 }
  0x40   :  { %296 = vst.msk [vmem:[%s1302_s6 + $0x10] sm:$0xff] %vm149_vm0, %v280_v63  ;;  %v260_v24 = vadd.f32 %v1112_v25, %v861_v58  ;;  %v286_v63 = vmul.f32 0.5, %v270_v43  ;;  %v311_v36 = vsub.f32 %v1383_v42, %v1382_v21  ;;  %v277_v45 = vsub.f32 %v261_v41, %v915_v4 }
  0x41   :  { %297 = vst.msk [vmem:[%s1302_s6 + $0x18] sm:$0xff] %vm149_vm0, %v281_v20  ;;  %v310_v20 = vsub.f32 %v1381_v26, %v1380_v17  ;;  %v290_v42 = vmul.f32 0.5, %v274_v62  ;;  %v291_v56 = vmul.f32 0.5, %v275_v0  ;;  %v317_v40 = vsub.f32 %v1028_v39, %v628_v61 }
  0x42   :  { %298 = vst.msk [vmem:[%s1302_s6 + $0x20] sm:$0xff] %vm149_vm0, %v282_v12  ;;  %v288_v12 = vmul.f32 0.5, %v272_v29  ;;  %v276_v43 = vsub.f32 %v260_v24, %v901_v55  ;;  %v327_v29 = vadd.f32 %v311_v36, %v466_v11  ;;  %v293_v11 = vmul.f32 0.5, %v277_v45 }
  0x43   :  { %299 = vst.msk [vmem:[%s1302_s6 + $0x28] sm:$0xff] %vm149_vm0, %v283_v2  ;;  %v289_v2 = vmul.f32 0.5, %v273_v48  ;;  %v329_v36 = vadd.f32 %v313_v23, %v1362_v14  ;;  %v330_v9 = vadd.f32 %v314_v13, %v1365_v53  ;;  %v318_v34 = vsub.f32 %v1032_v16, %v654_v5 }
  0x44   :  { %300 = vst.msk [vmem:[%s1302_s6 + $0x30] sm:$0xff] %vm149_vm0, %v284_v47  ;;  %v326_v47 = vadd.f32 %v310_v20, %v450_v6  ;;  %v292_v6 = vmul.f32 0.5, %v276_v43  ;;  %v343_v57 = vmul.f32 0.5, %v327_v29  ;;  %v331_v14 = vadd.f32 %v315_v19, %v593_v51 }
  0x45   :  { %301 = vst.msk [vmem:[%s1302_s6 + $0x38] sm:$0xff] %vm149_vm0, %v285_v8  ;;  %v319_v61 = vsub.f32 %v1042_v52, %v687_v27  ;;  %v344_v39 = vmul.f32 0.5, %v328_v59  ;;  %v332_v53 = vadd.f32 %v316_v32, %v623_v60  ;;  %v320_v5 = vsub.f32 %v1073_v18, %v734_v33 }
  0x46   :  { %302 = vst.msk [vmem:[%s1302_s6 + $0x40] sm:$0xff] %vm149_vm0, %v286_v63  ;;  %v342_v49 = vmul.f32 0.5, %v326_v47  ;;  %v345_v51 = vmul.f32 0.5, %v329_v36  ;;  %v333_v16 = vadd.f32 %v317_v40, %v644_v3  ;;  %v321_v27 = vsub.f32 %v1077_v35, %v760_v15 }
  0x47   :  { %303 = vst.msk [vmem:[%s1302_s6 + $0x48] sm:$0xff] %vm149_vm0, %v287_v22  ;;  %v346_v60 = vmul.f32 0.5, %v330_v9  ;;  %v334_v52 = vadd.f32 %v318_v34, %v697_v30  ;;  %v322_v33 = vsub.f32 %v1081_v28, %v791_v10  ;;  %v347_v3 = vmul.f32 0.5, %v331_v14  ;;  %v1385_v28 = vld [vmem:[#allocation11_spill] sm:$0xff] }
  0x48   :  { %304 = vst.msk [vmem:[%s1302_s6 + $0x50] sm:$0xff] %vm149_vm0, %v288_v12  ;;  %v335_v31 = vadd.f32 %v319_v61, %v729_v50  ;;  %v323_v15 = vsub.f32 %v1090_v7, %v835_v46  ;;  %v348_v30 = vmul.f32 0.5, %v332_v53  ;;  %v336_v18 = vadd.f32 %v320_v5, %v750_v1  ;;  %v1384_v46 = vld [vmem:[#allocation26_spill] sm:$0xff] }
  0x49   :  { %305 = vst.msk [vmem:[%s1302_s6 + $0x58] sm:$0xff] %vm149_vm0, %v289_v2  ;;  %v324_v10 = vsub.f32 %v1112_v25, %v861_v58  ;;  %v349_v50 = vmul.f32 0.5, %v333_v16  ;;  %v337_v35 = vadd.f32 %v321_v27, %v801_v44  ;;  %v325_v7 = vsub.f32 %v1385_v28, %v1384_v46 }
  0x4a   :  { %306 = vst.msk [vmem:[%s1302_s6 + $0x60] sm:$0xff] %vm149_vm0, %v290_v42  ;;  %v350_v1 = vmul.f32 0.5, %v334_v52  ;;  %v338_v8 = vadd.f32 %v322_v33, %v830_v37  ;;  %v351_v58 = vmul.f32 0.5, %v335_v31  ;;  %v339_v25 = vadd.f32 %v323_v15, %v851_v38 }
  0x4b   :  { %307 = vst.msk [vmem:[%s1302_s6 + $0x68] sm:$0xff] %vm149_vm0, %v291_v56  ;;  %v352_v44 = vmul.f32 0.5, %v336_v18  ;;  %v340_v48 = vadd.f32 %v324_v10, %v901_v55  ;;  %v353_v37 = vmul.f32 0.5, %v337_v35  ;;  %v341_v24 = vadd.f32 %v325_v7, %v915_v4 }
  0x4c   :  { %308 = vst.msk [vmem:[%s1302_s6 + $0x70] sm:$0xff] %vm149_vm0, %v292_v6  ;;  %v354_v38 = vmul.f32 0.5, %v338_v8  ;;  %v355_v55 = vmul.f32 0.5, %v339_v25 }
  0x4d   :  { %309 = vst.msk [vmem:[%s1302_s6 + $0x78] sm:$0xff] %vm149_vm0, %v293_v11  ;;  %v356_v41 = vmul.f32 0.5, %v340_v48  ;;  %v357_v4 = vmul.f32 0.5, %v341_v24 }
  0x4e   :  { %358 = vst.msk [vmem:[%s1303_s7] sm:$0xff] %vm149_vm0, %v342_v49 }
  0x4f   :  { %359 = vst.msk [vmem:[%s1303_s7 + $0x8] sm:$0xff] %vm149_vm0, %v343_v57 }
  0x50   :  { %360 = vst.msk [vmem:[%s1303_s7 + $0x10] sm:$0xff] %vm149_vm0, %v344_v39 }
  0x51   :  { %361 = vst.msk [vmem:[%s1303_s7 + $0x18] sm:$0xff] %vm149_vm0, %v345_v51 }
  0x52   :  { %362 = vst.msk [vmem:[%s1303_s7 + $0x20] sm:$0xff] %vm149_vm0, %v346_v60 }
  0x53   :  { %363 = vst.msk [vmem:[%s1303_s7 + $0x28] sm:$0xff] %vm149_vm0, %v347_v3 }
  0x54   :  { %364 = vst.msk [vmem:[%s1303_s7 + $0x30] sm:$0xff] %vm149_vm0, %v348_v30 }
  0x55   :  { %365 = vst.msk [vmem:[%s1303_s7 + $0x38] sm:$0xff] %vm149_vm0, %v349_v50 }
  0x56   :  { %366 = vst.msk [vmem:[%s1303_s7 + $0x40] sm:$0xff] %vm149_vm0, %v350_v1 }
  0x57   :  { %367 = vst.msk [vmem:[%s1303_s7 + $0x48] sm:$0xff] %vm149_vm0, %v351_v58 }
  0x58   :  { %368 = vst.msk [vmem:[%s1303_s7 + $0x50] sm:$0xff] %vm149_vm0, %v352_v44 }
  0x59   :  { %369 = vst.msk [vmem:[%s1303_s7 + $0x58] sm:$0xff] %vm149_vm0, %v353_v37 }
  0x5a   :  { %370 = vst.msk [vmem:[%s1303_s7 + $0x60] sm:$0xff] %vm149_vm0, %v354_v38 }
  0x5b   :  { %371 = vst.msk [vmem:[%s1303_s7 + $0x68] sm:$0xff] %vm149_vm0, %v355_v55 }
  0x5c   :  { %372 = vst.msk [vmem:[%s1303_s7 + $0x70] sm:$0xff] %vm149_vm0, %v356_v41 }
  0x5d   :  { %373 = vst.msk [vmem:[%s1303_s7 + $0x78] sm:$0xff] %vm149_vm0, %v357_v4 }

// kernel: _lambda_.17
= control target key start
LH: loop header
LB: loop body
LE: loop exit
PB: predicated region body
PF: predicated region fallthrough
CT: control target
= control target key end

     0   :  { %vm143_vm0 = vcmask 1040384   ;;  %v368_v2 = vmov 0   ;;  %vm118_vm1 = vcmask 662528   ;;  %s534_s1 = inlined_call_operand.vmem [shape: bf16[81,128], index: 1, kind: input, shape index: {}]   ;;  %s535_s2 = inlined_call_operand.vmem [shape: f32[1,128], index: 2, kind: input, shape index: {}]   ;;  %s536_s3 = inlined_call_operand.vmem [shape: f32[1,128], index: 3, kind: input, shape index: {}]   ;;  %s537_s0 = inlined_call_operand.vmem [shape: bf16[128,81], index: 0, kind: input, shape index: {}]   ;;  %s538_s4 = inlined_call_operand.vmem [shape: f32[128,128], index: 4, kind: output, shape index: {}]  }
   0x1   :  { %v44_v0 = vld [vmem:[%s534_s1 + $0x28] sm:$0x1]  ;;  %v145_v3 = vsel %vm143_vm0, 65535, %v368_v2  ;;  %v346_v6 = vld [vmem:[%s534_s1 + $0x20] sm:$0xff]  ;;  %v345_v7 = vld [vmem:[%s534_s1 + $0x18] sm:$0xff] }
   0x2   :  { %v106_v1 = vunpack.c.l.b16 %v44_v0  ;;  %v344_v8 = vld [vmem:[%s534_s1 + $0x10] sm:$0xff]  ;;  %v343_v9 = vld [vmem:[%s534_s1 + $0x8] sm:$0xff]  ;;  %v342_v10 = vld [vmem:[%s534_s1] sm:$0xff] }
   0x3   :  { %v334_v11 = vld [vmem:[%s537_s0] sm:$0xff]  ;;  %v336_v12 = vld [vmem:[%s537_s0 + $0x10] sm:$0xff]  ;;  %v335_v15 = vld [vmem:[%s537_s0 + $0x8] sm:$0xff] }
   0x4   :  { %v112_v4 = vpack.c.b16 %v106_v1, %v106_v1  ;;  %v338_v13 = vld [vmem:[%s537_s0 + $0x20] sm:$0xff]  ;;  %v340_v14 = vld [vmem:[%s537_s0 + $0x30] sm:$0xff]  ;;  %v337_v16 = vld [vmem:[%s537_s0 + $0x18] sm:$0xff] }
   0x5   :  { %v339_v17 = vld [vmem:[%s537_s0 + $0x28] sm:$0xff]  ;;  %v341_v18 = vld [vmem:[%s537_s0 + $0x38] sm:$0xff]  ;;  %v447_v19 = vld [vmem:[%s535_s2] ss:$0 sm:$0xff] }
   0x6   :  { %v147_v5 = vand.u32 %v145_v3, %v112_v4  ;;  %v452_v20 = vld [vmem:[%s536_s3] ss:$0 sm:$0xff] }
   0x8   :  { %151 = vmatpush.bf16.msra.mxu0 %v147_v5  ;;  %347 = vmatpush.bf16.msra.mxu1 %v147_v5 }
   0x9   :  { %348 = vmatpush.bf16.msra.mxu2 %v147_v5  ;;  %349 = vmatpush.bf16.msra.mxu3 %v147_v5 }
   0xc   :  { %152 = vmatpush.bf16.msra.mxu0 %v346_v6  ;;  %350 = vmatpush.bf16.msra.mxu1 %v346_v6 }
   0xd   :  { %351 = vmatpush.bf16.msra.mxu2 %v346_v6  ;;  %352 = vmatpush.bf16.msra.mxu3 %v346_v6 }
  0x10   :  { %153 = vmatpush.bf16.msra.mxu0 %v345_v7  ;;  %353 = vmatpush.bf16.msra.mxu1 %v345_v7 }
  0x11   :  { %354 = vmatpush.bf16.msra.mxu2 %v345_v7  ;;  %355 = vmatpush.bf16.msra.mxu3 %v345_v7 }
  0x14   :  { %154 = vmatpush.bf16.msra.mxu0 %v344_v8  ;;  %356 = vmatpush.bf16.msra.mxu1 %v344_v8 }
  0x15   :  { %357 = vmatpush.bf16.msra.mxu2 %v344_v8  ;;  %358 = vmatpush.bf16.msra.mxu3 %v344_v8 }
  0x18   :  { %155 = vmatpush.bf16.msra.mxu0 %v343_v9  ;;  %359 = vmatpush.bf16.msra.mxu1 %v343_v9 }
  0x19   :  { %360 = vmatpush.bf16.msra.mxu2 %v343_v9  ;;  %361 = vmatpush.bf16.msra.mxu3 %v343_v9 }
  0x1c   :  { %156 = vmatpush.bf16.msra.mxu0 %v342_v10  ;;  %362 = vmatpush.bf16.msra.mxu1 %v342_v10 }
  0x1d   :  { %363 = vmatpush.bf16.msra.mxu2 %v342_v10  ;;  %364 = vmatpush.bf16.msra.mxu3 %v342_v10 }
  0x1f   :  { %326 = vmatmul.msk.bf16.vlgmr.msra.gmra.mxu0 %vm118_vm1, %v334_v11  ;;  %328 = vmatmul.msk.bf16.vlgmr.msra.gmra.mxu1 %vm118_vm1, %v336_v12 }
  0x20   :  { %330 = vmatmul.msk.bf16.vlgmr.msra.gmra.mxu2 %vm118_vm1, %v338_v13  ;;  %332 = vmatmul.msk.bf16.vlgmr.msra.gmra.mxu3 %vm118_vm1, %v340_v14 }
  0x2f   :  { %327 = vmatmul.msk.bf16.gmra.mxu0 %vm118_vm1, %v335_v15  ;;  %329 = vmatmul.msk.bf16.gmra.mxu1 %vm118_vm1, %v337_v16 }
  0x30   :  { %331 = vmatmul.msk.bf16.gmra.mxu2 %vm118_vm1, %v339_v17  ;;  %333 = vmatmul.msk.bf16.gmra.mxu3 %vm118_vm1, %v341_v18 }
  0x9c   :  { %v158_v21 = vpop.f32.mrf.mxu0  ;;  %v168_v22 = vpop.f32.mrf.mxu1 }
  0x9d   :  { %v202_v23 = vmul.f32 %v447_v19, %v158_v21  ;;  %v206_v24 = vmul.f32 %v447_v19, %v168_v22 }
  0x9f   :  { %v222_v25 = vadd.f32 %v452_v20, %v202_v23  ;;  %v226_v26 = vadd.f32 %v452_v20, %v206_v24 }
  0xa1   :  { %v238_v27 = vmax.f32 %v222_v25, 0.0  ;;  %v242_v28 = vmax.f32 %v226_v26, 0.0 }
  0xa3   :  { %254 = vst [vmem:[%s538_s4] sm:$0xff] %v238_v27  ;;  %v178_v29 = vpop.f32.mrf.mxu2  ;;  %v188_v30 = vpop.f32.mrf.mxu3 }
  0xa4   :  { %258 = vst [vmem:[%s538_s4 + $0x20] sm:$0xff] %v242_v28  ;;  %v210_v31 = vmul.f32 %v447_v19, %v178_v29  ;;  %v214_v32 = vmul.f32 %v447_v19, %v188_v30  ;;  %v160_v33 = vpop.f32.mrf.mxu0  ;;  %v170_v34 = vpop.f32.mrf.mxu1 }
  0xa5   :  { %v203_v35 = vmul.f32 %v447_v19, %v160_v33  ;;  %v207_v36 = vmul.f32 %v447_v19, %v170_v34 }
  0xa6   :  { %v230_v37 = vadd.f32 %v452_v20, %v210_v31  ;;  %v234_v38 = vadd.f32 %v452_v20, %v214_v32 }
  0xa7   :  { %v223_v39 = vadd.f32 %v452_v20, %v203_v35  ;;  %v227_v40 = vadd.f32 %v452_v20, %v207_v36 }
  0xa8   :  { %v246_v41 = vmax.f32 %v230_v37, 0.0  ;;  %v250_v42 = vmax.f32 %v234_v38, 0.0 }
  0xa9   :  { %v239_v43 = vmax.f32 %v223_v39, 0.0  ;;  %v243_v44 = vmax.f32 %v227_v40, 0.0 }
  0xaa   :  { %262 = vst [vmem:[%s538_s4 + $0x40] sm:$0xff] %v246_v41 }
  0xab   :  { %266 = vst [vmem:[%s538_s4 + $0x60] sm:$0xff] %v250_v42  ;;  %v180_v45 = vpop.f32.mrf.mxu2  ;;  %v190_v46 = vpop.f32.mrf.mxu3 }
  0xac   :  { %255 = vst [vmem:[%s538_s4 + $0x8] sm:$0xff] %v239_v43  ;;  %v211_v47 = vmul.f32 %v447_v19, %v180_v45  ;;  %v215_v48 = vmul.f32 %v447_v19, %v190_v46  ;;  %v163_v49 = vpop.f32.mrf.mxu0  ;;  %v173_v50 = vpop.f32.mrf.mxu1 }
  0xad   :  { %259 = vst [vmem:[%s538_s4 + $0x28] sm:$0xff] %v243_v44  ;;  %v204_v51 = vmul.f32 %v447_v19, %v163_v49  ;;  %v208_v52 = vmul.f32 %v447_v19, %v173_v50 }
  0xae   :  { %v231_v53 = vadd.f32 %v452_v20, %v211_v47  ;;  %v235_v54 = vadd.f32 %v452_v20, %v215_v48 }
  0xaf   :  { %v224_v55 = vadd.f32 %v452_v20, %v204_v51  ;;  %v228_v56 = vadd.f32 %v452_v20, %v208_v52 }
  0xb0   :  { %v247_v57 = vmax.f32 %v231_v53, 0.0  ;;  %v251_v58 = vmax.f32 %v235_v54, 0.0 }
  0xb1   :  { %v240_v59 = vmax.f32 %v224_v55, 0.0  ;;  %v244_v60 = vmax.f32 %v228_v56, 0.0 }
  0xb2   :  { %263 = vst [vmem:[%s538_s4 + $0x48] sm:$0xff] %v247_v57 }
  0xb3   :  { %267 = vst [vmem:[%s538_s4 + $0x68] sm:$0xff] %v251_v58  ;;  %v183_v61 = vpop.f32.mrf.mxu2  ;;  %v193_v62 = vpop.f32.mrf.mxu3 }
  0xb4   :  { %256 = vst [vmem:[%s538_s4 + $0x10] sm:$0xff] %v240_v59  ;;  %v212_v63 = vmul.f32 %v447_v19, %v183_v61  ;;  %v216_v0 = vmul.f32 %v447_v19, %v193_v62  ;;  %v165_v1 = vpop.f32.mrf.mxu0  ;;  %v175_v2 = vpop.f32.mrf.mxu1 }
  0xb5   :  { %260 = vst [vmem:[%s538_s4 + $0x30] sm:$0xff] %v244_v60  ;;  %v205_v3 = vmul.f32 %v447_v19, %v165_v1  ;;  %v209_v4 = vmul.f32 %v447_v19, %v175_v2 }
  0xb6   :  { %v232_v5 = vadd.f32 %v452_v20, %v212_v63  ;;  %v236_v6 = vadd.f32 %v452_v20, %v216_v0 }
  0xb7   :  { %v225_v7 = vadd.f32 %v452_v20, %v205_v3  ;;  %v229_v8 = vadd.f32 %v452_v20, %v209_v4 }
  0xb8   :  { %v248_v9 = vmax.f32 %v232_v5, 0.0  ;;  %v252_v10 = vmax.f32 %v236_v6, 0.0 }
  0xb9   :  { %v241_v11 = vmax.f32 %v225_v7, 0.0  ;;  %v245_v12 = vmax.f32 %v229_v8, 0.0 }
  0xba   :  { %264 = vst [vmem:[%s538_s4 + $0x50] sm:$0xff] %v248_v9 }
  0xbb   :  { %268 = vst [vmem:[%s538_s4 + $0x70] sm:$0xff] %v252_v10  ;;  %v185_v13 = vpop.f32.mrf.mxu2  ;;  %v195_v14 = vpop.f32.mrf.mxu3 }
  0xbc   :  { %257 = vst [vmem:[%s538_s4 + $0x18] sm:$0xff] %v241_v11  ;;  %v213_v15 = vmul.f32 %v447_v19, %v185_v13  ;;  %v217_v16 = vmul.f32 %v447_v19, %v195_v14 }
  0xbd   :  { %261 = vst [vmem:[%s538_s4 + $0x38] sm:$0xff] %v245_v12 }
  0xbe   :  { %v233_v17 = vadd.f32 %v452_v20, %v213_v15  ;;  %v237_v18 = vadd.f32 %v452_v20, %v217_v16 }
  0xc0   :  { %v249_v21 = vmax.f32 %v233_v17, 0.0  ;;  %v253_v22 = vmax.f32 %v237_v18, 0.0 }
  0xc2   :  { %265 = vst [vmem:[%s538_s4 + $0x58] sm:$0xff] %v249_v21 }
  0xc3   :  { %269 = vst [vmem:[%s538_s4 + $0x78] sm:$0xff] %v253_v22 }

// kernel: _lambda_.18
= control target key start
LH: loop header
LB: loop body
LE: loop exit
PB: predicated region body
PF: predicated region fallthrough
CT: control target
= control target key end

     0   :  { %vm471_vm0 = vcmask 1042432   ;;  %vm446_vm1 = vcmask 834560   ;;  %s1475_s1 = inlined_call_operand.vmem [shape: bf16[486,128], index: 1, kind: input, shape index: {}]   ;;  %s1476_s0 = inlined_call_operand.vmem [shape: bf16[128,486], index: 0, kind: input, shape index: {}]   ;;  %s1477_s2 = inlined_call_operand.vmem [shape: f32[1,128], index: 2, kind: input, shape index: {}]   ;;  %s1478_s3 = inlined_call_operand.vmem [shape: f32[1,128], index: 3, kind: input, shape index: {}]   ;;  %s1479_s4 = inlined_call_operand.vmem [shape: f32[128,128], index: 4, kind: output, shape index: {}]  }
   0x1   :  { %v1042_v0 = vld [vmem:[%s1475_s1 + $0x38] sm:$0xff]  ;;  %v110_v3 = vld [vmem:[%s1475_s1 + $0xf0] sm:$0x7]  ;;  %v1040_v10 = vld [vmem:[%s1475_s1 + $0x28] sm:$0xff] }
   0x2   :  { %v1050_v1 = vld [vmem:[%s1475_s1 + $0x78] sm:$0xff]  ;;  %475 = vmatpush.bf16.msra.mxu0 %v1042_v0  ;;  %v384_v4 = vunpack.c.l.b16 %v110_v3  ;;  %v1041_v5 = vld [vmem:[%s1475_s1 + $0x30] sm:$0xff]  ;;  %v1048_v11 = vld [vmem:[%s1475_s1 + $0x68] sm:$0xff] }
   0x3   :  { %v1058_v2 = vld [vmem:[%s1475_s1 + $0xb8] sm:$0xff]  ;;  %524 = vmatpush.bf16.msra.mxu1 %v1050_v1  ;;  %v1049_v6 = vld [vmem:[%s1475_s1 + $0x70] sm:$0xff]  ;;  %v1064_v12 = vld [vmem:[%s1475_s1 + $0xe8] sm:$0xff] }
   0x4   :  { %573 = vmatpush.bf16.msra.mxu2 %v1058_v2  ;;  %v1057_v7 = vld [vmem:[%s1475_s1 + $0xb0] sm:$0xff]  ;;  %v415_v8 = vpack.c.b16 %v384_v4, %v384_v4  ;;  %v1056_v13 = vld [vmem:[%s1475_s1 + $0xa8] sm:$0xff]  ;;  %v1039_v14 = vld [vmem:[%s1475_s1 + $0x20] sm:$0xff] }
   0x5   :  { %v1047_v15 = vld [vmem:[%s1475_s1 + $0x60] sm:$0xff]  ;;  %v1038_v18 = vld [vmem:[%s1475_s1 + $0x18] sm:$0xff]  ;;  %v1037_v22 = vld [vmem:[%s1475_s1 + $0x10] sm:$0xff] }
   0x6   :  { %v473_v9 = vsel %vm471_vm0, %v415_v8, 0  ;;  %476 = vmatpush.bf16.msra.mxu0 %v1041_v5  ;;  %v1063_v16 = vld [vmem:[%s1475_s1 + $0xe0] sm:$0xff]  ;;  %v1046_v19 = vld [vmem:[%s1475_s1 + $0x58] sm:$0xff]  ;;  %v1045_v23 = vld [vmem:[%s1475_s1 + $0x50] sm:$0xff] }
   0x7   :  { %525 = vmatpush.bf16.msra.mxu1 %v1049_v6  ;;  %623 = vmatpush.bf16.msra.mxu3 %v473_v9  ;;  %v1055_v17 = vld [vmem:[%s1475_s1 + $0xa0] sm:$0xff]  ;;  %v1062_v20 = vld [vmem:[%s1475_s1 + $0xd8] sm:$0xff]  ;;  %v1061_v24 = vld [vmem:[%s1475_s1 + $0xd0] sm:$0xff] }
   0x8   :  { %574 = vmatpush.bf16.msra.mxu2 %v1057_v7  ;;  %v1054_v21 = vld [vmem:[%s1475_s1 + $0x98] sm:$0xff]  ;;  %v1053_v25 = vld [vmem:[%s1475_s1 + $0x90] sm:$0xff]  ;;  %v1036_v26 = vld [vmem:[%s1475_s1 + $0x8] sm:$0xff] }
   0x9   :  { %v1044_v27 = vld [vmem:[%s1475_s1 + $0x48] sm:$0xff]  ;;  %v1035_v30 = vld [vmem:[%s1475_s1] sm:$0xff]  ;;  %v1005_v36 = vld [vmem:[%s1476_s0 + $0xc] sm:$0xf0] }
   0xa   :  { %477 = vmatpush.bf16.msra.mxu0 %v1040_v10  ;;  %v1060_v28 = vld [vmem:[%s1475_s1 + $0xc8] sm:$0xff]  ;;  %v1043_v31 = vld [vmem:[%s1475_s1 + $0x40] sm:$0xff]  ;;  %v751_v38 = vld [vmem:[%s1476_s0 + $0x10] sm:$0xf0] }
   0xb   :  { %526 = vmatpush.bf16.msra.mxu1 %v1048_v11  ;;  %624 = vmatpush.bf16.msra.mxu3 %v1064_v12  ;;  %v1052_v29 = vld [vmem:[%s1475_s1 + $0x88] sm:$0xff]  ;;  %v1059_v32 = vld [vmem:[%s1475_s1 + $0xc0] sm:$0xff]  ;;  %v759_v39 = vld [vmem:[%s1476_s0 + $0x18] sm:$0xf0] }
   0xc   :  { %575 = vmatpush.bf16.msra.mxu2 %v1056_v13  ;;  %v1051_v33 = vld [vmem:[%s1475_s1 + $0x80] sm:$0xff]  ;;  %v1004_v34 = vld [vmem:[%s1476_s0 + $0xc] sm:$0xf]  ;;  %v757_v40 = vld [vmem:[%s1476_s0 + $0x8] sm:$0xf] }
   0xd   :  { %v749_v35 = vld [vmem:[%s1476_s0] sm:$0xf]  ;;  %v1003_v37 = vld [vmem:[%s1476_s0 + $0x4] sm:$0xf]  ;;  %v1006_v41 = vld [vmem:[%s1476_s0 + $0x14] sm:$0xf0]  ;;  %v762_v44 = vor.u32 %v1004_v34, %v759_v39 }
   0xe   :  { %478 = vmatpush.bf16.msra.mxu0 %v1039_v14  ;;  %v750_v42 = vor.u32 %v1005_v36, %v749_v35  ;;  %v754_v43 = vor.u32 %v1003_v37, %v751_v38  ;;  %v758_v45 = vor.u32 %v1006_v41, %v757_v40  ;;  %v1008_v46 = vld [vmem:[%s1476_s0 + $0x2c] sm:$0xf]  ;;  %v765_v47 = vld [vmem:[%s1476_s0 + $0x20] sm:$0xf]  ;;  %v1009_v48 = vld [vmem:[%s1476_s0 + $0x2c] sm:$0xf0] }
   0xf   :  { %527 = vmatpush.bf16.msra.mxu1 %v1047_v15  ;;  %625 = vmatpush.bf16.msra.mxu3 %v1063_v16  ;;  %v1007_v49 = vld [vmem:[%s1476_s0 + $0x24] sm:$0xf]  ;;  %v767_v50 = vld [vmem:[%s1476_s0 + $0x30] sm:$0xf0]  ;;  %v775_v51 = vld [vmem:[%s1476_s0 + $0x38] sm:$0xf0]  ;;  %v766_v54 = vor.u32 %v1009_v48, %v765_v47 }
  0x10   :  { %576 = vmatpush.bf16.msra.mxu2 %v1055_v17  ;;  %v773_v52 = vld [vmem:[%s1476_s0 + $0x28] sm:$0xf]  ;;  %v1010_v53 = vld [vmem:[%s1476_s0 + $0x34] sm:$0xf0]  ;;  %v770_v55 = vor.u32 %v1007_v49, %v767_v50  ;;  %v778_v56 = vor.u32 %v1008_v46, %v775_v51  ;;  %v1012_v58 = vld [vmem:[%s1476_s0 + $0x4c] sm:$0xf] }
  0x11   :  { %v774_v57 = vor.u32 %v1010_v53, %v773_v52  ;;  %v781_v59 = vld [vmem:[%s1476_s0 + $0x40] sm:$0xf]  ;;  %v1013_v60 = vld [vmem:[%s1476_s0 + $0x4c] sm:$0xf0]  ;;  %v1011_v61 = vld [vmem:[%s1476_s0 + $0x44] sm:$0xf] }
  0x12   :  { %479 = vmatpush.bf16.msra.mxu0 %v1038_v18  ;;  %v783_v62 = vld [vmem:[%s1476_s0 + $0x50] sm:$0xf0]  ;;  %v791_v63 = vld [vmem:[%s1476_s0 + $0x58] sm:$0xf0]  ;;  %v789_v0 = vld [vmem:[%s1476_s0 + $0x48] sm:$0xf]  ;;  %v782_v2 = vor.u32 %v1013_v60, %v781_v59 }
  0x13   :  { %528 = vmatpush.bf16.msra.mxu1 %v1046_v19  ;;  %626 = vmatpush.bf16.msra.mxu3 %v1062_v20  ;;  %v1014_v1 = vld [vmem:[%s1476_s0 + $0x54] sm:$0xf0]  ;;  %v786_v3 = vor.u32 %v1011_v61, %v783_v62  ;;  %v794_v4 = vor.u32 %v1012_v58, %v791_v63  ;;  %v1016_v6 = vld [vmem:[%s1476_s0 + $0x6c] sm:$0xf]  ;;  %v797_v7 = vld [vmem:[%s1476_s0 + $0x60] sm:$0xf] }
  0x14   :  { %577 = vmatpush.bf16.msra.mxu2 %v1054_v21  ;;  %v790_v5 = vor.u32 %v1014_v1, %v789_v0  ;;  %v1017_v8 = vld [vmem:[%s1476_s0 + $0x6c] sm:$0xf0]  ;;  %v1015_v9 = vld [vmem:[%s1476_s0 + $0x64] sm:$0xf]  ;;  %v799_v10 = vld [vmem:[%s1476_s0 + $0x70] sm:$0xf0] }
  0x15   :  { %v807_v11 = vld [vmem:[%s1476_s0 + $0x78] sm:$0xf0]  ;;  %v805_v12 = vld [vmem:[%s1476_s0 + $0x68] sm:$0xf]  ;;  %v1018_v13 = vld [vmem:[%s1476_s0 + $0x74] sm:$0xf0]  ;;  %v798_v14 = vor.u32 %v1017_v8, %v797_v7  ;;  %v802_v15 = vor.u32 %v1015_v9, %v799_v10 }
  0x16   :  { %480 = vmatpush.bf16.msra.mxu0 %v1037_v22  ;;  %v810_v16 = vor.u32 %v1016_v6, %v807_v11  ;;  %v806_v17 = vor.u32 %v1018_v13, %v805_v12  ;;  %v1020_v18 = vld [vmem:[%s1476_s0 + $0x8c] sm:$0xf]  ;;  %v813_v19 = vld [vmem:[%s1476_s0 + $0x80] sm:$0xf]  ;;  %v1021_v20 = vld [vmem:[%s1476_s0 + $0x8c] sm:$0xf0] }
  0x17   :  { %529 = vmatpush.bf16.msra.mxu1 %v1045_v23  ;;  %627 = vmatpush.bf16.msra.mxu3 %v1061_v24  ;;  %v1019_v21 = vld [vmem:[%s1476_s0 + $0x84] sm:$0xf]  ;;  %v815_v22 = vld [vmem:[%s1476_s0 + $0x90] sm:$0xf0]  ;;  %v823_v23 = vld [vmem:[%s1476_s0 + $0x98] sm:$0xf0] }
  0x18   :  { %578 = vmatpush.bf16.msra.mxu2 %v1053_v25  ;;  %v821_v24 = vld [vmem:[%s1476_s0 + $0x88] sm:$0xf]  ;;  %v1022_v25 = vld [vmem:[%s1476_s0 + $0x94] sm:$0xf0]  ;;  %v831_v34 = vld [vmem:[%s1476_s0 + $0xb0] sm:$0xf0] }
  0x19   :  { %v839_v35 = vld [vmem:[%s1476_s0 + $0xb8] sm:$0xf0]  ;;  %v837_v36 = vld [vmem:[%s1476_s0 + $0xa8] sm:$0xf]  ;;  %v1026_v37 = vld [vmem:[%s1476_s0 + $0xb4] sm:$0xf0] }
  0x1a   :  { %481 = vmatpush.bf16.msra.mxu0 %v1036_v26  ;;  %v814_v26 = vor.u32 %v1021_v20, %v813_v19  ;;  %v838_v41 = vor.u32 %v1026_v37, %v837_v36  ;;  %v847_v46 = vld [vmem:[%s1476_s0 + $0xd0] sm:$0xf0]  ;;  %v855_v47 = vld [vmem:[%s1476_s0 + $0xd8] sm:$0xf0]  ;;  %v853_v48 = vld [vmem:[%s1476_s0 + $0xc8] sm:$0xf] }
  0x1b   :  { %530 = vmatpush.bf16.msra.mxu1 %v1044_v27  ;;  %628 = vmatpush.bf16.msra.mxu3 %v1060_v28  ;;  %v818_v27 = vor.u32 %v1019_v21, %v815_v22  ;;  %v826_v28 = vor.u32 %v1020_v18, %v823_v23  ;;  %v1030_v49 = vld [vmem:[%s1476_s0 + $0xd4] sm:$0xf0]  ;;  %v863_v58 = vld [vmem:[%s1476_s0 + $0xf0] sm:$0xf0]  ;;  %v871_v59 = vld [vmem:[%s1476_s0 + $0xf8] sm:$0xf0] }
  0x1c   :  { %579 = vmatpush.bf16.msra.mxu2 %v1052_v29  ;;  %v822_v29 = vor.u32 %v1022_v25, %v821_v24  ;;  %v854_v53 = vor.u32 %v1030_v49, %v853_v48  ;;  %v869_v60 = vld [vmem:[%s1476_s0 + $0xe8] sm:$0xf]  ;;  %v1034_v61 = vld [vmem:[%s1476_s0 + $0xf4] sm:$0xf0]  ;;  %v1388_v8 = vld [vmem:[%s1477_s2] ss:$0 sm:$0xff] }
  0x1d   :  { %v870_v1 = vor.u32 %v1034_v61, %v869_v60  ;;  %v1393_v12 = vld [vmem:[%s1478_s3] ss:$0 sm:$0xff] }
  0x1e   :  { %482 = vmatpush.bf16.msra.mxu0 %v1035_v30  ;;  %v1024_v30 = vld [vmem:[%s1476_s0 + $0xac] sm:$0xf] }
  0x1f   :  { %531 = vmatpush.bf16.msra.mxu1 %v1043_v31  ;;  %629 = vmatpush.bf16.msra.mxu3 %v1059_v32  ;;  %v829_v31 = vld [vmem:[%s1476_s0 + $0xa0] sm:$0xf]  ;;  %v1025_v32 = vld [vmem:[%s1476_s0 + $0xac] sm:$0xf0]  ;;  %v842_v40 = vor.u32 %v1024_v30, %v839_v35 }
  0x20   :  { %580 = vmatpush.bf16.msra.mxu2 %v1051_v33  ;;  %v1023_v33 = vld [vmem:[%s1476_s0 + $0xa4] sm:$0xf]  ;;  %v830_v38 = vor.u32 %v1025_v32, %v829_v31 }
  0x21   :  { %483 = vmatmul.bf16.vlgmr.msra.gmra.mxu0 %v750_v42  ;;  %v834_v39 = vor.u32 %v1023_v33, %v831_v34  ;;  %v1028_v42 = vld [vmem:[%s1476_s0 + $0xcc] sm:$0xf] }
  0x22   :  { %532 = vmatmul.bf16.vlgmr.msra.gmra.mxu1 %v754_v43  ;;  %995 = vmatmul.msk.bf16.vlgmr.msra.gmra.mxu3 %vm446_vm1, %v762_v44  ;;  %v845_v43 = vld [vmem:[%s1476_s0 + $0xc0] sm:$0xf]  ;;  %v1029_v44 = vld [vmem:[%s1476_s0 + $0xcc] sm:$0xf0]  ;;  %v858_v52 = vor.u32 %v1028_v42, %v855_v47 }
  0x23   :  { %581 = vmatmul.bf16.vlgmr.msra.gmra.mxu2 %v758_v45  ;;  %v1027_v45 = vld [vmem:[%s1476_s0 + $0xc4] sm:$0xf]  ;;  %v846_v50 = vor.u32 %v1029_v44, %v845_v43 }
  0x24   :  { %v850_v51 = vor.u32 %v1027_v45, %v847_v46 }
  0x31   :  { %488 = vmatmul.bf16.gmra.mxu0 %v766_v54  ;;  %v1032_v54 = vld [vmem:[%s1476_s0 + $0xec] sm:$0xf] }
  0x32   :  { %537 = vmatmul.bf16.gmra.mxu1 %v770_v55  ;;  %996 = vmatmul.msk.bf16.gmra.mxu3 %vm446_vm1, %v778_v56  ;;  %v861_v55 = vld [vmem:[%s1476_s0 + $0xe0] sm:$0xf]  ;;  %v1033_v56 = vld [vmem:[%s1476_s0 + $0xec] sm:$0xf0]  ;;  %v874_v0 = vor.u32 %v1032_v54, %v871_v59 }
  0x33   :  { %586 = vmatmul.bf16.gmra.mxu2 %v774_v57  ;;  %v1031_v57 = vld [vmem:[%s1476_s0 + $0xe4] sm:$0xf]  ;;  %v862_v62 = vor.u32 %v1033_v56, %v861_v55 }
  0x34   :  { %v866_v63 = vor.u32 %v1031_v57, %v863_v58 }
  0x41   :  { %493 = vmatmul.bf16.gmra.mxu0 %v782_v2 }
  0x42   :  { %542 = vmatmul.bf16.gmra.mxu1 %v786_v3  ;;  %997 = vmatmul.msk.bf16.gmra.mxu3 %vm446_vm1, %v794_v4 }
  0x43   :  { %591 = vmatmul.bf16.gmra.mxu2 %v790_v5 }
  0x51   :  { %498 = vmatmul.bf16.gmra.mxu0 %v798_v14 }
  0x52   :  { %547 = vmatmul.bf16.gmra.mxu1 %v802_v15  ;;  %998 = vmatmul.msk.bf16.gmra.mxu3 %vm446_vm1, %v810_v16 }
  0x53   :  { %596 = vmatmul.bf16.gmra.mxu2 %v806_v17 }
  0x61   :  { %503 = vmatmul.bf16.gmra.mxu0 %v814_v26 }
  0x62   :  { %552 = vmatmul.bf16.gmra.mxu1 %v818_v27  ;;  %999 = vmatmul.msk.bf16.gmra.mxu3 %vm446_vm1, %v826_v28 }
  0x63   :  { %601 = vmatmul.bf16.gmra.mxu2 %v822_v29 }
  0x71   :  { %508 = vmatmul.bf16.gmra.mxu0 %v830_v38 }
  0x72   :  { %557 = vmatmul.bf16.gmra.mxu1 %v834_v39  ;;  %1000 = vmatmul.msk.bf16.gmra.mxu3 %vm446_vm1, %v842_v40 }
  0x73   :  { %606 = vmatmul.bf16.gmra.mxu2 %v838_v41 }
  0x81   :  { %513 = vmatmul.bf16.gmra.mxu0 %v846_v50 }
  0x82   :  { %562 = vmatmul.bf16.gmra.mxu1 %v850_v51  ;;  %1001 = vmatmul.msk.bf16.gmra.mxu3 %vm446_vm1, %v858_v52 }
  0x83   :  { %611 = vmatmul.bf16.gmra.mxu2 %v854_v53 }
  0x91   :  { %518 = vmatmul.bf16.gmra.mxu0 %v862_v62 }
  0x92   :  { %567 = vmatmul.bf16.gmra.mxu1 %v866_v63  ;;  %1002 = vmatmul.msk.bf16.gmra.mxu3 %vm446_vm1, %v874_v0 }
  0x93   :  { %616 = vmatmul.bf16.gmra.mxu2 %v870_v1 }
  0x9e   :  { %v484_v2 = vpop.f32.mrf.mxu0 }
  0x9f   :  { %v533_v3 = vpop.f32.mrf.mxu1 }
  0xa0   :  { %v534_v4 = vadd.f32 %v533_v3, %v484_v2 }
  0xa5   :  { %v631_v5 = vpop.f32.mrf.mxu3 }
  0xa6   :  { %v582_v6 = vpop.f32.mrf.mxu2  ;;  %v486_v9 = vpop.f32.mrf.mxu0 }
  0xa7   :  { %v583_v7 = vadd.f32 %v582_v6, %v534_v4  ;;  %v535_v10 = vpop.f32.mrf.mxu1 }
  0xa8   :  { %v536_v15 = vadd.f32 %v535_v10, %v486_v9 }
  0xa9   :  { %v632_v11 = vadd.f32 %v631_v5, %v583_v7 }
  0xab   :  { %v675_v13 = vmul.f32 %v1388_v8, %v632_v11 }
  0xad   :  { %v695_v14 = vadd.f32 %v1393_v12, %v675_v13  ;;  %v633_v16 = vpop.f32.mrf.mxu3 }
  0xae   :  { %v584_v17 = vpop.f32.mrf.mxu2  ;;  %v489_v20 = vpop.f32.mrf.mxu0 }
  0xaf   :  { %v711_v18 = vmax.f32 %v695_v14, 0.0  ;;  %v585_v19 = vadd.f32 %v584_v17, %v536_v15  ;;  %v538_v21 = vpop.f32.mrf.mxu1 }
  0xb0   :  { %v539_v24 = vadd.f32 %v538_v21, %v489_v20 }
  0xb1   :  { %727 = vst [vmem:[%s1479_s4] sm:$0xff] %v711_v18  ;;  %v634_v22 = vadd.f32 %v633_v16, %v585_v19 }
  0xb3   :  { %v676_v23 = vmul.f32 %v1388_v8, %v634_v22 }
  0xb5   :  { %v696_v25 = vadd.f32 %v1393_v12, %v676_v23  ;;  %v636_v26 = vpop.f32.mrf.mxu3 }
  0xb6   :  { %v587_v27 = vpop.f32.mrf.mxu2  ;;  %v491_v30 = vpop.f32.mrf.mxu0 }
  0xb7   :  { %v712_v28 = vmax.f32 %v696_v25, 0.0  ;;  %v588_v29 = vadd.f32 %v587_v27, %v539_v24  ;;  %v540_v31 = vpop.f32.mrf.mxu1 }
  0xb8   :  { %v541_v35 = vadd.f32 %v540_v31, %v491_v30 }
  0xb9   :  { %728 = vst [vmem:[%s1479_s4 + $0x8] sm:$0xff] %v712_v28  ;;  %v637_v32 = vadd.f32 %v636_v26, %v588_v29 }
  0xbb   :  { %v677_v33 = vmul.f32 %v1388_v8, %v637_v32 }
  0xbd   :  { %v697_v34 = vadd.f32 %v1393_v12, %v677_v33  ;;  %v638_v36 = vpop.f32.mrf.mxu3 }
  0xbe   :  { %v589_v37 = vpop.f32.mrf.mxu2  ;;  %v494_v40 = vpop.f32.mrf.mxu0 }
  0xbf   :  { %v713_v38 = vmax.f32 %v697_v34, 0.0  ;;  %v590_v39 = vadd.f32 %v589_v37, %v541_v35  ;;  %v543_v41 = vpop.f32.mrf.mxu1 }
  0xc0   :  { %v544_v44 = vadd.f32 %v543_v41, %v494_v40 }
  0xc1   :  { %729 = vst [vmem:[%s1479_s4 + $0x10] sm:$0xff] %v713_v38  ;;  %v639_v42 = vadd.f32 %v638_v36, %v590_v39 }
  0xc3   :  { %v678_v43 = vmul.f32 %v1388_v8, %v639_v42 }
  0xc5   :  { %v698_v45 = vadd.f32 %v1393_v12, %v678_v43  ;;  %v641_v46 = vpop.f32.mrf.mxu3 }
  0xc6   :  { %v592_v47 = vpop.f32.mrf.mxu2  ;;  %v496_v50 = vpop.f32.mrf.mxu0 }
  0xc7   :  { %v714_v48 = vmax.f32 %v698_v45, 0.0  ;;  %v593_v49 = vadd.f32 %v592_v47, %v544_v44  ;;  %v545_v51 = vpop.f32.mrf.mxu1 }
  0xc8   :  { %v546_v55 = vadd.f32 %v545_v51, %v496_v50 }
  0xc9   :  { %730 = vst [vmem:[%s1479_s4 + $0x18] sm:$0xff] %v714_v48  ;;  %v642_v52 = vadd.f32 %v641_v46, %v593_v49 }
  0xcb   :  { %v679_v53 = vmul.f32 %v1388_v8, %v642_v52 }
  0xcd   :  { %v699_v54 = vadd.f32 %v1393_v12, %v679_v53  ;;  %v643_v56 = vpop.f32.mrf.mxu3 }
  0xce   :  { %v594_v57 = vpop.f32.mrf.mxu2  ;;  %v499_v60 = vpop.f32.mrf.mxu0 }
  0xcf   :  { %v715_v58 = vmax.f32 %v699_v54, 0.0  ;;  %v595_v59 = vadd.f32 %v594_v57, %v546_v55  ;;  %v548_v61 = vpop.f32.mrf.mxu1 }
  0xd0   :  { %v549_v0 = vadd.f32 %v548_v61, %v499_v60 }
  0xd1   :  { %731 = vst [vmem:[%s1479_s4 + $0x20] sm:$0xff] %v715_v58  ;;  %v644_v62 = vadd.f32 %v643_v56, %v595_v59 }
  0xd3   :  { %v680_v63 = vmul.f32 %v1388_v8, %v644_v62 }
  0xd5   :  { %v700_v1 = vadd.f32 %v1393_v12, %v680_v63  ;;  %v646_v2 = vpop.f32.mrf.mxu3 }
  0xd6   :  { %v597_v3 = vpop.f32.mrf.mxu2  ;;  %v501_v6 = vpop.f32.mrf.mxu0 }
  0xd7   :  { %v716_v4 = vmax.f32 %v700_v1, 0.0  ;;  %v598_v5 = vadd.f32 %v597_v3, %v549_v0  ;;  %v550_v7 = vpop.f32.mrf.mxu1 }
  0xd8   :  { %v551_v13 = vadd.f32 %v550_v7, %v501_v6 }
  0xd9   :  { %732 = vst [vmem:[%s1479_s4 + $0x28] sm:$0xff] %v716_v4  ;;  %v647_v9 = vadd.f32 %v646_v2, %v598_v5 }
  0xdb   :  { %v681_v10 = vmul.f32 %v1388_v8, %v647_v9 }
  0xdd   :  { %v701_v11 = vadd.f32 %v1393_v12, %v681_v10  ;;  %v648_v14 = vpop.f32.mrf.mxu3 }
  0xde   :  { %v599_v15 = vpop.f32.mrf.mxu2  ;;  %v504_v18 = vpop.f32.mrf.mxu0 }
  0xdf   :  { %v717_v16 = vmax.f32 %v701_v11, 0.0  ;;  %v600_v17 = vadd.f32 %v599_v15, %v551_v13  ;;  %v553_v19 = vpop.f32.mrf.mxu1 }
  0xe0   :  { %v554_v22 = vadd.f32 %v553_v19, %v504_v18 }
  0xe1   :  { %733 = vst [vmem:[%s1479_s4 + $0x30] sm:$0xff] %v717_v16  ;;  %v649_v20 = vadd.f32 %v648_v14, %v600_v17 }
  0xe3   :  { %v682_v21 = vmul.f32 %v1388_v8, %v649_v20 }
  0xe5   :  { %v702_v23 = vadd.f32 %v1393_v12, %v682_v21  ;;  %v651_v24 = vpop.f32.mrf.mxu3 }
  0xe6   :  { %v602_v25 = vpop.f32.mrf.mxu2  ;;  %v506_v28 = vpop.f32.mrf.mxu0 }
  0xe7   :  { %v718_v26 = vmax.f32 %v702_v23, 0.0  ;;  %v603_v27 = vadd.f32 %v602_v25, %v554_v22  ;;  %v555_v29 = vpop.f32.mrf.mxu1 }
  0xe8   :  { %v556_v33 = vadd.f32 %v555_v29, %v506_v28 }
  0xe9   :  { %734 = vst [vmem:[%s1479_s4 + $0x38] sm:$0xff] %v718_v26  ;;  %v652_v30 = vadd.f32 %v651_v24, %v603_v27 }
  0xeb   :  { %v683_v31 = vmul.f32 %v1388_v8, %v652_v30 }
  0xed   :  { %v703_v32 = vadd.f32 %v1393_v12, %v683_v31  ;;  %v653_v34 = vpop.f32.mrf.mxu3 }
  0xee   :  { %v604_v35 = vpop.f32.mrf.mxu2  ;;  %v509_v38 = vpop.f32.mrf.mxu0 }
  0xef   :  { %v719_v36 = vmax.f32 %v703_v32, 0.0  ;;  %v605_v37 = vadd.f32 %v604_v35, %v556_v33  ;;  %v558_v39 = vpop.f32.mrf.mxu1 }
  0xf0   :  { %v559_v42 = vadd.f32 %v558_v39, %v509_v38 }
  0xf1   :  { %735 = vst [vmem:[%s1479_s4 + $0x40] sm:$0xff] %v719_v36  ;;  %v654_v40 = vadd.f32 %v653_v34, %v605_v37 }
  0xf3   :  { %v684_v41 = vmul.f32 %v1388_v8, %v654_v40 }
  0xf5   :  { %v704_v43 = vadd.f32 %v1393_v12, %v684_v41  ;;  %v656_v44 = vpop.f32.mrf.mxu3 }
  0xf6   :  { %v607_v45 = vpop.f32.mrf.mxu2  ;;  %v511_v48 = vpop.f32.mrf.mxu0 }
  0xf7   :  { %v720_v46 = vmax.f32 %v704_v43, 0.0  ;;  %v608_v47 = vadd.f32 %v607_v45, %v559_v42  ;;  %v560_v49 = vpop.f32.mrf.mxu1 }
  0xf8   :  { %v561_v53 = vadd.f32 %v560_v49, %v511_v48 }
  0xf9   :  { %736 = vst [vmem:[%s1479_s4 + $0x48] sm:$0xff] %v720_v46  ;;  %v657_v50 = vadd.f32 %v656_v44, %v608_v47 }
  0xfb   :  { %v685_v51 = vmul.f32 %v1388_v8, %v657_v50 }
  0xfd   :  { %v705_v52 = vadd.f32 %v1393_v12, %v685_v51  ;;  %v658_v54 = vpop.f32.mrf.mxu3 }
  0xfe   :  { %v609_v55 = vpop.f32.mrf.mxu2  ;;  %v514_v58 = vpop.f32.mrf.mxu0 }
  0xff   :  { %v721_v56 = vmax.f32 %v705_v52, 0.0  ;;  %v610_v57 = vadd.f32 %v609_v55, %v561_v53  ;;  %v563_v59 = vpop.f32.mrf.mxu1 }
 0x100   :  { %v564_v62 = vadd.f32 %v563_v59, %v514_v58 }
 0x101   :  { %737 = vst [vmem:[%s1479_s4 + $0x50] sm:$0xff] %v721_v56  ;;  %v659_v60 = vadd.f32 %v658_v54, %v610_v57 }
 0x103   :  { %v686_v61 = vmul.f32 %v1388_v8, %v659_v60 }
 0x105   :  { %v706_v63 = vadd.f32 %v1393_v12, %v686_v61  ;;  %v661_v0 = vpop.f32.mrf.mxu3 }
 0x106   :  { %v612_v1 = vpop.f32.mrf.mxu2  ;;  %v516_v4 = vpop.f32.mrf.mxu0 }
 0x107   :  { %v722_v2 = vmax.f32 %v706_v63, 0.0  ;;  %v613_v3 = vadd.f32 %v612_v1, %v564_v62  ;;  %v565_v5 = vpop.f32.mrf.mxu1 }
 0x108   :  { %v566_v10 = vadd.f32 %v565_v5, %v516_v4 }
 0x109   :  { %738 = vst [vmem:[%s1479_s4 + $0x58] sm:$0xff] %v722_v2  ;;  %v662_v6 = vadd.f32 %v661_v0, %v613_v3 }
 0x10b   :  { %v687_v7 = vmul.f32 %v1388_v8, %v662_v6 }
 0x10d   :  { %v707_v9 = vadd.f32 %v1393_v12, %v687_v7  ;;  %v663_v11 = vpop.f32.mrf.mxu3 }
 0x10e   :  { %v614_v13 = vpop.f32.mrf.mxu2  ;;  %v519_v16 = vpop.f32.mrf.mxu0 }
 0x10f   :  { %v723_v14 = vmax.f32 %v707_v9, 0.0  ;;  %v615_v15 = vadd.f32 %v614_v13, %v566_v10  ;;  %v568_v17 = vpop.f32.mrf.mxu1 }
 0x110   :  { %v569_v20 = vadd.f32 %v568_v17, %v519_v16 }
 0x111   :  { %739 = vst [vmem:[%s1479_s4 + $0x60] sm:$0xff] %v723_v14  ;;  %v664_v18 = vadd.f32 %v663_v11, %v615_v15 }
 0x113   :  { %v688_v19 = vmul.f32 %v1388_v8, %v664_v18 }
 0x115   :  { %v708_v21 = vadd.f32 %v1393_v12, %v688_v19  ;;  %v666_v22 = vpop.f32.mrf.mxu3 }
 0x116   :  { %v617_v23 = vpop.f32.mrf.mxu2  ;;  %v521_v27 = vpop.f32.mrf.mxu0 }
 0x117   :  { %v724_v24 = vmax.f32 %v708_v21, 0.0  ;;  %v618_v25 = vadd.f32 %v617_v23, %v569_v20  ;;  %v570_v28 = vpop.f32.mrf.mxu1 }
 0x118   :  { %v571_v31 = vadd.f32 %v570_v28, %v521_v27 }
 0x119   :  { %740 = vst [vmem:[%s1479_s4 + $0x68] sm:$0xff] %v724_v24  ;;  %v667_v26 = vadd.f32 %v666_v22, %v618_v25 }
 0x11b   :  { %v689_v29 = vmul.f32 %v1388_v8, %v667_v26 }
 0x11d   :  { %v709_v30 = vadd.f32 %v1393_v12, %v689_v29  ;;  %v668_v35 = vpop.f32.mrf.mxu3 }
 0x11e   :  { %v619_v32 = vpop.f32.mrf.mxu2 }
 0x11f   :  { %v725_v33 = vmax.f32 %v709_v30, 0.0  ;;  %v620_v34 = vadd.f32 %v619_v32, %v571_v31 }
 0x121   :  { %741 = vst [vmem:[%s1479_s4 + $0x70] sm:$0xff] %v725_v33  ;;  %v669_v36 = vadd.f32 %v668_v35, %v620_v34 }
 0x123   :  { %v690_v37 = vmul.f32 %v1388_v8, %v669_v36 }
 0x125   :  { %v710_v38 = vadd.f32 %v1393_v12, %v690_v37 }
 0x127   :  { %v726_v39 = vmax.f32 %v710_v38, 0.0 }
 0x129   :  { %742 = vst [vmem:[%s1479_s4 + $0x78] sm:$0xff] %v726_v39 }

// kernel: _lambda_.19
= control target key start
LH: loop header
LB: loop body
LE: loop exit
PB: predicated region body
PF: predicated region fallthrough
CT: control target
= control target key end

     0   :  { %vm85_vm0 = vcmask 19456   ;;  %s614_s0 = inlined_call_operand.vmem [shape: f32[2,4,4,3], index: 0, kind: input, shape index: {}]   ;;  %s615_s1 = inlined_call_operand.vmem [shape: f32[2,4,4,3], index: 1, kind: input, shape index: {}]   ;;  %s616_s2 = inlined_call_operand.vmem [shape: f32[2,4,4,3], index: 2, kind: input, shape index: {}]   ;;  %s617_s3 = inlined_call_operand.vmem [shape: f32[2,4,4,3], index: 3, kind: input, shape index: {}]   ;;  %s618_s4 = inlined_call_operand.vmem [shape: f32[2,4,4,3], index: 4, kind: output, shape index: {0}]   ;;  %s619_s5 = inlined_call_operand.vmem [shape: f32[2,4,4,3], index: 5, kind: output, shape index: {1}]   ;;  %s620_s6 = inlined_call_operand.vmem [shape: f32[2,4,4,3], index: 6, kind: output, shape index: {2}]   ;;  %s621_s7 = inlined_call_operand.vmem [shape: f32[2,4,4,3], index: 7, kind: output, shape index: {3}]  }
   0x1   :  { %v21_v0 = vld [vmem:[%s614_s0] sm:$0xf]  ;;  %v22_v5 = vld [vmem:[%s614_s0 + $0x4] sm:$0xf]  ;;  %v289_v10 = vld [vmem:[%s614_s0 + $0x8] sm:$0xf] }
   0x2   :  { %v29_v1 = vld [vmem:[%s615_s1] sm:$0xf]  ;;  %v30_v6 = vld [vmem:[%s615_s1 + $0x4] sm:$0xf]  ;;  %v295_v12 = vld [vmem:[%s615_s1 + $0x8] sm:$0xf] }
   0x3   :  { %v263_v2 = vld [vmem:[%s616_s2] sm:$0xf]  ;;  %v53_v4 = vadd.f32 %v29_v1, %v21_v0  ;;  %v279_v7 = vld [vmem:[%s616_s2 + $0x4] sm:$0xf]  ;;  %v54_v9 = vadd.f32 %v30_v6, %v22_v5  ;;  %v300_v13 = vld [vmem:[%s616_s2 + $0x8] sm:$0xf]  ;;  %v55_v17 = vadd.f32 %v295_v12, %v289_v10  ;;  %v346_v28 = vsub.f32 %v21_v0, %v29_v1 }
   0x4   :  { %v268_v3 = vld [vmem:[%s617_s3] sm:$0xf]  ;;  %v284_v8 = vld [vmem:[%s617_s3 + $0x4] sm:$0xf]  ;;  %v305_v14 = vld [vmem:[%s617_s3 + $0x8] sm:$0xf]  ;;  %v407_v53 = vsub.f32 %v22_v5, %v30_v6 }
   0x5   :  { %v61_v11 = vadd.f32 %v53_v4, %v263_v2  ;;  %v94_v15 = vsub.f32 %v53_v4, %v263_v2  ;;  %v62_v16 = vadd.f32 %v54_v9, %v279_v7  ;;  %v314_v18 = vld [vmem:[%s614_s0 + $0xc] sm:$0xf]  ;;  %v95_v21 = vsub.f32 %v54_v9, %v279_v7  ;;  %v338_v25 = vld [vmem:[%s614_s0 + $0x10] sm:$0xf]  ;;  %v365_v34 = vld [vmem:[%s614_s0 + $0x14] sm:$0xf] }
   0x6   :  { %v319_v19 = vld [vmem:[%s615_s1 + $0xc] sm:$0xf]  ;;  %v343_v26 = vld [vmem:[%s615_s1 + $0x10] sm:$0xf]  ;;  %v63_v30 = vadd.f32 %v55_v17, %v300_v13  ;;  %v372_v38 = vld [vmem:[%s615_s1 + $0x14] sm:$0xf]  ;;  %v96_v41 = vsub.f32 %v55_v17, %v300_v13  ;;  %v134_v0 = vadd.f32 %v346_v28, %v263_v2 }
   0x7   :  { %v324_v20 = vld [vmem:[%s616_s2 + $0xc] sm:$0xf]  ;;  %v69_v22 = vadd.f32 %v61_v11, %v268_v3  ;;  %v56_v24 = vadd.f32 %v319_v19, %v314_v18  ;;  %v102_v27 = vsub.f32 %v94_v15, %v268_v3  ;;  %v70_v29 = vadd.f32 %v62_v16, %v284_v8  ;;  %v353_v31 = vld [vmem:[%s616_s2 + $0x10] sm:$0xf]  ;;  %v377_v39 = vld [vmem:[%s616_s2 + $0x14] sm:$0xf] }
   0x8   :  { %v331_v23 = vld [vmem:[%s617_s3 + $0xc] sm:$0xf]  ;;  %v358_v32 = vld [vmem:[%s617_s3 + $0x10] sm:$0xf]  ;;  %v57_v33 = vadd.f32 %v343_v26, %v338_v25  ;;  %v103_v35 = vsub.f32 %v95_v21, %v284_v8  ;;  %v71_v43 = vadd.f32 %v63_v30, %v305_v14  ;;  %v385_v45 = vld [vmem:[%s617_s3 + $0x14] sm:$0xf]  ;;  %v58_v46 = vadd.f32 %v372_v38, %v365_v34 }
   0x9   :  { %v77_v36 = vmul.f32 0.5, %v69_v22  ;;  %v64_v37 = vadd.f32 %v56_v24, %v324_v20  ;;  %v110_v40 = vmul.f32 0.5, %v102_v27  ;;  %v78_v42 = vmul.f32 0.5, %v70_v29  ;;  %v27_v47 = vld [vmem:[%s614_s0 + $0x18] sm:$0xf] }
   0xa   :  { %v65_v44 = vadd.f32 %v57_v33, %v353_v31  ;;  %v35_v49 = vld [vmem:[%s615_s1 + $0x18] sm:$0xf]  ;;  %v97_v51 = vsub.f32 %v56_v24, %v324_v20  ;;  %v98_v52 = vsub.f32 %v57_v33, %v353_v31  ;;  %v79_v54 = vmul.f32 0.5, %v71_v43  ;;  %v28_v60 = vld [vmem:[%s614_s0 + $0x1c] sm:$0xf] }
   0xb   :  { %86 = vst.msk [vmem:[%s618_s4] sm:$0xf] %vm85_vm0, %v77_v36  ;;  %v72_v48 = vadd.f32 %v64_v37, %v331_v23  ;;  %v403_v50 = vld [vmem:[%s616_s2 + $0x18] sm:$0xf]  ;;  %v66_v56 = vadd.f32 %v58_v46, %v377_v39  ;;  %v59_v58 = vadd.f32 %v35_v49, %v27_v47  ;;  %v36_v61 = vld [vmem:[%s615_s1 + $0x1c] sm:$0xf]  ;;  %v104_v63 = vsub.f32 %v96_v41, %v305_v14 }
   0xc   :  { %87 = vst.msk [vmem:[%s618_s4 + $0x4] sm:$0xf] %vm85_vm0, %v78_v42  ;;  %v73_v55 = vadd.f32 %v65_v44, %v358_v32  ;;  %v418_v57 = vld [vmem:[%s617_s3 + $0x18] sm:$0xf]  ;;  %v111_v62 = vmul.f32 0.5, %v103_v35  ;;  %v60_v9 = vadd.f32 %v36_v61, %v28_v60  ;;  %v105_v15 = vsub.f32 %v97_v51, %v331_v23 }
   0xd   :  { %v80_v59 = vmul.f32 0.5, %v72_v48  ;;  %88 = vst.msk [vmem:[%s618_s4 + $0x8] sm:$0xf] %vm85_vm0, %v79_v54  ;;  %v74_v4 = vadd.f32 %v66_v56, %v385_v45  ;;  %v67_v5 = vadd.f32 %v59_v58, %v403_v50  ;;  %v438_v6 = vld [vmem:[%s616_s2 + $0x1c] sm:$0xf]  ;;  %v106_v16 = vsub.f32 %v98_v52, %v358_v32 }
   0xe   :  { %v81_v1 = vmul.f32 0.5, %v73_v55  ;;  %v447_v11 = vld [vmem:[%s617_s3 + $0x1c] sm:$0xf]  ;;  %v99_v17 = vsub.f32 %v58_v46, %v377_v39  ;;  %v100_v21 = vsub.f32 %v59_v58, %v403_v50  ;;  %v68_v27 = vadd.f32 %v60_v9, %v438_v6  ;;  %118 = vst.msk [vmem:[%s619_s5] sm:$0xf] %vm85_vm0, %v110_v40 }
   0xf   :  { %89 = vst.msk [vmem:[%s618_s4 + $0xc] sm:$0xf] %vm85_vm0, %v80_v59  ;;  %v82_v22 = vmul.f32 0.5, %v74_v4  ;;  %v75_v24 = vadd.f32 %v67_v5, %v418_v57  ;;  %v135_v29 = vadd.f32 %v407_v53, %v279_v7  ;;  %v112_v30 = vmul.f32 0.5, %v104_v63 }
  0x10   :  { %90 = vst.msk [vmem:[%s618_s4 + $0x10] sm:$0xf] %vm85_vm0, %v81_v1  ;;  %v107_v33 = vsub.f32 %v99_v17, %v385_v45  ;;  %v101_v35 = vsub.f32 %v60_v9, %v438_v6  ;;  %v142_v36 = vsub.f32 %v134_v0, %v268_v3  ;;  %v76_v41 = vadd.f32 %v68_v27, %v447_v11 }
  0x11   :  { %91 = vst.msk [vmem:[%s618_s4 + $0x14] sm:$0xf] %vm85_vm0, %v82_v22  ;;  %v83_v37 = vmul.f32 0.5, %v75_v24  ;;  %v108_v42 = vsub.f32 %v100_v21, %v418_v57  ;;  %v128_v40 = vsub.f32 %v289_v10, %v295_v12  ;;  %v113_v43 = vmul.f32 0.5, %v105_v15 }
  0x12   :  { %119 = vst.msk [vmem:[%s619_s5 + $0x4] sm:$0xf] %vm85_vm0, %v111_v62  ;;  %v114_v44 = vmul.f32 0.5, %v106_v16  ;;  %v109_v46 = vsub.f32 %v101_v35, %v447_v11  ;;  %v129_v48 = vsub.f32 %v314_v18, %v319_v19  ;;  %v84_v51 = vmul.f32 0.5, %v76_v41 }
  0x13   :  { %92 = vst.msk [vmem:[%s618_s4 + $0x18] sm:$0xf] %vm85_vm0, %v83_v37  ;;  %v143_v10 = vsub.f32 %v135_v29, %v284_v8  ;;  %v136_v12 = vadd.f32 %v128_v40, %v300_v13  ;;  %v130_v52 = vsub.f32 %v338_v25, %v343_v26  ;;  %v115_v54 = vmul.f32 0.5, %v107_v33 }
  0x14   :  { %120 = vst.msk [vmem:[%s619_s5 + $0x8] sm:$0xf] %vm85_vm0, %v112_v30  ;;  %v137_v18 = vadd.f32 %v129_v48, %v324_v20  ;;  %v131_v19 = vsub.f32 %v365_v34, %v372_v38  ;;  %v132_v55 = vsub.f32 %v27_v47, %v35_v49  ;;  %v116_v56 = vmul.f32 0.5, %v108_v42 }
  0x15   :  { %93 = vst.msk [vmem:[%s618_s4 + $0x1c] sm:$0xf] %vm85_vm0, %v84_v51  ;;  %v144_v25 = vsub.f32 %v136_v12, %v305_v14  ;;  %v138_v26 = vadd.f32 %v130_v52, %v353_v31  ;;  %v133_v58 = vsub.f32 %v28_v60, %v36_v61  ;;  %v117_v59 = vmul.f32 0.5, %v109_v46 }
  0x16   :  { %121 = vst.msk [vmem:[%s619_s5 + $0xc] sm:$0xf] %vm85_vm0, %v113_v43  ;;  %v145_v34 = vsub.f32 %v137_v18, %v331_v23  ;;  %v139_v38 = vadd.f32 %v131_v19, %v377_v39  ;;  %v140_v47 = vadd.f32 %v132_v55, %v403_v50  ;;  %v150_v49 = vmul.f32 0.5, %v142_v36 }
  0x17   :  { %122 = vst.msk [vmem:[%s619_s5 + $0x10] sm:$0xf] %vm85_vm0, %v114_v44  ;;  %v146_v60 = vsub.f32 %v138_v26, %v358_v32  ;;  %v141_v61 = vadd.f32 %v133_v58, %v438_v6  ;;  %v166_v62 = vsub.f32 %v346_v28, %v263_v2  ;;  %v151_v63 = vmul.f32 0.5, %v143_v10 }
  0x18   :  { %123 = vst.msk [vmem:[%s619_s5 + $0x14] sm:$0xf] %vm85_vm0, %v115_v54  ;;  %v147_v0 = vsub.f32 %v139_v38, %v385_v45  ;;  %v167_v1 = vsub.f32 %v407_v53, %v279_v7  ;;  %v152_v4 = vmul.f32 0.5, %v144_v25  ;;  %v148_v5 = vsub.f32 %v140_v47, %v418_v57 }
  0x19   :  { %124 = vst.msk [vmem:[%s619_s5 + $0x18] sm:$0xf] %vm85_vm0, %v116_v56  ;;  %v168_v2 = vsub.f32 %v128_v40, %v300_v13  ;;  %v153_v28 = vmul.f32 0.5, %v145_v34  ;;  %v149_v9 = vsub.f32 %v141_v61, %v447_v11  ;;  %v169_v7 = vsub.f32 %v129_v48, %v324_v20 }
  0x1a   :  { %125 = vst.msk [vmem:[%s619_s5 + $0x1c] sm:$0xf] %vm85_vm0, %v117_v59  ;;  %v154_v53 = vmul.f32 0.5, %v146_v60  ;;  %v174_v15 = vadd.f32 %v166_v62, %v268_v3  ;;  %v170_v13 = vsub.f32 %v130_v52, %v353_v31  ;;  %v155_v16 = vmul.f32 0.5, %v147_v0 }
  0x1b   :  { %158 = vst.msk [vmem:[%s620_s6] sm:$0xf] %vm85_vm0, %v150_v49  ;;  %v175_v17 = vadd.f32 %v167_v1, %v284_v8  ;;  %v171_v20 = vsub.f32 %v131_v19, %v377_v39  ;;  %v156_v21 = vmul.f32 0.5, %v148_v5  ;;  %v176_v3 = vadd.f32 %v168_v2, %v305_v14 }
  0x1c   :  { %159 = vst.msk [vmem:[%s620_s6 + $0x4] sm:$0xf] %vm85_vm0, %v151_v63  ;;  %v172_v31 = vsub.f32 %v132_v55, %v403_v50  ;;  %v157_v22 = vmul.f32 0.5, %v149_v9  ;;  %v177_v8 = vadd.f32 %v169_v7, %v331_v23  ;;  %v173_v39 = vsub.f32 %v133_v58, %v438_v6 }
  0x1d   :  { %160 = vst.msk [vmem:[%s620_s6 + $0x8] sm:$0xf] %vm85_vm0, %v152_v4  ;;  %v182_v24 = vmul.f32 0.5, %v174_v15  ;;  %v178_v14 = vadd.f32 %v170_v13, %v358_v32  ;;  %v183_v50 = vmul.f32 0.5, %v175_v17  ;;  %v179_v27 = vadd.f32 %v171_v20, %v385_v45 }
  0x1e   :  { %161 = vst.msk [vmem:[%s620_s6 + $0xc] sm:$0xf] %vm85_vm0, %v153_v28  ;;  %v184_v23 = vmul.f32 0.5, %v176_v3  ;;  %v180_v6 = vadd.f32 %v172_v31, %v418_v57  ;;  %v185_v32 = vmul.f32 0.5, %v177_v8  ;;  %v181_v29 = vadd.f32 %v173_v39, %v447_v11 }
  0x1f   :  { %162 = vst.msk [vmem:[%s620_s6 + $0x10] sm:$0xf] %vm85_vm0, %v154_v53  ;;  %v186_v45 = vmul.f32 0.5, %v178_v14  ;;  %v187_v57 = vmul.f32 0.5, %v179_v27 }
  0x20   :  { %163 = vst.msk [vmem:[%s620_s6 + $0x14] sm:$0xf] %vm85_vm0, %v155_v16  ;;  %v188_v30 = vmul.f32 0.5, %v180_v6  ;;  %v189_v11 = vmul.f32 0.5, %v181_v29 }
  0x21   :  { %164 = vst.msk [vmem:[%s620_s6 + $0x18] sm:$0xf] %vm85_vm0, %v156_v21 }
  0x22   :  { %165 = vst.msk [vmem:[%s620_s6 + $0x1c] sm:$0xf] %vm85_vm0, %v157_v22 }
  0x23   :  { %190 = vst.msk [vmem:[%s621_s7] sm:$0xf] %vm85_vm0, %v182_v24 }
  0x24   :  { %191 = vst.msk [vmem:[%s621_s7 + $0x4] sm:$0xf] %vm85_vm0, %v183_v50 }
  0x25   :  { %192 = vst.msk [vmem:[%s621_s7 + $0x8] sm:$0xf] %vm85_vm0, %v184_v23 }
  0x26   :  { %193 = vst.msk [vmem:[%s621_s7 + $0xc] sm:$0xf] %vm85_vm0, %v185_v32 }
  0x27   :  { %194 = vst.msk [vmem:[%s621_s7 + $0x10] sm:$0xf] %vm85_vm0, %v186_v45 }
  0x28   :  { %195 = vst.msk [vmem:[%s621_s7 + $0x14] sm:$0xf] %vm85_vm0, %v187_v57 }
  0x29   :  { %196 = vst.msk [vmem:[%s621_s7 + $0x18] sm:$0xf] %vm85_vm0, %v188_v30 }
  0x2a   :  { %197 = vst.msk [vmem:[%s621_s7 + $0x1c] sm:$0xf] %vm85_vm0, %v189_v11 }

// kernel: _lambda_.20
= control target key start
LH: loop header
LB: loop body
LE: loop exit
PB: predicated region body
PF: predicated region fallthrough
CT: control target
= control target key end

     0   :  { %v422_v0 = vmov 0   ;;  %vm397_vm0 = vcmask 72704   ;;  %s892_s4 = inlined_call_operand.vmem [shape: f32[1,8,8,1], index: 4, kind: input, shape index: {}]   ;;  %s893_s5 = inlined_call_operand.vmem [shape: f32[1,8,8,1], index: 5, kind: input, shape index: {}]   ;;  %s894_s6 = inlined_call_operand.vmem [shape: f32[1,8,8,1], index: 6, kind: input, shape index: {}]   ;;  %s895_s7 = inlined_call_operand.vmem [shape: f32[1,8,8,1], index: 7, kind: input, shape index: {}]   ;;  %s896_s0 = inlined_call_operand.vmem [shape: f32[2,8,8,9], index: 0, kind: input, shape index: {}]   ;;  %s897_s1 = inlined_call_operand.vmem [shape: f32[2,8,8,9], index: 1, kind: input, shape index: {}]   ;;  %s898_s2 = inlined_call_operand.vmem [shape: f32[2,8,8,9], index: 2, kind: input, shape index: {}]   ;;  %s899_s3 = inlined_call_operand.vmem [shape: f32[2,8,8,9], index: 3, kind: input, shape index: {}]   ;;  %s900_s8 = inlined_call_operand.vmem [shape: f32[2,8,8,9], index: 8, kind: output, shape index: {}]  }
   0x1   :  { %421 = vset.pattern.permute.xlu2 %v422_v0  ;;  %420 = vset.pattern.permute.xlu1 %v422_v0  ;;  %v49_v1 = vld [vmem:[%s892_s4 + $0x20] sm:$0xff]  ;;  %v47_v2 = vld [vmem:[%s892_s4 + $0x10] sm:$0xff]  ;;  %v50_v4 = vld [vmem:[%s892_s4 + $0x28] sm:$0xff] }
   0x2   :  { %v45_v3 = vld [vmem:[%s892_s4] sm:$0xff]  ;;  %419 = vset.pattern.permute.xlu0 %v422_v0  ;;  %75 = vperm.xlu2 %421, %v49_v1   ;;  %v48_v5 = vld [vmem:[%s892_s4 + $0x18] sm:$0xff]  ;;  %v46_v6 = vld [vmem:[%s892_s4 + $0x8] sm:$0xff] }
   0x3   :  { %65 = vperm.xlu1 %420, %v47_v2   ;;  %55 = vperm.xlu0 %419, %v45_v3   ;;  %v125_v7 = vld [vmem:[%s893_s5] sm:$0xff]  ;;  %v52_v8 = vld [vmem:[%s892_s4 + $0x38] sm:$0xff]  ;;  %v51_v9 = vld [vmem:[%s892_s4 + $0x30] sm:$0xff] }
   0x4   :  { %v128_v10 = vld [vmem:[%s893_s5 + $0x18] sm:$0xff]  ;;  %v127_v11 = vld [vmem:[%s893_s5 + $0x10] sm:$0xff]  ;;  %v126_v12 = vld [vmem:[%s893_s5 + $0x8] sm:$0xff] }
   0x5   :  { %v131_v13 = vld [vmem:[%s893_s5 + $0x30] sm:$0xff]  ;;  %v130_v14 = vld [vmem:[%s893_s5 + $0x28] sm:$0xff]  ;;  %v129_v15 = vld [vmem:[%s893_s5 + $0x20] sm:$0xff] }
   0x6   :  { %v222_v16 = vld [vmem:[%s894_s6 + $0x8] sm:$0xff]  ;;  %v221_v17 = vld [vmem:[%s894_s6] sm:$0xff]  ;;  %v132_v18 = vld [vmem:[%s893_s5 + $0x38] sm:$0xff] }
   0x7   :  { %v225_v19 = vld [vmem:[%s894_s6 + $0x20] sm:$0xff]  ;;  %v224_v20 = vld [vmem:[%s894_s6 + $0x18] sm:$0xff]  ;;  %v223_v21 = vld [vmem:[%s894_s6 + $0x10] sm:$0xff] }
   0x8   :  { %v228_v22 = vld [vmem:[%s894_s6 + $0x38] sm:$0xff]  ;;  %v227_v23 = vld [vmem:[%s894_s6 + $0x30] sm:$0xff]  ;;  %v226_v24 = vld [vmem:[%s894_s6 + $0x28] sm:$0xff] }
   0x9   :  { %v319_v25 = vld [vmem:[%s895_s7 + $0x10] sm:$0xff]  ;;  %v318_v26 = vld [vmem:[%s895_s7 + $0x8] sm:$0xff]  ;;  %v317_v27 = vld [vmem:[%s895_s7] sm:$0xff] }
   0xa   :  { %80 = vperm.xlu2 %421, %v50_v4   ;;  %v322_v28 = vld [vmem:[%s895_s7 + $0x28] sm:$0xff]  ;;  %v321_v29 = vld [vmem:[%s895_s7 + $0x20] sm:$0xff]  ;;  %v320_v30 = vld [vmem:[%s895_s7 + $0x18] sm:$0xff] }
   0xb   :  { %70 = vperm.xlu1 %420, %v48_v5   ;;  %60 = vperm.xlu0 %419, %v46_v6   ;;  %v324_v31 = vld [vmem:[%s895_s7 + $0x38] sm:$0xff]  ;;  %v323_v32 = vld [vmem:[%s895_s7 + $0x30] sm:$0xff] }
   0xc   :  { %v111_v53 = vld [vmem:[%s897_s1 + $0x10] sm:$0xff] }
   0xd   :  { %v119_v54 = vld [vmem:[%s897_s1 + $0x50] sm:$0xff] }
   0xe   :  { %v31_v55 = vld [vmem:[%s896_s0 + $0x10] sm:$0xff] }
   0xf   :  { %v39_v56 = vld [vmem:[%s896_s0 + $0x50] sm:$0xff] }
  0x10   :  { %v207_v60 = vld [vmem:[%s898_s2 + $0x10] sm:$0xff] }
  0x11   :  { %v215_v61 = vld [vmem:[%s898_s2 + $0x50] sm:$0xff] }
  0x12   :  { %135 = vperm.xlu2 %421, %v125_v7   ;;  %v303_v0 = vld [vmem:[%s899_s3 + $0x10] sm:$0xff] }
  0x13   :  { %90 = vperm.xlu1 %420, %v52_v8   ;;  %85 = vperm.xlu0 %419, %v51_v9   ;;  %v311_v1 = vld [vmem:[%s899_s3 + $0x50] sm:$0xff]  ;;  %v114_v8 = vld [vmem:[%s897_s1 + $0x28] sm:$0xff] }
  0x14   :  { %v122_v9 = vld [vmem:[%s897_s1 + $0x68] sm:$0xff] }
  0x1a   :  { %150 = vperm.xlu2 %421, %v128_v10  }
  0x1b   :  { %145 = vperm.xlu1 %420, %v127_v11   ;;  %140 = vperm.xlu0 %419, %v126_v12  }
  0x22   :  { %165 = vperm.xlu2 %421, %v131_v13  }
  0x23   :  { %160 = vperm.xlu1 %420, %v130_v14   ;;  %155 = vperm.xlu0 %419, %v129_v15   ;;  %v34_v14 = vld [vmem:[%s896_s0 + $0x28] sm:$0xff] }
  0x24   :  { %v42_v15 = vld [vmem:[%s896_s0 + $0x68] sm:$0xff] }
  0x2a   :  { %236 = vperm.xlu2 %421, %v222_v16   ;;  %v109_v16 = vld [vmem:[%s897_s1] sm:$0xff] }
  0x2b   :  { %231 = vperm.xlu1 %420, %v221_v17   ;;  %170 = vperm.xlu0 %419, %v132_v18   ;;  %v117_v17 = vld [vmem:[%s897_s1 + $0x40] sm:$0xff]  ;;  %v110_v18 = vld [vmem:[%s897_s1 + $0x8] sm:$0xff] }
  0x32   :  { %251 = vperm.xlu2 %421, %v225_v19   ;;  %v118_v19 = vld [vmem:[%s897_s1 + $0x48] sm:$0xff] }
  0x33   :  { %246 = vperm.xlu1 %420, %v224_v20   ;;  %241 = vperm.xlu0 %419, %v223_v21  }
  0x3a   :  { %266 = vperm.xlu2 %421, %v228_v22  }
  0x3b   :  { %261 = vperm.xlu1 %420, %v227_v23   ;;  %256 = vperm.xlu0 %419, %v226_v24   ;;  %v29_v24 = vld [vmem:[%s896_s0] sm:$0xff] }
  0x42   :  { %337 = vperm.xlu2 %421, %v319_v25   ;;  %v210_v25 = vld [vmem:[%s898_s2 + $0x28] sm:$0xff] }
  0x43   :  { %332 = vperm.xlu1 %420, %v318_v26   ;;  %327 = vperm.xlu0 %419, %v317_v27   ;;  %v218_v26 = vld [vmem:[%s898_s2 + $0x68] sm:$0xff] }
  0x4a   :  { %352 = vperm.xlu2 %421, %v322_v28  }
  0x4b   :  { %347 = vperm.xlu1 %420, %v321_v29   ;;  %342 = vperm.xlu0 %419, %v320_v30   ;;  %v37_v29 = vld [vmem:[%s896_s0 + $0x40] sm:$0xff]  ;;  %v30_v30 = vld [vmem:[%s896_s0 + $0x8] sm:$0xff] }
  0x53   :  { %362 = vperm.xlu1 %420, %v324_v31   ;;  %357 = vperm.xlu0 %419, %v323_v32   ;;  %v38_v31 = vld [vmem:[%s896_s0 + $0x48] sm:$0xff] }
  0x5c   :  { %v564_v33 = vpop.permute.xlu2 %75 }
  0x64   :  { %v566_v34 = vpop.permute.xlu2 %80 }
  0x65   :  { %v98_v27 = vmul.f32 %v566_v34, %v34_v14  ;;  %v106_v28 = vmul.f32 %v566_v34, %v42_v15  ;;  %v121_v14 = vld [vmem:[%s897_s1 + $0x60] sm:$0xff] }
  0x6c   :  { %v568_v35 = vpop.permute.xlu2 %135 }
  0x6d   :  { %v173_v34 = vmul.f32 %v568_v35, %v109_v16 }
  0x74   :  { %v570_v36 = vpop.permute.xlu2 %150 }
  0x75   :  { %v66_v37 = vpop.permute.xlu1 %65  ;;  %v572_v38 = vpop.permute.xlu0 %55 }
  0x76   :  { %v95_v62 = vmul.f32 %v66_v37, %v31_v55  ;;  %v103_v63 = vmul.f32 %v66_v37, %v39_v56  ;;  %v181_v37 = vmul.f32 %v568_v35, %v117_v17  ;;  %v302_v17 = vld [vmem:[%s899_s3 + $0x8] sm:$0xff] }
  0x7c   :  { %v574_v39 = vpop.permute.xlu2 %165 }
  0x7d   :  { %v576_v40 = vpop.permute.xlu1 %70  ;;  %v578_v41 = vpop.permute.xlu0 %60 }
  0x84   :  { %v580_v42 = vpop.permute.xlu2 %236 }
  0x85   :  { %v582_v43 = vpop.permute.xlu1 %90  ;;  %v584_v44 = vpop.permute.xlu0 %85 }
  0x8c   :  { %v586_v47 = vpop.permute.xlu2 %251 }
  0x8d   :  { %v146_v45 = vpop.permute.xlu1 %145  ;;  %v141_v46 = vpop.permute.xlu0 %140 }
  0x8e   :  { %v175_v57 = vmul.f32 %v146_v45, %v111_v53  ;;  %v183_v58 = vmul.f32 %v146_v45, %v119_v54  ;;  %v174_v45 = vmul.f32 %v141_v46, %v110_v18  ;;  %v306_v53 = vld [vmem:[%s899_s3 + $0x28] sm:$0xff] }
  0x8f   :  { %v314_v54 = vld [vmem:[%s899_s3 + $0x68] sm:$0xff] }
  0x90   :  { %v191_v4 = vadd.f32 %v175_v57, %v95_v62  ;;  %v199_v5 = vadd.f32 %v183_v58, %v103_v63  ;;  %v101_v62 = vmul.f32 %v572_v38, %v37_v29  ;;  %v94_v63 = vmul.f32 %v578_v41, %v30_v30 }
  0x94   :  { %v590_v50 = vpop.permute.xlu2 %266 }
  0x95   :  { %v161_v48 = vpop.permute.xlu1 %160  ;;  %v588_v49 = vpop.permute.xlu0 %155 }
  0x96   :  { %v178_v20 = vmul.f32 %v161_v48, %v114_v8  ;;  %v186_v21 = vmul.f32 %v161_v48, %v122_v9  ;;  %v182_v48 = vmul.f32 %v141_v46, %v118_v19  ;;  %v205_v46 = vld [vmem:[%s898_s2] sm:$0xff]  ;;  %v112_v8 = vld [vmem:[%s897_s1 + $0x18] sm:$0xff]  ;;  %v190_v9 = vadd.f32 %v174_v45, %v94_v63 }
  0x97   :  { %v208_v45 = vld [vmem:[%s898_s2 + $0x18] sm:$0xff] }
  0x98   :  { %v194_v57 = vadd.f32 %v178_v20, %v98_v27  ;;  %v202_v35 = vadd.f32 %v186_v21, %v106_v28  ;;  %v32_v27 = vld [vmem:[%s896_s0 + $0x18] sm:$0xff] }
  0x99   :  { %v40_v28 = vld [vmem:[%s896_s0 + $0x58] sm:$0xff] }
  0x9c   :  { %v338_v59 = vpop.permute.xlu2 %337 }
  0x9d   :  { %v592_v51 = vpop.permute.xlu1 %231  ;;  %v594_v52 = vpop.permute.xlu0 %170  ;;  %v367_v10 = vmul.f32 %v338_v59, %v303_v0  ;;  %v375_v11 = vmul.f32 %v338_v59, %v311_v1  ;;  %v102_v0 = vmul.f32 %v578_v41, %v38_v31  ;;  %v206_v1 = vld [vmem:[%s898_s2 + $0x8] sm:$0xff]  ;;  %v41_v41 = vld [vmem:[%s896_s0 + $0x60] sm:$0xff] }
  0x9e   :  { %v270_v19 = vmul.f32 %v580_v42, %v206_v1 }
  0xa4   :  { %v353_v32 = vpop.permute.xlu2 %352 }
  0xa5   :  { %v620_v2 = vpop.permute.xlu1 %246  ;;  %v242_v3 = vpop.permute.xlu0 %241 }
  0xa6   :  { %v271_v6 = vmul.f32 %v242_v3, %v207_v60  ;;  %v279_v7 = vmul.f32 %v242_v3, %v215_v61  ;;  %v33_v60 = vld [vmem:[%s896_s0 + $0x20] sm:$0xff]  ;;  %v93_v61 = vmul.f32 %v572_v38, %v29_v24  ;;  %v214_v3 = vld [vmem:[%s898_s2 + $0x48] sm:$0xff]  ;;  %v272_v1 = vmul.f32 %v620_v2, %v208_v45 }
  0xa7   :  { %v278_v20 = vmul.f32 %v580_v42, %v214_v3  ;;  %v309_v24 = vld [vmem:[%s899_s3 + $0x40] sm:$0xff]  ;;  %v120_v42 = vld [vmem:[%s897_s1 + $0x58] sm:$0xff] }
  0xa8   :  { %v287_v12 = vadd.f32 %v271_v6, %v191_v4  ;;  %v295_v13 = vadd.f32 %v279_v7, %v199_v5  ;;  %v213_v4 = vld [vmem:[%s898_s2 + $0x40] sm:$0xff]  ;;  %v370_v5 = vmul.f32 %v353_v32, %v306_v53  ;;  %v378_v6 = vmul.f32 %v353_v32, %v314_v54 }
  0xa9   :  { %v189_v18 = vadd.f32 %v173_v34, %v93_v61  ;;  %v277_v21 = vmul.f32 %v592_v51, %v213_v4  ;;  %v286_v32 = vadd.f32 %v270_v19, %v190_v9  ;;  %v216_v61 = vld [vmem:[%s898_s2 + $0x58] sm:$0xff]  ;;  %v313_v9 = vld [vmem:[%s899_s3 + $0x60] sm:$0xff] }
  0xaa   :  { %v383_v22 = vadd.f32 %v367_v10, %v287_v12  ;;  %v391_v23 = vadd.f32 %v375_v11, %v295_v13  ;;  %v198_v10 = vadd.f32 %v182_v48, %v102_v0  ;;  %v113_v11 = vld [vmem:[%s897_s1 + $0x20] sm:$0xff]  ;;  %v269_v12 = vmul.f32 %v592_v51, %v205_v46 }
  0xab   :  { %v97_v13 = vmul.f32 %v564_v33, %v33_v60  ;;  %v176_v51 = vmul.f32 %v570_v36, %v112_v8  ;;  %v177_v29 = vmul.f32 %v588_v49, %v113_v11  ;;  %v209_v46 = vld [vmem:[%s898_s2 + $0x20] sm:$0xff]  ;;  %v280_v8 = vmul.f32 %v620_v2, %v216_v61  ;;  %v312_v11 = vld [vmem:[%s899_s3 + $0x58] sm:$0xff] }
  0xac   :  { %400 = vst.msk [vmem:[%s900_s8 + $0x10] sm:$0xff] %vm397_vm0, %v383_v22  ;;  %v310_v22 = vld [vmem:[%s899_s3 + $0x48] sm:$0xff]  ;;  %v285_v30 = vadd.f32 %v269_v12, %v189_v18  ;;  %v294_v34 = vadd.f32 %v278_v20, %v198_v10  ;;  %v273_v4 = vmul.f32 %v586_v47, %v209_v46  ;;  %v304_v10 = vld [vmem:[%s899_s3 + $0x18] sm:$0xff] }
  0xad   :  { %408 = vst.msk [vmem:[%s900_s8 + $0x50] sm:$0xff] %vm397_vm0, %v391_v23  ;;  %v682_v55 = vpop.permute.xlu1 %261  ;;  %v257_v56 = vpop.permute.xlu0 %256  ;;  %v301_v23 = vld [vmem:[%s899_s3] sm:$0xff]  ;;  %v193_v60 = vadd.f32 %v177_v29, %v97_v13  ;;  %v36_v12 = vld [vmem:[%s896_s0 + $0x38] sm:$0xff] }
  0xae   :  { %v274_v58 = vmul.f32 %v257_v56, %v210_v25  ;;  %v282_v59 = vmul.f32 %v257_v56, %v218_v26  ;;  %v105_v25 = vmul.f32 %v564_v33, %v41_v41  ;;  %v197_v26 = vadd.f32 %v181_v37, %v101_v62  ;;  %v44_v13 = vld [vmem:[%s896_s0 + $0x78] sm:$0xff] }
  0xaf   :  { %v185_v33 = vmul.f32 %v588_v49, %v121_v14  ;;  %v184_v49 = vmul.f32 %v570_v36, %v120_v42  ;;  %v35_v14 = vld [vmem:[%s896_s0 + $0x30] sm:$0xff] }
  0xb0   :  { %v290_v7 = vadd.f32 %v274_v58, %v194_v57  ;;  %v298_v38 = vadd.f32 %v282_v59, %v202_v35  ;;  %v96_v57 = vmul.f32 %v576_v40, %v32_v27  ;;  %v104_v35 = vmul.f32 %v576_v40, %v40_v28  ;;  %v217_v59 = vld [vmem:[%s898_s2 + $0x60] sm:$0xff]  ;;  %v115_v40 = vld [vmem:[%s897_s1 + $0x30] sm:$0xff] }
  0xb1   :  { %v293_v58 = vadd.f32 %v277_v21, %v197_v26  ;;  %v201_v0 = vadd.f32 %v185_v33, %v105_v25  ;;  %v281_v41 = vmul.f32 %v586_v47, %v217_v59  ;;  %v179_v47 = vmul.f32 %v574_v39, %v115_v40  ;;  %v315_v59 = vld [vmem:[%s899_s3 + $0x70] sm:$0xff] }
  0xb2   :  { %v386_v15 = vadd.f32 %v370_v5, %v290_v7  ;;  %v394_v16 = vadd.f32 %v378_v6, %v298_v38  ;;  %v116_v5 = vld [vmem:[%s897_s1 + $0x38] sm:$0xff]  ;;  %v305_v7 = vld [vmem:[%s899_s3 + $0x20] sm:$0xff]  ;;  %v192_v38 = vadd.f32 %v176_v51, %v96_v57  ;;  %v200_v2 = vadd.f32 %v184_v49, %v104_v35 }
  0xb3   :  { %v124_v6 = vld [vmem:[%s897_s1 + $0x78] sm:$0xff]  ;;  %v297_v21 = vadd.f32 %v281_v41, %v201_v0  ;;  %v100_v26 = vmul.f32 %v582_v43, %v36_v12  ;;  %v108_v27 = vmul.f32 %v582_v43, %v44_v13  ;;  %v99_v28 = vmul.f32 %v584_v44, %v35_v14 }
  0xb4   :  { %403 = vst.msk [vmem:[%s900_s8 + $0x28] sm:$0xff] %vm397_vm0, %v386_v15  ;;  %v289_v15 = vadd.f32 %v273_v4, %v193_v60  ;;  %v188_v18 = vmul.f32 %v594_v52, %v124_v6  ;;  %v288_v19 = vadd.f32 %v272_v1, %v192_v38  ;;  %v296_v29 = vadd.f32 %v280_v8, %v200_v2 }
  0xb5   :  { %411 = vst.msk [vmem:[%s900_s8 + $0x68] sm:$0xff] %vm397_vm0, %v394_v16  ;;  %v333_v31 = vpop.permute.xlu1 %332  ;;  %v328_v37 = vpop.permute.xlu0 %327  ;;  %v43_v16 = vld [vmem:[%s896_s0 + $0x70] sm:$0xff]  ;;  %v195_v49 = vadd.f32 %v179_v47, %v99_v28 }
  0xb6   :  { %v366_v48 = vmul.f32 %v333_v31, %v302_v17  ;;  %v374_v53 = vmul.f32 %v333_v31, %v310_v22  ;;  %v365_v54 = vmul.f32 %v328_v37, %v301_v23  ;;  %v373_v56 = vmul.f32 %v328_v37, %v309_v24  ;;  %v211_v23 = vld [vmem:[%s898_s2 + $0x30] sm:$0xff]  ;;  %v220_v31 = vld [vmem:[%s898_s2 + $0x78] sm:$0xff] }
  0xb7   :  { %v180_v17 = vmul.f32 %v594_v52, %v116_v5  ;;  %v123_v52 = vld [vmem:[%s897_s1 + $0x70] sm:$0xff]  ;;  %v107_v33 = vmul.f32 %v584_v44, %v43_v16  ;;  %v284_v35 = vmul.f32 %v590_v50, %v220_v31 }
  0xb8   :  { %v382_v62 = vadd.f32 %v366_v48, %v286_v32  ;;  %v390_v36 = vadd.f32 %v374_v53, %v294_v34  ;;  %v381_v63 = vadd.f32 %v365_v54, %v285_v30  ;;  %v389_v3 = vadd.f32 %v373_v56, %v293_v58  ;;  %v212_v30 = vld [vmem:[%s898_s2 + $0x38] sm:$0xff]  ;;  %v219_v32 = vld [vmem:[%s898_s2 + $0x70] sm:$0xff] }
  0xb9   :  { %v196_v45 = vadd.f32 %v180_v17, %v100_v26  ;;  %v204_v48 = vadd.f32 %v188_v18, %v108_v27  ;;  %v275_v53 = vmul.f32 %v682_v55, %v211_v23  ;;  %v187_v54 = vmul.f32 %v574_v39, %v123_v52  ;;  %v308_v56 = vld [vmem:[%s899_s3 + $0x38] sm:$0xff]  ;;  %v307_v58 = vld [vmem:[%s899_s3 + $0x30] sm:$0xff] }
  0xba   :  { %399 = vst.msk [vmem:[%s900_s8 + $0x8] sm:$0xff] %vm397_vm0, %v382_v62  ;;  %v276_v57 = vmul.f32 %v590_v50, %v212_v30  ;;  %v283_v46 = vmul.f32 %v682_v55, %v219_v32  ;;  %v316_v39 = vld [vmem:[%s899_s3 + $0x78] sm:$0xff] }
  0xbb   :  { %407 = vst.msk [vmem:[%s900_s8 + $0x48] sm:$0xff] %vm397_vm0, %v390_v36  ;;  %v203_v50 = vadd.f32 %v187_v54, %v107_v33  ;;  %v291_v55 = vadd.f32 %v275_v53, %v195_v49  ;;  %v300_v62 = vadd.f32 %v284_v35, %v204_v48 }
  0xbc   :  { %398 = vst.msk [vmem:[%s900_s8] sm:$0xff] %vm397_vm0, %v381_v63  ;;  %v292_v61 = vadd.f32 %v276_v57, %v196_v45 }
  0xbd   :  { %406 = vst.msk [vmem:[%s900_s8 + $0x40] sm:$0xff] %vm397_vm0, %v389_v3  ;;  %v348_v20 = vpop.permute.xlu1 %347  ;;  %v343_v22 = vpop.permute.xlu0 %342  ;;  %v299_v3 = vadd.f32 %v283_v46, %v203_v50 }
  0xbe   :  { %v369_v24 = vmul.f32 %v348_v20, %v305_v7  ;;  %v377_v25 = vmul.f32 %v348_v20, %v313_v9  ;;  %v368_v42 = vmul.f32 %v343_v22, %v304_v10  ;;  %v376_v51 = vmul.f32 %v343_v22, %v312_v11 }
  0xc0   :  { %v385_v34 = vadd.f32 %v369_v24, %v289_v15  ;;  %v393_v37 = vadd.f32 %v377_v25, %v297_v21  ;;  %v384_v43 = vadd.f32 %v368_v42, %v288_v19  ;;  %v392_v44 = vadd.f32 %v376_v51, %v296_v29 }
  0xc2   :  { %402 = vst.msk [vmem:[%s900_s8 + $0x20] sm:$0xff] %vm397_vm0, %v385_v34 }
  0xc3   :  { %410 = vst.msk [vmem:[%s900_s8 + $0x60] sm:$0xff] %vm397_vm0, %v393_v37 }
  0xc4   :  { %401 = vst.msk [vmem:[%s900_s8 + $0x18] sm:$0xff] %vm397_vm0, %v384_v43 }
  0xc5   :  { %409 = vst.msk [vmem:[%s900_s8 + $0x58] sm:$0xff] %vm397_vm0, %v392_v44  ;;  %v363_v60 = vpop.permute.xlu1 %362  ;;  %v358_v36 = vpop.permute.xlu0 %357 }
  0xc6   :  { %v372_v63 = vmul.f32 %v363_v60, %v308_v56  ;;  %v380_v40 = vmul.f32 %v363_v60, %v316_v39  ;;  %v371_v0 = vmul.f32 %v358_v36, %v307_v58  ;;  %v379_v1 = vmul.f32 %v358_v36, %v315_v59 }
  0xc8   :  { %v388_v4 = vadd.f32 %v372_v63, %v292_v61  ;;  %v396_v5 = vadd.f32 %v380_v40, %v300_v62  ;;  %v387_v6 = vadd.f32 %v371_v0, %v291_v55  ;;  %v395_v7 = vadd.f32 %v379_v1, %v299_v3 }
  0xca   :  { %405 = vst.msk [vmem:[%s900_s8 + $0x38] sm:$0xff] %vm397_vm0, %v388_v4 }
  0xcb   :  { %413 = vst.msk [vmem:[%s900_s8 + $0x78] sm:$0xff] %vm397_vm0, %v396_v5 }
  0xcc   :  { %404 = vst.msk [vmem:[%s900_s8 + $0x30] sm:$0xff] %vm397_vm0, %v387_v6 }
  0xcd   :  { %412 = vst.msk [vmem:[%s900_s8 + $0x70] sm:$0xff] %vm397_vm0, %v395_v7 }

// kernel: _lambda_.23
= control target key start
LH: loop header
LB: loop body
LE: loop exit
PB: predicated region body
PF: predicated region fallthrough
CT: control target
= control target key end

     0   :  { %vm54_vm0 = vcmask 17408   ;;  %s328_s0 = inlined_call_operand.vmem [shape: f32[2,2,2,3], index: 0, kind: input, shape index: {}]   ;;  %s329_s1 = inlined_call_operand.vmem [shape: f32[2,2,2,3], index: 1, kind: input, shape index: {}]   ;;  %s330_s2 = inlined_call_operand.vmem [shape: f32[2,2,2,3], index: 2, kind: input, shape index: {}]   ;;  %s331_s3 = inlined_call_operand.vmem [shape: f32[2,2,2,3], index: 3, kind: input, shape index: {}]   ;;  %s332_s4 = inlined_call_operand.hbm [shape: f32[2,2,2,3], index: 4, kind: output, shape index: {0}]   ;;  %s333_s5 = inlined_call_operand.vmem [shape: f32[2,2,2,3], index: 5, kind: output, shape index: {1}]   ;;  %s334_s6 = inlined_call_operand.vmem [shape: f32[2,2,2,3], index: 6, kind: output, shape index: {2}]   ;;  %s335_s7 = inlined_call_operand.vmem [shape: f32[2,2,2,3], index: 7, kind: output, shape index: {3}]  }
   0x1   :  { %v22_v0 = vld [vmem:[%s328_s0] sm:$0x3]  ;;  %v23_v5 = vld [vmem:[%s328_s0 + $0x2] sm:$0x3]  ;;  %v24_v11 = vld [vmem:[%s328_s0 + $0x4] sm:$0x3] }
   0x2   :  { %v26_v1 = vld [vmem:[%s329_s1] sm:$0x3]  ;;  %v27_v7 = vld [vmem:[%s329_s1 + $0x2] sm:$0x3]  ;;  %v28_v12 = vld [vmem:[%s329_s1 + $0x4] sm:$0x3] }
   0x3   :  { %v222_v2 = vld [vmem:[%s330_s2] sm:$0x3]  ;;  %v38_v4 = vadd.f32 %v26_v1, %v22_v0  ;;  %v75_v6 = vsub.f32 %v22_v0, %v26_v1  ;;  %v31_v8 = vld [vmem:[%s330_s2 + $0x2] sm:$0x3]  ;;  %v39_v10 = vadd.f32 %v27_v7, %v23_v5  ;;  %v32_v13 = vld [vmem:[%s330_s2 + $0x4] sm:$0x3]  ;;  %v40_v17 = vadd.f32 %v28_v12, %v24_v11 }
   0x4   :  { %v227_v3 = vld [vmem:[%s331_s3] sm:$0x3]  ;;  %v35_v16 = vld [vmem:[%s331_s3 + $0x2] sm:$0x3]  ;;  %v25_v18 = vld [vmem:[%s328_s0 + $0x6] sm:$0x3]  ;;  %v76_v20 = vsub.f32 %v23_v5, %v27_v7  ;;  %v77_v21 = vsub.f32 %v24_v11, %v28_v12 }
   0x5   :  { %v42_v9 = vadd.f32 %v38_v4, %v222_v2  ;;  %v59_v14 = vsub.f32 %v38_v4, %v222_v2  ;;  %v79_v15 = vadd.f32 %v75_v6, %v222_v2  ;;  %v29_v19 = vld [vmem:[%s329_s1 + $0x6] sm:$0x3]  ;;  %v43_v23 = vadd.f32 %v39_v10, %v31_v8  ;;  %v36_v24 = vld [vmem:[%s331_s3 + $0x4] sm:$0x3] }
   0x6   :  { %v33_v25 = vld [vmem:[%s330_s2 + $0x6] sm:$0x3]  ;;  %v41_v26 = vadd.f32 %v29_v19, %v25_v18 }
   0x7   :  { %v46_v22 = vadd.f32 %v42_v9, %v227_v3  ;;  %v63_v27 = vsub.f32 %v59_v14, %v227_v3 }
   0x8   :  { %13 = vsyncpa [#allocation3], 0  ;;  %v44_v28 = vadd.f32 %v40_v17, %v32_v13  ;;  %v37_v29 = vld [vmem:[%s331_s3 + $0x6] sm:$0x3]  ;;  %v60_v30 = vsub.f32 %v39_v10, %v31_v8  ;;  %v61_v31 = vsub.f32 %v40_v17, %v32_v13  ;;  %v83_v32 = vsub.f32 %v79_v15, %v227_v3  ;;  %s170_s18 = smov [#allocation2]   ;;  %s171_s1 = smov 32  }
   0x9   :  { %v50_v33 = vmul.f32 0.5, %v46_v22  ;;  %v47_v34 = vadd.f32 %v43_v23, %v35_v16  ;;  %v45_v35 = vadd.f32 %v41_v26, %v33_v25  ;;  %v67_v36 = vmul.f32 0.5, %v63_v27  ;;  %s115_s19 = sshll.u32 %s170_s18, 4  ;;  %s172_s2 = smov 2   ;;  %s116_s19 = int_to_ptr.vmem [resolvable:$true] %s115_s19 }
   0xa   :  { %v48_v37 = vadd.f32 %v44_v28, %v36_v24  ;;  %v64_v38 = vsub.f32 %v60_v30, %v35_v16  ;;  %v65_v39 = vsub.f32 %v61_v31, %v36_v24  ;;  %v62_v40 = vsub.f32 %v41_v26, %v33_v25 }
   0xb   :  { %55 = vst.msk [vmem:[#allocation2] sm:$0x3] %vm54_vm0, %v50_v33  ;;  %v51_v41 = vmul.f32 0.5, %v47_v34  ;;  %v49_v42 = vadd.f32 %v45_v35, %v37_v29  ;;  %v80_v43 = vadd.f32 %v76_v20, %v31_v8  ;;  %v95_v44 = vsub.f32 %v75_v6, %v222_v2 }
   0xc   :  { %v52_v45 = vmul.f32 0.5, %v48_v37  ;;  %71 = vst.msk [vmem:[%s333_s5] sm:$0x3] %vm54_vm0, %v67_v36  ;;  %v68_v46 = vmul.f32 0.5, %v64_v38  ;;  %v69_v47 = vmul.f32 0.5, %v65_v39  ;;  %v66_v48 = vsub.f32 %v62_v40, %v37_v29 }
   0xd   :  { %56 = vst.msk [vmem:[#allocation2 + $0x2] sm:$0x3] %vm54_vm0, %v51_v41  ;;  %v53_v49 = vmul.f32 0.5, %v49_v42  ;;  %v84_v50 = vsub.f32 %v80_v43, %v35_v16  ;;  %v81_v51 = vadd.f32 %v77_v21, %v32_v13  ;;  %v78_v52 = vsub.f32 %v25_v18, %v29_v19 }
   0xe   :  { %57 = vst.msk [vmem:[#allocation2 + $0x4] sm:$0x3] %vm54_vm0, %v52_v45  ;;  %v70_v53 = vmul.f32 0.5, %v66_v48  ;;  %v87_v54 = vmul.f32 0.5, %v83_v32  ;;  %v96_v55 = vsub.f32 %v76_v20, %v31_v8  ;;  %v97_v56 = vsub.f32 %v77_v21, %v32_v13 }
   0xf   :  { %58 = vst.msk [vmem:[#allocation2 + $0x6] sm:$0x3] %vm54_vm0, %v53_v49  ;;  %v85_v57 = vsub.f32 %v81_v51, %v36_v24  ;;  %v82_v58 = vadd.f32 %v78_v52, %v33_v25  ;;  %v99_v59 = vadd.f32 %v95_v44, %v227_v3  ;;  %v98_v60 = vsub.f32 %v78_v52, %v33_v25 }
  0x10   :  { %72 = vst.msk [vmem:[%s333_s5 + $0x2] sm:$0x3] %vm54_vm0, %v68_v46  ;;  %v88_v61 = vmul.f32 0.5, %v84_v50  ;;  %v100_v62 = vadd.f32 %v96_v55, %v35_v16  ;;  %v101_v1 = vadd.f32 %v97_v56, %v36_v24 }
  0x11   :  { %73 = vst.msk [vmem:[%s333_s5 + $0x4] sm:$0x3] %vm54_vm0, %v69_v47  ;;  %v89_v63 = vmul.f32 0.5, %v85_v57  ;;  %v86_v0 = vsub.f32 %v82_v58, %v37_v29  ;;  %v102_v2 = vadd.f32 %v98_v60, %v37_v29  ;;  %v103_v4 = vmul.f32 0.5, %v99_v59 }
  0x12   :  { %74 = vst.msk [vmem:[%s333_s5 + $0x6] sm:$0x3] %vm54_vm0, %v70_v53  ;;  %v104_v5 = vmul.f32 0.5, %v100_v62  ;;  %s117_s5 = sshll.u32 %s332_s4, 4  ;;  %v105_v6 = vmul.f32 0.5, %v101_v1  ;;  %s118_s5 = int_to_ptr.hbm [resolvable:$true] %s117_s5 }
  0x13   :  { %91 = vst.msk [vmem:[%s334_s6] sm:$0x3] %vm54_vm0, %v87_v54  ;;  %v90_v3 = vmul.f32 0.5, %v86_v0  ;;  %v106_v7 = vmul.f32 0.5, %v102_v2 }
  0x14   :  { %92 = vst.msk [vmem:[%s334_s6 + $0x2] sm:$0x3] %vm54_vm0, %v88_v61 }
  0x15   :  { %93 = vst.msk [vmem:[%s334_s6 + $0x4] sm:$0x3] %vm54_vm0, %v89_v63 }
  0x16   :  { %94 = vst.msk [vmem:[%s334_s6 + $0x6] sm:$0x3] %vm54_vm0, %v90_v3 }
  0x17   :  { %107 = vst.msk [vmem:[%s335_s7] sm:$0x3] %vm54_vm0, %v103_v4 }
  0x18   :  { %108 = vst.msk [vmem:[%s335_s7 + $0x2] sm:$0x3] %vm54_vm0, %v104_v5 }
  0x19   :  { %109 = vst.msk [vmem:[%s335_s7 + $0x4] sm:$0x3] %vm54_vm0, %v105_v6 }
  0x1a   :  { %110 = vst.msk [vmem:[%s335_s7 + $0x6] sm:$0x3] %vm54_vm0, %v106_v7 }
  0x1b   :  { %123 = dma.vmem_to_hbm [thread:$0]  %s116_s19, 128, %s118_s5, [#allocation3], %s171_s1, %s171_s1, %s172_s2  }
  0x1c   :  { %168 = dma.done.wait [#allocation3], 128  }
  0x1d   :  { %169 = vsyncadd [#allocation3], 4294967168 }
  0x1e   :  { %140 = vsyncpa [#allocation3], 1 }

// kernel: _lambda_.29
= control target key start
LH: loop header
LB: loop body
LE: loop exit
PB: predicated region body
PF: predicated region fallthrough
CT: control target
= control target key end

     0   :  { %s138_s0 = inlined_call_operand.vmem [shape: f32[2,2,2,128], index: 0, kind: input, shape index: {}]   ;;  %s139_s1 = inlined_call_operand.vmem [shape: f32[2,2,2,128], index: 1, kind: input, shape index: {}]   ;;  %s140_s2 = inlined_call_operand.vmem [shape: f32[2,2,2,128], index: 2, kind: input, shape index: {}]   ;;  %s141_s3 = inlined_call_operand.vmem [shape: f32[2,2,2,128], index: 3, kind: input, shape index: {}]   ;;  %s142_s4 = inlined_call_operand.vmem [shape: f32[2,2,2,128], index: 4, kind: output, shape index: {}]  }
   0x1   :  { %v17_v0 = vld [vmem:[%s138_s0] sm:$0x3]  ;;  %v18_v5 = vld [vmem:[%s138_s0 + $0x2] sm:$0x3]  ;;  %v19_v11 = vld [vmem:[%s138_s0 + $0x4] sm:$0x3] }
   0x2   :  { %v21_v1 = vld [vmem:[%s139_s1] sm:$0x3]  ;;  %v22_v6 = vld [vmem:[%s139_s1 + $0x2] sm:$0x3]  ;;  %v23_v13 = vld [vmem:[%s139_s1 + $0x4] sm:$0x3] }
   0x3   :  { %v29_v2 = vld [vmem:[%s140_s2] sm:$0x3]  ;;  %v25_v3 = vmax.f32 %v17_v0, %v21_v1  ;;  %v26_v8 = vmax.f32 %v18_v5, %v22_v6  ;;  %v30_v9 = vld [vmem:[%s140_s2 + $0x2] sm:$0x3]  ;;  %v31_v14 = vld [vmem:[%s140_s2 + $0x4] sm:$0x3]  ;;  %v27_v17 = vmax.f32 %v19_v11, %v23_v13 }
   0x4   :  { %v33_v4 = vld [vmem:[%s141_s3] sm:$0x3]  ;;  %v34_v10 = vld [vmem:[%s141_s3 + $0x2] sm:$0x3]  ;;  %v35_v15 = vld [vmem:[%s141_s3 + $0x4] sm:$0x3] }
   0x5   :  { %v37_v7 = vmax.f32 %v29_v2, %v33_v4  ;;  %v38_v12 = vmax.f32 %v30_v9, %v34_v10  ;;  %v39_v18 = vmax.f32 %v31_v14, %v35_v15  ;;  %v20_v19 = vld [vmem:[%s138_s0 + $0x6] sm:$0x3] }
   0x6   :  { %v24_v20 = vld [vmem:[%s139_s1 + $0x6] sm:$0x3] }
   0x7   :  { %v41_v16 = vmax.f32 %v25_v3, %v37_v7  ;;  %v32_v21 = vld [vmem:[%s140_s2 + $0x6] sm:$0x3]  ;;  %v42_v22 = vmax.f32 %v26_v8, %v38_v12  ;;  %v28_v23 = vmax.f32 %v20_v19, %v24_v20  ;;  %v43_v25 = vmax.f32 %v27_v17, %v39_v18 }
   0x8   :  { %v36_v24 = vld [vmem:[%s141_s3 + $0x6] sm:$0x3] }
   0x9   :  { %45 = vst [vmem:[%s142_s4] sm:$0x3] %v41_v16  ;;  %v40_v26 = vmax.f32 %v32_v21, %v36_v24 }
   0xa   :  { %46 = vst [vmem:[%s142_s4 + $0x2] sm:$0x3] %v42_v22 }
   0xb   :  { %47 = vst [vmem:[%s142_s4 + $0x4] sm:$0x3] %v43_v25  ;;  %v44_v27 = vmax.f32 %v28_v23, %v40_v26 }
   0xd   :  { %48 = vst [vmem:[%s142_s4 + $0x6] sm:$0x3] %v44_v27 }

// kernel: _lambda_.28
= control target key start
LH: loop header
LB: loop body
LE: loop exit
PB: predicated region body
PF: predicated region fallthrough
CT: control target
= control target key end

     0   :  { %s1731_s1 = inlined_call_operand.vmem [shape: bf16[1152,128], index: 1, kind: input, shape index: {}]   ;;  %s1732_s0 = inlined_call_operand.vmem [shape: bf16[32,1152], index: 0, kind: input, shape index: {}]   ;;  %s1733_s2 = inlined_call_operand.vmem [shape: f32[1,128], index: 2, kind: input, shape index: {}]   ;;  %s1734_s3 = inlined_call_operand.vmem [shape: f32[1,128], index: 3, kind: input, shape index: {}]   ;;  %s1735_s4 = inlined_call_operand.vmem [shape: f32[32,128], index: 4, kind: output, shape index: {}]  }
   0x1   :  { %v1289_v0 = vld [vmem:[%s1731_s1 + $0x38] sm:$0xff]  ;;  %v1288_v4 = vld [vmem:[%s1731_s1 + $0x30] sm:$0xff]  ;;  %v1287_v8 = vld [vmem:[%s1731_s1 + $0x28] sm:$0xff] }
   0x2   :  { %v1297_v1 = vld [vmem:[%s1731_s1 + $0x78] sm:$0xff]  ;;  %705 = vmatpush.bf16.msra.mxu0 %v1289_v0  ;;  %v1296_v5 = vld [vmem:[%s1731_s1 + $0x70] sm:$0xff]  ;;  %v1295_v9 = vld [vmem:[%s1731_s1 + $0x68] sm:$0xff] }
   0x3   :  { %v1305_v2 = vld [vmem:[%s1731_s1 + $0xb8] sm:$0xff]  ;;  %724 = vmatpush.bf16.msra.mxu1 %v1297_v1  ;;  %v1304_v6 = vld [vmem:[%s1731_s1 + $0xb0] sm:$0xff]  ;;  %v1303_v10 = vld [vmem:[%s1731_s1 + $0xa8] sm:$0xff] }
   0x4   :  { %v1313_v3 = vld [vmem:[%s1731_s1 + $0xf8] sm:$0xff]  ;;  %743 = vmatpush.bf16.msra.mxu2 %v1305_v2  ;;  %v1312_v7 = vld [vmem:[%s1731_s1 + $0xf0] sm:$0xff]  ;;  %v1311_v11 = vld [vmem:[%s1731_s1 + $0xe8] sm:$0xff] }
   0x5   :  { %762 = vmatpush.bf16.msra.mxu3 %v1313_v3  ;;  %v1286_v12 = vld [vmem:[%s1731_s1 + $0x20] sm:$0xff]  ;;  %v1285_v16 = vld [vmem:[%s1731_s1 + $0x18] sm:$0xff]  ;;  %v1284_v20 = vld [vmem:[%s1731_s1 + $0x10] sm:$0xff] }
   0x6   :  { %706 = vmatpush.bf16.msra.mxu0 %v1288_v4  ;;  %v1294_v13 = vld [vmem:[%s1731_s1 + $0x60] sm:$0xff]  ;;  %v1293_v17 = vld [vmem:[%s1731_s1 + $0x58] sm:$0xff]  ;;  %v1292_v21 = vld [vmem:[%s1731_s1 + $0x50] sm:$0xff] }
   0x7   :  { %725 = vmatpush.bf16.msra.mxu1 %v1296_v5  ;;  %v1302_v14 = vld [vmem:[%s1731_s1 + $0xa0] sm:$0xff]  ;;  %v1301_v18 = vld [vmem:[%s1731_s1 + $0x98] sm:$0xff]  ;;  %v1300_v22 = vld [vmem:[%s1731_s1 + $0x90] sm:$0xff] }
   0x8   :  { %744 = vmatpush.bf16.msra.mxu2 %v1304_v6  ;;  %v1310_v15 = vld [vmem:[%s1731_s1 + $0xe0] sm:$0xff]  ;;  %v1309_v19 = vld [vmem:[%s1731_s1 + $0xd8] sm:$0xff]  ;;  %v1308_v23 = vld [vmem:[%s1731_s1 + $0xd0] sm:$0xff] }
   0x9   :  { %763 = vmatpush.bf16.msra.mxu3 %v1312_v7  ;;  %v1283_v24 = vld [vmem:[%s1731_s1 + $0x8] sm:$0xff]  ;;  %v1282_v28 = vld [vmem:[%s1731_s1] sm:$0xff]  ;;  %v916_v39 = vld [vmem:[%s1732_s0 + $0x2c] sm:$0xf0] }
   0xa   :  { %707 = vmatpush.bf16.msra.mxu0 %v1287_v8  ;;  %v1291_v25 = vld [vmem:[%s1731_s1 + $0x48] sm:$0xff]  ;;  %v1290_v29 = vld [vmem:[%s1731_s1 + $0x40] sm:$0xff]  ;;  %v1321_v40 = vld [vmem:[%s1731_s1 + $0x138] sm:$0xff] }
   0xb   :  { %726 = vmatpush.bf16.msra.mxu1 %v1295_v9  ;;  %v1299_v26 = vld [vmem:[%s1731_s1 + $0x88] sm:$0xff]  ;;  %v1298_v30 = vld [vmem:[%s1731_s1 + $0x80] sm:$0xff]  ;;  %v1329_v41 = vld [vmem:[%s1731_s1 + $0x178] sm:$0xff] }
   0xc   :  { %745 = vmatpush.bf16.msra.mxu2 %v1303_v10  ;;  %v1307_v27 = vld [vmem:[%s1731_s1 + $0xc8] sm:$0xff]  ;;  %v1306_v31 = vld [vmem:[%s1731_s1 + $0xc0] sm:$0xff]  ;;  %v1337_v46 = vld [vmem:[%s1731_s1 + $0x1b8] sm:$0xff] }
   0xd   :  { %764 = vmatpush.bf16.msra.mxu3 %v1311_v11  ;;  %v906_v32 = vld [vmem:[%s1732_s0] sm:$0xf]  ;;  %v1268_v33 = vld [vmem:[%s1732_s0 + $0x20] sm:$0xf0]  ;;  %v908_v35 = vld [vmem:[%s1732_s0 + $0x24] sm:$0xf0] }
   0xe   :  { %708 = vmatpush.bf16.msra.mxu0 %v1286_v12  ;;  %v1264_v34 = vld [vmem:[%s1732_s0 + $0x4] sm:$0xf]  ;;  %v914_v36 = vld [vmem:[%s1732_s0 + $0x8] sm:$0xf]  ;;  %v1269_v37 = vld [vmem:[%s1732_s0 + $0x28] sm:$0xf0]  ;;  %v907_v42 = vor.u32 %v1268_v33, %v906_v32 }
   0xf   :  { %727 = vmatpush.bf16.msra.mxu1 %v1294_v13  ;;  %v1265_v38 = vld [vmem:[%s1732_s0 + $0xc] sm:$0xf]  ;;  %v911_v43 = vor.u32 %v1264_v34, %v908_v35  ;;  %v915_v44 = vor.u32 %v1269_v37, %v914_v36  ;;  %v1345_v47 = vld [vmem:[%s1731_s1 + $0x1f8] sm:$0xff]  ;;  %v1320_v48 = vld [vmem:[%s1731_s1 + $0x130] sm:$0xff] }
  0x10   :  { %746 = vmatpush.bf16.msra.mxu2 %v1302_v14  ;;  %v919_v45 = vor.u32 %v1265_v38, %v916_v39  ;;  %v1328_v49 = vld [vmem:[%s1731_s1 + $0x170] sm:$0xff]  ;;  %v1319_v52 = vld [vmem:[%s1731_s1 + $0x128] sm:$0xff]  ;;  %v1318_v56 = vld [vmem:[%s1731_s1 + $0x120] sm:$0xff] }
  0x11   :  { %765 = vmatpush.bf16.msra.mxu3 %v1310_v15  ;;  %v1336_v50 = vld [vmem:[%s1731_s1 + $0x1b0] sm:$0xff]  ;;  %v1327_v53 = vld [vmem:[%s1731_s1 + $0x168] sm:$0xff]  ;;  %v1326_v57 = vld [vmem:[%s1731_s1 + $0x160] sm:$0xff] }
  0x12   :  { %709 = vmatpush.bf16.msra.mxu0 %v1285_v16  ;;  %v1344_v51 = vld [vmem:[%s1731_s1 + $0x1f0] sm:$0xff]  ;;  %v1335_v54 = vld [vmem:[%s1731_s1 + $0x1a8] sm:$0xff]  ;;  %v1334_v58 = vld [vmem:[%s1731_s1 + $0x1a0] sm:$0xff] }
  0x13   :  { %728 = vmatpush.bf16.msra.mxu1 %v1293_v17  ;;  %v1343_v55 = vld [vmem:[%s1731_s1 + $0x1e8] sm:$0xff]  ;;  %v1342_v59 = vld [vmem:[%s1731_s1 + $0x1e0] sm:$0xff]  ;;  %v944_v63 = vld [vmem:[%s1732_s0 + $0x6c] sm:$0xf0] }
  0x14   :  { %747 = vmatpush.bf16.msra.mxu2 %v1301_v18  ;;  %v942_v60 = vld [vmem:[%s1732_s0 + $0x48] sm:$0xf]  ;;  %v1277_v61 = vld [vmem:[%s1732_s0 + $0x68] sm:$0xf0]  ;;  %v950_v0 = vld [vmem:[%s1732_s0 + $0x50] sm:$0xf] }
  0x15   :  { %766 = vmatpush.bf16.msra.mxu3 %v1309_v19  ;;  %v1273_v62 = vld [vmem:[%s1732_s0 + $0x4c] sm:$0xf]  ;;  %v1278_v1 = vld [vmem:[%s1732_s0 + $0x70] sm:$0xf0]  ;;  %v952_v3 = vld [vmem:[%s1732_s0 + $0x74] sm:$0xf0]  ;;  %v943_v6 = vor.u32 %v1277_v61, %v942_v60 }
  0x16   :  { %710 = vmatpush.bf16.msra.mxu0 %v1284_v20  ;;  %v1274_v2 = vld [vmem:[%s1732_s0 + $0x54] sm:$0xf]  ;;  %v1317_v4 = vld [vmem:[%s1731_s1 + $0x118] sm:$0xff]  ;;  %v947_v7 = vor.u32 %v1273_v62, %v944_v63  ;;  %v951_v8 = vor.u32 %v1278_v1, %v950_v0  ;;  %v1315_v16 = vld [vmem:[%s1731_s1 + $0x108] sm:$0xff] }
  0x17   :  { %729 = vmatpush.bf16.msra.mxu1 %v1292_v21  ;;  %v1325_v5 = vld [vmem:[%s1731_s1 + $0x158] sm:$0xff]  ;;  %v955_v9 = vor.u32 %v1274_v2, %v952_v3  ;;  %v1316_v12 = vld [vmem:[%s1731_s1 + $0x110] sm:$0xff]  ;;  %v1323_v17 = vld [vmem:[%s1731_s1 + $0x148] sm:$0xff] }
  0x18   :  { %748 = vmatpush.bf16.msra.mxu2 %v1300_v22  ;;  %v1333_v10 = vld [vmem:[%s1731_s1 + $0x198] sm:$0xff]  ;;  %v1324_v13 = vld [vmem:[%s1731_s1 + $0x150] sm:$0xff]  ;;  %v1331_v18 = vld [vmem:[%s1731_s1 + $0x188] sm:$0xff] }
  0x19   :  { %767 = vmatpush.bf16.msra.mxu3 %v1308_v23  ;;  %v1341_v11 = vld [vmem:[%s1731_s1 + $0x1d8] sm:$0xff]  ;;  %v1332_v14 = vld [vmem:[%s1731_s1 + $0x190] sm:$0xff]  ;;  %v1339_v19 = vld [vmem:[%s1731_s1 + $0x1c8] sm:$0xff] }
  0x1a   :  { %711 = vmatpush.bf16.msra.mxu0 %v1283_v24  ;;  %v1340_v15 = vld [vmem:[%s1731_s1 + $0x1d0] sm:$0xff]  ;;  %v1314_v20 = vld [vmem:[%s1731_s1 + $0x100] sm:$0xff]  ;;  %v1351_v38 = vld [vmem:[%s1731_s1 + $0x228] sm:$0xff] }
  0x1b   :  { %730 = vmatpush.bf16.msra.mxu1 %v1291_v25  ;;  %v1322_v21 = vld [vmem:[%s1731_s1 + $0x140] sm:$0xff]  ;;  %v922_v24 = vld [vmem:[%s1732_s0 + $0x10] sm:$0xf]  ;;  %v1270_v25 = vld [vmem:[%s1732_s0 + $0x30] sm:$0xf0] }
  0x1c   :  { %749 = vmatpush.bf16.msra.mxu2 %v1299_v26  ;;  %v1330_v22 = vld [vmem:[%s1731_s1 + $0x180] sm:$0xff]  ;;  %v1353_v26 = vld [vmem:[%s1731_s1 + $0x238] sm:$0xff]  ;;  %v923_v33 = vor.u32 %v1270_v25, %v922_v24  ;;  %v1352_v37 = vld [vmem:[%s1731_s1 + $0x230] sm:$0xff] }
  0x1d   :  { %768 = vmatpush.bf16.msra.mxu3 %v1307_v27  ;;  %v1338_v23 = vld [vmem:[%s1731_s1 + $0x1c0] sm:$0xff]  ;;  %v1266_v27 = vld [vmem:[%s1732_s0 + $0x14] sm:$0xf] }
  0x1e   :  { %712 = vmatpush.bf16.msra.mxu0 %v1282_v28  ;;  %v924_v28 = vld [vmem:[%s1732_s0 + $0x34] sm:$0xf0]  ;;  %v932_v32 = vld [vmem:[%s1732_s0 + $0x3c] sm:$0xf0] }
  0x1f   :  { %731 = vmatpush.bf16.msra.mxu1 %v1290_v29  ;;  %v930_v29 = vld [vmem:[%s1732_s0 + $0x18] sm:$0xf]  ;;  %v927_v34 = vor.u32 %v1266_v27, %v924_v28  ;;  %v1350_v39 = vld [vmem:[%s1731_s1 + $0x220] sm:$0xff] }
  0x20   :  { %750 = vmatpush.bf16.msra.mxu2 %v1298_v30  ;;  %v1271_v30 = vld [vmem:[%s1732_s0 + $0x38] sm:$0xf0] }
  0x21   :  { %769 = vmatpush.bf16.msra.mxu3 %v1306_v31  ;;  %713 = vmatmul.bf16.vlgmr.msra.gmra.mxu0 %v907_v42  ;;  %v1267_v31 = vld [vmem:[%s1732_s0 + $0x1c] sm:$0xf]  ;;  %v931_v35 = vor.u32 %v1271_v30, %v930_v29 }
  0x22   :  { %781 = vmatpush.bf16.msrb.mxu0 %v1321_v40  ;;  %732 = vmatmul.bf16.vlgmr.msra.gmra.mxu1 %v911_v43  ;;  %v935_v36 = vor.u32 %v1267_v31, %v932_v32  ;;  %v958_v40 = vld [vmem:[%s1732_s0 + $0x58] sm:$0xf]  ;;  %v1275_v42 = vld [vmem:[%s1732_s0 + $0x5c] sm:$0xf]  ;;  %v960_v43 = vld [vmem:[%s1732_s0 + $0x7c] sm:$0xf0] }
  0x23   :  { %800 = vmatpush.bf16.msrb.mxu1 %v1329_v41  ;;  %751 = vmatmul.bf16.vlgmr.msra.gmra.mxu2 %v915_v44  ;;  %v1279_v41 = vld [vmem:[%s1732_s0 + $0x78] sm:$0xf0]  ;;  %v966_v44 = vld [vmem:[%s1732_s0 + $0x60] sm:$0xf] }
  0x24   :  { %770 = vmatmul.bf16.vlgmr.msra.gmra.mxu3 %v919_v45  ;;  %819 = vmatpush.bf16.msrb.mxu2 %v1337_v46  ;;  %v1280_v45 = vld [vmem:[%s1732_s0 + $0x80] sm:$0xf0] }
  0x25   :  { %838 = vmatpush.bf16.msrb.mxu3 %v1345_v47  ;;  %v1276_v46 = vld [vmem:[%s1732_s0 + $0x64] sm:$0xf]  ;;  %v968_v47 = vld [vmem:[%s1732_s0 + $0x84] sm:$0xf0] }
  0x26   :  { %782 = vmatpush.bf16.msrb.mxu0 %v1320_v48  ;;  %v1349_v48 = vld [vmem:[%s1731_s1 + $0x218] sm:$0xff] }
  0x27   :  { %801 = vmatpush.bf16.msrb.mxu1 %v1328_v49  ;;  %v959_v49 = vor.u32 %v1279_v41, %v958_v40 }
  0x28   :  { %820 = vmatpush.bf16.msrb.mxu2 %v1336_v50  ;;  %v963_v50 = vor.u32 %v1275_v42, %v960_v43 }
  0x29   :  { %839 = vmatpush.bf16.msrb.mxu3 %v1344_v51  ;;  %v967_v51 = vor.u32 %v1280_v45, %v966_v44 }
  0x2a   :  { %783 = vmatpush.bf16.msrb.mxu0 %v1319_v52  ;;  %v971_v52 = vor.u32 %v1276_v46, %v968_v47 }
  0x2b   :  { %802 = vmatpush.bf16.msrb.mxu1 %v1327_v53  ;;  %v1348_v53 = vld [vmem:[%s1731_s1 + $0x210] sm:$0xff] }
  0x2c   :  { %821 = vmatpush.bf16.msrb.mxu2 %v1335_v54  ;;  %v1347_v54 = vld [vmem:[%s1731_s1 + $0x208] sm:$0xff] }
  0x2d   :  { %840 = vmatpush.bf16.msrb.mxu3 %v1343_v55  ;;  %v1346_v55 = vld [vmem:[%s1731_s1 + $0x200] sm:$0xff] }
  0x2e   :  { %784 = vmatpush.bf16.msrb.mxu0 %v1318_v56  ;;  %v938_v56 = vld [vmem:[%s1732_s0 + $0x20] sm:$0xf] }
  0x2f   :  { %803 = vmatpush.bf16.msrb.mxu1 %v1326_v57  ;;  %v1272_v57 = vld [vmem:[%s1732_s0 + $0x40] sm:$0xf0] }
  0x30   :  { %822 = vmatpush.bf16.msrb.mxu2 %v1334_v58  ;;  %v974_v58 = vld [vmem:[%s1732_s0 + $0x68] sm:$0xf]  ;;  %v939_v60 = vor.u32 %v1272_v57, %v938_v56  ;;  %v1363_v57 = vld [vmem:[%s1734_s3] ss:$0 sm:$0xff] }
  0x31   :  { %841 = vmatpush.bf16.msrb.mxu3 %v1342_v59  ;;  %718 = vmatmul.bf16.gmra.mxu0 %v943_v6  ;;  %v1281_v59 = vld [vmem:[%s1732_s0 + $0x88] sm:$0xf0] }
  0x32   :  { %785 = vmatpush.bf16.msrb.mxu0 %v1317_v4  ;;  %737 = vmatmul.bf16.gmra.mxu1 %v947_v7  ;;  %v975_v61 = vor.u32 %v1281_v59, %v974_v58 }
  0x33   :  { %804 = vmatpush.bf16.msrb.mxu1 %v1325_v5  ;;  %756 = vmatmul.bf16.gmra.mxu2 %v951_v8 }
  0x34   :  { %775 = vmatmul.bf16.gmra.mxu3 %v955_v9  ;;  %823 = vmatpush.bf16.msrb.mxu2 %v1333_v10 }
  0x35   :  { %842 = vmatpush.bf16.msrb.mxu3 %v1341_v11 }
  0x36   :  { %786 = vmatpush.bf16.msrb.mxu0 %v1316_v12 }
  0x37   :  { %805 = vmatpush.bf16.msrb.mxu1 %v1324_v13 }
  0x38   :  { %824 = vmatpush.bf16.msrb.mxu2 %v1332_v14 }
  0x39   :  { %843 = vmatpush.bf16.msrb.mxu3 %v1340_v15 }
  0x3a   :  { %787 = vmatpush.bf16.msrb.mxu0 %v1315_v16 }
  0x3b   :  { %806 = vmatpush.bf16.msrb.mxu1 %v1323_v17 }
  0x3c   :  { %825 = vmatpush.bf16.msrb.mxu2 %v1331_v18 }
  0x3d   :  { %844 = vmatpush.bf16.msrb.mxu3 %v1339_v19 }
  0x3e   :  { %788 = vmatpush.bf16.msrb.mxu0 %v1314_v20 }
  0x3f   :  { %807 = vmatpush.bf16.msrb.mxu1 %v1322_v21 }
  0x40   :  { %826 = vmatpush.bf16.msrb.mxu2 %v1330_v22 }
  0x41   :  { %845 = vmatpush.bf16.msrb.mxu3 %v1338_v23  ;;  %789 = vmatmul.bf16.vlgmr.msrb.gmra.mxu0 %v923_v33 }
  0x42   :  { %857 = vmatpush.bf16.msra.mxu0 %v1353_v26  ;;  %808 = vmatmul.bf16.vlgmr.msrb.gmra.mxu1 %v927_v34 }
  0x43   :  { %1354 = vmatpush.bf16.msra.mxu1 %v1353_v26  ;;  %827 = vmatmul.bf16.vlgmr.msrb.gmra.mxu2 %v931_v35 }
  0x44   :  { %846 = vmatmul.bf16.vlgmr.msrb.gmra.mxu3 %v935_v36 }
  0x46   :  { %858 = vmatpush.bf16.msra.mxu0 %v1352_v37 }
  0x47   :  { %1355 = vmatpush.bf16.msra.mxu1 %v1352_v37 }
  0x4a   :  { %859 = vmatpush.bf16.msra.mxu0 %v1351_v38 }
  0x4b   :  { %1356 = vmatpush.bf16.msra.mxu1 %v1351_v38 }
  0x4e   :  { %860 = vmatpush.bf16.msra.mxu0 %v1350_v39 }
  0x4f   :  { %1357 = vmatpush.bf16.msra.mxu1 %v1350_v39 }
  0x51   :  { %794 = vmatmul.bf16.gmra.mxu0 %v959_v49 }
  0x52   :  { %861 = vmatpush.bf16.msra.mxu0 %v1349_v48  ;;  %813 = vmatmul.bf16.gmra.mxu1 %v963_v50 }
  0x53   :  { %1358 = vmatpush.bf16.msra.mxu1 %v1349_v48  ;;  %832 = vmatmul.bf16.gmra.mxu2 %v967_v51  ;;  %v1362_v51 = vld [vmem:[%s1733_s2] ss:$0 sm:$0xff] }
  0x54   :  { %851 = vmatmul.bf16.gmra.mxu3 %v971_v52 }
  0x56   :  { %862 = vmatpush.bf16.msra.mxu0 %v1348_v53 }
  0x57   :  { %1359 = vmatpush.bf16.msra.mxu1 %v1348_v53 }
  0x5a   :  { %863 = vmatpush.bf16.msra.mxu0 %v1347_v54 }
  0x5b   :  { %1360 = vmatpush.bf16.msra.mxu1 %v1347_v54 }
  0x5e   :  { %864 = vmatpush.bf16.msra.mxu0 %v1346_v55 }
  0x5f   :  { %1361 = vmatpush.bf16.msra.mxu1 %v1346_v55 }
  0x61   :  { %865 = vmatmul.bf16.vlgmr.msra.gmra.mxu0 %v939_v60 }
  0x62   :  { %870 = vmatmul.bf16.vlgmr.msra.gmra.mxu1 %v975_v61 }
  0x9e   :  { %v714_v62 = vpop.f32.mrf.mxu0 }
  0x9f   :  { %v733_v63 = vpop.f32.mrf.mxu1 }
  0xa0   :  { %v734_v20 = vadd.f32 %v733_v63, %v714_v62 }
  0xa6   :  { %v752_v0 = vpop.f32.mrf.mxu2  ;;  %v716_v2 = vpop.f32.mrf.mxu0 }
  0xa7   :  { %v771_v1 = vpop.f32.mrf.mxu3  ;;  %v735_v3 = vpop.f32.mrf.mxu1  ;;  %v753_v22 = vadd.f32 %v752_v0, %v734_v20 }
  0xa8   :  { %v736_v30 = vadd.f32 %v735_v3, %v716_v2 }
  0xa9   :  { %v772_v28 = vadd.f32 %v771_v1, %v753_v22 }
  0xae   :  { %v754_v4 = vpop.f32.mrf.mxu2  ;;  %v719_v6 = vpop.f32.mrf.mxu0 }
  0xaf   :  { %v773_v5 = vpop.f32.mrf.mxu3  ;;  %v738_v7 = vpop.f32.mrf.mxu1  ;;  %v755_v34 = vadd.f32 %v754_v4, %v736_v30 }
  0xb0   :  { %v739_v21 = vadd.f32 %v738_v7, %v719_v6 }
  0xb1   :  { %v774_v41 = vadd.f32 %v773_v5, %v755_v34 }
  0xb6   :  { %v757_v8 = vpop.f32.mrf.mxu2  ;;  %v721_v10 = vpop.f32.mrf.mxu0 }
  0xb7   :  { %v776_v9 = vpop.f32.mrf.mxu3  ;;  %v740_v11 = vpop.f32.mrf.mxu1  ;;  %v758_v23 = vadd.f32 %v757_v8, %v739_v21 }
  0xb8   :  { %v741_v31 = vadd.f32 %v740_v11, %v721_v10 }
  0xb9   :  { %v777_v29 = vadd.f32 %v776_v9, %v758_v23 }
  0xbe   :  { %v759_v12 = vpop.f32.mrf.mxu2  ;;  %v790_v14 = vpop.f32.mrf.mxu0 }
  0xbf   :  { %v778_v13 = vpop.f32.mrf.mxu3  ;;  %v809_v15 = vpop.f32.mrf.mxu1  ;;  %v791_v32 = vadd.f32 %v790_v14, %v772_v28  ;;  %v760_v35 = vadd.f32 %v759_v12, %v741_v31 }
  0xc1   :  { %v810_v39 = vadd.f32 %v809_v15, %v791_v32  ;;  %v779_v42 = vadd.f32 %v778_v13, %v760_v35 }
  0xc6   :  { %v828_v16 = vpop.f32.mrf.mxu2  ;;  %v792_v18 = vpop.f32.mrf.mxu0 }
  0xc7   :  { %v847_v17 = vpop.f32.mrf.mxu3  ;;  %v811_v19 = vpop.f32.mrf.mxu1  ;;  %v829_v43 = vadd.f32 %v828_v16, %v810_v39  ;;  %v793_v46 = vadd.f32 %v792_v18, %v774_v41 }
  0xc9   :  { %v848_v48 = vadd.f32 %v847_v17, %v829_v43  ;;  %v812_v54 = vadd.f32 %v811_v19, %v793_v46 }
  0xce   :  { %v830_v24 = vpop.f32.mrf.mxu2  ;;  %v795_v25 = vpop.f32.mrf.mxu0 }
  0xcf   :  { %v814_v26 = vpop.f32.mrf.mxu1  ;;  %v849_v27 = vpop.f32.mrf.mxu3  ;;  %v796_v33 = vadd.f32 %v795_v25, %v777_v29  ;;  %v831_v59 = vadd.f32 %v830_v24, %v812_v54 }
  0xd1   :  { %v815_v40 = vadd.f32 %v814_v26, %v796_v33  ;;  %v850_v2 = vadd.f32 %v849_v27, %v831_v59 }
  0xd6   :  { %v833_v36 = vpop.f32.mrf.mxu2  ;;  %v797_v37 = vpop.f32.mrf.mxu0 }
  0xd7   :  { %v816_v38 = vpop.f32.mrf.mxu1  ;;  %v834_v44 = vadd.f32 %v833_v36, %v815_v40  ;;  %v852_v45 = vpop.f32.mrf.mxu3  ;;  %v798_v47 = vadd.f32 %v797_v37, %v779_v42 }
  0xd9   :  { %v853_v49 = vadd.f32 %v852_v45, %v834_v44  ;;  %v817_v55 = vadd.f32 %v816_v38, %v798_v47 }
  0xde   :  { %v835_v50 = vpop.f32.mrf.mxu2  ;;  %v866_v52 = vpop.f32.mrf.mxu0 }
  0xdf   :  { %v871_v53 = vpop.f32.mrf.mxu1  ;;  %v867_v56 = vadd.f32 %v866_v52, %v848_v48  ;;  %v836_v60 = vadd.f32 %v835_v50, %v817_v55  ;;  %v854_v1 = vpop.f32.mrf.mxu3 }
  0xe0   :  { %v872_v58 = vadd.f32 %v871_v53, %v853_v49 }
  0xe1   :  { %v880_v61 = vmul.f32 %v1362_v51, %v867_v56  ;;  %v855_v3 = vadd.f32 %v854_v1, %v836_v60 }
  0xe2   :  { %v882_v62 = vmul.f32 %v1362_v51, %v872_v58 }
  0xe3   :  { %v888_v63 = vadd.f32 %v1363_v57, %v880_v61 }
  0xe4   :  { %v890_v0 = vadd.f32 %v1363_v57, %v882_v62 }
  0xe5   :  { %v892_v4 = vmax.f32 %v888_v63, 0.0 }
  0xe6   :  { %v894_v5 = vmax.f32 %v890_v0, 0.0  ;;  %v868_v6 = vpop.f32.mrf.mxu0 }
  0xe7   :  { %v873_v7 = vpop.f32.mrf.mxu1  ;;  %896 = vst [vmem:[%s1735_s4] sm:$0xff] %v892_v4  ;;  %v869_v8 = vadd.f32 %v868_v6, %v850_v2 }
  0xe8   :  { %v874_v9 = vadd.f32 %v873_v7, %v855_v3  ;;  %898 = vst [vmem:[%s1735_s4 + $0x10] sm:$0xff] %v894_v5 }
  0xe9   :  { %v881_v10 = vmul.f32 %v1362_v51, %v869_v8 }
  0xea   :  { %v883_v11 = vmul.f32 %v1362_v51, %v874_v9 }
  0xeb   :  { %v889_v12 = vadd.f32 %v1363_v57, %v881_v10 }
  0xec   :  { %v891_v13 = vadd.f32 %v1363_v57, %v883_v11 }
  0xed   :  { %v893_v14 = vmax.f32 %v889_v12, 0.0 }
  0xee   :  { %v895_v15 = vmax.f32 %v891_v13, 0.0 }
  0xef   :  { %897 = vst [vmem:[%s1735_s4 + $0x8] sm:$0xff] %v893_v14 }
  0xf0   :  { %899 = vst [vmem:[%s1735_s4 + $0x18] sm:$0xff] %v895_v15 }

// kernel: _lambda_.31
= control target key start
LH: loop header
LB: loop body
LE: loop exit
PB: predicated region body
PF: predicated region fallthrough
CT: control target
= control target key end

     0   :  { %s81_s0 = inlined_call_operand.vmem [shape: f32[2,1,128], index: 0, kind: input, shape index: {}]   ;;  %s82_s1 = inlined_call_operand.hbm [shape: f32[2,1,128], index: 1, kind: output, shape index: {}]  }
   0x1   :  { %v9_v0 = vld [vmem:[%s81_s0] sm:$0x3]  }
   0x2   :  { %6 = vsyncpa [#allocation3], 0  ;;  %s21_s10 = sshll.u32 %s82_s1, 4  ;;  %13 = vst [vmem:[#allocation2] sm:$0x3] %v9_v0   ;;  %s62_s11 = smov [#allocation2]   ;;  %s22_s10 = int_to_ptr.hbm [resolvable:$true] %s21_s10 }
   0x3   :  { %s19_s12 = sshll.u32 %s62_s11, 4  ;;  %s63_s13 = smov 16   ;;  %s20_s12 = int_to_ptr.vmem [resolvable:$true] %s19_s12 }
   0x4   :  { %s64_s14 = smov 1  }
   0x5   :  { %27 = dma.vmem_to_hbm [thread:$0]  %s20_s12, 32, %s22_s10, [#allocation3], %s63_s13, %s63_s13, %s64_s14  }
   0x6   :  { %60 = dma.done.wait [#allocation3], 32  }
   0x7   :  { %61 = vsyncadd [#allocation3], 4294967264 }
   0x8   :  { %32 = vsyncpa [#allocation3], 1 }

// kernel: _lambda_.30
= control target key start
LH: loop header
LB: loop body
LE: loop exit
PB: predicated region body
PF: predicated region fallthrough
CT: control target
= control target key end

     0   :  { %s1390_s1 = inlined_call_operand.vmem [shape: bf16[1152,128], index: 1, kind: input, shape index: {}]   ;;  %s1391_s0 = inlined_call_operand.vmem [shape: bf16[8,1152], index: 0, kind: input, shape index: {}]   ;;  %s1392_s2 = inlined_call_operand.vmem [shape: f32[1,128], index: 2, kind: input, shape index: {}]   ;;  %s1393_s3 = inlined_call_operand.vmem [shape: f32[1,128], index: 3, kind: input, shape index: {}]   ;;  %s1394_s4 = inlined_call_operand.vmem [shape: f32[8,128], index: 4, kind: output, shape index: {}]  }
   0x1   :  { %v1058_v0 = vld [vmem:[%s1390_s1 + $0x38] sm:$0xff]  ;;  %v1057_v4 = vld [vmem:[%s1390_s1 + $0x30] sm:$0xff]  ;;  %v1056_v8 = vld [vmem:[%s1390_s1 + $0x28] sm:$0xff] }
   0x2   :  { %v1074_v1 = vld [vmem:[%s1390_s1 + $0xb8] sm:$0xff]  ;;  %630 = vmatpush.bf16.msra.mxu0 %v1058_v0  ;;  %v1073_v5 = vld [vmem:[%s1390_s1 + $0xb0] sm:$0xff]  ;;  %v1072_v9 = vld [vmem:[%s1390_s1 + $0xa8] sm:$0xff] }
   0x3   :  { %v1082_v2 = vld [vmem:[%s1390_s1 + $0xf8] sm:$0xff]  ;;  %656 = vmatpush.bf16.msra.mxu2 %v1074_v1  ;;  %v1081_v6 = vld [vmem:[%s1390_s1 + $0xf0] sm:$0xff]  ;;  %v1080_v10 = vld [vmem:[%s1390_s1 + $0xe8] sm:$0xff] }
   0x4   :  { %v1066_v3 = vld [vmem:[%s1390_s1 + $0x78] sm:$0xff]  ;;  %669 = vmatpush.bf16.msra.mxu3 %v1082_v2  ;;  %v1065_v7 = vld [vmem:[%s1390_s1 + $0x70] sm:$0xff]  ;;  %v1064_v11 = vld [vmem:[%s1390_s1 + $0x68] sm:$0xff] }
   0x5   :  { %643 = vmatpush.bf16.msra.mxu1 %v1066_v3  ;;  %v1055_v12 = vld [vmem:[%s1390_s1 + $0x20] sm:$0xff]  ;;  %v1054_v16 = vld [vmem:[%s1390_s1 + $0x18] sm:$0xff]  ;;  %v1053_v20 = vld [vmem:[%s1390_s1 + $0x10] sm:$0xff] }
   0x6   :  { %631 = vmatpush.bf16.msra.mxu0 %v1057_v4  ;;  %v1071_v13 = vld [vmem:[%s1390_s1 + $0xa0] sm:$0xff]  ;;  %v1070_v17 = vld [vmem:[%s1390_s1 + $0x98] sm:$0xff]  ;;  %v1069_v21 = vld [vmem:[%s1390_s1 + $0x90] sm:$0xff] }
   0x7   :  { %657 = vmatpush.bf16.msra.mxu2 %v1073_v5  ;;  %v1079_v14 = vld [vmem:[%s1390_s1 + $0xe0] sm:$0xff]  ;;  %v1078_v18 = vld [vmem:[%s1390_s1 + $0xd8] sm:$0xff]  ;;  %v1077_v22 = vld [vmem:[%s1390_s1 + $0xd0] sm:$0xff] }
   0x8   :  { %670 = vmatpush.bf16.msra.mxu3 %v1081_v6  ;;  %v1063_v15 = vld [vmem:[%s1390_s1 + $0x60] sm:$0xff]  ;;  %v1062_v19 = vld [vmem:[%s1390_s1 + $0x58] sm:$0xff]  ;;  %v1061_v23 = vld [vmem:[%s1390_s1 + $0x50] sm:$0xff] }
   0x9   :  { %644 = vmatpush.bf16.msra.mxu1 %v1065_v7  ;;  %v1052_v24 = vld [vmem:[%s1390_s1 + $0x8] sm:$0xff]  ;;  %v17_v29 = vld [vmem:[%s1391_s0] sm:$0xff]  ;;  %v1090_v34 = vld [vmem:[%s1390_s1 + $0x138] sm:$0xff] }
   0xa   :  { %632 = vmatpush.bf16.msra.mxu0 %v1056_v8  ;;  %v1068_v25 = vld [vmem:[%s1390_s1 + $0x88] sm:$0xff]  ;;  %v1051_v30 = vld [vmem:[%s1390_s1] sm:$0xff]  ;;  %v171_v33 = vunpack.c.l.b16 %v17_v29  ;;  %v1106_v35 = vld [vmem:[%s1390_s1 + $0x1b8] sm:$0xff]  ;;  %v172_v39 = vunpack.c.h.b16 %v17_v29 }
   0xb   :  { %658 = vmatpush.bf16.msra.mxu2 %v1072_v9  ;;  %v1076_v26 = vld [vmem:[%s1390_s1 + $0xc8] sm:$0xff]  ;;  %v1067_v31 = vld [vmem:[%s1390_s1 + $0x80] sm:$0xff]  ;;  %v1114_v40 = vld [vmem:[%s1390_s1 + $0x1f8] sm:$0xff] }
   0xc   :  { %671 = vmatpush.bf16.msra.mxu3 %v1080_v10  ;;  %v1060_v27 = vld [vmem:[%s1390_s1 + $0x48] sm:$0xff]  ;;  %v1075_v36 = vld [vmem:[%s1390_s1 + $0xc0] sm:$0xff]  ;;  %v1098_v41 = vld [vmem:[%s1390_s1 + $0x178] sm:$0xff]  ;;  %v180_v43 = vpack.c.b16 %v171_v33, %v171_v33  ;;  %v181_v47 = vpack.c.b16 %v172_v39, %v172_v39 }
   0xd   :  { %645 = vmatpush.bf16.msra.mxu1 %v1064_v11  ;;  %v18_v28 = vld [vmem:[%s1391_s0 + $0x8] sm:$0xff]  ;;  %v1059_v37 = vld [vmem:[%s1390_s1 + $0x40] sm:$0xff]  ;;  %v1089_v44 = vld [vmem:[%s1390_s1 + $0x130] sm:$0xff] }
   0xe   :  { %633 = vmatpush.bf16.msra.mxu0 %v1055_v12  ;;  %v173_v32 = vunpack.c.l.b16 %v18_v28  ;;  %v174_v38 = vunpack.c.h.b16 %v18_v28  ;;  %v1105_v45 = vld [vmem:[%s1390_s1 + $0x1b0] sm:$0xff]  ;;  %v1088_v50 = vld [vmem:[%s1390_s1 + $0x128] sm:$0xff]  ;;  %v1087_v54 = vld [vmem:[%s1390_s1 + $0x120] sm:$0xff] }
   0xf   :  { %659 = vmatpush.bf16.msra.mxu2 %v1071_v13  ;;  %v1113_v48 = vld [vmem:[%s1390_s1 + $0x1f0] sm:$0xff]  ;;  %v1104_v51 = vld [vmem:[%s1390_s1 + $0x1a8] sm:$0xff]  ;;  %v1103_v55 = vld [vmem:[%s1390_s1 + $0x1a0] sm:$0xff] }
  0x10   :  { %672 = vmatpush.bf16.msra.mxu3 %v1079_v14  ;;  %v182_v42 = vpack.c.b16 %v173_v32, %v173_v32  ;;  %v183_v46 = vpack.c.b16 %v174_v38, %v174_v38  ;;  %v1097_v49 = vld [vmem:[%s1390_s1 + $0x170] sm:$0xff]  ;;  %v1112_v52 = vld [vmem:[%s1390_s1 + $0x1e8] sm:$0xff]  ;;  %v1111_v56 = vld [vmem:[%s1390_s1 + $0x1e0] sm:$0xff] }
  0x11   :  { %646 = vmatpush.bf16.msra.mxu1 %v1063_v15  ;;  %v1096_v53 = vld [vmem:[%s1390_s1 + $0x168] sm:$0xff]  ;;  %v1095_v57 = vld [vmem:[%s1390_s1 + $0x160] sm:$0xff]  ;;  %v1086_v58 = vld [vmem:[%s1390_s1 + $0x118] sm:$0xff] }
  0x12   :  { %634 = vmatpush.bf16.msra.mxu0 %v1054_v16  ;;  %v1102_v59 = vld [vmem:[%s1390_s1 + $0x198] sm:$0xff]  ;;  %v1085_v62 = vld [vmem:[%s1390_s1 + $0x110] sm:$0xff]  ;;  %v1084_v2 = vld [vmem:[%s1390_s1 + $0x108] sm:$0xff] }
  0x13   :  { %660 = vmatpush.bf16.msra.mxu2 %v1070_v17  ;;  %v1110_v60 = vld [vmem:[%s1390_s1 + $0x1d8] sm:$0xff]  ;;  %v1101_v63 = vld [vmem:[%s1390_s1 + $0x190] sm:$0xff]  ;;  %v1100_v3 = vld [vmem:[%s1390_s1 + $0x188] sm:$0xff] }
  0x14   :  { %673 = vmatpush.bf16.msra.mxu3 %v1078_v18  ;;  %v1094_v61 = vld [vmem:[%s1390_s1 + $0x158] sm:$0xff]  ;;  %v1109_v0 = vld [vmem:[%s1390_s1 + $0x1d0] sm:$0xff]  ;;  %v1108_v6 = vld [vmem:[%s1390_s1 + $0x1c8] sm:$0xff] }
  0x15   :  { %647 = vmatpush.bf16.msra.mxu1 %v1062_v19  ;;  %v1093_v1 = vld [vmem:[%s1390_s1 + $0x150] sm:$0xff]  ;;  %v20_v4 = vld [vmem:[%s1391_s0 + $0x18] sm:$0xff]  ;;  %v1092_v7 = vld [vmem:[%s1390_s1 + $0x148] sm:$0xff] }
  0x16   :  { %635 = vmatpush.bf16.msra.mxu0 %v1053_v20  ;;  %v19_v5 = vld [vmem:[%s1391_s0 + $0x10] sm:$0xff]  ;;  %v177_v8 = vunpack.c.l.b16 %v20_v4  ;;  %v1083_v10 = vld [vmem:[%s1390_s1 + $0x100] sm:$0xff]  ;;  %v1122_v12 = vld [vmem:[%s1390_s1 + $0x238] sm:$0xff]  ;;  %v178_v13 = vunpack.c.h.b16 %v20_v4 }
  0x17   :  { %661 = vmatpush.bf16.msra.mxu2 %v1069_v21  ;;  %v175_v9 = vunpack.c.l.b16 %v19_v5  ;;  %v1099_v11 = vld [vmem:[%s1390_s1 + $0x180] sm:$0xff]  ;;  %v176_v16 = vunpack.c.h.b16 %v19_v5  ;;  %v1121_v19 = vld [vmem:[%s1390_s1 + $0x230] sm:$0xff] }
  0x18   :  { %674 = vmatpush.bf16.msra.mxu3 %v1077_v22  ;;  %v1107_v14 = vld [vmem:[%s1390_s1 + $0x1c0] sm:$0xff]  ;;  %v186_v17 = vpack.c.b16 %v177_v8, %v177_v8  ;;  %v187_v20 = vpack.c.b16 %v178_v13, %v178_v13  ;;  %v1120_v22 = vld [vmem:[%s1390_s1 + $0x228] sm:$0xff] }
  0x19   :  { %648 = vmatpush.bf16.msra.mxu1 %v1061_v23  ;;  %v1091_v15 = vld [vmem:[%s1390_s1 + $0x140] sm:$0xff]  ;;  %v184_v18 = vpack.c.b16 %v175_v9, %v175_v9  ;;  %v185_v21 = vpack.c.b16 %v176_v16, %v176_v16 }
  0x1a   :  { %636 = vmatpush.bf16.msra.mxu0 %v1052_v24  ;;  %v1119_v23 = vld [vmem:[%s1390_s1 + $0x220] sm:$0xff]  ;;  %v1118_v24 = vld [vmem:[%s1390_s1 + $0x218] sm:$0xff] }
  0x1b   :  { %662 = vmatpush.bf16.msra.mxu2 %v1068_v25  ;;  %v1117_v25 = vld [vmem:[%s1390_s1 + $0x210] sm:$0xff]  ;;  %v1115_v29 = vld [vmem:[%s1390_s1 + $0x200] sm:$0xff] }
  0x1c   :  { %675 = vmatpush.bf16.msra.mxu3 %v1076_v26  ;;  %v1116_v26 = vld [vmem:[%s1390_s1 + $0x208] sm:$0xff] }
  0x1d   :  { %649 = vmatpush.bf16.msra.mxu1 %v1060_v27  ;;  %v21_v27 = vld [vmem:[%s1391_s0 + $0x20] sm:$0xf] }
  0x1e   :  { %637 = vmatpush.bf16.msra.mxu0 %v1051_v30  ;;  %v179_v28 = vunpack.c.l.b16 %v21_v27 }
  0x1f   :  { %663 = vmatpush.bf16.msra.mxu2 %v1067_v31 }
  0x20   :  { %676 = vmatpush.bf16.msra.mxu3 %v1075_v36  ;;  %v188_v30 = vpack.c.b16 %v179_v28, %v179_v28 }
  0x21   :  { %650 = vmatpush.bf16.msra.mxu1 %v1059_v37  ;;  %638 = vmatmul.bf16.vlgmr.msra.gmra.mxu0 %v180_v43 }
  0x22   :  { %682 = vmatpush.bf16.msrb.mxu0 %v1090_v34  ;;  %664 = vmatmul.bf16.vlgmr.msra.gmra.mxu2 %v182_v42 }
  0x23   :  { %708 = vmatpush.bf16.msrb.mxu2 %v1106_v35  ;;  %677 = vmatmul.bf16.vlgmr.msra.gmra.mxu3 %v183_v46 }
  0x24   :  { %721 = vmatpush.bf16.msrb.mxu3 %v1114_v40  ;;  %651 = vmatmul.bf16.vlgmr.msra.gmra.mxu1 %v181_v47 }
  0x25   :  { %695 = vmatpush.bf16.msrb.mxu1 %v1098_v41 }
  0x26   :  { %683 = vmatpush.bf16.msrb.mxu0 %v1089_v44 }
  0x27   :  { %709 = vmatpush.bf16.msrb.mxu2 %v1105_v45 }
  0x28   :  { %722 = vmatpush.bf16.msrb.mxu3 %v1113_v48 }
  0x29   :  { %696 = vmatpush.bf16.msrb.mxu1 %v1097_v49 }
  0x2a   :  { %684 = vmatpush.bf16.msrb.mxu0 %v1088_v50 }
  0x2b   :  { %710 = vmatpush.bf16.msrb.mxu2 %v1104_v51 }
  0x2c   :  { %723 = vmatpush.bf16.msrb.mxu3 %v1112_v52 }
  0x2d   :  { %697 = vmatpush.bf16.msrb.mxu1 %v1096_v53 }
  0x2e   :  { %685 = vmatpush.bf16.msrb.mxu0 %v1087_v54  ;;  %v1123_v54 = vld [vmem:[%s1392_s2] ss:$0 sm:$0xff] }
  0x2f   :  { %711 = vmatpush.bf16.msrb.mxu2 %v1103_v55 }
  0x30   :  { %724 = vmatpush.bf16.msrb.mxu3 %v1111_v56 }
  0x31   :  { %698 = vmatpush.bf16.msrb.mxu1 %v1095_v57  ;;  %v1124_v57 = vld [vmem:[%s1393_s3] ss:$0 sm:$0xff] }
  0x32   :  { %686 = vmatpush.bf16.msrb.mxu0 %v1086_v58 }
  0x33   :  { %712 = vmatpush.bf16.msrb.mxu2 %v1102_v59 }
  0x34   :  { %725 = vmatpush.bf16.msrb.mxu3 %v1110_v60 }
  0x35   :  { %699 = vmatpush.bf16.msrb.mxu1 %v1094_v61 }
  0x36   :  { %687 = vmatpush.bf16.msrb.mxu0 %v1085_v62 }
  0x37   :  { %713 = vmatpush.bf16.msrb.mxu2 %v1101_v63 }
  0x38   :  { %726 = vmatpush.bf16.msrb.mxu3 %v1109_v0 }
  0x39   :  { %700 = vmatpush.bf16.msrb.mxu1 %v1093_v1 }
  0x3a   :  { %688 = vmatpush.bf16.msrb.mxu0 %v1084_v2 }
  0x3b   :  { %714 = vmatpush.bf16.msrb.mxu2 %v1100_v3 }
  0x3c   :  { %727 = vmatpush.bf16.msrb.mxu3 %v1108_v6 }
  0x3d   :  { %701 = vmatpush.bf16.msrb.mxu1 %v1092_v7 }
  0x3e   :  { %689 = vmatpush.bf16.msrb.mxu0 %v1083_v10 }
  0x3f   :  { %715 = vmatpush.bf16.msrb.mxu2 %v1099_v11 }
  0x40   :  { %728 = vmatpush.bf16.msrb.mxu3 %v1107_v14 }
  0x41   :  { %702 = vmatpush.bf16.msrb.mxu1 %v1091_v15  ;;  %690 = vmatmul.bf16.vlgmr.msrb.gmra.mxu0 %v184_v18 }
  0x42   :  { %734 = vmatpush.bf16.msra.mxu0 %v1122_v12  ;;  %716 = vmatmul.bf16.vlgmr.msrb.gmra.mxu2 %v186_v17 }
  0x43   :  { %729 = vmatmul.bf16.vlgmr.msrb.gmra.mxu3 %v187_v20 }
  0x44   :  { %703 = vmatmul.bf16.vlgmr.msrb.gmra.mxu1 %v185_v21 }
  0x46   :  { %735 = vmatpush.bf16.msra.mxu0 %v1121_v19 }
  0x4a   :  { %736 = vmatpush.bf16.msra.mxu0 %v1120_v22 }
  0x4e   :  { %737 = vmatpush.bf16.msra.mxu0 %v1119_v23 }
  0x52   :  { %738 = vmatpush.bf16.msra.mxu0 %v1118_v24 }
  0x56   :  { %739 = vmatpush.bf16.msra.mxu0 %v1117_v25 }
  0x5a   :  { %740 = vmatpush.bf16.msra.mxu0 %v1116_v26 }
  0x5e   :  { %741 = vmatpush.bf16.msra.mxu0 %v1115_v29 }
  0x61   :  { %742 = vmatmul.bf16.vlgmr.msra.gmra.mxu0 %v188_v30 }
  0x9e   :  { %v639_v31 = vpop.f32.mrf.mxu0 }
  0xa1   :  { %v652_v32 = vpop.f32.mrf.mxu1 }
  0xa2   :  { %v653_v41 = vadd.f32 %v652_v32, %v639_v31 }
  0xa5   :  { %v665_v33 = vpop.f32.mrf.mxu2 }
  0xa6   :  { %v678_v34 = vpop.f32.mrf.mxu3  ;;  %v641_v35 = vpop.f32.mrf.mxu0  ;;  %v666_v43 = vadd.f32 %v665_v33, %v653_v41 }
  0xa8   :  { %v679_v47 = vadd.f32 %v678_v34, %v666_v43 }
  0xa9   :  { %v654_v36 = vpop.f32.mrf.mxu1 }
  0xad   :  { %v667_v37 = vpop.f32.mrf.mxu2 }
  0xae   :  { %v680_v38 = vpop.f32.mrf.mxu3 }
  0xbe   :  { %v691_v39 = vpop.f32.mrf.mxu0 }
  0xbf   :  { %v692_v49 = vadd.f32 %v691_v39, %v679_v47 }
  0xc1   :  { %v704_v40 = vpop.f32.mrf.mxu1 }
  0xc2   :  { %v705_v51 = vadd.f32 %v704_v40, %v692_v49 }
  0xc5   :  { %v717_v42 = vpop.f32.mrf.mxu2 }
  0xc6   :  { %v730_v44 = vpop.f32.mrf.mxu3  ;;  %v693_v45 = vpop.f32.mrf.mxu0  ;;  %v718_v52 = vadd.f32 %v717_v42, %v705_v51 }
  0xc8   :  { %v731_v53 = vadd.f32 %v730_v44, %v718_v52 }
  0xc9   :  { %v706_v46 = vpop.f32.mrf.mxu1 }
  0xcd   :  { %v719_v48 = vpop.f32.mrf.mxu2 }
  0xce   :  { %v732_v50 = vpop.f32.mrf.mxu3 }
  0xde   :  { %v743_v55 = vpop.f32.mrf.mxu0 }
  0xdf   :  { %v744_v56 = vadd.f32 %v743_v55, %v731_v53 }
  0xe1   :  { %v751_v58 = vmul.f32 %v1123_v54, %v744_v56 }
  0xe3   :  { %v756_v59 = vadd.f32 %v1124_v57, %v751_v58 }
  0xe5   :  { %v757_v60 = vmax.f32 %v756_v59, 0.0 }
  0xe6   :  { %v745_v61 = vpop.f32.mrf.mxu0 }
  0xe7   :  { %758 = vst [vmem:[%s1394_s4] sm:$0xff] %v757_v60 }

// kernel: _lambda_.27
= control target key start
LH: loop header
LB: loop body
LE: loop exit
PB: predicated region body
PF: predicated region fallthrough
CT: control target
= control target key end

     0   :  { %s9077_s1 = inlined_call_operand.vmem [shape: bf16[3456,128], index: 1, kind: input, shape index: {}]   ;;  %s9078_s0 = inlined_call_operand.vmem [shape: bf16[128,3456], index: 0, kind: input, shape index: {}]   ;;  %s9079_s2 = inlined_call_operand.vmem [shape: f32[1,128], index: 2, kind: input, shape index: {}]   ;;  %s9080_s3 = inlined_call_operand.vmem [shape: f32[1,128], index: 3, kind: input, shape index: {}]   ;;  %s9081_s4 = inlined_call_operand.vmem [shape: f32[128,128], index: 4, kind: output, shape index: {}]  }
   0x1   :  { %v6407_v0 = vld [vmem:[%s9077_s1 + $0x38] sm:$0xff]  ;;  %v6406_v3 = vld [vmem:[%s9077_s1 + $0x30] sm:$0xff]  ;;  %v6405_v6 = vld [vmem:[%s9077_s1 + $0x28] sm:$0xff] }
   0x2   :  { %v6673_v1 = vld [vmem:[%s9077_s1 + $0xb8] sm:$0xff]  ;;  %3057 = vmatpush.bf16.msra.mxu0 %v6407_v0  ;;  %6616 = vmatpush.bf16.msra.mxu3 %v6407_v0  ;;  %v6688_v4 = vld [vmem:[%s9077_s1 + $0xb0] sm:$0xff]  ;;  %v6703_v7 = vld [vmem:[%s9077_s1 + $0xa8] sm:$0xff] }
   0x3   :  { %v6678_v2 = vld [vmem:[%s9077_s1 + $0x78] sm:$0xff]  ;;  %6632 = vmatpush.bf16.msra.mxu2 %v6673_v1  ;;  %v6693_v5 = vld [vmem:[%s9077_s1 + $0x70] sm:$0xff]  ;;  %v6708_v8 = vld [vmem:[%s9077_s1 + $0x68] sm:$0xff] }
   0x4   :  { %6624 = vmatpush.bf16.msra.mxu1 %v6678_v2  ;;  %v6404_v9 = vld [vmem:[%s9077_s1 + $0x20] sm:$0xff]  ;;  %v6403_v12 = vld [vmem:[%s9077_s1 + $0x18] sm:$0xff]  ;;  %v6402_v15 = vld [vmem:[%s9077_s1 + $0x10] sm:$0xff] }
   0x5   :  { %v6718_v10 = vld [vmem:[%s9077_s1 + $0xa0] sm:$0xff]  ;;  %v6733_v13 = vld [vmem:[%s9077_s1 + $0x98] sm:$0xff]  ;;  %v6748_v16 = vld [vmem:[%s9077_s1 + $0x90] sm:$0xff] }
   0x6   :  { %3058 = vmatpush.bf16.msra.mxu0 %v6406_v3  ;;  %6617 = vmatpush.bf16.msra.mxu3 %v6406_v3  ;;  %v6723_v11 = vld [vmem:[%s9077_s1 + $0x60] sm:$0xff]  ;;  %v6738_v14 = vld [vmem:[%s9077_s1 + $0x58] sm:$0xff]  ;;  %v6753_v17 = vld [vmem:[%s9077_s1 + $0x50] sm:$0xff] }
   0x7   :  { %6633 = vmatpush.bf16.msra.mxu2 %v6688_v4  ;;  %v6401_v18 = vld [vmem:[%s9077_s1 + $0x8] sm:$0xff]  ;;  %v6400_v21 = vld [vmem:[%s9077_s1] sm:$0xff]  ;;  %v4674_v26 = vld [vmem:[%s9078_s0 + $0x1b0] sm:$0xf] }
   0x8   :  { %6625 = vmatpush.bf16.msra.mxu1 %v6693_v5  ;;  %v6763_v19 = vld [vmem:[%s9077_s1 + $0x88] sm:$0xff]  ;;  %v6776_v22 = vld [vmem:[%s9077_s1 + $0x80] sm:$0xff]  ;;  %v6251_v27 = vld [vmem:[%s9078_s0 + $0x218] sm:$0xf0] }
   0x9   :  { %v6768_v20 = vld [vmem:[%s9077_s1 + $0x48] sm:$0xff]  ;;  %v6781_v23 = vld [vmem:[%s9077_s1 + $0x40] sm:$0xff]  ;;  %v4682_v28 = vld [vmem:[%s9078_s0 + $0x1b8] sm:$0xf]  ;;  %v4675_v34 = vor.u32 %v6251_v27, %v4674_v26 }
   0xa   :  { %3059 = vmatpush.bf16.msra.mxu0 %v6405_v6  ;;  %6618 = vmatpush.bf16.msra.mxu3 %v6405_v6  ;;  %v4458_v24 = vld [vmem:[%s9078_s0] sm:$0xf]  ;;  %v6197_v25 = vld [vmem:[%s9078_s0 + $0x68] sm:$0xf0]  ;;  %v6252_v29 = vld [vmem:[%s9078_s0 + $0x220] sm:$0xf0] }
   0xb   :  { %6634 = vmatpush.bf16.msra.mxu2 %v6703_v7  ;;  %v6238_v30 = vld [vmem:[%s9078_s0 + $0x1b4] sm:$0xf]  ;;  %v4676_v31 = vld [vmem:[%s9078_s0 + $0x21c] sm:$0xf0]  ;;  %v6431_v32 = vld [vmem:[%s9077_s1 + $0xf8] sm:$0xff]  ;;  %v4459_v33 = vor.u32 %v6197_v25, %v4458_v24  ;;  %v4683_v35 = vor.u32 %v6252_v29, %v4682_v28 }
   0xc   :  { %6626 = vmatpush.bf16.msra.mxu1 %v6708_v8  ;;  %v4679_v36 = vor.u32 %v6238_v30, %v4676_v31  ;;  %v6455_v37 = vld [vmem:[%s9077_s1 + $0x1b8] sm:$0xff]  ;;  %v6430_v39 = vld [vmem:[%s9077_s1 + $0xf0] sm:$0xff]  ;;  %v6429_v42 = vld [vmem:[%s9077_s1 + $0xe8] sm:$0xff] }
   0xd   :  { %v6447_v38 = vld [vmem:[%s9077_s1 + $0x178] sm:$0xff]  ;;  %v6454_v40 = vld [vmem:[%s9077_s1 + $0x1b0] sm:$0xff]  ;;  %v6453_v43 = vld [vmem:[%s9077_s1 + $0x1a8] sm:$0xff] }
   0xe   :  { %3060 = vmatpush.bf16.msra.mxu0 %v6404_v9  ;;  %6619 = vmatpush.bf16.msra.mxu3 %v6404_v9  ;;  %v6446_v41 = vld [vmem:[%s9077_s1 + $0x170] sm:$0xff]  ;;  %v6445_v44 = vld [vmem:[%s9077_s1 + $0x168] sm:$0xff]  ;;  %v4566_v45 = vld [vmem:[%s9078_s0 + $0xd8] sm:$0xf] }
   0xf   :  { %6635 = vmatpush.bf16.msra.mxu2 %v6718_v10  ;;  %v6428_v46 = vld [vmem:[%s9077_s1 + $0xe0] sm:$0xff]  ;;  %v4782_v48 = vld [vmem:[%s9078_s0 + $0x288] sm:$0xf]  ;;  %v6278_v49 = vld [vmem:[%s9078_s0 + $0x2f0] sm:$0xf0] }
  0x10   :  { %6627 = vmatpush.bf16.msra.mxu1 %v6723_v11  ;;  %v6224_v47 = vld [vmem:[%s9078_s0 + $0x140] sm:$0xf0]  ;;  %v4790_v50 = vld [vmem:[%s9078_s0 + $0x290] sm:$0xf]  ;;  %v6279_v51 = vld [vmem:[%s9078_s0 + $0x2f8] sm:$0xf0]  ;;  %v4783_v57 = vor.u32 %v6278_v49, %v4782_v48 }
  0x11   :  { %v6265_v52 = vld [vmem:[%s9078_s0 + $0x28c] sm:$0xf]  ;;  %v4784_v53 = vld [vmem:[%s9078_s0 + $0x2f4] sm:$0xf0]  ;;  %v6452_v54 = vld [vmem:[%s9077_s1 + $0x1a0] sm:$0xff]  ;;  %v4567_v56 = vor.u32 %v6224_v47, %v4566_v45  ;;  %v4791_v58 = vor.u32 %v6279_v51, %v4790_v50 }
  0x12   :  { %3061 = vmatpush.bf16.msra.mxu0 %v6403_v12  ;;  %6620 = vmatpush.bf16.msra.mxu3 %v6403_v12  ;;  %v6444_v55 = vld [vmem:[%s9077_s1 + $0x160] sm:$0xff]  ;;  %v4787_v59 = vor.u32 %v6265_v52, %v4784_v53  ;;  %v6427_v60 = vld [vmem:[%s9077_s1 + $0xd8] sm:$0xff]  ;;  %v6426_v63 = vld [vmem:[%s9077_s1 + $0xd0] sm:$0xff] }
  0x13   :  { %6636 = vmatpush.bf16.msra.mxu2 %v6733_v13  ;;  %v6451_v61 = vld [vmem:[%s9077_s1 + $0x198] sm:$0xff]  ;;  %v4890_v0 = vld [vmem:[%s9078_s0 + $0x360] sm:$0xf]  ;;  %v6184_v3 = vld [vmem:[%s9078_s0 + $0x4] sm:$0xf] }
  0x14   :  { %6628 = vmatpush.bf16.msra.mxu1 %v6738_v14  ;;  %v6443_v62 = vld [vmem:[%s9077_s1 + $0x158] sm:$0xff]  ;;  %v4898_v6 = vld [vmem:[%s9078_s0 + $0x368] sm:$0xf]  ;;  %v6292_v9 = vld [vmem:[%s9078_s0 + $0x364] sm:$0xf] }
  0x15   :  { %v6211_v24 = vld [vmem:[%s9078_s0 + $0xdc] sm:$0xf]  ;;  %v5006_v25 = vld [vmem:[%s9078_s0 + $0x440] sm:$0xf]  ;;  %v6333_v26 = vld [vmem:[%s9078_s0 + $0x4a8] sm:$0xf0] }
  0x16   :  { %3062 = vmatpush.bf16.msra.mxu0 %v6402_v15  ;;  %6621 = vmatpush.bf16.msra.mxu3 %v6402_v15  ;;  %v6319_v27 = vld [vmem:[%s9078_s0 + $0x43c] sm:$0xf]  ;;  %v5000_v28 = vld [vmem:[%s9078_s0 + $0x4a4] sm:$0xf0]  ;;  %v5007_v31 = vor.u32 %v6333_v26, %v5006_v25  ;;  %v6436_v50 = vld [vmem:[%s9077_s1 + $0x120] sm:$0xff] }
  0x17   :  { %6637 = vmatpush.bf16.msra.mxu2 %v6748_v16  ;;  %v6463_v47 = vld [vmem:[%s9077_s1 + $0x1f8] sm:$0xff]  ;;  %v5214_v52 = vld [vmem:[%s9078_s0 + $0x5e8] sm:$0xf]  ;;  %v6386_v53 = vld [vmem:[%s9078_s0 + $0x650] sm:$0xf0] }
  0x18   :  { %6629 = vmatpush.bf16.msra.mxu1 %v6753_v17  ;;  %v6487_v48 = vld [vmem:[%s9077_s1 + $0x2b8] sm:$0xff]  ;;  %v6461_v25 = vld [vmem:[%s9077_s1 + $0x1e8] sm:$0xff] }
  0x19   :  { %v6479_v49 = vld [vmem:[%s9077_s1 + $0x278] sm:$0xff]  ;;  %v6485_v26 = vld [vmem:[%s9077_s1 + $0x2a8] sm:$0xff] }
  0x1a   :  { %3063 = vmatpush.bf16.msra.mxu0 %v6401_v18  ;;  %6622 = vmatpush.bf16.msra.mxu3 %v6401_v18  ;;  %v6450_v18 = vld [vmem:[%s9077_s1 + $0x190] sm:$0xff]  ;;  %v6435_v51 = vld [vmem:[%s9077_s1 + $0x118] sm:$0xff] }
  0x1b   :  { %6638 = vmatpush.bf16.msra.mxu2 %v6763_v19 }
  0x1c   :  { %6630 = vmatpush.bf16.msra.mxu1 %v6768_v20 }
  0x1e   :  { %3064 = vmatpush.bf16.msra.mxu0 %v6400_v21  ;;  %6623 = vmatpush.bf16.msra.mxu3 %v6400_v21  ;;  %v6449_v21 = vld [vmem:[%s9077_s1 + $0x188] sm:$0xff] }
  0x1f   :  { %6639 = vmatpush.bf16.msra.mxu2 %v6776_v22 }
  0x20   :  { %6631 = vmatpush.bf16.msra.mxu1 %v6781_v23 }
  0x21   :  { %3065 = vmatmul.bf16.vlgmr.msra.gmra.mxu0 %v4459_v33  ;;  %3075 = vmatmul.bf16.vlgmr.msra.gmra.mxu3 %v4675_v34  ;;  %v6424_v33 = vld [vmem:[%s9077_s1 + $0xc0] sm:$0xff]  ;;  %v6439_v34 = vld [vmem:[%s9077_s1 + $0x138] sm:$0xff] }
  0x22   :  { %3204 = vmatpush.bf16.msrb.mxu3 %v6431_v32  ;;  %3106 = vmatpush.bf16.msrb.mxu0 %v6678_v2  ;;  %v6305_v2 = vld [vmem:[%s9078_s0 + $0x3c8] sm:$0xf0]  ;;  %v5003_v32 = vor.u32 %v6319_v27, %v5000_v28 }
  0x23   :  { %3173 = vmatmul.bf16.vlgmr.msra.gmra.mxu2 %v4683_v35  ;;  %3124 = vmatmul.bf16.vlgmr.msra.gmra.mxu1 %v4679_v36  ;;  %v4891_v12 = vor.u32 %v6305_v2, %v4890_v0  ;;  %v6440_v35 = vld [vmem:[%s9077_s1 + $0x140] sm:$0xff]  ;;  %v6359_v36 = vld [vmem:[%s9078_s0 + $0x578] sm:$0xf0]  ;;  %v6433_v2 = vld [vmem:[%s9077_s1 + $0x108] sm:$0xff] }
  0x24   :  { %3351 = vmatpush.bf16.msrb.mxu2 %v6455_v37  ;;  %3302 = vmatpush.bf16.msrb.mxu1 %v6447_v38  ;;  %v6198_v37 = vld [vmem:[%s9078_s0 + $0x70] sm:$0xf0]  ;;  %v5114_v38 = vld [vmem:[%s9078_s0 + $0x518] sm:$0xf]  ;;  %v6469_v27 = vld [vmem:[%s9077_s1 + $0x228] sm:$0xff] }
  0x25   :  { %v6477_v28 = vld [vmem:[%s9077_s1 + $0x268] sm:$0xff] }
  0x26   :  { %3107 = vmatpush.bf16.msrb.mxu0 %v6693_v5  ;;  %3205 = vmatpush.bf16.msrb.mxu3 %v6430_v39  ;;  %v4460_v5 = vld [vmem:[%s9078_s0 + $0x6c] sm:$0xf0]  ;;  %v6360_v39 = vld [vmem:[%s9078_s0 + $0x580] sm:$0xf0] }
  0x28   :  { %3352 = vmatpush.bf16.msrb.mxu2 %v6454_v40  ;;  %3303 = vmatpush.bf16.msrb.mxu1 %v6446_v41  ;;  %v6346_v40 = vld [vmem:[%s9078_s0 + $0x514] sm:$0xf]  ;;  %v5108_v41 = vld [vmem:[%s9078_s0 + $0x57c] sm:$0xf0] }
  0x29   :  { %v5111_v45 = vor.u32 %v6346_v40, %v5108_v41  ;;  %v6476_v40 = vld [vmem:[%s9077_s1 + $0x260] sm:$0xff]  ;;  %v6239_v41 = vld [vmem:[%s9078_s0 + $0x1bc] sm:$0xf] }
  0x2a   :  { %3108 = vmatpush.bf16.msrb.mxu0 %v6708_v8  ;;  %3206 = vmatpush.bf16.msrb.mxu3 %v6429_v42  ;;  %v6306_v8 = vld [vmem:[%s9078_s0 + $0x3d0] sm:$0xf0] }
  0x2b   :  { %v4899_v15 = vor.u32 %v6306_v8, %v4898_v6  ;;  %v6438_v42 = vld [vmem:[%s9077_s1 + $0x130] sm:$0xff]  ;;  %v6432_v8 = vld [vmem:[%s9077_s1 + $0x100] sm:$0xff] }
  0x2c   :  { %3353 = vmatpush.bf16.msrb.mxu2 %v6453_v43  ;;  %3304 = vmatpush.bf16.msrb.mxu1 %v6445_v44  ;;  %v6478_v6 = vld [vmem:[%s9077_s1 + $0x270] sm:$0xff] }
  0x2e   :  { %3109 = vmatpush.bf16.msrb.mxu0 %v6723_v11  ;;  %3207 = vmatpush.bf16.msrb.mxu3 %v6428_v46  ;;  %v4892_v11 = vld [vmem:[%s9078_s0 + $0x3cc] sm:$0xf0]  ;;  %v6437_v46 = vld [vmem:[%s9077_s1 + $0x128] sm:$0xff] }
  0x30   :  { %3354 = vmatpush.bf16.msrb.mxu2 %v6452_v54  ;;  %3305 = vmatpush.bf16.msrb.mxu1 %v6444_v55  ;;  %v4574_v54 = vld [vmem:[%s9078_s0 + $0xe0] sm:$0xf]  ;;  %v6225_v55 = vld [vmem:[%s9078_s0 + $0x148] sm:$0xf0] }
  0x31   :  { %3070 = vmatmul.bf16.gmra.mxu0 %v4567_v56  ;;  %3080 = vmatmul.bf16.gmra.mxu3 %v4783_v57  ;;  %v5222_v56 = vld [vmem:[%s9078_s0 + $0x5f0] sm:$0xf]  ;;  %v6387_v57 = vld [vmem:[%s9078_s0 + $0x658] sm:$0xf0] }
  0x32   :  { %3110 = vmatpush.bf16.msrb.mxu0 %v6738_v14  ;;  %3208 = vmatpush.bf16.msrb.mxu3 %v6427_v60  ;;  %v4463_v14 = vor.u32 %v6184_v3, %v4460_v5  ;;  %v6434_v60 = vld [vmem:[%s9077_s1 + $0x110] sm:$0xff] }
  0x33   :  { %3178 = vmatmul.bf16.gmra.mxu2 %v4791_v58  ;;  %3129 = vmatmul.bf16.gmra.mxu1 %v4787_v59  ;;  %v6373_v58 = vld [vmem:[%s9078_s0 + $0x5ec] sm:$0xf]  ;;  %v5216_v59 = vld [vmem:[%s9078_s0 + $0x654] sm:$0xf0]  ;;  %v6462_v3 = vld [vmem:[%s9077_s1 + $0x1f0] sm:$0xff] }
  0x34   :  { %3355 = vmatpush.bf16.msrb.mxu2 %v6451_v61  ;;  %3306 = vmatpush.bf16.msrb.mxu1 %v6443_v62  ;;  %v5215_v61 = vor.u32 %v6386_v53, %v5214_v52  ;;  %v4575_v62 = vor.u32 %v6225_v55, %v4574_v54  ;;  %v5219_v0 = vor.u32 %v6373_v58, %v5216_v59  ;;  %v6486_v5 = vld [vmem:[%s9077_s1 + $0x2b0] sm:$0xff]  ;;  %v6459_v54 = vld [vmem:[%s9077_s1 + $0x1d8] sm:$0xff] }
  0x36   :  { %3111 = vmatpush.bf16.msrb.mxu0 %v6753_v17  ;;  %3209 = vmatpush.bf16.msrb.mxu3 %v6426_v63  ;;  %v4895_v17 = vor.u32 %v6292_v9, %v4892_v11  ;;  %v5223_v63 = vor.u32 %v6387_v57, %v5222_v56  ;;  %v6471_v9 = vld [vmem:[%s9077_s1 + $0x238] sm:$0xff]  ;;  %v6185_v11 = vld [vmem:[%s9078_s0 + $0xc] sm:$0xf] }
  0x38   :  { %3356 = vmatpush.bf16.msrb.mxu2 %v6450_v18  ;;  %v4482_v18 = vld [vmem:[%s9078_s0 + $0x18] sm:$0xf] }
  0x3a   :  { %3112 = vmatpush.bf16.msrb.mxu0 %v6768_v20  ;;  %v6442_v20 = vld [vmem:[%s9077_s1 + $0x150] sm:$0xff] }
  0x3b   :  { %3307 = vmatpush.bf16.msrb.mxu1 %v6442_v20  ;;  %v6200_v20 = vld [vmem:[%s9078_s0 + $0x80] sm:$0xf0] }
  0x3c   :  { %3357 = vmatpush.bf16.msrb.mxu2 %v6449_v21  ;;  %v4476_v21 = vld [vmem:[%s9078_s0 + $0x7c] sm:$0xf0] }
  0x3e   :  { %3113 = vmatpush.bf16.msrb.mxu0 %v6781_v23  ;;  %v4998_v23 = vld [vmem:[%s9078_s0 + $0x438] sm:$0xf] }
  0x41   :  { %3085 = vmatmul.bf16.gmra.mxu3 %v4891_v12  ;;  %3114 = vmatmul.bf16.vlgmr.msrb.gmra.mxu0 %v4463_v14  ;;  %v4468_v12 = vld [vmem:[%s9078_s0 + $0x74] sm:$0xf0]  ;;  %v6470_v14 = vld [vmem:[%s9077_s1 + $0x230] sm:$0xff] }
  0x42   :  { %3155 = vmatpush.bf16.msra.mxu0 %v6673_v1  ;;  %v6425_v1 = vld [vmem:[%s9077_s1 + $0xc8] sm:$0xff] }
  0x43   :  { %3183 = vmatmul.bf16.gmra.mxu2 %v4899_v15  ;;  %3134 = vmatmul.bf16.gmra.mxu1 %v4895_v17  ;;  %v4474_v15 = vld [vmem:[%s9078_s0 + $0x10] sm:$0xf]  ;;  %v6199_v17 = vld [vmem:[%s9078_s0 + $0x78] sm:$0xf0] }
  0x44   :  { %3210 = vmatpush.bf16.msrb.mxu3 %v6425_v1  ;;  %v6186_v1 = vld [vmem:[%s9078_s0 + $0x14] sm:$0xf] }
  0x46   :  { %3156 = vmatpush.bf16.msra.mxu0 %v6688_v4  ;;  %v6332_v4 = vld [vmem:[%s9078_s0 + $0x4a0] sm:$0xf0] }
  0x47   :  { %v4999_v29 = vor.u32 %v6332_v4, %v4998_v23  ;;  %v4471_v23 = vor.u32 %v6185_v11, %v4468_v12  ;;  %v4475_v4 = vor.u32 %v6199_v17, %v4474_v15  ;;  %v4800_v11 = vld [vmem:[%s9078_s0 + $0x304] sm:$0xf0] }
  0x48   :  { %3211 = vmatpush.bf16.msrb.mxu3 %v6424_v33  ;;  %v6227_v33 = vld [vmem:[%s9078_s0 + $0x158] sm:$0xf0] }
  0x4a   :  { %3157 = vmatpush.bf16.msra.mxu0 %v6703_v7  ;;  %v4568_v7 = vld [vmem:[%s9078_s0 + $0x144] sm:$0xf0] }
  0x4b   :  { %v4571_v30 = vor.u32 %v6211_v24, %v4568_v7  ;;  %v4483_v24 = vor.u32 %v6200_v20, %v4482_v18  ;;  %v4479_v7 = vor.u32 %v6186_v1, %v4476_v21 }
  0x4c   :  { %3400 = vmatpush.bf16.msra.mxu3 %v6463_v47  ;;  %v4692_v47 = vld [vmem:[%s9078_s0 + $0x22c] sm:$0xf0] }
  0x4e   :  { %3158 = vmatpush.bf16.msra.mxu0 %v6718_v10  ;;  %v6441_v10 = vld [vmem:[%s9077_s1 + $0x148] sm:$0xff] }
  0x4f   :  { %3308 = vmatpush.bf16.msrb.mxu1 %v6441_v10  ;;  %v4590_v10 = vld [vmem:[%s9078_s0 + $0xf0] sm:$0xf] }
  0x50   :  { %3401 = vmatpush.bf16.msra.mxu3 %v6462_v3  ;;  %v4798_v3 = vld [vmem:[%s9078_s0 + $0x298] sm:$0xf] }
  0x51   :  { %3090 = vmatmul.bf16.gmra.mxu3 %v4999_v29  ;;  %3119 = vmatmul.bf16.gmra.mxu0 %v4571_v30  ;;  %v6212_v29 = vld [vmem:[%s9078_s0 + $0xe4] sm:$0xf]  ;;  %v4576_v30 = vld [vmem:[%s9078_s0 + $0x14c] sm:$0xf0] }
  0x52   :  { %3159 = vmatpush.bf16.msra.mxu0 %v6733_v13  ;;  %v6448_v13 = vld [vmem:[%s9077_s1 + $0x180] sm:$0xff] }
  0x53   :  { %3188 = vmatmul.bf16.gmra.mxu2 %v5007_v31  ;;  %3139 = vmatmul.bf16.gmra.mxu1 %v5003_v32  ;;  %v4582_v31 = vld [vmem:[%s9078_s0 + $0xe8] sm:$0xf]  ;;  %v6226_v32 = vld [vmem:[%s9078_s0 + $0x150] sm:$0xf0] }
  0x54   :  { %3358 = vmatpush.bf16.msrb.mxu2 %v6448_v13  ;;  %3309 = vmatpush.bf16.msrb.mxu1 %v6440_v35  ;;  %v6213_v13 = vld [vmem:[%s9078_s0 + $0xec] sm:$0xf]  ;;  %v4579_v35 = vor.u32 %v6212_v29, %v4576_v30  ;;  %v6482_v30 = vld [vmem:[%s9077_s1 + $0x290] sm:$0xff] }
  0x55   :  { %3402 = vmatpush.bf16.msra.mxu3 %v6461_v25 }
  0x56   :  { %3160 = vmatpush.bf16.msra.mxu0 %v6748_v16  ;;  %v5106_v16 = vld [vmem:[%s9078_s0 + $0x510] sm:$0xf] }
  0x57   :  { %v5107_v43 = vor.u32 %v6359_v36, %v5106_v16  ;;  %v4583_v16 = vor.u32 %v6226_v32, %v4582_v31  ;;  %v4591_v36 = vor.u32 %v6227_v33, %v4590_v10  ;;  %v6466_v31 = vld [vmem:[%s9077_s1 + $0x210] sm:$0xff]  ;;  %v6293_v10 = vld [vmem:[%s9078_s0 + $0x36c] sm:$0xf]  ;;  %v4900_v33 = vld [vmem:[%s9078_s0 + $0x3d4] sm:$0xf0] }
  0x58   :  { %3547 = vmatpush.bf16.msra.mxu2 %v6487_v48  ;;  %3498 = vmatpush.bf16.msra.mxu1 %v6479_v49  ;;  %v6474_v32 = vld [vmem:[%s9077_s1 + $0x250] sm:$0xff] }
  0x5a   :  { %3161 = vmatpush.bf16.msra.mxu0 %v6763_v19  ;;  %v4466_v19 = vld [vmem:[%s9078_s0 + $0x8] sm:$0xf] }
  0x5b   :  { %v4467_v44 = vor.u32 %v6198_v37, %v4466_v19  ;;  %v6460_v37 = vld [vmem:[%s9077_s1 + $0x1e0] sm:$0xff] }
  0x5c   :  { %3548 = vmatpush.bf16.msra.mxu2 %v6486_v5  ;;  %3499 = vmatpush.bf16.msra.mxu1 %v6478_v6  ;;  %v6280_v5 = vld [vmem:[%s9078_s0 + $0x300] sm:$0xf0]  ;;  %v4806_v6 = vld [vmem:[%s9078_s0 + $0x2a0] sm:$0xf] }
  0x5d   :  { %3403 = vmatpush.bf16.msra.mxu3 %v6460_v37  ;;  %v4799_v18 = vor.u32 %v6280_v5, %v4798_v3  ;;  %v5016_v3 = vld [vmem:[%s9078_s0 + $0x4b4] sm:$0xf0] }
  0x5e   :  { %3162 = vmatpush.bf16.msra.mxu0 %v6776_v22  ;;  %v5115_v22 = vor.u32 %v6360_v39, %v5114_v38  ;;  %v6484_v38 = vld [vmem:[%s9077_s1 + $0x2a0] sm:$0xff] }
  0x5f   :  { %v6468_v39 = vld [vmem:[%s9077_s1 + $0x220] sm:$0xff] }
  0x60   :  { %3549 = vmatpush.bf16.msra.mxu2 %v6485_v26  ;;  %3500 = vmatpush.bf16.msra.mxu1 %v6477_v28 }
  0x61   :  { %3095 = vmatmul.bf16.gmra.mxu3 %v5107_v43  ;;  %3163 = vmatmul.bf16.vlgmr.msra.gmra.mxu0 %v4467_v44  ;;  %v4690_v43 = vld [vmem:[%s9078_s0 + $0x1c0] sm:$0xf]  ;;  %v6253_v44 = vld [vmem:[%s9078_s0 + $0x228] sm:$0xf0] }
  0x62   :  { %3253 = vmatpush.bf16.msrb.mxu0 %v6439_v34  ;;  %v4584_v34 = vld [vmem:[%s9078_s0 + $0x154] sm:$0xf0]  ;;  %v4691_v49 = vor.u32 %v6253_v44, %v4690_v43  ;;  %3404 = vmatpush.bf16.msra.mxu3 %v6459_v54 }
  0x63   :  { %3193 = vmatmul.bf16.gmra.mxu2 %v5115_v22  ;;  %3144 = vmatmul.bf16.gmra.mxu1 %v5111_v45  ;;  %v4587_v19 = vor.u32 %v6213_v13, %v4584_v34  ;;  %v4698_v22 = vld [vmem:[%s9078_s0 + $0x1c8] sm:$0xf]  ;;  %v6254_v45 = vld [vmem:[%s9078_s0 + $0x230] sm:$0xf0]  ;;  %v4906_v13 = vld [vmem:[%s9078_s0 + $0x370] sm:$0xf] }
  0x64   :  { %3550 = vmatpush.bf16.msra.mxu2 %v6484_v38  ;;  %3501 = vmatpush.bf16.msra.mxu1 %v6476_v40  ;;  %v6307_v34 = vld [vmem:[%s9078_s0 + $0x3d8] sm:$0xf0]  ;;  %v4903_v40 = vor.u32 %v6293_v10, %v4900_v33  ;;  %v5122_v33 = vld [vmem:[%s9078_s0 + $0x520] sm:$0xf] }
  0x65   :  { %v6347_v10 = vld [vmem:[%s9078_s0 + $0x51c] sm:$0xf] }
  0x66   :  { %3254 = vmatpush.bf16.msrb.mxu0 %v6438_v42  ;;  %v4684_v42 = vld [vmem:[%s9078_s0 + $0x224] sm:$0xf0] }
  0x67   :  { %v4687_v48 = vor.u32 %v6239_v41, %v4684_v42  ;;  %v4907_v41 = vor.u32 %v6307_v34, %v4906_v13  ;;  %v6361_v13 = vld [vmem:[%s9078_s0 + $0x588] sm:$0xf0]  ;;  %v5130_v34 = vld [vmem:[%s9078_s0 + $0x528] sm:$0xf] }
  0x6a   :  { %3255 = vmatpush.bf16.msrb.mxu0 %v6437_v46  ;;  %v6240_v46 = vld [vmem:[%s9078_s0 + $0x1c4] sm:$0xf] }
  0x6b   :  { %v4695_v52 = vor.u32 %v6240_v46, %v4692_v47  ;;  %v6457_v47 = vld [vmem:[%s9077_s1 + $0x1c8] sm:$0xff] }
  0x6e   :  { %3256 = vmatpush.bf16.msrb.mxu0 %v6436_v50 }
  0x71   :  { %3100 = vmatmul.bf16.gmra.mxu3 %v5215_v61  ;;  %3168 = vmatmul.bf16.gmra.mxu0 %v4575_v62  ;;  %v6483_v61 = vld [vmem:[%s9077_s1 + $0x298] sm:$0xff] }
  0x72   :  { %3257 = vmatpush.bf16.msrb.mxu0 %v6435_v51  ;;  %v4699_v51 = vor.u32 %v6254_v45, %v4698_v22  ;;  %v6467_v62 = vld [vmem:[%s9077_s1 + $0x218] sm:$0xff]  ;;  %3551 = vmatpush.bf16.msra.mxu2 %v6483_v61  ;;  %v5014_v61 = vld [vmem:[%s9078_s0 + $0x448] sm:$0xf] }
  0x73   :  { %3198 = vmatmul.bf16.gmra.mxu2 %v5223_v63  ;;  %3149 = vmatmul.bf16.gmra.mxu1 %v5219_v0  ;;  %v6475_v63 = vld [vmem:[%s9077_s1 + $0x258] sm:$0xff]  ;;  %v6266_v0 = vld [vmem:[%s9078_s0 + $0x294] sm:$0xf] }
  0x74   :  { %3502 = vmatpush.bf16.msra.mxu1 %v6475_v63  ;;  %v5022_v63 = vld [vmem:[%s9078_s0 + $0x450] sm:$0xf] }
  0x76   :  { %3258 = vmatpush.bf16.msrb.mxu0 %v6434_v60  ;;  %3552 = vmatpush.bf16.msra.mxu2 %v6482_v30  ;;  %v6480_v30 = vld [vmem:[%s9077_s1 + $0x280] sm:$0xff] }
  0x78   :  { %3503 = vmatpush.bf16.msra.mxu1 %v6474_v32  ;;  %v6472_v32 = vld [vmem:[%s9077_s1 + $0x240] sm:$0xff] }
  0x7a   :  { %3259 = vmatpush.bf16.msrb.mxu0 %v6433_v2  ;;  %v4792_v2 = vld [vmem:[%s9078_s0 + $0x2fc] sm:$0xf0] }
  0x7b   :  { %v4795_v17 = vor.u32 %v6266_v0, %v4792_v2  ;;  %v6335_v0 = vld [vmem:[%s9078_s0 + $0x4b8] sm:$0xf0]  ;;  %v6321_v2 = vld [vmem:[%s9078_s0 + $0x44c] sm:$0xf] }
  0x7e   :  { %3260 = vmatpush.bf16.msrb.mxu0 %v6432_v8  ;;  %v6281_v8 = vld [vmem:[%s9078_s0 + $0x308] sm:$0xf0] }
  0x7f   :  { %v4807_v1 = vor.u32 %v6281_v8, %v4806_v6 }
  0x81   :  { %3212 = vmatmul.bf16.vlgmr.msrb.gmra.mxu3 %v4471_v23  ;;  %3261 = vmatmul.bf16.vlgmr.msrb.gmra.mxu0 %v4475_v4 }
  0x82   :  { %3449 = vmatpush.bf16.msra.mxu0 %v6471_v9  ;;  %v6267_v9 = vld [vmem:[%s9078_s0 + $0x29c] sm:$0xf] }
  0x83   :  { %3359 = vmatmul.bf16.vlgmr.msrb.gmra.mxu2 %v4483_v24  ;;  %3310 = vmatmul.bf16.vlgmr.msrb.gmra.mxu1 %v4479_v7  ;;  %v4803_v21 = vor.u32 %v6267_v9, %v4800_v11  ;;  %v6458_v24 = vld [vmem:[%s9077_s1 + $0x1d0] sm:$0xff] }
  0x84   :  { %3405 = vmatpush.bf16.msra.mxu3 %v6458_v24 }
  0x86   :  { %3450 = vmatpush.bf16.msra.mxu0 %v6470_v14 }
  0x88   :  { %3406 = vmatpush.bf16.msra.mxu3 %v6457_v47 }
  0x8a   :  { %3451 = vmatpush.bf16.msra.mxu0 %v6469_v27 }
  0x8e   :  { %3452 = vmatpush.bf16.msra.mxu0 %v6468_v39 }
  0x91   :  { %3217 = vmatmul.bf16.gmra.mxu3 %v4579_v35  ;;  %3266 = vmatmul.bf16.gmra.mxu0 %v4583_v16  ;;  %v4914_v35 = vld [vmem:[%s9078_s0 + $0x378] sm:$0xf]  ;;  %v6308_v16 = vld [vmem:[%s9078_s0 + $0x3e0] sm:$0xf0] }
  0x92   :  { %3453 = vmatpush.bf16.msra.mxu0 %v6467_v62  ;;  %v4915_v43 = vor.u32 %v6308_v16, %v4914_v35  ;;  %v6334_v62 = vld [vmem:[%s9078_s0 + $0x4b0] sm:$0xf0]  ;;  %v6348_v16 = vld [vmem:[%s9078_s0 + $0x524] sm:$0xf] }
  0x93   :  { %3364 = vmatmul.bf16.gmra.mxu2 %v4591_v36  ;;  %3315 = vmatmul.bf16.gmra.mxu1 %v4587_v19  ;;  %v6294_v36 = vld [vmem:[%s9078_s0 + $0x374] sm:$0xf]  ;;  %v4908_v19 = vld [vmem:[%s9078_s0 + $0x3dc] sm:$0xf0]  ;;  %v5015_v11 = vor.u32 %v6334_v62, %v5014_v61  ;;  %v6388_v61 = vld [vmem:[%s9078_s0 + $0x660] sm:$0xf0] }
  0x94   :  { %v4911_v44 = vor.u32 %v6294_v36, %v4908_v19  ;;  %v6362_v35 = vld [vmem:[%s9078_s0 + $0x590] sm:$0xf0]  ;;  %v5124_v36 = vld [vmem:[%s9078_s0 + $0x58c] sm:$0xf0]  ;;  %v6389_v62 = vld [vmem:[%s9078_s0 + $0x668] sm:$0xf0] }
  0x96   :  { %3454 = vmatpush.bf16.msra.mxu0 %v6466_v31  ;;  %v6464_v31 = vld [vmem:[%s9077_s1 + $0x200] sm:$0xff] }
  0x9e   :  { %v7163_v50 = vpop.f32.mrf.mxu0 }
  0xa0   :  { %v3125_v53 = vpop.f32.mrf.mxu1 }
  0xa1   :  { %3222 = vmatmul.bf16.gmra.mxu3 %v4687_v48  ;;  %3271 = vmatmul.bf16.gmra.mxu0 %v4691_v49 }
  0xa3   :  { %3369 = vmatmul.bf16.gmra.mxu2 %v4699_v51  ;;  %3320 = vmatmul.bf16.gmra.mxu1 %v4695_v52 }
  0xa4   :  { %v3076_v55 = vpop.f32.mrf.mxu3 }
  0xa5   :  { %v3126_v56 = vadd.f32 %v3125_v53, %v3076_v55  ;;  %v6481_v55 = vld [vmem:[%s9077_s1 + $0x288] sm:$0xff] }
  0xa6   :  { %v3174_v57 = vpop.f32.mrf.mxu2  ;;  %v7168_v58 = vpop.f32.mrf.mxu0  ;;  %3553 = vmatpush.bf16.msra.mxu2 %v6481_v55 }
  0xa7   :  { %v7170_v59 = vadd.f32 %v3174_v57, %v3126_v56  ;;  %v6465_v56 = vld [vmem:[%s9077_s1 + $0x208] sm:$0xff] }
  0xa8   :  { %v3127_v60 = vpop.f32.mrf.mxu1  ;;  %v6473_v57 = vld [vmem:[%s9077_s1 + $0x248] sm:$0xff]  ;;  %3455 = vmatpush.bf16.msra.mxu0 %v6465_v56 }
  0xa9   :  { %3504 = vmatpush.bf16.msra.mxu1 %v6473_v57  ;;  %v6374_v57 = vld [vmem:[%s9078_s0 + $0x5f4] sm:$0xf] }
  0xaa   :  { %3554 = vmatpush.bf16.msra.mxu2 %v6480_v30 }
  0xac   :  { %v3078_v12 = vpop.f32.mrf.mxu3  ;;  %3456 = vmatpush.bf16.msra.mxu0 %v6464_v31 }
  0xad   :  { %v3128_v14 = vadd.f32 %v3127_v60, %v3078_v12  ;;  %v6320_v60 = vld [vmem:[%s9078_s0 + $0x444] sm:$0xf]  ;;  %3505 = vmatpush.bf16.msra.mxu1 %v6472_v32 }
  0xae   :  { %v3176_v15 = vpop.f32.mrf.mxu2  ;;  %v7205_v20 = vpop.f32.mrf.mxu0 }
  0xaf   :  { %v7207_v23 = vadd.f32 %v3176_v15, %v3128_v14  ;;  %v5023_v14 = vor.u32 %v6335_v0, %v5022_v63  ;;  %v5019_v15 = vor.u32 %v6321_v2, %v5016_v3  ;;  %v6375_v63 = vld [vmem:[%s9078_s0 + $0x5fc] sm:$0xf]  ;;  %v5232_v0 = vld [vmem:[%s9078_s0 + $0x664] sm:$0xf0] }
  0xb0   :  { %v3130_v4 = vpop.f32.mrf.mxu1  ;;  %v6519_v2 = vld [vmem:[%s9077_s1 + $0x3b8] sm:$0xff] }
  0xb1   :  { %3227 = vmatmul.bf16.gmra.mxu3 %v4795_v17  ;;  %3276 = vmatmul.bf16.gmra.mxu0 %v4799_v18  ;;  %v6503_v3 = vld [vmem:[%s9077_s1 + $0x338] sm:$0xff] }
  0xb2   :  { %3743 = vmatpush.bf16.msrb.mxu2 %v6519_v2  ;;  %3645 = vmatpush.bf16.msrb.mxu0 %v6503_v3  ;;  %v4598_v2 = vld [vmem:[%s9078_s0 + $0xf8] sm:$0xf]  ;;  %v4606_v3 = vld [vmem:[%s9078_s0 + $0x100] sm:$0xf] }
  0xb3   :  { %3374 = vmatmul.bf16.gmra.mxu2 %v4807_v1  ;;  %3325 = vmatmul.bf16.gmra.mxu1 %v4803_v21  ;;  %v6456_v21 = vld [vmem:[%s9077_s1 + $0x1c0] sm:$0xff] }
  0xb4   :  { %v3081_v7 = vpop.f32.mrf.mxu3  ;;  %3407 = vmatpush.bf16.msra.mxu3 %v6456_v21 }
  0xb5   :  { %v3131_v25 = vadd.f32 %v3130_v4, %v3081_v7 }
  0xb6   :  { %v3179_v26 = vpop.f32.mrf.mxu2  ;;  %v7212_v27 = vpop.f32.mrf.mxu0 }
  0xb7   :  { %v7214_v28 = vadd.f32 %v3179_v26, %v3131_v25 }
  0xb8   :  { %v3132_v29 = vpop.f32.mrf.mxu1 }
  0xbc   :  { %v3083_v37 = vpop.f32.mrf.mxu3 }
  0xbd   :  { %v3133_v38 = vadd.f32 %v3132_v29, %v3083_v37 }
  0xbe   :  { %v3181_v39 = vpop.f32.mrf.mxu2  ;;  %v3115_v42 = vpop.f32.mrf.mxu0 }
  0xbf   :  { %v7249_v22 = vadd.f32 %v3181_v39, %v3133_v38  ;;  %v7252_v45 = vadd.f32 %v3115_v42, %v7163_v50  ;;  %v5131_v42 = vor.u32 %v6362_v35, %v5130_v34  ;;  %v6201_v34 = vld [vmem:[%s9078_s0 + $0x88] sm:$0xf0]  ;;  %v6202_v35 = vld [vmem:[%s9078_s0 + $0x90] sm:$0xf0] }
  0xc0   :  { %v3135_v46 = vpop.f32.mrf.mxu1 }
  0xc1   :  { %3232 = vmatmul.bf16.gmra.mxu3 %v4903_v40  ;;  %3281 = vmatmul.bf16.gmra.mxu0 %v4907_v41  ;;  %v5123_v40 = vor.u32 %v6361_v13, %v5122_v33  ;;  %v4484_v33 = vld [vmem:[%s9078_s0 + $0x84] sm:$0xf0]  ;;  %v4490_v13 = vld [vmem:[%s9078_s0 + $0x20] sm:$0xf] }
  0xc3   :  { %3379 = vmatmul.bf16.gmra.mxu2 %v4915_v43  ;;  %3330 = vmatmul.bf16.gmra.mxu1 %v4911_v44  ;;  %v5127_v43 = vor.u32 %v6348_v16, %v5124_v36  ;;  %v6188_v16 = vld [vmem:[%s9078_s0 + $0x24] sm:$0xf]  ;;  %v4492_v36 = vld [vmem:[%s9078_s0 + $0x8c] sm:$0xf0] }
  0xc4   :  { %v3086_v48 = vpop.f32.mrf.mxu3 }
  0xc5   :  { %v3136_v49 = vadd.f32 %v3135_v46, %v3086_v48  ;;  %v6495_v48 = vld [vmem:[%s9077_s1 + $0x2f8] sm:$0xff] }
  0xc6   :  { %v3184_v51 = vpop.f32.mrf.mxu2  ;;  %v3117_v52 = vpop.f32.mrf.mxu0  ;;  %3596 = vmatpush.bf16.msrb.mxu3 %v6495_v48 }
  0xc7   :  { %v7257_v53 = vadd.f32 %v3184_v51, %v3136_v49  ;;  %v7260_v54 = vadd.f32 %v3117_v52, %v7168_v58  ;;  %v5008_v58 = vld [vmem:[%s9078_s0 + $0x4ac] sm:$0xf0] }
  0xc8   :  { %v3137_v50 = vpop.f32.mrf.mxu1  ;;  %v5011_v9 = vor.u32 %v6320_v60, %v5008_v58  ;;  %v5224_v60 = vld [vmem:[%s9078_s0 + $0x65c] sm:$0xf0]  ;;  %v5230_v58 = vld [vmem:[%s9078_s0 + $0x5f8] sm:$0xf] }
  0xcc   :  { %v3088_v5 = vpop.f32.mrf.mxu3 }
  0xcd   :  { %v3138_v6 = vadd.f32 %v3137_v50, %v3088_v5  ;;  %v6511_v5 = vld [vmem:[%s9077_s1 + $0x378] sm:$0xff] }
  0xce   :  { %v3186_v8 = vpop.f32.mrf.mxu2  ;;  %v3120_v12 = vpop.f32.mrf.mxu0  ;;  %3694 = vmatpush.bf16.msrb.mxu1 %v6511_v5  ;;  %v6229_v5 = vld [vmem:[%s9078_s0 + $0x168] sm:$0xf0] }
  0xcf   :  { %v7295_v17 = vadd.f32 %v3186_v8, %v3138_v6  ;;  %v7298_v18 = vadd.f32 %v3120_v12, %v7205_v20  ;;  %v5231_v12 = vor.u32 %v6388_v61, %v5230_v58 }
  0xd0   :  { %v3140_v1 = vpop.f32.mrf.mxu1 }
  0xd1   :  { %3237 = vmatmul.bf16.gmra.mxu3 %v5011_v9  ;;  %3286 = vmatmul.bf16.gmra.mxu0 %v5015_v11  ;;  %v5227_v11 = vor.u32 %v6374_v57, %v5224_v60 }
  0xd3   :  { %3384 = vmatmul.bf16.gmra.mxu2 %v5023_v14  ;;  %3335 = vmatmul.bf16.gmra.mxu1 %v5019_v15 }
  0xd4   :  { %v3091_v4 = vpop.f32.mrf.mxu3 }
  0xd5   :  { %v3141_v24 = vadd.f32 %v3140_v1, %v3091_v4  ;;  %v5235_v1 = vor.u32 %v6375_v63, %v5232_v0  ;;  %v4592_v63 = vld [vmem:[%s9078_s0 + $0x15c] sm:$0xf0] }
  0xd6   :  { %v3189_v7 = vpop.f32.mrf.mxu2  ;;  %v3122_v25 = vpop.f32.mrf.mxu0 }
  0xd7   :  { %v7303_v26 = vadd.f32 %v3189_v7, %v3141_v24  ;;  %v7306_v29 = vadd.f32 %v3122_v25, %v7212_v27  ;;  %v5116_v27 = vld [vmem:[%s9078_s0 + $0x584] sm:$0xf0]  ;;  %v6494_v7 = vld [vmem:[%s9077_s1 + $0x2f0] sm:$0xff] }
  0xd8   :  { %v3142_v20 = vpop.f32.mrf.mxu1  ;;  %v5119_v39 = vor.u32 %v6347_v10, %v5116_v27  ;;  %3597 = vmatpush.bf16.msrb.mxu3 %v6494_v7  ;;  %v6187_v27 = vld [vmem:[%s9078_s0 + $0x1c] sm:$0xf] }
  0xdc   :  { %v3093_v19 = vpop.f32.mrf.mxu3 }
  0xdd   :  { %v3143_v37 = vadd.f32 %v3142_v20, %v3093_v19  ;;  %v6518_v19 = vld [vmem:[%s9077_s1 + $0x3b0] sm:$0xff] }
  0xde   :  { %v3191_v38 = vpop.f32.mrf.mxu2  ;;  %v3164_v41 = vpop.f32.mrf.mxu0  ;;  %3744 = vmatpush.bf16.msrb.mxu2 %v6518_v19 }
  0xdf   :  { %v7341_v44 = vadd.f32 %v3191_v38, %v3143_v37  ;;  %v7344_v46 = vadd.f32 %v3164_v41, %v7252_v45  ;;  %v6502_v37 = vld [vmem:[%s9077_s1 + $0x330] sm:$0xff] }
  0xe0   :  { %v3145_v47 = vpop.f32.mrf.mxu1  ;;  %v6510_v38 = vld [vmem:[%s9077_s1 + $0x370] sm:$0xff]  ;;  %3646 = vmatpush.bf16.msrb.mxu0 %v6502_v37  ;;  %v6241_v37 = vld [vmem:[%s9078_s0 + $0x1cc] sm:$0xf] }
  0xe1   :  { %3242 = vmatmul.bf16.gmra.mxu3 %v5119_v39  ;;  %3291 = vmatmul.bf16.gmra.mxu0 %v5123_v40 }
  0xe2   :  { %3695 = vmatpush.bf16.msrb.mxu1 %v6510_v38  ;;  %v4700_v38 = vld [vmem:[%s9078_s0 + $0x234] sm:$0xf0] }
  0xe3   :  { %3389 = vmatmul.bf16.gmra.mxu2 %v5131_v42  ;;  %3340 = vmatmul.bf16.gmra.mxu1 %v5127_v43  ;;  %v4487_v42 = vor.u32 %v6187_v27, %v4484_v33  ;;  %v4491_v43 = vor.u32 %v6201_v34, %v4490_v13 }
  0xe4   :  { %v3096_v49 = vpop.f32.mrf.mxu3 }
  0xe5   :  { %v3146_v51 = vadd.f32 %v3145_v47, %v3096_v49  ;;  %v4495_v49 = vor.u32 %v6188_v16, %v4492_v36 }
  0xe6   :  { %v3194_v52 = vpop.f32.mrf.mxu2  ;;  %v3166_v50 = vpop.f32.mrf.mxu0 }
  0xe7   :  { %v7349_v55 = vadd.f32 %v3194_v52, %v3146_v51  ;;  %v7352_v56 = vadd.f32 %v3166_v50, %v7260_v54  ;;  %v5238_v54 = vld [vmem:[%s9078_s0 + $0x600] sm:$0xf]  ;;  %v6493_v50 = vld [vmem:[%s9077_s1 + $0x2e8] sm:$0xff] }
  0xe8   :  { %v3147_v45 = vpop.f32.mrf.mxu1  ;;  %v5239_v15 = vor.u32 %v6389_v62, %v5238_v54  ;;  %3598 = vmatpush.bf16.msrb.mxu3 %v6493_v50  ;;  %v6214_v62 = vld [vmem:[%s9078_s0 + $0xf4] sm:$0xf]  ;;  %v6508_v50 = vld [vmem:[%s9077_s1 + $0x360] sm:$0xff] }
  0xe9   :  { %v4595_v7 = vor.u32 %v6214_v62, %v4592_v63 }
  0xec   :  { %v3098_v6 = vpop.f32.mrf.mxu3 }
  0xed   :  { %v3148_v8 = vadd.f32 %v3147_v45, %v3098_v6  ;;  %v6215_v6 = vld [vmem:[%s9078_s0 + $0xfc] sm:$0xf] }
  0xee   :  { %v3196_v9 = vpop.f32.mrf.mxu2  ;;  %v3169_v14 = vpop.f32.mrf.mxu0 }
  0xef   :  { %v7387_v21 = vadd.f32 %v3196_v9, %v3148_v8  ;;  %v7390_v4 = vadd.f32 %v3169_v14, %v7298_v18  ;;  %v4600_v8 = vld [vmem:[%s9078_s0 + $0x164] sm:$0xf0] }
  0xf0   :  { %v3150_v24 = vpop.f32.mrf.mxu1  ;;  %v6509_v14 = vld [vmem:[%s9077_s1 + $0x368] sm:$0xff] }
  0xf1   :  { %3247 = vmatmul.bf16.gmra.mxu3 %v5227_v11  ;;  %3296 = vmatmul.bf16.gmra.mxu0 %v5231_v12  ;;  %v6517_v11 = vld [vmem:[%s9077_s1 + $0x3a8] sm:$0xff] }
  0xf2   :  { %v6501_v12 = vld [vmem:[%s9077_s1 + $0x328] sm:$0xff]  ;;  %3745 = vmatpush.bf16.msrb.mxu2 %v6517_v11  ;;  %3696 = vmatpush.bf16.msrb.mxu1 %v6509_v14 }
  0xf3   :  { %3394 = vmatmul.bf16.gmra.mxu2 %v5239_v15  ;;  %3345 = vmatmul.bf16.gmra.mxu1 %v5235_v1 }
  0xf4   :  { %v3101_v25 = vpop.f32.mrf.mxu3  ;;  %3647 = vmatpush.bf16.msrb.mxu0 %v6501_v12 }
  0xf5   :  { %v3151_v20 = vadd.f32 %v3150_v24, %v3101_v25 }
  0xf6   :  { %v3199_v30 = vpop.f32.mrf.mxu2  ;;  %v3171_v31 = vpop.f32.mrf.mxu0  ;;  %3697 = vmatpush.bf16.msrb.mxu1 %v6508_v50 }
  0xf7   :  { %v7395_v32 = vadd.f32 %v3199_v30, %v3151_v20  ;;  %v7398_v10 = vadd.f32 %v3171_v31, %v7306_v29  ;;  %v4498_v29 = vld [vmem:[%s9078_s0 + $0x28] sm:$0xf]  ;;  %v4607_v30 = vor.u32 %v6229_v5, %v4606_v3  ;;  %v4603_v31 = vor.u32 %v6215_v6, %v4600_v8 }
  0xf8   :  { %v3152_v18 = vpop.f32.mrf.mxu1  ;;  %v4499_v48 = vor.u32 %v6202_v35, %v4498_v29 }
  0xfc   :  { %v3103_v39 = vpop.f32.mrf.mxu3 }
  0xfd   :  { %v3153_v40 = vadd.f32 %v3152_v18, %v3103_v39 }
  0xfe   :  { %v3201_v41 = vpop.f32.mrf.mxu2  ;;  %v3262_v47 = vpop.f32.mrf.mxu0 }
  0xff   :  { %v7433_v51 = vadd.f32 %v3201_v41, %v3153_v40  ;;  %v4706_v40 = vld [vmem:[%s9078_s0 + $0x1d0] sm:$0xf]  ;;  %v4714_v41 = vld [vmem:[%s9078_s0 + $0x1d8] sm:$0xf] }
 0x100   :  { %v3311_v52 = vpop.f32.mrf.mxu1 }
 0x101   :  { %3408 = vmatmul.bf16.vlgmr.msra.gmra.mxu3 %v4487_v42  ;;  %3457 = vmatmul.bf16.vlgmr.msra.gmra.mxu0 %v4491_v43  ;;  %v6256_v42 = vld [vmem:[%s9078_s0 + $0x240] sm:$0xf0]  ;;  %v6242_v43 = vld [vmem:[%s9078_s0 + $0x1d4] sm:$0xf] }
 0x102   :  { %v4715_v62 = vor.u32 %v6256_v42, %v4714_v41 }
 0x103   :  { %3555 = vmatmul.bf16.vlgmr.msra.gmra.mxu2 %v4499_v48  ;;  %3506 = vmatmul.bf16.vlgmr.msra.gmra.mxu1 %v4495_v49  ;;  %v6516_v49 = vld [vmem:[%s9077_s1 + $0x3a0] sm:$0xff] }
 0x104   :  { %v3213_v45 = vpop.f32.mrf.mxu3  ;;  %3746 = vmatpush.bf16.msrb.mxu2 %v6516_v49 }
 0x105   :  { %v3214_v57 = vadd.f32 %v3213_v45, %v7344_v46  ;;  %v6228_v46 = vld [vmem:[%s9078_s0 + $0x160] sm:$0xf0] }
 0x106   :  { %v3360_v60 = vpop.f32.mrf.mxu2  ;;  %v3264_v58 = vpop.f32.mrf.mxu0  ;;  %v4599_v25 = vor.u32 %v6228_v46, %v4598_v2 }
 0x107   :  { %v3263_v61 = vadd.f32 %v3262_v47, %v3214_v57  ;;  %v4708_v47 = vld [vmem:[%s9078_s0 + $0x23c] sm:$0xf0] }
 0x108   :  { %v3313_v54 = vpop.f32.mrf.mxu1  ;;  %v4711_v63 = vor.u32 %v6242_v43, %v4708_v47 }
 0x109   :  { %v3312_v0 = vadd.f32 %v3311_v52, %v3263_v61  ;;  %v6500_v52 = vld [vmem:[%s9077_s1 + $0x320] sm:$0xff] }
 0x10a   :  { %3648 = vmatpush.bf16.msrb.mxu0 %v6500_v52 }
 0x10b   :  { %v7463_v9 = vadd.f32 %v3360_v60, %v3312_v0 }
 0x10c   :  { %v3215_v15 = vpop.f32.mrf.mxu3 }
 0x10d   :  { %v3216_v1 = vadd.f32 %v3215_v15, %v7352_v56  ;;  %v6492_v56 = vld [vmem:[%s9077_s1 + $0x2e0] sm:$0xff] }
 0x10e   :  { %v3362_v24 = vpop.f32.mrf.mxu2  ;;  %v3267_v20 = vpop.f32.mrf.mxu0  ;;  %3599 = vmatpush.bf16.msrb.mxu3 %v6492_v56  ;;  %v6268_v15 = vld [vmem:[%s9078_s0 + $0x2a4] sm:$0xf]  ;;  %v6507_v56 = vld [vmem:[%s9077_s1 + $0x358] sm:$0xff] }
 0x10f   :  { %v3265_v18 = vadd.f32 %v3264_v58, %v3216_v1  ;;  %v4703_v58 = vor.u32 %v6241_v37, %v4700_v38  ;;  %v4808_v1 = vld [vmem:[%s9078_s0 + $0x30c] sm:$0xf0]  ;;  %3698 = vmatpush.bf16.msrb.mxu1 %v6507_v56 }
 0x110   :  { %v3316_v27 = vpop.f32.mrf.mxu1 }
 0x111   :  { %v3314_v33 = vadd.f32 %v3313_v54, %v3265_v18  ;;  %3413 = vmatmul.bf16.gmra.mxu3 %v4595_v7  ;;  %3462 = vmatmul.bf16.gmra.mxu0 %v4599_v25  ;;  %v4814_v7 = vld [vmem:[%s9078_s0 + $0x2a8] sm:$0xf]  ;;  %v4822_v25 = vld [vmem:[%s9078_s0 + $0x2b0] sm:$0xf] }
 0x113   :  { %3560 = vmatmul.bf16.gmra.mxu2 %v4607_v30  ;;  %3511 = vmatmul.bf16.gmra.mxu1 %v4603_v31  ;;  %v7475_v13 = vadd.f32 %v3362_v24, %v3314_v33  ;;  %v6269_v30 = vld [vmem:[%s9078_s0 + $0x2ac] sm:$0xf]  ;;  %v4816_v31 = vld [vmem:[%s9078_s0 + $0x314] sm:$0xf0] }
 0x114   :  { %v3218_v34 = vpop.f32.mrf.mxu3  ;;  %v6499_v33 = vld [vmem:[%s9077_s1 + $0x318] sm:$0xff]  ;;  %v4819_v38 = vor.u32 %v6269_v30, %v4816_v31 }
 0x115   :  { %v3219_v29 = vadd.f32 %v3218_v34, %v7390_v4  ;;  %v6255_v4 = vld [vmem:[%s9078_s0 + $0x238] sm:$0xf0]  ;;  %3649 = vmatpush.bf16.msrb.mxu0 %v6499_v33 }
 0x116   :  { %v3365_v35 = vpop.f32.mrf.mxu2  ;;  %v3269_v16 = vpop.f32.mrf.mxu0  ;;  %v4707_v61 = vor.u32 %v6255_v4, %v4706_v40 }
 0x117   :  { %v3268_v36 = vadd.f32 %v3267_v20, %v3219_v29  ;;  %v6283_v20 = vld [vmem:[%s9078_s0 + $0x318] sm:$0xf0] }
 0x118   :  { %v3318_v19 = vpop.f32.mrf.mxu1  ;;  %v4823_v37 = vor.u32 %v6283_v20, %v4822_v25 }
 0x119   :  { %v3317_v39 = vadd.f32 %v3316_v27, %v3268_v36  ;;  %v6515_v27 = vld [vmem:[%s9077_s1 + $0x398] sm:$0xff] }
 0x11a   :  { %3747 = vmatpush.bf16.msrb.mxu2 %v6515_v27 }
 0x11b   :  { %v7505_v48 = vadd.f32 %v3365_v35, %v3317_v39 }
 0x11c   :  { %v3220_v45 = vpop.f32.mrf.mxu3 }
 0x11d   :  { %v3221_v57 = vadd.f32 %v3220_v45, %v7398_v10  ;;  %v6491_v10 = vld [vmem:[%s9077_s1 + $0x2d8] sm:$0xff] }
 0x11e   :  { %v3367_v60 = vpop.f32.mrf.mxu2  ;;  %v3272_v54 = vpop.f32.mrf.mxu0  ;;  %3600 = vmatpush.bf16.msrb.mxu3 %v6491_v10  ;;  %v6295_v45 = vld [vmem:[%s9078_s0 + $0x37c] sm:$0xf]  ;;  %v6506_v10 = vld [vmem:[%s9077_s1 + $0x350] sm:$0xff] }
 0x11f   :  { %v3270_v0 = vadd.f32 %v3269_v16, %v3221_v57  ;;  %v4811_v16 = vor.u32 %v6268_v15, %v4808_v1  ;;  %v4916_v57 = vld [vmem:[%s9078_s0 + $0x3e4] sm:$0xf0]  ;;  %3699 = vmatpush.bf16.msrb.mxu1 %v6506_v10 }
 0x120   :  { %v3321_v2 = vpop.f32.mrf.mxu1 }
 0x121   :  { %v3319_v46 = vadd.f32 %v3318_v19, %v3270_v0  ;;  %3418 = vmatmul.bf16.gmra.mxu3 %v4703_v58  ;;  %3467 = vmatmul.bf16.gmra.mxu0 %v4707_v61  ;;  %v4922_v58 = vld [vmem:[%s9078_s0 + $0x380] sm:$0xf]  ;;  %v4930_v61 = vld [vmem:[%s9078_s0 + $0x388] sm:$0xf] }
 0x123   :  { %3565 = vmatmul.bf16.gmra.mxu2 %v4715_v62  ;;  %3516 = vmatmul.bf16.gmra.mxu1 %v4711_v63  ;;  %v7517_v3 = vadd.f32 %v3367_v60, %v3319_v46  ;;  %v6296_v62 = vld [vmem:[%s9078_s0 + $0x384] sm:$0xf]  ;;  %v4924_v63 = vld [vmem:[%s9078_s0 + $0x3ec] sm:$0xf0] }
 0x124   :  { %v3223_v5 = vpop.f32.mrf.mxu3  ;;  %v6498_v46 = vld [vmem:[%s9077_s1 + $0x310] sm:$0xff]  ;;  %v4927_v1 = vor.u32 %v6296_v62, %v4924_v63 }
 0x125   :  { %v3224_v6 = vadd.f32 %v3223_v5, %v7170_v59  ;;  %v6282_v59 = vld [vmem:[%s9078_s0 + $0x310] sm:$0xf0]  ;;  %3650 = vmatpush.bf16.msrb.mxu0 %v6498_v46 }
 0x126   :  { %v3370_v8 = vpop.f32.mrf.mxu2  ;;  %v3274_v11 = vpop.f32.mrf.mxu0  ;;  %v4815_v36 = vor.u32 %v6282_v59, %v4814_v7 }
 0x127   :  { %v3273_v12 = vadd.f32 %v3272_v54, %v3224_v6  ;;  %v6310_v54 = vld [vmem:[%s9078_s0 + $0x3f0] sm:$0xf0] }
 0x128   :  { %v3323_v14 = vpop.f32.mrf.mxu1  ;;  %v4931_v15 = vor.u32 %v6310_v54, %v4930_v61 }
 0x129   :  { %v3322_v24 = vadd.f32 %v3321_v2, %v3273_v12  ;;  %v6514_v2 = vld [vmem:[%s9077_s1 + $0x390] sm:$0xff] }
 0x12a   :  { %3748 = vmatpush.bf16.msrb.mxu2 %v6514_v2 }
 0x12b   :  { %v7547_v18 = vadd.f32 %v3370_v8, %v3322_v24 }
 0x12c   :  { %v3225_v34 = vpop.f32.mrf.mxu3 }
 0x12d   :  { %v3226_v29 = vadd.f32 %v3225_v34, %v7207_v23  ;;  %v6490_v23 = vld [vmem:[%s9077_s1 + $0x2d0] sm:$0xff] }
 0x12e   :  { %v3372_v35 = vpop.f32.mrf.mxu2  ;;  %v3277_v19 = vpop.f32.mrf.mxu0  ;;  %3601 = vmatpush.bf16.msrb.mxu3 %v6490_v23  ;;  %v6322_v34 = vld [vmem:[%s9078_s0 + $0x454] sm:$0xf]  ;;  %v6505_v23 = vld [vmem:[%s9077_s1 + $0x348] sm:$0xff] }
 0x12f   :  { %v3275_v39 = vadd.f32 %v3274_v11, %v3226_v29  ;;  %v4919_v11 = vor.u32 %v6295_v45, %v4916_v57  ;;  %v5024_v29 = vld [vmem:[%s9078_s0 + $0x4bc] sm:$0xf0]  ;;  %3700 = vmatpush.bf16.msrb.mxu1 %v6505_v23 }
 0x130   :  { %v3326_v40 = vpop.f32.mrf.mxu1 }
 0x131   :  { %v3324_v4 = vadd.f32 %v3323_v14, %v3275_v39  ;;  %3423 = vmatmul.bf16.gmra.mxu3 %v4811_v16  ;;  %3472 = vmatmul.bf16.gmra.mxu0 %v4815_v36  ;;  %v5030_v16 = vld [vmem:[%s9078_s0 + $0x458] sm:$0xf]  ;;  %v5038_v36 = vld [vmem:[%s9078_s0 + $0x460] sm:$0xf] }
 0x133   :  { %3570 = vmatmul.bf16.gmra.mxu2 %v4823_v37  ;;  %3521 = vmatmul.bf16.gmra.mxu1 %v4819_v38  ;;  %v7559_v41 = vadd.f32 %v3372_v35, %v3324_v4  ;;  %v6323_v37 = vld [vmem:[%s9078_s0 + $0x45c] sm:$0xf]  ;;  %v5032_v38 = vld [vmem:[%s9078_s0 + $0x4c4] sm:$0xf0] }
 0x134   :  { %v3228_v42 = vpop.f32.mrf.mxu3  ;;  %v6497_v4 = vld [vmem:[%s9077_s1 + $0x308] sm:$0xff]  ;;  %v5035_v57 = vor.u32 %v6323_v37, %v5032_v38 }
 0x135   :  { %v3229_v43 = vadd.f32 %v3228_v42, %v7214_v28  ;;  %v6309_v28 = vld [vmem:[%s9078_s0 + $0x3e8] sm:$0xf0]  ;;  %3651 = vmatpush.bf16.msrb.mxu0 %v6497_v4 }
 0x136   :  { %v3375_v47 = vpop.f32.mrf.mxu2  ;;  %v3279_v49 = vpop.f32.mrf.mxu0  ;;  %v4923_v12 = vor.u32 %v6309_v28, %v4922_v58 }
 0x137   :  { %v3278_v52 = vadd.f32 %v3277_v19, %v3229_v43  ;;  %v6337_v19 = vld [vmem:[%s9078_s0 + $0x4c8] sm:$0xf0] }
 0x138   :  { %v3328_v50 = vpop.f32.mrf.mxu1  ;;  %v5039_v45 = vor.u32 %v6337_v19, %v5038_v36 }
 0x139   :  { %v3327_v60 = vadd.f32 %v3326_v40, %v3278_v52  ;;  %v6513_v40 = vld [vmem:[%s9077_s1 + $0x388] sm:$0xff] }
 0x13a   :  { %3749 = vmatpush.bf16.msrb.mxu2 %v6513_v40 }
 0x13b   :  { %v7589_v0 = vadd.f32 %v3375_v47, %v3327_v60 }
 0x13c   :  { %v3230_v5 = vpop.f32.mrf.mxu3 }
 0x13d   :  { %v3231_v6 = vadd.f32 %v3230_v5, %v7249_v22  ;;  %v6489_v22 = vld [vmem:[%s9077_s1 + $0x2c8] sm:$0xff] }
 0x13e   :  { %v3377_v8 = vpop.f32.mrf.mxu2  ;;  %v3282_v14 = vpop.f32.mrf.mxu0  ;;  %3602 = vmatpush.bf16.msrb.mxu3 %v6489_v22  ;;  %v6349_v5 = vld [vmem:[%s9078_s0 + $0x52c] sm:$0xf]  ;;  %v6504_v22 = vld [vmem:[%s9077_s1 + $0x340] sm:$0xff] }
 0x13f   :  { %v3280_v24 = vadd.f32 %v3279_v49, %v3231_v6  ;;  %v5027_v49 = vor.u32 %v6322_v34, %v5024_v29  ;;  %v5132_v6 = vld [vmem:[%s9078_s0 + $0x594] sm:$0xf0]  ;;  %3701 = vmatpush.bf16.msrb.mxu1 %v6504_v22 }
 0x140   :  { %v3331_v7 = vpop.f32.mrf.mxu1 }
 0x141   :  { %v3329_v59 = vadd.f32 %v3328_v50, %v3280_v24  ;;  %3428 = vmatmul.bf16.gmra.mxu3 %v4919_v11  ;;  %3477 = vmatmul.bf16.gmra.mxu0 %v4923_v12  ;;  %v5138_v11 = vld [vmem:[%s9078_s0 + $0x530] sm:$0xf]  ;;  %v5146_v12 = vld [vmem:[%s9078_s0 + $0x538] sm:$0xf] }
 0x143   :  { %3575 = vmatmul.bf16.gmra.mxu2 %v4931_v15  ;;  %3526 = vmatmul.bf16.gmra.mxu1 %v4927_v1  ;;  %v7601_v25 = vadd.f32 %v3377_v8, %v3329_v59  ;;  %v6350_v15 = vld [vmem:[%s9078_s0 + $0x534] sm:$0xf]  ;;  %v5140_v1 = vld [vmem:[%s9078_s0 + $0x59c] sm:$0xf0] }
 0x144   :  { %v3233_v20 = vpop.f32.mrf.mxu3  ;;  %v6496_v59 = vld [vmem:[%s9077_s1 + $0x300] sm:$0xff]  ;;  %v5143_v29 = vor.u32 %v6350_v15, %v5140_v1 }
 0x145   :  { %v3234_v30 = vadd.f32 %v3233_v20, %v7257_v53  ;;  %v6336_v53 = vld [vmem:[%s9078_s0 + $0x4c0] sm:$0xf0]  ;;  %3652 = vmatpush.bf16.msrb.mxu0 %v6496_v59 }
 0x146   :  { %v3380_v31 = vpop.f32.mrf.mxu2  ;;  %v3284_v27 = vpop.f32.mrf.mxu0  ;;  %v5031_v52 = vor.u32 %v6336_v53, %v5030_v16 }
 0x147   :  { %v3283_v33 = vadd.f32 %v3282_v14, %v3234_v30  ;;  %v6364_v14 = vld [vmem:[%s9078_s0 + $0x5a0] sm:$0xf0] }
 0x148   :  { %v3333_v56 = vpop.f32.mrf.mxu1  ;;  %v5147_v34 = vor.u32 %v6364_v14, %v5146_v12 }
 0x149   :  { %v3332_v35 = vadd.f32 %v3331_v7, %v3283_v33  ;;  %v6512_v7 = vld [vmem:[%s9077_s1 + $0x380] sm:$0xff] }
 0x14a   :  { %3750 = vmatpush.bf16.msrb.mxu2 %v6512_v7 }
 0x14b   :  { %v7631_v39 = vadd.f32 %v3380_v31, %v3332_v35 }
 0x14c   :  { %v3235_v42 = vpop.f32.mrf.mxu3 }
 0x14d   :  { %v3236_v43 = vadd.f32 %v3235_v42, %v7295_v17  ;;  %v6488_v17 = vld [vmem:[%s9077_s1 + $0x2c0] sm:$0xff] }
 0x14e   :  { %v3382_v47 = vpop.f32.mrf.mxu2  ;;  %v3287_v50 = vpop.f32.mrf.mxu0  ;;  %3603 = vmatpush.bf16.msrb.mxu3 %v6488_v17  ;;  %v6376_v42 = vld [vmem:[%s9078_s0 + $0x604] sm:$0xf]  ;;  %v6543_v17 = vld [vmem:[%s9077_s1 + $0x478] sm:$0xff] }
 0x14f   :  { %v3285_v60 = vadd.f32 %v3284_v27, %v3236_v43  ;;  %v5135_v27 = vor.u32 %v6349_v5, %v5132_v6  ;;  %v5240_v43 = vld [vmem:[%s9078_s0 + $0x66c] sm:$0xf0]  ;;  %3890 = vmatpush.bf16.msra.mxu1 %v6543_v17 }
 0x150   :  { %v3336_v58 = vpop.f32.mrf.mxu1 }
 0x151   :  { %v3334_v28 = vadd.f32 %v3333_v56, %v3285_v60  ;;  %3433 = vmatmul.bf16.gmra.mxu3 %v5027_v49  ;;  %3482 = vmatmul.bf16.gmra.mxu0 %v5031_v52  ;;  %v5246_v49 = vld [vmem:[%s9078_s0 + $0x608] sm:$0xf]  ;;  %v5254_v52 = vld [vmem:[%s9078_s0 + $0x610] sm:$0xf] }
 0x153   :  { %3580 = vmatmul.bf16.gmra.mxu2 %v5039_v45  ;;  %3531 = vmatmul.bf16.gmra.mxu1 %v5035_v57  ;;  %v7643_v61 = vadd.f32 %v3382_v47, %v3334_v28  ;;  %v6377_v45 = vld [vmem:[%s9078_s0 + $0x60c] sm:$0xf]  ;;  %v5248_v57 = vld [vmem:[%s9078_s0 + $0x674] sm:$0xf0] }
 0x154   :  { %v3238_v54 = vpop.f32.mrf.mxu3  ;;  %v6535_v28 = vld [vmem:[%s9077_s1 + $0x438] sm:$0xff]  ;;  %v5251_v6 = vor.u32 %v6377_v45, %v5248_v57 }
 0x155   :  { %v3239_v62 = vadd.f32 %v3238_v54, %v7303_v26  ;;  %v6363_v26 = vld [vmem:[%s9078_s0 + $0x598] sm:$0xf0]  ;;  %3841 = vmatpush.bf16.msra.mxu0 %v6535_v28 }
 0x156   :  { %v3385_v63 = vpop.f32.mrf.mxu2  ;;  %v3289_v2 = vpop.f32.mrf.mxu0  ;;  %v5139_v33 = vor.u32 %v6363_v26, %v5138_v11 }
 0x157   :  { %v3288_v46 = vadd.f32 %v3287_v50, %v3239_v62  ;;  %v6391_v50 = vld [vmem:[%s9078_s0 + $0x678] sm:$0xf0] }
 0x158   :  { %v3338_v10 = vpop.f32.mrf.mxu1  ;;  %v5255_v5 = vor.u32 %v6391_v50, %v5254_v52 }
 0x159   :  { %v3337_v8 = vadd.f32 %v3336_v58, %v3288_v46  ;;  %v6551_v58 = vld [vmem:[%s9077_s1 + $0x4b8] sm:$0xff] }
 0x15a   :  { %3939 = vmatpush.bf16.msra.mxu2 %v6551_v58 }
 0x15b   :  { %v7673_v24 = vadd.f32 %v3385_v63, %v3337_v8 }
 0x15c   :  { %v3240_v20 = vpop.f32.mrf.mxu3 }
 0x15d   :  { %v3241_v30 = vadd.f32 %v3240_v20, %v7341_v44  ;;  %v6527_v44 = vld [vmem:[%s9077_s1 + $0x3f8] sm:$0xff]  ;;  %v6189_v20 = vld [vmem:[%s9078_s0 + $0x2c] sm:$0xf] }
 0x15e   :  { %v3387_v31 = vpop.f32.mrf.mxu2  ;;  %v3292_v56 = vpop.f32.mrf.mxu0  ;;  %3792 = vmatpush.bf16.msra.mxu3 %v6527_v44  ;;  %v6542_v44 = vld [vmem:[%s9077_s1 + $0x470] sm:$0xff] }
 0x15f   :  { %v3290_v35 = vadd.f32 %v3289_v2, %v3241_v30  ;;  %v5243_v2 = vor.u32 %v6376_v42, %v5240_v43  ;;  %v4500_v30 = vld [vmem:[%s9078_s0 + $0x94] sm:$0xf0]  ;;  %3891 = vmatpush.bf16.msra.mxu1 %v6542_v44 }
 0x160   :  { %v3341_v16 = vpop.f32.mrf.mxu1 }
 0x161   :  { %v3339_v53 = vadd.f32 %v3338_v10, %v3290_v35  ;;  %3438 = vmatmul.bf16.gmra.mxu3 %v5135_v27  ;;  %3487 = vmatmul.bf16.gmra.mxu0 %v5139_v33  ;;  %v4506_v27 = vld [vmem:[%s9078_s0 + $0x30] sm:$0xf]  ;;  %v4514_v33 = vld [vmem:[%s9078_s0 + $0x38] sm:$0xf] }
 0x163   :  { %3585 = vmatmul.bf16.gmra.mxu2 %v5147_v34  ;;  %3536 = vmatmul.bf16.gmra.mxu1 %v5143_v29  ;;  %v7685_v36 = vadd.f32 %v3387_v31, %v3339_v53  ;;  %v6190_v34 = vld [vmem:[%s9078_s0 + $0x34] sm:$0xf]  ;;  %v4508_v29 = vld [vmem:[%s9078_s0 + $0x9c] sm:$0xf0] }
 0x164   :  { %v3243_v19 = vpop.f32.mrf.mxu3  ;;  %v6534_v53 = vld [vmem:[%s9077_s1 + $0x430] sm:$0xff]  ;;  %v4511_v43 = vor.u32 %v6190_v34, %v4508_v29 }
 0x165   :  { %v3244_v37 = vadd.f32 %v3243_v19, %v7349_v55  ;;  %v6390_v55 = vld [vmem:[%s9078_s0 + $0x670] sm:$0xf0]  ;;  %3842 = vmatpush.bf16.msra.mxu0 %v6534_v53 }
 0x166   :  { %v3390_v38 = vpop.f32.mrf.mxu2  ;;  %v3294_v40 = vpop.f32.mrf.mxu0  ;;  %v5247_v46 = vor.u32 %v6390_v55, %v5246_v49 }
 0x167   :  { %v3293_v4 = vadd.f32 %v3292_v56, %v3244_v37  ;;  %v6204_v56 = vld [vmem:[%s9078_s0 + $0xa0] sm:$0xf0] }
 0x168   :  { %v3343_v23 = vpop.f32.mrf.mxu1  ;;  %v4515_v42 = vor.u32 %v6204_v56, %v4514_v33 }
 0x169   :  { %v3342_v47 = vadd.f32 %v3341_v16, %v3293_v4  ;;  %v6550_v16 = vld [vmem:[%s9077_s1 + $0x4b0] sm:$0xff] }
 0x16a   :  { %3940 = vmatpush.bf16.msra.mxu2 %v6550_v16 }
 0x16b   :  { %v7715_v60 = vadd.f32 %v3390_v38, %v3342_v47 }
 0x16c   :  { %v3245_v54 = vpop.f32.mrf.mxu3 }
 0x16d   :  { %v3246_v62 = vadd.f32 %v3245_v54, %v7387_v21  ;;  %v6526_v21 = vld [vmem:[%s9077_s1 + $0x3f0] sm:$0xff]  ;;  %v6216_v54 = vld [vmem:[%s9078_s0 + $0x104] sm:$0xf] }
 0x16e   :  { %v3392_v63 = vpop.f32.mrf.mxu2  ;;  %v3297_v10 = vpop.f32.mrf.mxu0  ;;  %3793 = vmatpush.bf16.msra.mxu3 %v6526_v21  ;;  %v6541_v21 = vld [vmem:[%s9077_s1 + $0x468] sm:$0xff] }
 0x16f   :  { %v3295_v8 = vadd.f32 %v3294_v40, %v3246_v62  ;;  %v4503_v40 = vor.u32 %v6189_v20, %v4500_v30  ;;  %v4608_v62 = vld [vmem:[%s9078_s0 + $0x16c] sm:$0xf0]  ;;  %3892 = vmatpush.bf16.msra.mxu1 %v6541_v21 }
 0x170   :  { %v3346_v11 = vpop.f32.mrf.mxu1 }
 0x171   :  { %v3344_v26 = vadd.f32 %v3343_v23, %v3295_v8  ;;  %3443 = vmatmul.bf16.gmra.mxu3 %v5243_v2  ;;  %3492 = vmatmul.bf16.gmra.mxu0 %v5247_v46  ;;  %v4614_v2 = vld [vmem:[%s9078_s0 + $0x108] sm:$0xf]  ;;  %v4622_v46 = vld [vmem:[%s9078_s0 + $0x110] sm:$0xf] }
 0x173   :  { %3590 = vmatmul.bf16.gmra.mxu2 %v5255_v5  ;;  %3541 = vmatmul.bf16.gmra.mxu1 %v5251_v6  ;;  %v7727_v12 = vadd.f32 %v3392_v63, %v3344_v26  ;;  %v6217_v5 = vld [vmem:[%s9078_s0 + $0x10c] sm:$0xf]  ;;  %v4616_v6 = vld [vmem:[%s9078_s0 + $0x174] sm:$0xf0] }
 0x174   :  { %v3248_v14 = vpop.f32.mrf.mxu3  ;;  %v6533_v26 = vld [vmem:[%s9077_s1 + $0x428] sm:$0xff]  ;;  %v4619_v30 = vor.u32 %v6217_v5, %v4616_v6 }
 0x175   :  { %v3249_v15 = vadd.f32 %v3248_v14, %v7395_v32  ;;  %v6203_v32 = vld [vmem:[%s9078_s0 + $0x98] sm:$0xf0]  ;;  %3843 = vmatpush.bf16.msra.mxu0 %v6533_v26 }
 0x176   :  { %v3395_v1 = vpop.f32.mrf.mxu2  ;;  %v3299_v7 = vpop.f32.mrf.mxu0  ;;  %v4507_v4 = vor.u32 %v6203_v32, %v4506_v27 }
 0x177   :  { %v3298_v59 = vadd.f32 %v3297_v10, %v3249_v15  ;;  %v6231_v10 = vld [vmem:[%s9078_s0 + $0x178] sm:$0xf0] }
 0x178   :  { %v3348_v22 = vpop.f32.mrf.mxu1  ;;  %v4623_v20 = vor.u32 %v6231_v10, %v4622_v46 }
 0x179   :  { %v3347_v31 = vadd.f32 %v3346_v11, %v3298_v59  ;;  %v6549_v11 = vld [vmem:[%s9077_s1 + $0x4a8] sm:$0xff] }
 0x17a   :  { %3941 = vmatpush.bf16.msra.mxu2 %v6549_v11 }
 0x17b   :  { %v7757_v35 = vadd.f32 %v3395_v1, %v3347_v31 }
 0x17c   :  { %v3250_v19 = vpop.f32.mrf.mxu3 }
 0x17d   :  { %v3251_v37 = vadd.f32 %v3250_v19, %v7433_v51  ;;  %v6525_v51 = vld [vmem:[%s9077_s1 + $0x3e8] sm:$0xff]  ;;  %v6243_v19 = vld [vmem:[%s9078_s0 + $0x1dc] sm:$0xf] }
 0x17e   :  { %v3397_v38 = vpop.f32.mrf.mxu2  ;;  %v3458_v23 = vpop.f32.mrf.mxu0  ;;  %3794 = vmatpush.bf16.msra.mxu3 %v6525_v51  ;;  %v6540_v51 = vld [vmem:[%s9077_s1 + $0x460] sm:$0xff] }
 0x17f   :  { %v3300_v47 = vadd.f32 %v3299_v7, %v3251_v37  ;;  %v4611_v7 = vor.u32 %v6216_v54, %v4608_v62  ;;  %v4716_v37 = vld [vmem:[%s9078_s0 + $0x244] sm:$0xf0]  ;;  %3893 = vmatpush.bf16.msra.mxu1 %v6540_v51 }
 0x180   :  { %v3507_v49 = vpop.f32.mrf.mxu1 }
 0x181   :  { %v3349_v55 = vadd.f32 %v3348_v22, %v3300_v47  ;;  %3604 = vmatmul.bf16.vlgmr.msrb.gmra.mxu3 %v4503_v40  ;;  %3653 = vmatmul.bf16.vlgmr.msrb.gmra.mxu0 %v4507_v4  ;;  %v4722_v40 = vld [vmem:[%s9078_s0 + $0x1e0] sm:$0xf]  ;;  %v4730_v4 = vld [vmem:[%s9078_s0 + $0x1e8] sm:$0xf] }
 0x183   :  { %3751 = vmatmul.bf16.vlgmr.msrb.gmra.mxu2 %v4515_v42  ;;  %3702 = vmatmul.bf16.vlgmr.msrb.gmra.mxu1 %v4511_v43  ;;  %v7769_v52 = vadd.f32 %v3397_v38, %v3349_v55  ;;  %v6244_v42 = vld [vmem:[%s9078_s0 + $0x1e4] sm:$0xf]  ;;  %v4724_v43 = vld [vmem:[%s9078_s0 + $0x24c] sm:$0xf0] }
 0x184   :  { %v3409_v50 = vpop.f32.mrf.mxu3  ;;  %v6532_v55 = vld [vmem:[%s9077_s1 + $0x420] sm:$0xff]  ;;  %v4727_v62 = vor.u32 %v6244_v42, %v4724_v43 }
 0x185   :  { %v3410_v45 = vadd.f32 %v3409_v50, %v7463_v9  ;;  %v6230_v9 = vld [vmem:[%s9078_s0 + $0x170] sm:$0xf0]  ;;  %3844 = vmatpush.bf16.msra.mxu0 %v6532_v55 }
 0x186   :  { %v3556_v57 = vpop.f32.mrf.mxu2  ;;  %v3460_v58 = vpop.f32.mrf.mxu0  ;;  %v4615_v59 = vor.u32 %v6230_v9, %v4614_v2 }
 0x187   :  { %v3459_v28 = vadd.f32 %v3458_v23, %v3410_v45  ;;  %v6258_v23 = vld [vmem:[%s9078_s0 + $0x250] sm:$0xf0] }
 0x188   :  { %v3509_v17 = vpop.f32.mrf.mxu1  ;;  %v4731_v54 = vor.u32 %v6258_v23, %v4730_v4 }
 0x189   :  { %v3508_v63 = vadd.f32 %v3507_v49, %v3459_v28  ;;  %v6548_v49 = vld [vmem:[%s9077_s1 + $0x4a0] sm:$0xff] }
 0x18a   :  { %3942 = vmatpush.bf16.msra.mxu2 %v6548_v49 }
 0x18b   :  { %v7799_v8 = vadd.f32 %v3556_v57, %v3508_v63 }
 0x18c   :  { %v3411_v14 = vpop.f32.mrf.mxu3 }
 0x18d   :  { %v3412_v15 = vadd.f32 %v3411_v14, %v7475_v13  ;;  %v6524_v13 = vld [vmem:[%s9077_s1 + $0x3e0] sm:$0xff]  ;;  %v6270_v14 = vld [vmem:[%s9078_s0 + $0x2b4] sm:$0xf] }
 0x18e   :  { %v3558_v1 = vpop.f32.mrf.mxu2  ;;  %v3463_v22 = vpop.f32.mrf.mxu0  ;;  %3795 = vmatpush.bf16.msra.mxu3 %v6524_v13  ;;  %v6539_v13 = vld [vmem:[%s9077_s1 + $0x458] sm:$0xff] }
 0x18f   :  { %v3461_v31 = vadd.f32 %v3460_v58, %v3412_v15  ;;  %v4719_v58 = vor.u32 %v6243_v19, %v4716_v37  ;;  %v4824_v15 = vld [vmem:[%s9078_s0 + $0x31c] sm:$0xf0]  ;;  %3894 = vmatpush.bf16.msra.mxu1 %v6539_v13 }
 0x190   :  { %v3512_v27 = vpop.f32.mrf.mxu1 }
 0x191   :  { %v3510_v32 = vadd.f32 %v3509_v17, %v3461_v31  ;;  %3609 = vmatmul.bf16.gmra.mxu3 %v4611_v7  ;;  %3658 = vmatmul.bf16.gmra.mxu0 %v4615_v59  ;;  %v4830_v7 = vld [vmem:[%s9078_s0 + $0x2b8] sm:$0xf]  ;;  %v4838_v59 = vld [vmem:[%s9078_s0 + $0x2c0] sm:$0xf] }
 0x193   :  { %3756 = vmatmul.bf16.gmra.mxu2 %v4623_v20  ;;  %3707 = vmatmul.bf16.gmra.mxu1 %v4619_v30  ;;  %v7811_v33 = vadd.f32 %v3558_v1, %v3510_v32  ;;  %v6271_v20 = vld [vmem:[%s9078_s0 + $0x2bc] sm:$0xf]  ;;  %v4832_v30 = vld [vmem:[%s9078_s0 + $0x324] sm:$0xf0] }
 0x194   :  { %v3414_v56 = vpop.f32.mrf.mxu3  ;;  %v6531_v32 = vld [vmem:[%s9077_s1 + $0x418] sm:$0xff]  ;;  %v4835_v37 = vor.u32 %v6271_v20, %v4832_v30 }
 0x195   :  { %v3415_v34 = vadd.f32 %v3414_v56, %v7505_v48  ;;  %v6257_v48 = vld [vmem:[%s9078_s0 + $0x248] sm:$0xf0]  ;;  %3845 = vmatpush.bf16.msra.mxu0 %v6531_v32 }
 0x196   :  { %v3561_v29 = vpop.f32.mrf.mxu2  ;;  %v3465_v16 = vpop.f32.mrf.mxu0  ;;  %v4723_v28 = vor.u32 %v6257_v48, %v4722_v40 }
 0x197   :  { %v3464_v53 = vadd.f32 %v3463_v22, %v3415_v34  ;;  %v6285_v22 = vld [vmem:[%s9078_s0 + $0x328] sm:$0xf0] }
 0x198   :  { %v3514_v44 = vpop.f32.mrf.mxu1  ;;  %v4839_v19 = vor.u32 %v6285_v22, %v4838_v59 }
 0x199   :  { %v3513_v38 = vadd.f32 %v3512_v27, %v3464_v53  ;;  %v6547_v27 = vld [vmem:[%s9077_s1 + $0x498] sm:$0xff] }
 0x19a   :  { %3943 = vmatpush.bf16.msra.mxu2 %v6547_v27 }
 0x19b   :  { %v7841_v47 = vadd.f32 %v3561_v29, %v3513_v38 }
 0x19c   :  { %v3416_v50 = vpop.f32.mrf.mxu3 }
 0x19d   :  { %v3417_v45 = vadd.f32 %v3416_v50, %v7517_v3  ;;  %v6523_v3 = vld [vmem:[%s9077_s1 + $0x3d8] sm:$0xff]  ;;  %v6297_v50 = vld [vmem:[%s9078_s0 + $0x38c] sm:$0xf] }
 0x19e   :  { %v3563_v57 = vpop.f32.mrf.mxu2  ;;  %v3468_v17 = vpop.f32.mrf.mxu0  ;;  %3796 = vmatpush.bf16.msra.mxu3 %v6523_v3  ;;  %v6538_v3 = vld [vmem:[%s9077_s1 + $0x450] sm:$0xff] }
 0x19f   :  { %v3466_v63 = vadd.f32 %v3465_v16, %v3417_v45  ;;  %v4827_v16 = vor.u32 %v6270_v14, %v4824_v15  ;;  %v4932_v45 = vld [vmem:[%s9078_s0 + $0x3f4] sm:$0xf0]  ;;  %3895 = vmatpush.bf16.msra.mxu1 %v6538_v3 }
 0x1a0   :  { %v3517_v2 = vpop.f32.mrf.mxu1 }
 0x1a1   :  { %v3515_v9 = vadd.f32 %v3514_v44, %v3466_v63  ;;  %3614 = vmatmul.bf16.gmra.mxu3 %v4719_v58  ;;  %3663 = vmatmul.bf16.gmra.mxu0 %v4723_v28  ;;  %v4938_v58 = vld [vmem:[%s9078_s0 + $0x390] sm:$0xf]  ;;  %v4946_v28 = vld [vmem:[%s9078_s0 + $0x398] sm:$0xf] }
 0x1a3   :  { %3761 = vmatmul.bf16.gmra.mxu2 %v4731_v54  ;;  %3712 = vmatmul.bf16.gmra.mxu1 %v4727_v62  ;;  %v7853_v46 = vadd.f32 %v3563_v57, %v3515_v9  ;;  %v6298_v54 = vld [vmem:[%s9078_s0 + $0x394] sm:$0xf]  ;;  %v4940_v62 = vld [vmem:[%s9078_s0 + $0x3fc] sm:$0xf0] }
 0x1a4   :  { %v3419_v10 = vpop.f32.mrf.mxu3  ;;  %v6530_v9 = vld [vmem:[%s9077_s1 + $0x410] sm:$0xff]  ;;  %v4943_v15 = vor.u32 %v6298_v54, %v4940_v62 }
 0x1a5   :  { %v3420_v5 = vadd.f32 %v3419_v10, %v7547_v18  ;;  %v6284_v18 = vld [vmem:[%s9078_s0 + $0x320] sm:$0xf0]  ;;  %3846 = vmatpush.bf16.msra.mxu0 %v6530_v9 }
 0x1a6   :  { %v3566_v6 = vpop.f32.mrf.mxu2  ;;  %v3470_v11 = vpop.f32.mrf.mxu0  ;;  %v4831_v53 = vor.u32 %v6284_v18, %v4830_v7 }
 0x1a7   :  { %v3469_v26 = vadd.f32 %v3468_v17, %v3420_v5  ;;  %v6312_v17 = vld [vmem:[%s9078_s0 + $0x400] sm:$0xf0] }
 0x1a8   :  { %v3519_v21 = vpop.f32.mrf.mxu1  ;;  %v4947_v14 = vor.u32 %v6312_v17, %v4946_v28 }
 0x1a9   :  { %v3518_v1 = vadd.f32 %v3517_v2, %v3469_v26  ;;  %v6546_v2 = vld [vmem:[%s9077_s1 + $0x490] sm:$0xff] }
 0x1aa   :  { %3944 = vmatpush.bf16.msra.mxu2 %v6546_v2 }
 0x1ab   :  { %v7883_v31 = vadd.f32 %v3566_v6, %v3518_v1 }
 0x1ac   :  { %v3421_v56 = vpop.f32.mrf.mxu3 }
 0x1ad   :  { %v3422_v34 = vadd.f32 %v3421_v56, %v7559_v41  ;;  %v6522_v41 = vld [vmem:[%s9077_s1 + $0x3d0] sm:$0xff]  ;;  %v6324_v56 = vld [vmem:[%s9078_s0 + $0x464] sm:$0xf] }
 0x1ae   :  { %v3568_v29 = vpop.f32.mrf.mxu2  ;;  %v3473_v44 = vpop.f32.mrf.mxu0  ;;  %3797 = vmatpush.bf16.msra.mxu3 %v6522_v41  ;;  %v6537_v41 = vld [vmem:[%s9077_s1 + $0x448] sm:$0xff] }
 0x1af   :  { %v3471_v38 = vadd.f32 %v3470_v11, %v3422_v34  ;;  %v4935_v11 = vor.u32 %v6297_v50, %v4932_v45  ;;  %v5040_v34 = vld [vmem:[%s9078_s0 + $0x4cc] sm:$0xf0]  ;;  %3896 = vmatpush.bf16.msra.mxu1 %v6537_v41 }
 0x1b0   :  { %v3522_v40 = vpop.f32.mrf.mxu1 }
 0x1b1   :  { %v3520_v48 = vadd.f32 %v3519_v21, %v3471_v38  ;;  %3619 = vmatmul.bf16.gmra.mxu3 %v4827_v16  ;;  %3668 = vmatmul.bf16.gmra.mxu0 %v4831_v53  ;;  %v5046_v16 = vld [vmem:[%s9078_s0 + $0x468] sm:$0xf]  ;;  %v5054_v53 = vld [vmem:[%s9078_s0 + $0x470] sm:$0xf] }
 0x1b3   :  { %3766 = vmatmul.bf16.gmra.mxu2 %v4839_v19  ;;  %3717 = vmatmul.bf16.gmra.mxu1 %v4835_v37  ;;  %v7895_v4 = vadd.f32 %v3568_v29, %v3520_v48  ;;  %v6325_v19 = vld [vmem:[%s9078_s0 + $0x46c] sm:$0xf]  ;;  %v5048_v37 = vld [vmem:[%s9078_s0 + $0x4d4] sm:$0xf0] }
 0x1b4   :  { %v3424_v23 = vpop.f32.mrf.mxu3  ;;  %v6529_v48 = vld [vmem:[%s9077_s1 + $0x408] sm:$0xff]  ;;  %v5051_v45 = vor.u32 %v6325_v19, %v5048_v37 }
 0x1b5   :  { %v3425_v42 = vadd.f32 %v3424_v23, %v7589_v0  ;;  %v6311_v0 = vld [vmem:[%s9078_s0 + $0x3f8] sm:$0xf0]  ;;  %3847 = vmatpush.bf16.msra.mxu0 %v6529_v48 }
 0x1b6   :  { %v3571_v43 = vpop.f32.mrf.mxu2  ;;  %v3475_v49 = vpop.f32.mrf.mxu0  ;;  %v4939_v26 = vor.u32 %v6311_v0, %v4938_v58 }
 0x1b7   :  { %v3474_v55 = vadd.f32 %v3473_v44, %v3425_v42  ;;  %v6339_v44 = vld [vmem:[%s9078_s0 + $0x4d8] sm:$0xf0] }
 0x1b8   :  { %v3524_v51 = vpop.f32.mrf.mxu1  ;;  %v5055_v50 = vor.u32 %v6339_v44, %v5054_v53 }
 0x1b9   :  { %v3523_v57 = vadd.f32 %v3522_v40, %v3474_v55  ;;  %v6545_v40 = vld [vmem:[%s9077_s1 + $0x488] sm:$0xff] }
 0x1ba   :  { %3945 = vmatpush.bf16.msra.mxu2 %v6545_v40 }
 0x1bb   :  { %v7925_v63 = vadd.f32 %v3571_v43, %v3523_v57 }
 0x1bc   :  { %v3426_v10 = vpop.f32.mrf.mxu3 }
 0x1bd   :  { %v3427_v5 = vadd.f32 %v3426_v10, %v7601_v25  ;;  %v6521_v25 = vld [vmem:[%s9077_s1 + $0x3c8] sm:$0xff]  ;;  %v6351_v10 = vld [vmem:[%s9078_s0 + $0x53c] sm:$0xf] }
 0x1be   :  { %v3573_v6 = vpop.f32.mrf.mxu2  ;;  %v3478_v21 = vpop.f32.mrf.mxu0  ;;  %3798 = vmatpush.bf16.msra.mxu3 %v6521_v25  ;;  %v6536_v25 = vld [vmem:[%s9077_s1 + $0x440] sm:$0xff] }
 0x1bf   :  { %v3476_v1 = vadd.f32 %v3475_v49, %v3427_v5  ;;  %v5043_v49 = vor.u32 %v6324_v56, %v5040_v34  ;;  %v5148_v5 = vld [vmem:[%s9078_s0 + $0x5a4] sm:$0xf0]  ;;  %3897 = vmatpush.bf16.msra.mxu1 %v6536_v25 }
 0x1c0   :  { %v3527_v7 = vpop.f32.mrf.mxu1 }
 0x1c1   :  { %v3525_v18 = vadd.f32 %v3524_v51, %v3476_v1  ;;  %3624 = vmatmul.bf16.gmra.mxu3 %v4935_v11  ;;  %3673 = vmatmul.bf16.gmra.mxu0 %v4939_v26  ;;  %v5154_v11 = vld [vmem:[%s9078_s0 + $0x540] sm:$0xf]  ;;  %v5162_v26 = vld [vmem:[%s9078_s0 + $0x548] sm:$0xf] }
 0x1c3   :  { %3771 = vmatmul.bf16.gmra.mxu2 %v4947_v14  ;;  %3722 = vmatmul.bf16.gmra.mxu1 %v4943_v15  ;;  %v7937_v59 = vadd.f32 %v3573_v6, %v3525_v18  ;;  %v6352_v14 = vld [vmem:[%s9078_s0 + $0x544] sm:$0xf]  ;;  %v5156_v15 = vld [vmem:[%s9078_s0 + $0x5ac] sm:$0xf0] }
 0x1c4   :  { %v3429_v22 = vpop.f32.mrf.mxu3  ;;  %v6528_v18 = vld [vmem:[%s9077_s1 + $0x400] sm:$0xff]  ;;  %v5159_v34 = vor.u32 %v6352_v14, %v5156_v15 }
 0x1c5   :  { %v3430_v20 = vadd.f32 %v3429_v22, %v7631_v39  ;;  %v6338_v39 = vld [vmem:[%s9078_s0 + $0x4d0] sm:$0xf0]  ;;  %3848 = vmatpush.bf16.msra.mxu0 %v6528_v18 }
 0x1c6   :  { %v3576_v30 = vpop.f32.mrf.mxu2  ;;  %v3480_v27 = vpop.f32.mrf.mxu0  ;;  %v5047_v55 = vor.u32 %v6338_v39, %v5046_v16 }
 0x1c7   :  { %v3479_v32 = vadd.f32 %v3478_v21, %v3430_v20  ;;  %v6366_v21 = vld [vmem:[%s9078_s0 + $0x5b0] sm:$0xf0] }
 0x1c8   :  { %v3529_v13 = vpop.f32.mrf.mxu1  ;;  %v5163_v56 = vor.u32 %v6366_v21, %v5162_v26 }
 0x1c9   :  { %v3528_v29 = vadd.f32 %v3527_v7, %v3479_v32  ;;  %v6544_v7 = vld [vmem:[%s9077_s1 + $0x480] sm:$0xff] }
 0x1ca   :  { %3946 = vmatpush.bf16.msra.mxu2 %v6544_v7 }
 0x1cb   :  { %v7967_v38 = vadd.f32 %v3576_v30, %v3528_v29 }
 0x1cc   :  { %v3431_v23 = vpop.f32.mrf.mxu3 }
 0x1cd   :  { %v3432_v42 = vadd.f32 %v3431_v23, %v7643_v61  ;;  %v6520_v61 = vld [vmem:[%s9077_s1 + $0x3c0] sm:$0xff]  ;;  %v6378_v23 = vld [vmem:[%s9078_s0 + $0x614] sm:$0xf] }
 0x1ce   :  { %v3578_v43 = vpop.f32.mrf.mxu2  ;;  %v3483_v51 = vpop.f32.mrf.mxu0  ;;  %3799 = vmatpush.bf16.msra.mxu3 %v6520_v61  ;;  %v6575_v61 = vld [vmem:[%s9077_s1 + $0x578] sm:$0xff] }
 0x1cf   :  { %v3481_v57 = vadd.f32 %v3480_v27, %v3432_v42  ;;  %v5151_v27 = vor.u32 %v6351_v10, %v5148_v5  ;;  %v5256_v42 = vld [vmem:[%s9078_s0 + $0x67c] sm:$0xf0]  ;;  %4086 = vmatpush.bf16.msrb.mxu1 %v6575_v61 }
 0x1d0   :  { %v3532_v58 = vpop.f32.mrf.mxu1 }
 0x1d1   :  { %v3530_v0 = vadd.f32 %v3529_v13, %v3481_v57  ;;  %3629 = vmatmul.bf16.gmra.mxu3 %v5043_v49  ;;  %3678 = vmatmul.bf16.gmra.mxu0 %v5047_v55  ;;  %v5262_v49 = vld [vmem:[%s9078_s0 + $0x618] sm:$0xf]  ;;  %v5270_v55 = vld [vmem:[%s9078_s0 + $0x620] sm:$0xf] }
 0x1d3   :  { %3776 = vmatmul.bf16.gmra.mxu2 %v5055_v50  ;;  %3727 = vmatmul.bf16.gmra.mxu1 %v5051_v45  ;;  %v7979_v28 = vadd.f32 %v3578_v43, %v3530_v0  ;;  %v6379_v50 = vld [vmem:[%s9078_s0 + $0x61c] sm:$0xf]  ;;  %v5264_v45 = vld [vmem:[%s9078_s0 + $0x684] sm:$0xf0] }
 0x1d4   :  { %v3434_v17 = vpop.f32.mrf.mxu3  ;;  %v6567_v0 = vld [vmem:[%s9077_s1 + $0x538] sm:$0xff]  ;;  %v5267_v5 = vor.u32 %v6379_v50, %v5264_v45 }
 0x1d5   :  { %v3435_v54 = vadd.f32 %v3434_v17, %v7673_v24  ;;  %v6365_v24 = vld [vmem:[%s9078_s0 + $0x5a8] sm:$0xf0]  ;;  %4037 = vmatpush.bf16.msrb.mxu0 %v6567_v0 }
 0x1d6   :  { %v3581_v62 = vpop.f32.mrf.mxu2  ;;  %v3485_v2 = vpop.f32.mrf.mxu0  ;;  %v5155_v32 = vor.u32 %v6365_v24, %v5154_v11 }
 0x1d7   :  { %v3484_v9 = vadd.f32 %v3483_v51, %v3435_v54  ;;  %v6393_v51 = vld [vmem:[%s9078_s0 + $0x688] sm:$0xf0] }
 0x1d8   :  { %v3534_v3 = vpop.f32.mrf.mxu1  ;;  %v5271_v10 = vor.u32 %v6393_v51, %v5270_v55 }
 0x1d9   :  { %v3533_v6 = vadd.f32 %v3532_v58, %v3484_v9  ;;  %v6583_v58 = vld [vmem:[%s9077_s1 + $0x5b8] sm:$0xff] }
 0x1da   :  { %4135 = vmatpush.bf16.msrb.mxu2 %v6583_v58 }
 0x1db   :  { %v8009_v1 = vadd.f32 %v3581_v62, %v3533_v6 }
 0x1dc   :  { %v3436_v22 = vpop.f32.mrf.mxu3 }
 0x1dd   :  { %v3437_v20 = vadd.f32 %v3436_v22, %v7685_v36  ;;  %v6559_v36 = vld [vmem:[%s9077_s1 + $0x4f8] sm:$0xff] }
 0x1de   :  { %v3583_v30 = vpop.f32.mrf.mxu2  ;;  %v3488_v13 = vpop.f32.mrf.mxu0  ;;  %3988 = vmatpush.bf16.msrb.mxu3 %v6559_v36  ;;  %v6191_v22 = vld [vmem:[%s9078_s0 + $0x3c] sm:$0xf]  ;;  %v6574_v36 = vld [vmem:[%s9077_s1 + $0x570] sm:$0xff] }
 0x1df   :  { %v3486_v29 = vadd.f32 %v3485_v2, %v3437_v20  ;;  %v5259_v2 = vor.u32 %v6378_v23, %v5256_v42  ;;  %v4516_v20 = vld [vmem:[%s9078_s0 + $0xa4] sm:$0xf0]  ;;  %4087 = vmatpush.bf16.msrb.mxu1 %v6574_v36 }
 0x1e0   :  { %v3537_v16 = vpop.f32.mrf.mxu1 }
 0x1e1   :  { %v3535_v39 = vadd.f32 %v3534_v3, %v3486_v29  ;;  %3634 = vmatmul.bf16.gmra.mxu3 %v5151_v27  ;;  %3683 = vmatmul.bf16.gmra.mxu0 %v5155_v32  ;;  %v4522_v27 = vld [vmem:[%s9078_s0 + $0x40] sm:$0xf]  ;;  %v4530_v32 = vld [vmem:[%s9078_s0 + $0x48] sm:$0xf] }
 0x1e3   :  { %3781 = vmatmul.bf16.gmra.mxu2 %v5163_v56  ;;  %3732 = vmatmul.bf16.gmra.mxu1 %v5159_v34  ;;  %v8021_v53 = vadd.f32 %v3583_v30, %v3535_v39  ;;  %v6192_v56 = vld [vmem:[%s9078_s0 + $0x44] sm:$0xf]  ;;  %v4524_v34 = vld [vmem:[%s9078_s0 + $0xac] sm:$0xf0] }
 0x1e4   :  { %v3439_v44 = vpop.f32.mrf.mxu3  ;;  %v6566_v39 = vld [vmem:[%s9077_s1 + $0x530] sm:$0xff]  ;;  %v4527_v42 = vor.u32 %v6192_v56, %v4524_v34 }
 0x1e5   :  { %v3440_v19 = vadd.f32 %v3439_v44, %v7715_v60  ;;  %v6392_v60 = vld [vmem:[%s9078_s0 + $0x680] sm:$0xf0]  ;;  %4038 = vmatpush.bf16.msrb.mxu0 %v6566_v39 }
 0x1e6   :  { %v3586_v37 = vpop.f32.mrf.mxu2  ;;  %v3490_v40 = vpop.f32.mrf.mxu0  ;;  %v5263_v9 = vor.u32 %v6392_v60, %v5262_v49 }
 0x1e7   :  { %v3489_v48 = vadd.f32 %v3488_v13, %v3440_v19  ;;  %v6206_v13 = vld [vmem:[%s9078_s0 + $0xb0] sm:$0xf0] }
 0x1e8   :  { %v3539_v41 = vpop.f32.mrf.mxu1  ;;  %v4531_v23 = vor.u32 %v6206_v13, %v4530_v32 }
 0x1e9   :  { %v3538_v43 = vadd.f32 %v3537_v16, %v3489_v48  ;;  %v6582_v16 = vld [vmem:[%s9077_s1 + $0x5b0] sm:$0xff] }
 0x1ea   :  { %4136 = vmatpush.bf16.msrb.mxu2 %v6582_v16 }
 0x1eb   :  { %v8051_v57 = vadd.f32 %v3586_v37, %v3538_v43 }
 0x1ec   :  { %v3441_v17 = vpop.f32.mrf.mxu3 }
 0x1ed   :  { %v3442_v54 = vadd.f32 %v3441_v17, %v7727_v12  ;;  %v6558_v12 = vld [vmem:[%s9077_s1 + $0x4f0] sm:$0xff] }
 0x1ee   :  { %v3588_v62 = vpop.f32.mrf.mxu2  ;;  %v3493_v3 = vpop.f32.mrf.mxu0  ;;  %3989 = vmatpush.bf16.msrb.mxu3 %v6558_v12  ;;  %v6218_v17 = vld [vmem:[%s9078_s0 + $0x114] sm:$0xf]  ;;  %v6573_v12 = vld [vmem:[%s9077_s1 + $0x568] sm:$0xff] }
 0x1ef   :  { %v3491_v6 = vadd.f32 %v3490_v40, %v3442_v54  ;;  %v4519_v40 = vor.u32 %v6191_v22, %v4516_v20  ;;  %v4624_v54 = vld [vmem:[%s9078_s0 + $0x17c] sm:$0xf0]  ;;  %4088 = vmatpush.bf16.msrb.mxu1 %v6573_v12 }
 0x1f0   :  { %v3542_v11 = vpop.f32.mrf.mxu1 }
 0x1f1   :  { %v3540_v24 = vadd.f32 %v3539_v41, %v3491_v6  ;;  %3639 = vmatmul.bf16.gmra.mxu3 %v5259_v2  ;;  %3688 = vmatmul.bf16.gmra.mxu0 %v5263_v9  ;;  %v4630_v2 = vld [vmem:[%s9078_s0 + $0x118] sm:$0xf]  ;;  %v4638_v9 = vld [vmem:[%s9078_s0 + $0x120] sm:$0xf] }
 0x1f3   :  { %3786 = vmatmul.bf16.gmra.mxu2 %v5271_v10  ;;  %3737 = vmatmul.bf16.gmra.mxu1 %v5267_v5  ;;  %v8063_v26 = vadd.f32 %v3588_v62, %v3540_v24  ;;  %v6219_v10 = vld [vmem:[%s9078_s0 + $0x11c] sm:$0xf]  ;;  %v4632_v5 = vld [vmem:[%s9078_s0 + $0x184] sm:$0xf0] }
 0x1f4   :  { %v3444_v21 = vpop.f32.mrf.mxu3  ;;  %v6565_v24 = vld [vmem:[%s9077_s1 + $0x528] sm:$0xff]  ;;  %v4635_v20 = vor.u32 %v6219_v10, %v4632_v5 }
 0x1f5   :  { %v3445_v14 = vadd.f32 %v3444_v21, %v7757_v35  ;;  %v6205_v35 = vld [vmem:[%s9078_s0 + $0xa8] sm:$0xf0]  ;;  %4039 = vmatpush.bf16.msrb.mxu0 %v6565_v24 }
 0x1f6   :  { %v3591_v15 = vpop.f32.mrf.mxu2  ;;  %v3495_v7 = vpop.f32.mrf.mxu0  ;;  %v4523_v48 = vor.u32 %v6205_v35, %v4522_v27 }
 0x1f7   :  { %v3494_v18 = vadd.f32 %v3493_v3, %v3445_v14  ;;  %v6233_v3 = vld [vmem:[%s9078_s0 + $0x188] sm:$0xf0] }
 0x1f8   :  { %v3544_v25 = vpop.f32.mrf.mxu1  ;;  %v4639_v22 = vor.u32 %v6233_v3, %v4638_v9 }
 0x1f9   :  { %v3543_v30 = vadd.f32 %v3542_v11, %v3494_v18  ;;  %v6581_v11 = vld [vmem:[%s9077_s1 + $0x5a8] sm:$0xff] }
 0x1fa   :  { %4137 = vmatpush.bf16.msrb.mxu2 %v6581_v11 }
 0x1fb   :  { %v8093_v29 = vadd.f32 %v3591_v15, %v3543_v30 }
 0x1fc   :  { %v3446_v44 = vpop.f32.mrf.mxu3 }
 0x1fd   :  { %v3447_v19 = vadd.f32 %v3446_v44, %v7769_v52  ;;  %v6557_v52 = vld [vmem:[%s9077_s1 + $0x4e8] sm:$0xff] }
 0x1fe   :  { %v3593_v37 = vpop.f32.mrf.mxu2  ;;  %v3654_v41 = vpop.f32.mrf.mxu0  ;;  %3990 = vmatpush.bf16.msrb.mxu3 %v6557_v52  ;;  %v6245_v44 = vld [vmem:[%s9078_s0 + $0x1ec] sm:$0xf]  ;;  %v6572_v52 = vld [vmem:[%s9077_s1 + $0x560] sm:$0xff] }
 0x1ff   :  { %v3496_v43 = vadd.f32 %v3495_v7, %v3447_v19  ;;  %v4627_v7 = vor.u32 %v6218_v17, %v4624_v54  ;;  %v4732_v19 = vld [vmem:[%s9078_s0 + $0x254] sm:$0xf0]  ;;  %4089 = vmatpush.bf16.msrb.mxu1 %v6572_v52 }
 0x200   :  { %v3703_v49 = vpop.f32.mrf.mxu1 }
 0x201   :  { %v3545_v60 = vadd.f32 %v3544_v25, %v3496_v43  ;;  %3800 = vmatmul.bf16.vlgmr.msra.gmra.mxu3 %v4519_v40  ;;  %3849 = vmatmul.bf16.vlgmr.msra.gmra.mxu0 %v4523_v48  ;;  %v4738_v40 = vld [vmem:[%s9078_s0 + $0x1f0] sm:$0xf]  ;;  %v4746_v48 = vld [vmem:[%s9078_s0 + $0x1f8] sm:$0xf] }
 0x203   :  { %3947 = vmatmul.bf16.vlgmr.msra.gmra.mxu2 %v4531_v23  ;;  %3898 = vmatmul.bf16.vlgmr.msra.gmra.mxu1 %v4527_v42  ;;  %v8105_v55 = vadd.f32 %v3593_v37, %v3545_v60  ;;  %v6246_v23 = vld [vmem:[%s9078_s0 + $0x1f4] sm:$0xf]  ;;  %v4740_v42 = vld [vmem:[%s9078_s0 + $0x25c] sm:$0xf0] }
 0x204   :  { %v3605_v51 = vpop.f32.mrf.mxu3  ;;  %v6564_v60 = vld [vmem:[%s9077_s1 + $0x520] sm:$0xff]  ;;  %v4743_v54 = vor.u32 %v6246_v23, %v4740_v42 }
 0x205   :  { %v3606_v50 = vadd.f32 %v3605_v51, %v7799_v8  ;;  %v6232_v8 = vld [vmem:[%s9078_s0 + $0x180] sm:$0xf0]  ;;  %4040 = vmatpush.bf16.msrb.mxu0 %v6564_v60 }
 0x206   :  { %v3752_v45 = vpop.f32.mrf.mxu2  ;;  %v3656_v58 = vpop.f32.mrf.mxu0  ;;  %v4631_v18 = vor.u32 %v6232_v8, %v4630_v2 }
 0x207   :  { %v3655_v0 = vadd.f32 %v3654_v41, %v3606_v50  ;;  %v6260_v41 = vld [vmem:[%s9078_s0 + $0x260] sm:$0xf0] }
 0x208   :  { %v3705_v61 = vpop.f32.mrf.mxu1  ;;  %v4747_v17 = vor.u32 %v6260_v41, %v4746_v48 }
 0x209   :  { %v3704_v62 = vadd.f32 %v3703_v49, %v3655_v0  ;;  %v6580_v49 = vld [vmem:[%s9077_s1 + $0x5a0] sm:$0xff] }
 0x20a   :  { %4138 = vmatpush.bf16.msrb.mxu2 %v6580_v49 }
 0x20b   :  { %v8135_v6 = vadd.f32 %v3752_v45, %v3704_v62 }
 0x20c   :  { %v3607_v21 = vpop.f32.mrf.mxu3 }
 0x20d   :  { %v3608_v14 = vadd.f32 %v3607_v21, %v7811_v33  ;;  %v6556_v33 = vld [vmem:[%s9077_s1 + $0x4e0] sm:$0xff] }
 0x20e   :  { %v3754_v15 = vpop.f32.mrf.mxu2  ;;  %v3659_v25 = vpop.f32.mrf.mxu0  ;;  %3991 = vmatpush.bf16.msrb.mxu3 %v6556_v33  ;;  %v6272_v21 = vld [vmem:[%s9078_s0 + $0x2c4] sm:$0xf]  ;;  %v6571_v33 = vld [vmem:[%s9077_s1 + $0x558] sm:$0xff] }
 0x20f   :  { %v3657_v30 = vadd.f32 %v3656_v58, %v3608_v14  ;;  %v4735_v58 = vor.u32 %v6245_v44, %v4732_v19  ;;  %v4840_v14 = vld [vmem:[%s9078_s0 + $0x32c] sm:$0xf0]  ;;  %4090 = vmatpush.bf16.msrb.mxu1 %v6571_v33 }
 0x210   :  { %v3708_v27 = vpop.f32.mrf.mxu1 }
 0x211   :  { %v3706_v35 = vadd.f32 %v3705_v61, %v3657_v30  ;;  %3805 = vmatmul.bf16.gmra.mxu3 %v4627_v7  ;;  %3854 = vmatmul.bf16.gmra.mxu0 %v4631_v18  ;;  %v4846_v7 = vld [vmem:[%s9078_s0 + $0x2c8] sm:$0xf]  ;;  %v4854_v18 = vld [vmem:[%s9078_s0 + $0x2d0] sm:$0xf] }
 0x213   :  { %3952 = vmatmul.bf16.gmra.mxu2 %v4639_v22  ;;  %3903 = vmatmul.bf16.gmra.mxu1 %v4635_v20  ;;  %v8147_v32 = vadd.f32 %v3754_v15, %v3706_v35  ;;  %v6273_v22 = vld [vmem:[%s9078_s0 + $0x2cc] sm:$0xf]  ;;  %v4848_v20 = vld [vmem:[%s9078_s0 + $0x334] sm:$0xf0] }
 0x214   :  { %v3610_v13 = vpop.f32.mrf.mxu3  ;;  %v6563_v35 = vld [vmem:[%s9077_s1 + $0x518] sm:$0xff]  ;;  %v4851_v19 = vor.u32 %v6273_v22, %v4848_v20 }
 0x215   :  { %v3611_v56 = vadd.f32 %v3610_v13, %v7841_v47  ;;  %v6259_v47 = vld [vmem:[%s9078_s0 + $0x258] sm:$0xf0]  ;;  %4041 = vmatpush.bf16.msrb.mxu0 %v6563_v35 }
 0x216   :  { %v3757_v34 = vpop.f32.mrf.mxu2  ;;  %v3661_v16 = vpop.f32.mrf.mxu0  ;;  %v4739_v0 = vor.u32 %v6259_v47, %v4738_v40 }
 0x217   :  { %v3660_v39 = vadd.f32 %v3659_v25, %v3611_v56  ;;  %v6287_v25 = vld [vmem:[%s9078_s0 + $0x338] sm:$0xf0] }
 0x218   :  { %v3710_v36 = vpop.f32.mrf.mxu1  ;;  %v4855_v44 = vor.u32 %v6287_v25, %v4854_v18 }
 0x219   :  { %v3709_v37 = vadd.f32 %v3708_v27, %v3660_v39  ;;  %v6579_v27 = vld [vmem:[%s9077_s1 + $0x598] sm:$0xff] }
 0x21a   :  { %4139 = vmatpush.bf16.msrb.mxu2 %v6579_v27 }
 0x21b   :  { %v8177_v43 = vadd.f32 %v3757_v34, %v3709_v37 }
 0x21c   :  { %v3612_v51 = vpop.f32.mrf.mxu3 }
 0x21d   :  { %v3613_v50 = vadd.f32 %v3612_v51, %v7853_v46  ;;  %v6555_v46 = vld [vmem:[%s9077_s1 + $0x4d8] sm:$0xff] }
 0x21e   :  { %v3759_v45 = vpop.f32.mrf.mxu2  ;;  %v3664_v61 = vpop.f32.mrf.mxu0  ;;  %3992 = vmatpush.bf16.msrb.mxu3 %v6555_v46  ;;  %v6299_v51 = vld [vmem:[%s9078_s0 + $0x39c] sm:$0xf]  ;;  %v6570_v46 = vld [vmem:[%s9077_s1 + $0x550] sm:$0xff] }
 0x21f   :  { %v3662_v62 = vadd.f32 %v3661_v16, %v3613_v50  ;;  %v4843_v16 = vor.u32 %v6272_v21, %v4840_v14  ;;  %v4948_v50 = vld [vmem:[%s9078_s0 + $0x404] sm:$0xf0]  ;;  %4091 = vmatpush.bf16.msrb.mxu1 %v6570_v46 }
 0x220   :  { %v3713_v2 = vpop.f32.mrf.mxu1 }
 0x221   :  { %v3711_v8 = vadd.f32 %v3710_v36, %v3662_v62  ;;  %3810 = vmatmul.bf16.gmra.mxu3 %v4735_v58  ;;  %3859 = vmatmul.bf16.gmra.mxu0 %v4739_v0  ;;  %v4954_v58 = vld [vmem:[%s9078_s0 + $0x3a0] sm:$0xf]  ;;  %v4962_v0 = vld [vmem:[%s9078_s0 + $0x3a8] sm:$0xf] }
 0x223   :  { %3957 = vmatmul.bf16.gmra.mxu2 %v4747_v17  ;;  %3908 = vmatmul.bf16.gmra.mxu1 %v4743_v54  ;;  %v8189_v9 = vadd.f32 %v3759_v45, %v3711_v8  ;;  %v6300_v17 = vld [vmem:[%s9078_s0 + $0x3a4] sm:$0xf]  ;;  %v4956_v54 = vld [vmem:[%s9078_s0 + $0x40c] sm:$0xf0] }
 0x224   :  { %v3615_v3 = vpop.f32.mrf.mxu3  ;;  %v6562_v8 = vld [vmem:[%s9077_s1 + $0x510] sm:$0xff]  ;;  %v4959_v14 = vor.u32 %v6300_v17, %v4956_v54 }
 0x225   :  { %v3616_v10 = vadd.f32 %v3615_v3, %v7883_v31  ;;  %v6286_v31 = vld [vmem:[%s9078_s0 + $0x330] sm:$0xf0]  ;;  %4042 = vmatpush.bf16.msrb.mxu0 %v6562_v8 }
 0x226   :  { %v3762_v5 = vpop.f32.mrf.mxu2  ;;  %v3666_v11 = vpop.f32.mrf.mxu0  ;;  %v4847_v39 = vor.u32 %v6286_v31, %v4846_v7 }
 0x227   :  { %v3665_v24 = vadd.f32 %v3664_v61, %v3616_v10  ;;  %v6314_v61 = vld [vmem:[%s9078_s0 + $0x410] sm:$0xf0] }
 0x228   :  { %v3715_v12 = vpop.f32.mrf.mxu1  ;;  %v4963_v21 = vor.u32 %v6314_v61, %v4962_v0 }
 0x229   :  { %v3714_v15 = vadd.f32 %v3713_v2, %v3665_v24  ;;  %v6578_v2 = vld [vmem:[%s9077_s1 + $0x590] sm:$0xff] }
 0x22a   :  { %4140 = vmatpush.bf16.msrb.mxu2 %v6578_v2 }
 0x22b   :  { %v8219_v30 = vadd.f32 %v3762_v5, %v3714_v15 }
 0x22c   :  { %v3617_v13 = vpop.f32.mrf.mxu3 }
 0x22d   :  { %v3618_v56 = vadd.f32 %v3617_v13, %v7895_v4  ;;  %v6554_v4 = vld [vmem:[%s9077_s1 + $0x4d0] sm:$0xff] }
 0x22e   :  { %v3764_v34 = vpop.f32.mrf.mxu2  ;;  %v3669_v36 = vpop.f32.mrf.mxu0  ;;  %3993 = vmatpush.bf16.msrb.mxu3 %v6554_v4  ;;  %v6326_v13 = vld [vmem:[%s9078_s0 + $0x474] sm:$0xf]  ;;  %v6569_v4 = vld [vmem:[%s9077_s1 + $0x548] sm:$0xff] }
 0x22f   :  { %v3667_v37 = vadd.f32 %v3666_v11, %v3618_v56  ;;  %v4951_v11 = vor.u32 %v6299_v51, %v4948_v50  ;;  %v5056_v56 = vld [vmem:[%s9078_s0 + $0x4dc] sm:$0xf0]  ;;  %4092 = vmatpush.bf16.msrb.mxu1 %v6569_v4 }
 0x230   :  { %v3718_v40 = vpop.f32.mrf.mxu1 }
 0x231   :  { %v3716_v47 = vadd.f32 %v3715_v12, %v3667_v37  ;;  %3815 = vmatmul.bf16.gmra.mxu3 %v4843_v16  ;;  %3864 = vmatmul.bf16.gmra.mxu0 %v4847_v39  ;;  %v5062_v16 = vld [vmem:[%s9078_s0 + $0x478] sm:$0xf]  ;;  %v5070_v39 = vld [vmem:[%s9078_s0 + $0x480] sm:$0xf] }
 0x233   :  { %3962 = vmatmul.bf16.gmra.mxu2 %v4855_v44  ;;  %3913 = vmatmul.bf16.gmra.mxu1 %v4851_v19  ;;  %v8231_v48 = vadd.f32 %v3764_v34, %v3716_v47  ;;  %v6327_v44 = vld [vmem:[%s9078_s0 + $0x47c] sm:$0xf]  ;;  %v5064_v19 = vld [vmem:[%s9078_s0 + $0x4e4] sm:$0xf0] }
 0x234   :  { %v3620_v41 = vpop.f32.mrf.mxu3  ;;  %v6561_v47 = vld [vmem:[%s9077_s1 + $0x508] sm:$0xff]  ;;  %v5067_v50 = vor.u32 %v6327_v44, %v5064_v19 }
 0x235   :  { %v3621_v23 = vadd.f32 %v3620_v41, %v7925_v63  ;;  %v6313_v63 = vld [vmem:[%s9078_s0 + $0x408] sm:$0xf0]  ;;  %4043 = vmatpush.bf16.msrb.mxu0 %v6561_v47 }
 0x236   :  { %v3767_v42 = vpop.f32.mrf.mxu2  ;;  %v3671_v49 = vpop.f32.mrf.mxu0  ;;  %v4955_v24 = vor.u32 %v6313_v63, %v4954_v58 }
 0x237   :  { %v3670_v60 = vadd.f32 %v3669_v36, %v3621_v23  ;;  %v6341_v36 = vld [vmem:[%s9078_s0 + $0x4e8] sm:$0xf0] }
 0x238   :  { %v3720_v52 = vpop.f32.mrf.mxu1  ;;  %v5071_v51 = vor.u32 %v6341_v36, %v5070_v39 }
 0x239   :  { %v3719_v45 = vadd.f32 %v3718_v40, %v3670_v60  ;;  %v6577_v40 = vld [vmem:[%s9077_s1 + $0x588] sm:$0xff] }
 0x23a   :  { %4141 = vmatpush.bf16.msrb.mxu2 %v6577_v40 }
 0x23b   :  { %v8261_v62 = vadd.f32 %v3767_v42, %v3719_v45 }
 0x23c   :  { %v3622_v3 = vpop.f32.mrf.mxu3 }
 0x23d   :  { %v3623_v10 = vadd.f32 %v3622_v3, %v7937_v59  ;;  %v6553_v59 = vld [vmem:[%s9077_s1 + $0x4c8] sm:$0xff] }
 0x23e   :  { %v3769_v5 = vpop.f32.mrf.mxu2  ;;  %v3674_v12 = vpop.f32.mrf.mxu0  ;;  %3994 = vmatpush.bf16.msrb.mxu3 %v6553_v59  ;;  %v6353_v3 = vld [vmem:[%s9078_s0 + $0x54c] sm:$0xf]  ;;  %v6568_v59 = vld [vmem:[%s9077_s1 + $0x540] sm:$0xff] }
 0x23f   :  { %v3672_v15 = vadd.f32 %v3671_v49, %v3623_v10  ;;  %v5059_v49 = vor.u32 %v6326_v13, %v5056_v56  ;;  %v5164_v10 = vld [vmem:[%s9078_s0 + $0x5b4] sm:$0xf0]  ;;  %4093 = vmatpush.bf16.msrb.mxu1 %v6568_v59 }
 0x240   :  { %v3723_v7 = vpop.f32.mrf.mxu1 }
 0x241   :  { %v3721_v31 = vadd.f32 %v3720_v52, %v3672_v15  ;;  %3820 = vmatmul.bf16.gmra.mxu3 %v4951_v11  ;;  %3869 = vmatmul.bf16.gmra.mxu0 %v4955_v24  ;;  %v5170_v11 = vld [vmem:[%s9078_s0 + $0x550] sm:$0xf]  ;;  %v5178_v24 = vld [vmem:[%s9078_s0 + $0x558] sm:$0xf] }
 0x243   :  { %3967 = vmatmul.bf16.gmra.mxu2 %v4963_v21  ;;  %3918 = vmatmul.bf16.gmra.mxu1 %v4959_v14  ;;  %v8273_v18 = vadd.f32 %v3769_v5, %v3721_v31  ;;  %v6354_v21 = vld [vmem:[%s9078_s0 + $0x554] sm:$0xf]  ;;  %v5172_v14 = vld [vmem:[%s9078_s0 + $0x5bc] sm:$0xf0] }
 0x244   :  { %v3625_v25 = vpop.f32.mrf.mxu3  ;;  %v6560_v31 = vld [vmem:[%s9077_s1 + $0x500] sm:$0xff]  ;;  %v5175_v56 = vor.u32 %v6354_v21, %v5172_v14 }
 0x245   :  { %v3626_v22 = vadd.f32 %v3625_v25, %v7967_v38  ;;  %v6340_v38 = vld [vmem:[%s9078_s0 + $0x4e0] sm:$0xf0]  ;;  %4044 = vmatpush.bf16.msrb.mxu0 %v6560_v31 }
 0x246   :  { %v3772_v20 = vpop.f32.mrf.mxu2  ;;  %v3676_v27 = vpop.f32.mrf.mxu0  ;;  %v5063_v60 = vor.u32 %v6340_v38, %v5062_v16 }
 0x247   :  { %v3675_v35 = vadd.f32 %v3674_v12, %v3626_v22  ;;  %v6368_v12 = vld [vmem:[%s9078_s0 + $0x5c0] sm:$0xf0] }
 0x248   :  { %v3725_v33 = vpop.f32.mrf.mxu1  ;;  %v5179_v13 = vor.u32 %v6368_v12, %v5178_v24 }
 0x249   :  { %v3724_v34 = vadd.f32 %v3723_v7, %v3675_v35  ;;  %v6576_v7 = vld [vmem:[%s9077_s1 + $0x580] sm:$0xff] }
 0x24a   :  { %4142 = vmatpush.bf16.msrb.mxu2 %v6576_v7 }
 0x24b   :  { %v8303_v37 = vadd.f32 %v3772_v20, %v3724_v34 }
 0x24c   :  { %v3627_v41 = vpop.f32.mrf.mxu3 }
 0x24d   :  { %v3628_v23 = vadd.f32 %v3627_v41, %v7979_v28  ;;  %v6552_v28 = vld [vmem:[%s9077_s1 + $0x4c0] sm:$0xff] }
 0x24e   :  { %v3774_v42 = vpop.f32.mrf.mxu2  ;;  %v3679_v52 = vpop.f32.mrf.mxu0  ;;  %3995 = vmatpush.bf16.msrb.mxu3 %v6552_v28  ;;  %v6380_v41 = vld [vmem:[%s9078_s0 + $0x624] sm:$0xf]  ;;  %v6607_v28 = vld [vmem:[%s9077_s1 + $0x678] sm:$0xff] }
 0x24f   :  { %v3677_v45 = vadd.f32 %v3676_v27, %v3628_v23  ;;  %v5167_v27 = vor.u32 %v6353_v3, %v5164_v10  ;;  %v5272_v23 = vld [vmem:[%s9078_s0 + $0x68c] sm:$0xf0]  ;;  %4282 = vmatpush.bf16.msra.mxu1 %v6607_v28 }
 0x250   :  { %v3728_v58 = vpop.f32.mrf.mxu1 }
 0x251   :  { %v3726_v63 = vadd.f32 %v3725_v33, %v3677_v45  ;;  %3825 = vmatmul.bf16.gmra.mxu3 %v5059_v49  ;;  %3874 = vmatmul.bf16.gmra.mxu0 %v5063_v60  ;;  %v5278_v49 = vld [vmem:[%s9078_s0 + $0x628] sm:$0xf]  ;;  %v5286_v60 = vld [vmem:[%s9078_s0 + $0x630] sm:$0xf] }
 0x253   :  { %3972 = vmatmul.bf16.gmra.mxu2 %v5071_v51  ;;  %3923 = vmatmul.bf16.gmra.mxu1 %v5067_v50  ;;  %v8315_v0 = vadd.f32 %v3774_v42, %v3726_v63  ;;  %v6381_v51 = vld [vmem:[%s9078_s0 + $0x62c] sm:$0xf]  ;;  %v5280_v50 = vld [vmem:[%s9078_s0 + $0x694] sm:$0xf0] }
 0x254   :  { %v3630_v61 = vpop.f32.mrf.mxu3  ;;  %v6599_v63 = vld [vmem:[%s9077_s1 + $0x638] sm:$0xff]  ;;  %v5283_v10 = vor.u32 %v6381_v51, %v5280_v50 }
 0x255   :  { %v3631_v17 = vadd.f32 %v3630_v61, %v8009_v1  ;;  %v6367_v1 = vld [vmem:[%s9078_s0 + $0x5b8] sm:$0xf0]  ;;  %4233 = vmatpush.bf16.msra.mxu0 %v6599_v63 }
 0x256   :  { %v3777_v54 = vpop.f32.mrf.mxu2  ;;  %v3681_v2 = vpop.f32.mrf.mxu0  ;;  %v5171_v35 = vor.u32 %v6367_v1, %v5170_v11 }
 0x257   :  { %v3680_v8 = vadd.f32 %v3679_v52, %v3631_v17  ;;  %v6395_v52 = vld [vmem:[%s9078_s0 + $0x698] sm:$0xf0] }
 0x258   :  { %v3730_v46 = vpop.f32.mrf.mxu1  ;;  %v5287_v3 = vor.u32 %v6395_v52, %v5286_v60 }
 0x259   :  { %v3729_v5 = vadd.f32 %v3728_v58, %v3680_v8  ;;  %v6615_v58 = vld [vmem:[%s9077_s1 + $0x6b8] sm:$0xff] }
 0x25a   :  { %4331 = vmatpush.bf16.msra.mxu2 %v6615_v58 }
 0x25b   :  { %v8345_v15 = vadd.f32 %v3777_v54, %v3729_v5 }
 0x25c   :  { %v3632_v25 = vpop.f32.mrf.mxu3 }
 0x25d   :  { %v3633_v22 = vadd.f32 %v3632_v25, %v8021_v53  ;;  %v6591_v53 = vld [vmem:[%s9077_s1 + $0x5f8] sm:$0xff]  ;;  %v6193_v25 = vld [vmem:[%s9078_s0 + $0x4c] sm:$0xf] }
 0x25e   :  { %v3779_v20 = vpop.f32.mrf.mxu2  ;;  %v3684_v33 = vpop.f32.mrf.mxu0  ;;  %4184 = vmatpush.bf16.msra.mxu3 %v6591_v53  ;;  %v6606_v53 = vld [vmem:[%s9077_s1 + $0x670] sm:$0xff] }
 0x25f   :  { %v3682_v34 = vadd.f32 %v3681_v2, %v3633_v22  ;;  %v5275_v2 = vor.u32 %v6380_v41, %v5272_v23  ;;  %v4532_v22 = vld [vmem:[%s9078_s0 + $0xb4] sm:$0xf0]  ;;  %4283 = vmatpush.bf16.msra.mxu1 %v6606_v53 }
 0x260   :  { %v3733_v16 = vpop.f32.mrf.mxu1 }
 0x261   :  { %v3731_v38 = vadd.f32 %v3730_v46, %v3682_v34  ;;  %3830 = vmatmul.bf16.gmra.mxu3 %v5167_v27  ;;  %3879 = vmatmul.bf16.gmra.mxu0 %v5171_v35  ;;  %v4538_v27 = vld [vmem:[%s9078_s0 + $0x50] sm:$0xf]  ;;  %v4546_v35 = vld [vmem:[%s9078_s0 + $0x58] sm:$0xf] }
 0x263   :  { %3977 = vmatmul.bf16.gmra.mxu2 %v5179_v13  ;;  %3928 = vmatmul.bf16.gmra.mxu1 %v5175_v56  ;;  %v8357_v39 = vadd.f32 %v3779_v20, %v3731_v38  ;;  %v6194_v13 = vld [vmem:[%s9078_s0 + $0x54] sm:$0xf]  ;;  %v4540_v56 = vld [vmem:[%s9078_s0 + $0xbc] sm:$0xf0] }
 0x264   :  { %v3635_v36 = vpop.f32.mrf.mxu3  ;;  %v6598_v38 = vld [vmem:[%s9077_s1 + $0x630] sm:$0xff]  ;;  %v4543_v23 = vor.u32 %v6194_v13, %v4540_v56 }
 0x265   :  { %v3636_v44 = vadd.f32 %v3635_v36, %v8051_v57  ;;  %v6394_v57 = vld [vmem:[%s9078_s0 + $0x690] sm:$0xf0]  ;;  %4234 = vmatpush.bf16.msra.mxu0 %v6598_v38 }
 0x266   :  { %v3782_v19 = vpop.f32.mrf.mxu2  ;;  %v3686_v40 = vpop.f32.mrf.mxu0  ;;  %v5279_v8 = vor.u32 %v6394_v57, %v5278_v49 }
 0x267   :  { %v3685_v47 = vadd.f32 %v3684_v33, %v3636_v44  ;;  %v6208_v33 = vld [vmem:[%s9078_s0 + $0xc0] sm:$0xf0] }
 0x268   :  { %v3735_v4 = vpop.f32.mrf.mxu1  ;;  %v4547_v41 = vor.u32 %v6208_v33, %v4546_v35 }
 0x269   :  { %v3734_v42 = vadd.f32 %v3733_v16, %v3685_v47  ;;  %v6614_v16 = vld [vmem:[%s9077_s1 + $0x6b0] sm:$0xff] }
 0x26a   :  { %4332 = vmatpush.bf16.msra.mxu2 %v6614_v16 }
 0x26b   :  { %v8387_v45 = vadd.f32 %v3782_v19, %v3734_v42 }
 0x26c   :  { %v3637_v61 = vpop.f32.mrf.mxu3 }
 0x26d   :  { %v3638_v17 = vadd.f32 %v3637_v61, %v8063_v26  ;;  %v6590_v26 = vld [vmem:[%s9077_s1 + $0x5f0] sm:$0xff]  ;;  %v6220_v61 = vld [vmem:[%s9078_s0 + $0x124] sm:$0xf] }
 0x26e   :  { %v3784_v54 = vpop.f32.mrf.mxu2  ;;  %v3689_v46 = vpop.f32.mrf.mxu0  ;;  %4185 = vmatpush.bf16.msra.mxu3 %v6590_v26  ;;  %v6605_v26 = vld [vmem:[%s9077_s1 + $0x668] sm:$0xff] }
 0x26f   :  { %v3687_v5 = vadd.f32 %v3686_v40, %v3638_v17  ;;  %v4535_v40 = vor.u32 %v6193_v25, %v4532_v22  ;;  %v4640_v17 = vld [vmem:[%s9078_s0 + $0x18c] sm:$0xf0]  ;;  %4284 = vmatpush.bf16.msra.mxu1 %v6605_v26 }
 0x270   :  { %v3738_v11 = vpop.f32.mrf.mxu1 }
 0x271   :  { %v3736_v1 = vadd.f32 %v3735_v4, %v3687_v5  ;;  %3835 = vmatmul.bf16.gmra.mxu3 %v5275_v2  ;;  %3884 = vmatmul.bf16.gmra.mxu0 %v5279_v8  ;;  %v4646_v2 = vld [vmem:[%s9078_s0 + $0x128] sm:$0xf]  ;;  %v4654_v8 = vld [vmem:[%s9078_s0 + $0x130] sm:$0xf] }
 0x273   :  { %3982 = vmatmul.bf16.gmra.mxu2 %v5287_v3  ;;  %3933 = vmatmul.bf16.gmra.mxu1 %v5283_v10  ;;  %v8399_v24 = vadd.f32 %v3784_v54, %v3736_v1  ;;  %v6221_v3 = vld [vmem:[%s9078_s0 + $0x12c] sm:$0xf]  ;;  %v4648_v10 = vld [vmem:[%s9078_s0 + $0x194] sm:$0xf0] }
 0x274   :  { %v3640_v12 = vpop.f32.mrf.mxu3  ;;  %v6597_v1 = vld [vmem:[%s9077_s1 + $0x628] sm:$0xff]  ;;  %v4651_v22 = vor.u32 %v6221_v3, %v4648_v10 }
 0x275   :  { %v3641_v21 = vadd.f32 %v3640_v12, %v8093_v29  ;;  %v6207_v29 = vld [vmem:[%s9078_s0 + $0xb8] sm:$0xf0]  ;;  %4235 = vmatpush.bf16.msra.mxu0 %v6597_v1 }
 0x276   :  { %v3787_v14 = vpop.f32.mrf.mxu2  ;;  %v3691_v7 = vpop.f32.mrf.mxu0  ;;  %v4539_v47 = vor.u32 %v6207_v29, %v4538_v27 }
 0x277   :  { %v3690_v31 = vadd.f32 %v3689_v46, %v3641_v21  ;;  %v6235_v46 = vld [vmem:[%s9078_s0 + $0x198] sm:$0xf0] }
 0x278   :  { %v3740_v59 = vpop.f32.mrf.mxu1  ;;  %v4655_v25 = vor.u32 %v6235_v46, %v4654_v8 }
 0x279   :  { %v3739_v20 = vadd.f32 %v3738_v11, %v3690_v31  ;;  %v6613_v11 = vld [vmem:[%s9077_s1 + $0x6a8] sm:$0xff] }
 0x27a   :  { %4333 = vmatpush.bf16.msra.mxu2 %v6613_v11 }
 0x27b   :  { %v8429_v34 = vadd.f32 %v3787_v14, %v3739_v20 }
 0x27c   :  { %v3642_v36 = vpop.f32.mrf.mxu3 }
 0x27d   :  { %v3643_v44 = vadd.f32 %v3642_v36, %v8105_v55  ;;  %v6589_v55 = vld [vmem:[%s9077_s1 + $0x5e8] sm:$0xff]  ;;  %v6247_v36 = vld [vmem:[%s9078_s0 + $0x1fc] sm:$0xf] }
 0x27e   :  { %v3789_v19 = vpop.f32.mrf.mxu2  ;;  %v3850_v4 = vpop.f32.mrf.mxu0  ;;  %4186 = vmatpush.bf16.msra.mxu3 %v6589_v55  ;;  %v6604_v55 = vld [vmem:[%s9077_s1 + $0x660] sm:$0xff] }
 0x27f   :  { %v3692_v42 = vadd.f32 %v3691_v7, %v3643_v44  ;;  %v4643_v7 = vor.u32 %v6220_v61, %v4640_v17  ;;  %v4748_v44 = vld [vmem:[%s9078_s0 + $0x264] sm:$0xf0]  ;;  %4285 = vmatpush.bf16.msra.mxu1 %v6604_v55 }
 0x280   :  { %v3899_v49 = vpop.f32.mrf.mxu1 }
 0x281   :  { %v3741_v57 = vadd.f32 %v3740_v59, %v3692_v42  ;;  %3996 = vmatmul.bf16.vlgmr.msrb.gmra.mxu3 %v4535_v40  ;;  %4045 = vmatmul.bf16.vlgmr.msrb.gmra.mxu0 %v4539_v47  ;;  %v4754_v40 = vld [vmem:[%s9078_s0 + $0x200] sm:$0xf]  ;;  %v4762_v47 = vld [vmem:[%s9078_s0 + $0x208] sm:$0xf] }
 0x283   :  { %4143 = vmatmul.bf16.vlgmr.msrb.gmra.mxu2 %v4547_v41  ;;  %4094 = vmatmul.bf16.vlgmr.msrb.gmra.mxu1 %v4543_v23  ;;  %v8441_v60 = vadd.f32 %v3789_v19, %v3741_v57  ;;  %v6248_v41 = vld [vmem:[%s9078_s0 + $0x204] sm:$0xf]  ;;  %v4756_v23 = vld [vmem:[%s9078_s0 + $0x26c] sm:$0xf0] }
 0x284   :  { %v3801_v52 = vpop.f32.mrf.mxu3  ;;  %v6596_v57 = vld [vmem:[%s9077_s1 + $0x620] sm:$0xff]  ;;  %v4759_v17 = vor.u32 %v6248_v41, %v4756_v23 }
 0x285   :  { %v3802_v51 = vadd.f32 %v3801_v52, %v8135_v6  ;;  %v6234_v6 = vld [vmem:[%s9078_s0 + $0x190] sm:$0xf0]  ;;  %4236 = vmatpush.bf16.msra.mxu0 %v6596_v57 }
 0x286   :  { %v3948_v50 = vpop.f32.mrf.mxu2  ;;  %v3852_v58 = vpop.f32.mrf.mxu0  ;;  %v4647_v31 = vor.u32 %v6234_v6, %v4646_v2 }
 0x287   :  { %v3851_v63 = vadd.f32 %v3850_v4, %v3802_v51  ;;  %v6262_v4 = vld [vmem:[%s9078_s0 + $0x270] sm:$0xf0] }
 0x288   :  { %v3901_v28 = vpop.f32.mrf.mxu1  ;;  %v4763_v61 = vor.u32 %v6262_v4, %v4762_v47 }
 0x289   :  { %v3900_v54 = vadd.f32 %v3899_v49, %v3851_v63  ;;  %v6612_v49 = vld [vmem:[%s9077_s1 + $0x6a0] sm:$0xff] }
 0x28a   :  { %4334 = vmatpush.bf16.msra.mxu2 %v6612_v49 }
 0x28b   :  { %v8471_v5 = vadd.f32 %v3948_v50, %v3900_v54 }
 0x28c   :  { %v3803_v12 = vpop.f32.mrf.mxu3 }
 0x28d   :  { %v3804_v21 = vadd.f32 %v3803_v12, %v8147_v32  ;;  %v6588_v32 = vld [vmem:[%s9077_s1 + $0x5e0] sm:$0xff]  ;;  %v6274_v12 = vld [vmem:[%s9078_s0 + $0x2d4] sm:$0xf] }
 0x28e   :  { %v3950_v14 = vpop.f32.mrf.mxu2  ;;  %v3855_v59 = vpop.f32.mrf.mxu0  ;;  %4187 = vmatpush.bf16.msra.mxu3 %v6588_v32  ;;  %v6603_v32 = vld [vmem:[%s9077_s1 + $0x658] sm:$0xff] }
 0x28f   :  { %v3853_v20 = vadd.f32 %v3852_v58, %v3804_v21  ;;  %v4751_v58 = vor.u32 %v6247_v36, %v4748_v44  ;;  %v4856_v21 = vld [vmem:[%s9078_s0 + $0x33c] sm:$0xf0]  ;;  %4286 = vmatpush.bf16.msra.mxu1 %v6603_v32 }
 0x290   :  { %v3904_v27 = vpop.f32.mrf.mxu1 }
 0x291   :  { %v3902_v29 = vadd.f32 %v3901_v28, %v3853_v20  ;;  %4001 = vmatmul.bf16.gmra.mxu3 %v4643_v7  ;;  %4050 = vmatmul.bf16.gmra.mxu0 %v4647_v31  ;;  %v4862_v7 = vld [vmem:[%s9078_s0 + $0x2d8] sm:$0xf]  ;;  %v4870_v31 = vld [vmem:[%s9078_s0 + $0x2e0] sm:$0xf] }
 0x293   :  { %4148 = vmatmul.bf16.gmra.mxu2 %v4655_v25  ;;  %4099 = vmatmul.bf16.gmra.mxu1 %v4651_v22  ;;  %v8483_v35 = vadd.f32 %v3950_v14, %v3902_v29  ;;  %v6275_v25 = vld [vmem:[%s9078_s0 + $0x2dc] sm:$0xf]  ;;  %v4864_v22 = vld [vmem:[%s9078_s0 + $0x344] sm:$0xf0] }
 0x294   :  { %v3806_v33 = vpop.f32.mrf.mxu3  ;;  %v6595_v29 = vld [vmem:[%s9077_s1 + $0x618] sm:$0xff]  ;;  %v4867_v44 = vor.u32 %v6275_v25, %v4864_v22 }
 0x295   :  { %v3807_v13 = vadd.f32 %v3806_v33, %v8177_v43  ;;  %v6261_v43 = vld [vmem:[%s9078_s0 + $0x268] sm:$0xf0]  ;;  %4237 = vmatpush.bf16.msra.mxu0 %v6595_v29 }
 0x296   :  { %v3953_v56 = vpop.f32.mrf.mxu2  ;;  %v3857_v16 = vpop.f32.mrf.mxu0  ;;  %v4755_v63 = vor.u32 %v6261_v43, %v4754_v40 }
 0x297   :  { %v3856_v38 = vadd.f32 %v3855_v59, %v3807_v13  ;;  %v6289_v59 = vld [vmem:[%s9078_s0 + $0x348] sm:$0xf0] }
 0x298   :  { %v3906_v53 = vpop.f32.mrf.mxu1  ;;  %v4871_v36 = vor.u32 %v6289_v59, %v4870_v31 }
 0x299   :  { %v3905_v19 = vadd.f32 %v3904_v27, %v3856_v38  ;;  %v6611_v27 = vld [vmem:[%s9077_s1 + $0x698] sm:$0xff] }
 0x29a   :  { %4335 = vmatpush.bf16.msra.mxu2 %v6611_v27 }
 0x29b   :  { %v8513_v42 = vadd.f32 %v3953_v56, %v3905_v19 }
 0x29c   :  { %v3808_v52 = vpop.f32.mrf.mxu3 }
 0x29d   :  { %v3809_v51 = vadd.f32 %v3808_v52, %v8189_v9  ;;  %v6587_v9 = vld [vmem:[%s9077_s1 + $0x5d8] sm:$0xff]  ;;  %v6301_v52 = vld [vmem:[%s9078_s0 + $0x3ac] sm:$0xf] }
 0x29e   :  { %v3955_v50 = vpop.f32.mrf.mxu2  ;;  %v3860_v28 = vpop.f32.mrf.mxu0  ;;  %4188 = vmatpush.bf16.msra.mxu3 %v6587_v9  ;;  %v6602_v9 = vld [vmem:[%s9077_s1 + $0x650] sm:$0xff] }
 0x29f   :  { %v3858_v54 = vadd.f32 %v3857_v16, %v3809_v51  ;;  %v4859_v16 = vor.u32 %v6274_v12, %v4856_v21  ;;  %v4964_v51 = vld [vmem:[%s9078_s0 + $0x414] sm:$0xf0]  ;;  %4287 = vmatpush.bf16.msra.mxu1 %v6602_v9 }
 0x2a0   :  { %v3909_v2 = vpop.f32.mrf.mxu1 }
 0x2a1   :  { %v3907_v6 = vadd.f32 %v3906_v53, %v3858_v54  ;;  %4006 = vmatmul.bf16.gmra.mxu3 %v4751_v58  ;;  %4055 = vmatmul.bf16.gmra.mxu0 %v4755_v63  ;;  %v4970_v58 = vld [vmem:[%s9078_s0 + $0x3b0] sm:$0xf]  ;;  %v4978_v63 = vld [vmem:[%s9078_s0 + $0x3b8] sm:$0xf] }
 0x2a3   :  { %4153 = vmatmul.bf16.gmra.mxu2 %v4763_v61  ;;  %4104 = vmatmul.bf16.gmra.mxu1 %v4759_v17  ;;  %v8525_v8 = vadd.f32 %v3955_v50, %v3907_v6  ;;  %v6302_v61 = vld [vmem:[%s9078_s0 + $0x3b4] sm:$0xf]  ;;  %v4972_v17 = vld [vmem:[%s9078_s0 + $0x41c] sm:$0xf0] }
 0x2a4   :  { %v3811_v46 = vpop.f32.mrf.mxu3  ;;  %v6594_v6 = vld [vmem:[%s9077_s1 + $0x610] sm:$0xff]  ;;  %v4975_v21 = vor.u32 %v6302_v61, %v4972_v17 }
 0x2a5   :  { %v3812_v3 = vadd.f32 %v3811_v46, %v8219_v30  ;;  %v6288_v30 = vld [vmem:[%s9078_s0 + $0x340] sm:$0xf0]  ;;  %4238 = vmatpush.bf16.msra.mxu0 %v6594_v6 }
 0x2a6   :  { %v3958_v10 = vpop.f32.mrf.mxu2  ;;  %v3862_v11 = vpop.f32.mrf.mxu0  ;;  %v4863_v38 = vor.u32 %v6288_v30, %v4862_v7 }
 0x2a7   :  { %v3861_v1 = vadd.f32 %v3860_v28, %v3812_v3  ;;  %v6316_v28 = vld [vmem:[%s9078_s0 + $0x420] sm:$0xf0] }
 0x2a8   :  { %v3911_v26 = vpop.f32.mrf.mxu1  ;;  %v4979_v12 = vor.u32 %v6316_v28, %v4978_v63 }
 0x2a9   :  { %v3910_v14 = vadd.f32 %v3909_v2, %v3861_v1  ;;  %v6610_v2 = vld [vmem:[%s9077_s1 + $0x690] sm:$0xff] }
 0x2aa   :  { %4336 = vmatpush.bf16.msra.mxu2 %v6610_v2 }
 0x2ab   :  { %v8555_v20 = vadd.f32 %v3958_v10, %v3910_v14 }
 0x2ac   :  { %v3813_v33 = vpop.f32.mrf.mxu3 }
 0x2ad   :  { %v3814_v13 = vadd.f32 %v3813_v33, %v8231_v48  ;;  %v6586_v48 = vld [vmem:[%s9077_s1 + $0x5d0] sm:$0xff]  ;;  %v6328_v33 = vld [vmem:[%s9078_s0 + $0x484] sm:$0xf] }
 0x2ae   :  { %v3960_v56 = vpop.f32.mrf.mxu2  ;;  %v3865_v53 = vpop.f32.mrf.mxu0  ;;  %4189 = vmatpush.bf16.msra.mxu3 %v6586_v48  ;;  %v6601_v48 = vld [vmem:[%s9077_s1 + $0x648] sm:$0xff] }
 0x2af   :  { %v3863_v19 = vadd.f32 %v3862_v11, %v3814_v13  ;;  %v4967_v11 = vor.u32 %v6301_v52, %v4964_v51  ;;  %v5072_v13 = vld [vmem:[%s9078_s0 + $0x4ec] sm:$0xf0]  ;;  %4288 = vmatpush.bf16.msra.mxu1 %v6601_v48 }
 0x2b0   :  { %v3914_v40 = vpop.f32.mrf.mxu1 }
 0x2b1   :  { %v3912_v43 = vadd.f32 %v3911_v26, %v3863_v19  ;;  %4011 = vmatmul.bf16.gmra.mxu3 %v4859_v16  ;;  %4060 = vmatmul.bf16.gmra.mxu0 %v4863_v38  ;;  %v5078_v16 = vld [vmem:[%s9078_s0 + $0x488] sm:$0xf]  ;;  %v5086_v38 = vld [vmem:[%s9078_s0 + $0x490] sm:$0xf] }
 0x2b3   :  { %4158 = vmatmul.bf16.gmra.mxu2 %v4871_v36  ;;  %4109 = vmatmul.bf16.gmra.mxu1 %v4867_v44  ;;  %v8567_v47 = vadd.f32 %v3960_v56, %v3912_v43  ;;  %v6329_v36 = vld [vmem:[%s9078_s0 + $0x48c] sm:$0xf]  ;;  %v5080_v44 = vld [vmem:[%s9078_s0 + $0x4f4] sm:$0xf0] }
 0x2b4   :  { %v3816_v4 = vpop.f32.mrf.mxu3  ;;  %v6593_v43 = vld [vmem:[%s9077_s1 + $0x608] sm:$0xff]  ;;  %v5083_v51 = vor.u32 %v6329_v36, %v5080_v44 }
 0x2b5   :  { %v3817_v41 = vadd.f32 %v3816_v4, %v8261_v62  ;;  %v6315_v62 = vld [vmem:[%s9078_s0 + $0x418] sm:$0xf0]  ;;  %4239 = vmatpush.bf16.msra.mxu0 %v6593_v43 }
 0x2b6   :  { %v3963_v23 = vpop.f32.mrf.mxu2  ;;  %v3867_v49 = vpop.f32.mrf.mxu0  ;;  %v4971_v1 = vor.u32 %v6315_v62, %v4970_v58 }
 0x2b7   :  { %v3866_v57 = vadd.f32 %v3865_v53, %v3817_v41  ;;  %v6343_v53 = vld [vmem:[%s9078_s0 + $0x4f8] sm:$0xf0] }
 0x2b8   :  { %v3916_v55 = vpop.f32.mrf.mxu1  ;;  %v5087_v52 = vor.u32 %v6343_v53, %v5086_v38 }
 0x2b9   :  { %v3915_v50 = vadd.f32 %v3914_v40, %v3866_v57  ;;  %v6609_v40 = vld [vmem:[%s9077_s1 + $0x688] sm:$0xff] }
 0x2ba   :  { %4337 = vmatpush.bf16.msra.mxu2 %v6609_v40 }
 0x2bb   :  { %v8597_v54 = vadd.f32 %v3963_v23, %v3915_v50 }
 0x2bc   :  { %v3818_v46 = vpop.f32.mrf.mxu3 }
 0x2bd   :  { %v3819_v3 = vadd.f32 %v3818_v46, %v8273_v18  ;;  %v6585_v18 = vld [vmem:[%s9077_s1 + $0x5c8] sm:$0xff]  ;;  %v6355_v46 = vld [vmem:[%s9078_s0 + $0x55c] sm:$0xf] }
 0x2be   :  { %v3965_v10 = vpop.f32.mrf.mxu2  ;;  %v3870_v26 = vpop.f32.mrf.mxu0  ;;  %4190 = vmatpush.bf16.msra.mxu3 %v6585_v18  ;;  %v6600_v18 = vld [vmem:[%s9077_s1 + $0x640] sm:$0xff] }
 0x2bf   :  { %v3868_v14 = vadd.f32 %v3867_v49, %v3819_v3  ;;  %v5075_v49 = vor.u32 %v6328_v33, %v5072_v13  ;;  %v5180_v3 = vld [vmem:[%s9078_s0 + $0x5c4] sm:$0xf0]  ;;  %4289 = vmatpush.bf16.msra.mxu1 %v6600_v18 }
 0x2c0   :  { %v3919_v7 = vpop.f32.mrf.mxu1  ;;  %v4562_v18 = vld [vmem:[%s9078_s0 + $0x68] sm:$0xf] }
 0x2c1   :  { %v3917_v30 = vadd.f32 %v3916_v55, %v3868_v14  ;;  %4016 = vmatmul.bf16.gmra.mxu3 %v4967_v11  ;;  %4065 = vmatmul.bf16.gmra.mxu0 %v4971_v1  ;;  %v5186_v11 = vld [vmem:[%s9078_s0 + $0x560] sm:$0xf]  ;;  %v5194_v1 = vld [vmem:[%s9078_s0 + $0x568] sm:$0xf] }
 0x2c3   :  { %4163 = vmatmul.bf16.gmra.mxu2 %v4979_v12  ;;  %4114 = vmatmul.bf16.gmra.mxu1 %v4975_v21  ;;  %v8609_v31 = vadd.f32 %v3965_v10, %v3917_v30  ;;  %v6356_v12 = vld [vmem:[%s9078_s0 + $0x564] sm:$0xf]  ;;  %v5188_v21 = vld [vmem:[%s9078_s0 + $0x5cc] sm:$0xf0] }
 0x2c4   :  { %v3821_v59 = vpop.f32.mrf.mxu3  ;;  %v6592_v30 = vld [vmem:[%s9077_s1 + $0x600] sm:$0xff]  ;;  %v5191_v13 = vor.u32 %v6356_v12, %v5188_v21  ;;  %v6195_v21 = vld [vmem:[%s9078_s0 + $0x5c] sm:$0xf] }
 0x2c5   :  { %v3822_v25 = vadd.f32 %v3821_v59, %v8303_v37  ;;  %v6342_v37 = vld [vmem:[%s9078_s0 + $0x4f0] sm:$0xf0]  ;;  %4240 = vmatpush.bf16.msra.mxu0 %v6592_v30  ;;  %v4554_v30 = vld [vmem:[%s9078_s0 + $0x60] sm:$0xf] }
 0x2c6   :  { %v3968_v22 = vpop.f32.mrf.mxu2  ;;  %v3872_v27 = vpop.f32.mrf.mxu0  ;;  %v5079_v57 = vor.u32 %v6342_v37, %v5078_v16 }
 0x2c7   :  { %v3871_v29 = vadd.f32 %v3870_v26, %v3822_v25  ;;  %v6370_v26 = vld [vmem:[%s9078_s0 + $0x5d0] sm:$0xf0] }
 0x2c8   :  { %v3921_v32 = vpop.f32.mrf.mxu1  ;;  %v5195_v33 = vor.u32 %v6370_v26, %v5194_v1 }
 0x2c9   :  { %v3920_v56 = vadd.f32 %v3919_v7, %v3871_v29  ;;  %v6608_v7 = vld [vmem:[%s9077_s1 + $0x680] sm:$0xff] }
 0x2ca   :  { %4338 = vmatpush.bf16.msra.mxu2 %v6608_v7  ;;  %v4548_v7 = vld [vmem:[%s9078_s0 + $0xc4] sm:$0xf0] }
 0x2cb   :  { %v8639_v19 = vadd.f32 %v3968_v22, %v3920_v56 }
 0x2cc   :  { %v3823_v4 = vpop.f32.mrf.mxu3 }
 0x2cd   :  { %v3824_v41 = vadd.f32 %v3823_v4, %v8315_v0  ;;  %v6584_v0 = vld [vmem:[%s9077_s1 + $0x5c0] sm:$0xff]  ;;  %v6382_v4 = vld [vmem:[%s9078_s0 + $0x634] sm:$0xf] }
 0x2ce   :  { %v3970_v23 = vpop.f32.mrf.mxu2  ;;  %v3875_v55 = vpop.f32.mrf.mxu0  ;;  %4191 = vmatpush.bf16.msra.mxu3 %v6584_v0 }
 0x2cf   :  { %v3873_v50 = vadd.f32 %v3872_v27, %v3824_v41  ;;  %v5183_v27 = vor.u32 %v6355_v46, %v5180_v3  ;;  %v5288_v41 = vld [vmem:[%s9078_s0 + $0x69c] sm:$0xf0] }
 0x2d0   :  { %v3924_v58 = vpop.f32.mrf.mxu1  ;;  %v5291_v0 = vor.u32 %v6382_v4, %v5288_v41 }
 0x2d1   :  { %v3922_v62 = vadd.f32 %v3921_v32, %v3873_v50  ;;  %4021 = vmatmul.bf16.gmra.mxu3 %v5075_v49  ;;  %4070 = vmatmul.bf16.gmra.mxu0 %v5079_v57  ;;  %v5302_v49 = vld [vmem:[%s9078_s0 + $0x640] sm:$0xf] }
 0x2d3   :  { %4168 = vmatmul.bf16.gmra.mxu2 %v5087_v52  ;;  %4119 = vmatmul.bf16.gmra.mxu1 %v5083_v51  ;;  %v8651_v63 = vadd.f32 %v3970_v23, %v3922_v62  ;;  %v5294_v23 = vld [vmem:[%s9078_s0 + $0x638] sm:$0xf]  ;;  %v6383_v52 = vld [vmem:[%s9078_s0 + $0x63c] sm:$0xf]  ;;  %v5296_v51 = vld [vmem:[%s9078_s0 + $0x6a4] sm:$0xf0] }
 0x2d4   :  { %v3826_v28 = vpop.f32.mrf.mxu3 }
 0x2d5   :  { %v3827_v61 = vadd.f32 %v3826_v28, %v8345_v15  ;;  %v6369_v15 = vld [vmem:[%s9078_s0 + $0x5c8] sm:$0xf0] }
 0x2d6   :  { %v3973_v17 = vpop.f32.mrf.mxu2  ;;  %v3877_v2 = vpop.f32.mrf.mxu0  ;;  %v5187_v29 = vor.u32 %v6369_v15, %v5186_v11 }
 0x2d7   :  { %v3876_v6 = vadd.f32 %v3875_v55, %v3827_v61  ;;  %v6397_v55 = vld [vmem:[%s9078_s0 + $0x6a8] sm:$0xf0] }
 0x2d8   :  { %v3926_v9 = vpop.f32.mrf.mxu1 }
 0x2d9   :  { %v3925_v10 = vadd.f32 %v3924_v58, %v3876_v6 }
 0x2db   :  { %v8681_v14 = vadd.f32 %v3973_v17, %v3925_v10  ;;  %v5303_v17 = vor.u32 %v6397_v55, %v5302_v49  ;;  %v6222_v49 = vld [vmem:[%s9078_s0 + $0x134] sm:$0xf]  ;;  %v4656_v55 = vld [vmem:[%s9078_s0 + $0x19c] sm:$0xf0] }
 0x2dc   :  { %v3828_v59 = vpop.f32.mrf.mxu3 }
 0x2dd   :  { %v3829_v25 = vadd.f32 %v3828_v59, %v8357_v39 }
 0x2de   :  { %v3975_v22 = vpop.f32.mrf.mxu2  ;;  %v3880_v32 = vpop.f32.mrf.mxu0 }
 0x2df   :  { %v3878_v56 = vadd.f32 %v3877_v2, %v3829_v25  ;;  %v5299_v2 = vor.u32 %v6383_v52, %v5296_v51  ;;  %v6210_v25 = vld [vmem:[%s9078_s0 + $0xd0] sm:$0xf0]  ;;  %v4662_v52 = vld [vmem:[%s9078_s0 + $0x138] sm:$0xf]  ;;  %v4670_v51 = vld [vmem:[%s9078_s0 + $0x140] sm:$0xf] }
 0x2e0   :  { %v3929_v16 = vpop.f32.mrf.mxu1 }
 0x2e1   :  { %v3927_v37 = vadd.f32 %v3926_v9, %v3878_v56  ;;  %4026 = vmatmul.bf16.gmra.mxu3 %v5183_v27  ;;  %4075 = vmatmul.bf16.gmra.mxu0 %v5187_v29  ;;  %v4556_v27 = vld [vmem:[%s9078_s0 + $0xcc] sm:$0xf0] }
 0x2e3   :  { %4173 = vmatmul.bf16.gmra.mxu2 %v5195_v33  ;;  %4124 = vmatmul.bf16.gmra.mxu1 %v5191_v13  ;;  %v8693_v38 = vadd.f32 %v3975_v22, %v3927_v37  ;;  %v6196_v22 = vld [vmem:[%s9078_s0 + $0x64] sm:$0xf]  ;;  %v4551_v13 = vor.u32 %v6195_v21, %v4548_v7  ;;  %v4563_v37 = vor.u32 %v6210_v25, %v4562_v18  ;;  %v6249_v18 = vld [vmem:[%s9078_s0 + $0x20c] sm:$0xf]  ;;  %v4764_v25 = vld [vmem:[%s9078_s0 + $0x274] sm:$0xf0] }
 0x2e4   :  { %v3831_v53 = vpop.f32.mrf.mxu3 }
 0x2e5   :  { %v3832_v39 = vadd.f32 %v3831_v53, %v8387_v45  ;;  %v6396_v45 = vld [vmem:[%s9078_s0 + $0x6a0] sm:$0xf0]  ;;  %v4559_v53 = vor.u32 %v6196_v22, %v4556_v27  ;;  %v4770_v22 = vld [vmem:[%s9078_s0 + $0x210] sm:$0xf]  ;;  %v4778_v27 = vld [vmem:[%s9078_s0 + $0x218] sm:$0xf] }
 0x2e6   :  { %v3978_v36 = vpop.f32.mrf.mxu2  ;;  %v3882_v44 = vpop.f32.mrf.mxu0  ;;  %v5295_v28 = vor.u32 %v6396_v45, %v5294_v23 }
 0x2e7   :  { %v3881_v40 = vadd.f32 %v3880_v32, %v3832_v39 }
 0x2e8   :  { %v3931_v43 = vpop.f32.mrf.mxu1 }
 0x2e9   :  { %v3930_v48 = vadd.f32 %v3929_v16, %v3881_v40 }
 0x2eb   :  { %v8711_v57 = vadd.f32 %v3978_v36, %v3930_v48 }
 0x2ec   :  { %v3833_v50 = vpop.f32.mrf.mxu3 }
 0x2ed   :  { %v3834_v58 = vadd.f32 %v3833_v50, %v8399_v24 }
 0x2ee   :  { %v3980_v62 = vpop.f32.mrf.mxu2  ;;  %v3885_v61 = vpop.f32.mrf.mxu0 }
 0x2ef   :  { %v3883_v6 = vadd.f32 %v3882_v44, %v3834_v58  ;;  %v6237_v58 = vld [vmem:[%s9078_s0 + $0x1a8] sm:$0xf0] }
 0x2f0   :  { %v3934_v9 = vpop.f32.mrf.mxu1 }
 0x2f1   :  { %v3932_v46 = vadd.f32 %v3931_v43, %v3883_v6  ;;  %4031 = vmatmul.bf16.gmra.mxu3 %v5291_v0  ;;  %4080 = vmatmul.bf16.gmra.mxu0 %v5295_v28  ;;  %v4664_v0 = vld [vmem:[%s9078_s0 + $0x1a4] sm:$0xf0] }
 0x2f3   :  { %4178 = vmatmul.bf16.gmra.mxu2 %v5303_v17  ;;  %4129 = vmatmul.bf16.gmra.mxu1 %v5299_v2  ;;  %v8723_v3 = vadd.f32 %v3980_v62, %v3932_v46  ;;  %v6223_v62 = vld [vmem:[%s9078_s0 + $0x13c] sm:$0xf]  ;;  %v4659_v2 = vor.u32 %v6222_v49, %v4656_v55  ;;  %v4671_v46 = vor.u32 %v6237_v58, %v4670_v51  ;;  %v6276_v51 = vld [vmem:[%s9078_s0 + $0x2e4] sm:$0xf]  ;;  %v4872_v58 = vld [vmem:[%s9078_s0 + $0x34c] sm:$0xf0] }
 0x2f4   :  { %v3836_v10 = vpop.f32.mrf.mxu3 }
 0x2f5   :  { %v3837_v11 = vadd.f32 %v3836_v10, %v8429_v34  ;;  %v6209_v34 = vld [vmem:[%s9078_s0 + $0xc8] sm:$0xf0]  ;;  %v4667_v10 = vor.u32 %v6223_v62, %v4664_v0  ;;  %v4878_v62 = vld [vmem:[%s9078_s0 + $0x2e8] sm:$0xf]  ;;  %v4886_v0 = vld [vmem:[%s9078_s0 + $0x2f0] sm:$0xf] }
 0x2f6   :  { %v3983_v15 = vpop.f32.mrf.mxu2  ;;  %v3887_v24 = vpop.f32.mrf.mxu0  ;;  %v4555_v56 = vor.u32 %v6209_v34, %v4554_v30 }
 0x2f7   :  { %v3886_v1 = vadd.f32 %v3885_v61, %v3837_v11 }
 0x2f8   :  { %v3936_v26 = vpop.f32.mrf.mxu1 }
 0x2f9   :  { %v3935_v12 = vadd.f32 %v3934_v9, %v3886_v1 }
 0x2fb   :  { %v8741_v59 = vadd.f32 %v3983_v15, %v3935_v12 }
 0x2fc   :  { %v3838_v29 = vpop.f32.mrf.mxu3 }
 0x2fd   :  { %v3839_v32 = vadd.f32 %v3838_v29, %v8441_v60 }
 0x2fe   :  { %v3985_v33 = vpop.f32.mrf.mxu2  ;;  %v4046_v16 = vpop.f32.mrf.mxu0 }
 0x2ff   :  { %v3888_v39 = vadd.f32 %v3887_v24, %v3839_v32  ;;  %v6264_v32 = vld [vmem:[%s9078_s0 + $0x280] sm:$0xf0] }
 0x300   :  { %v4095_v36 = vpop.f32.mrf.mxu1 }
 0x301   :  { %v3937_v44 = vadd.f32 %v3936_v26, %v3888_v39  ;;  %4192 = vmatmul.bf16.vlgmr.msra.gmra.mxu3 %v4551_v13  ;;  %4241 = vmatmul.bf16.vlgmr.msra.gmra.mxu0 %v4555_v56  ;;  %v4772_v13 = vld [vmem:[%s9078_s0 + $0x27c] sm:$0xf0] }
 0x303   :  { %4339 = vmatmul.bf16.vlgmr.msra.gmra.mxu2 %v4563_v37  ;;  %4290 = vmatmul.bf16.vlgmr.msra.gmra.mxu1 %v4559_v53  ;;  %v8753_v40 = vadd.f32 %v3985_v33, %v3937_v44  ;;  %v6250_v33 = vld [vmem:[%s9078_s0 + $0x214] sm:$0xf]  ;;  %v4767_v53 = vor.u32 %v6249_v18, %v4764_v25  ;;  %v4779_v44 = vor.u32 %v6264_v32, %v4778_v27  ;;  %v6303_v27 = vld [vmem:[%s9078_s0 + $0x3bc] sm:$0xf]  ;;  %v4980_v32 = vld [vmem:[%s9078_s0 + $0x424] sm:$0xf0] }
 0x304   :  { %v3997_v43 = vpop.f32.mrf.mxu3 }
 0x305   :  { %v3998_v48 = vadd.f32 %v3997_v43, %v8471_v5  ;;  %v6236_v5 = vld [vmem:[%s9078_s0 + $0x1a0] sm:$0xf0]  ;;  %v4775_v43 = vor.u32 %v6250_v33, %v4772_v13  ;;  %v4986_v33 = vld [vmem:[%s9078_s0 + $0x3c0] sm:$0xf]  ;;  %v4994_v13 = vld [vmem:[%s9078_s0 + $0x3c8] sm:$0xf] }
 0x306   :  { %v4144_v4 = vpop.f32.mrf.mxu2  ;;  %v4048_v60 = vpop.f32.mrf.mxu0  ;;  %v4663_v6 = vor.u32 %v6236_v5, %v4662_v52 }
 0x307   :  { %v4047_v41 = vadd.f32 %v4046_v16, %v3998_v48 }
 0x308   :  { %v4097_v23 = vpop.f32.mrf.mxu1 }
 0x309   :  { %v4096_v45 = vadd.f32 %v4095_v36, %v4047_v41 }
 0x30b   :  { %v8771_v50 = vadd.f32 %v4144_v4, %v4096_v45 }
 0x30c   :  { %v3999_v28 = vpop.f32.mrf.mxu3 }
 0x30d   :  { %v4000_v61 = vadd.f32 %v3999_v28, %v8483_v35 }
 0x30e   :  { %v4146_v17 = vpop.f32.mrf.mxu2  ;;  %v4051_v9 = vpop.f32.mrf.mxu0 }
 0x30f   :  { %v4049_v11 = vadd.f32 %v4048_v60, %v4000_v61  ;;  %v6291_v61 = vld [vmem:[%s9078_s0 + $0x358] sm:$0xf0] }
 0x310   :  { %v4100_v15 = vpop.f32.mrf.mxu1 }
 0x311   :  { %v4098_v24 = vadd.f32 %v4097_v23, %v4049_v11  ;;  %4197 = vmatmul.bf16.gmra.mxu3 %v4659_v2  ;;  %4246 = vmatmul.bf16.gmra.mxu0 %v4663_v6  ;;  %v4880_v2 = vld [vmem:[%s9078_s0 + $0x354] sm:$0xf0] }
 0x313   :  { %4344 = vmatmul.bf16.gmra.mxu2 %v4671_v46  ;;  %4295 = vmatmul.bf16.gmra.mxu1 %v4667_v10  ;;  %v8783_v1 = vadd.f32 %v4146_v17, %v4098_v24  ;;  %v6277_v17 = vld [vmem:[%s9078_s0 + $0x2ec] sm:$0xf]  ;;  %v4875_v10 = vor.u32 %v6276_v51, %v4872_v58  ;;  %v4887_v24 = vor.u32 %v6291_v61, %v4886_v0  ;;  %v6330_v0 = vld [vmem:[%s9078_s0 + $0x494] sm:$0xf]  ;;  %v5088_v61 = vld [vmem:[%s9078_s0 + $0x4fc] sm:$0xf0] }
 0x314   :  { %v4002_v26 = vpop.f32.mrf.mxu3 }
 0x315   :  { %v4003_v12 = vadd.f32 %v4002_v26, %v8513_v42  ;;  %v6263_v42 = vld [vmem:[%s9078_s0 + $0x278] sm:$0xf0]  ;;  %v4883_v26 = vor.u32 %v6277_v17, %v4880_v2  ;;  %v5094_v17 = vld [vmem:[%s9078_s0 + $0x498] sm:$0xf]  ;;  %v5102_v2 = vld [vmem:[%s9078_s0 + $0x4a0] sm:$0xf] }
 0x316   :  { %v4149_v21 = vpop.f32.mrf.mxu2  ;;  %v4053_v35 = vpop.f32.mrf.mxu0  ;;  %v4771_v39 = vor.u32 %v6263_v42, %v4770_v22 }
 0x317   :  { %v4052_v7 = vadd.f32 %v4051_v9, %v4003_v12 }
 0x318   :  { %v4102_v30 = vpop.f32.mrf.mxu1 }
 0x319   :  { %v4101_v34 = vadd.f32 %v4100_v15, %v4052_v7 }
 0x31b   :  { %v8801_v29 = vadd.f32 %v4149_v21, %v4101_v34 }
 0x31c   :  { %v4004_v56 = vpop.f32.mrf.mxu3 }
 0x31d   :  { %v4005_v16 = vadd.f32 %v4004_v56, %v8525_v8 }
 0x31e   :  { %v4151_v37 = vpop.f32.mrf.mxu2  ;;  %v4056_v36 = vpop.f32.mrf.mxu0 }
 0x31f   :  { %v4054_v48 = vadd.f32 %v4053_v35, %v4005_v16  ;;  %v6318_v16 = vld [vmem:[%s9078_s0 + $0x430] sm:$0xf0] }
 0x320   :  { %v4105_v4 = vpop.f32.mrf.mxu1 }
 0x321   :  { %v4103_v60 = vadd.f32 %v4102_v30, %v4054_v48  ;;  %4202 = vmatmul.bf16.gmra.mxu3 %v4767_v53  ;;  %4251 = vmatmul.bf16.gmra.mxu0 %v4771_v39  ;;  %v4988_v53 = vld [vmem:[%s9078_s0 + $0x42c] sm:$0xf0] }
 0x323   :  { %4349 = vmatmul.bf16.gmra.mxu2 %v4779_v44  ;;  %4300 = vmatmul.bf16.gmra.mxu1 %v4775_v43  ;;  %v8813_v41 = vadd.f32 %v4151_v37, %v4103_v60  ;;  %v6304_v37 = vld [vmem:[%s9078_s0 + $0x3c4] sm:$0xf]  ;;  %v4983_v43 = vor.u32 %v6303_v27, %v4980_v32  ;;  %v4995_v60 = vor.u32 %v6318_v16, %v4994_v13  ;;  %v6357_v13 = vld [vmem:[%s9078_s0 + $0x56c] sm:$0xf]  ;;  %v5196_v16 = vld [vmem:[%s9078_s0 + $0x5d4] sm:$0xf0] }
 0x324   :  { %v4007_v23 = vpop.f32.mrf.mxu3 }
 0x325   :  { %v4008_v45 = vadd.f32 %v4007_v23, %v8555_v20  ;;  %v6290_v20 = vld [vmem:[%s9078_s0 + $0x350] sm:$0xf0]  ;;  %v4991_v23 = vor.u32 %v6304_v37, %v4988_v53  ;;  %v5202_v37 = vld [vmem:[%s9078_s0 + $0x570] sm:$0xf]  ;;  %v5210_v53 = vld [vmem:[%s9078_s0 + $0x578] sm:$0xf] }
 0x326   :  { %v4154_v49 = vpop.f32.mrf.mxu2  ;;  %v4058_v8 = vpop.f32.mrf.mxu0  ;;  %v4879_v11 = vor.u32 %v6290_v20, %v4878_v62 }
 0x327   :  { %v4057_v55 = vadd.f32 %v4056_v36, %v4008_v45 }
 0x328   :  { %v4107_v52 = vpop.f32.mrf.mxu1 }
 0x329   :  { %v4106_v5 = vadd.f32 %v4105_v4, %v4057_v55 }
 0x32b   :  { %v8831_v28 = vadd.f32 %v4154_v49, %v4106_v5 }
 0x32c   :  { %v4009_v6 = vpop.f32.mrf.mxu3 }
 0x32d   :  { %v4010_v9 = vadd.f32 %v4009_v6, %v8567_v47 }
 0x32e   :  { %v4156_v46 = vpop.f32.mrf.mxu2  ;;  %v4061_v15 = vpop.f32.mrf.mxu0 }
 0x32f   :  { %v4059_v12 = vadd.f32 %v4058_v8, %v4010_v9  ;;  %v6345_v9 = vld [vmem:[%s9078_s0 + $0x508] sm:$0xf0] }
 0x330   :  { %v4110_v21 = vpop.f32.mrf.mxu1 }
 0x331   :  { %v4108_v35 = vadd.f32 %v4107_v52, %v4059_v12  ;;  %4207 = vmatmul.bf16.gmra.mxu3 %v4875_v10  ;;  %4256 = vmatmul.bf16.gmra.mxu0 %v4879_v11  ;;  %v5096_v10 = vld [vmem:[%s9078_s0 + $0x504] sm:$0xf0] }
 0x333   :  { %4354 = vmatmul.bf16.gmra.mxu2 %v4887_v24  ;;  %4305 = vmatmul.bf16.gmra.mxu1 %v4883_v26  ;;  %v8843_v7 = vadd.f32 %v4156_v46, %v4108_v35  ;;  %v6331_v46 = vld [vmem:[%s9078_s0 + $0x49c] sm:$0xf]  ;;  %v5091_v26 = vor.u32 %v6330_v0, %v5088_v61  ;;  %v5103_v35 = vor.u32 %v6345_v9, %v5102_v2  ;;  %v6384_v2 = vld [vmem:[%s9078_s0 + $0x644] sm:$0xf]  ;;  %v5304_v9 = vld [vmem:[%s9078_s0 + $0x6ac] sm:$0xf0] }
 0x334   :  { %v4012_v30 = vpop.f32.mrf.mxu3 }
 0x335   :  { %v4013_v34 = vadd.f32 %v4012_v30, %v8597_v54  ;;  %v6317_v54 = vld [vmem:[%s9078_s0 + $0x428] sm:$0xf0]  ;;  %v5099_v30 = vor.u32 %v6331_v46, %v5096_v10  ;;  %v5310_v46 = vld [vmem:[%s9078_s0 + $0x648] sm:$0xf]  ;;  %v5318_v10 = vld [vmem:[%s9078_s0 + $0x650] sm:$0xf] }
 0x336   :  { %v4159_v18 = vpop.f32.mrf.mxu2  ;;  %v4063_v47 = vpop.f32.mrf.mxu0  ;;  %v4987_v48 = vor.u32 %v6317_v54, %v4986_v33 }
 0x337   :  { %v4062_v25 = vadd.f32 %v4061_v15, %v4013_v34 }
 0x338   :  { %v4112_v22 = vpop.f32.mrf.mxu1 }
 0x339   :  { %v4111_v42 = vadd.f32 %v4110_v21, %v4062_v25 }
 0x33b   :  { %v8861_v56 = vadd.f32 %v4159_v18, %v4111_v42 }
 0x33c   :  { %v4014_v39 = vpop.f32.mrf.mxu3 }
 0x33d   :  { %v4015_v36 = vadd.f32 %v4014_v39, %v8609_v31 }
 0x33e   :  { %v4161_v44 = vpop.f32.mrf.mxu2  ;;  %v4066_v4 = vpop.f32.mrf.mxu0 }
 0x33f   :  { %v4064_v45 = vadd.f32 %v4063_v47, %v4015_v36  ;;  %v6372_v36 = vld [vmem:[%s9078_s0 + $0x5e0] sm:$0xf0] }
 0x340   :  { %v4115_v49 = vpop.f32.mrf.mxu1 }
 0x341   :  { %v4113_v8 = vadd.f32 %v4112_v22, %v4064_v45  ;;  %4212 = vmatmul.bf16.gmra.mxu3 %v4983_v43  ;;  %4261 = vmatmul.bf16.gmra.mxu0 %v4987_v48  ;;  %v5204_v43 = vld [vmem:[%s9078_s0 + $0x5dc] sm:$0xf0] }
 0x343   :  { %4359 = vmatmul.bf16.gmra.mxu2 %v4995_v60  ;;  %4310 = vmatmul.bf16.gmra.mxu1 %v4991_v23  ;;  %v8873_v55 = vadd.f32 %v4161_v44, %v4113_v8  ;;  %v6358_v44 = vld [vmem:[%s9078_s0 + $0x574] sm:$0xf]  ;;  %v5199_v23 = vor.u32 %v6357_v13, %v5196_v16  ;;  %v5211_v8 = vor.u32 %v6372_v36, %v5210_v53 }
 0x344   :  { %v4017_v52 = vpop.f32.mrf.mxu3 }
 0x345   :  { %v4018_v5 = vadd.f32 %v4017_v52, %v8639_v19  ;;  %v6344_v19 = vld [vmem:[%s9078_s0 + $0x500] sm:$0xf0]  ;;  %v5207_v52 = vor.u32 %v6358_v44, %v5204_v43 }
 0x346   :  { %v4164_v51 = vpop.f32.mrf.mxu2  ;;  %v4068_v31 = vpop.f32.mrf.mxu0  ;;  %v5095_v12 = vor.u32 %v6344_v19, %v5094_v17 }
 0x347   :  { %v4067_v58 = vadd.f32 %v4066_v4, %v4018_v5 }
 0x348   :  { %v4117_v62 = vpop.f32.mrf.mxu1 }
 0x349   :  { %v4116_v20 = vadd.f32 %v4115_v49, %v4067_v58 }
 0x34b   :  { %v8891_v6 = vadd.f32 %v4164_v51, %v4116_v20 }
 0x34c   :  { %v4019_v11 = vpop.f32.mrf.mxu3 }
 0x34d   :  { %v4020_v15 = vadd.f32 %v4019_v11, %v8651_v63 }
 0x34e   :  { %v4166_v24 = vpop.f32.mrf.mxu2  ;;  %v4071_v21 = vpop.f32.mrf.mxu0 }
 0x34f   :  { %v4069_v34 = vadd.f32 %v4068_v31, %v4020_v15  ;;  %v6399_v15 = vld [vmem:[%s9078_s0 + $0x6b8] sm:$0xf0] }
 0x350   :  { %v4120_v18 = vpop.f32.mrf.mxu1 }
 0x351   :  { %v4118_v47 = vadd.f32 %v4117_v62, %v4069_v34  ;;  %4217 = vmatmul.bf16.gmra.mxu3 %v5091_v26  ;;  %4266 = vmatmul.bf16.gmra.mxu0 %v5095_v12  ;;  %v5312_v26 = vld [vmem:[%s9078_s0 + $0x6b4] sm:$0xf0] }
 0x353   :  { %4364 = vmatmul.bf16.gmra.mxu2 %v5103_v35  ;;  %4315 = vmatmul.bf16.gmra.mxu1 %v5099_v30  ;;  %v8903_v25 = vadd.f32 %v4166_v24, %v4118_v47  ;;  %v6385_v24 = vld [vmem:[%s9078_s0 + $0x64c] sm:$0xf]  ;;  %v5307_v30 = vor.u32 %v6384_v2, %v5304_v9  ;;  %v5319_v47 = vor.u32 %v6399_v15, %v5318_v10 }
 0x354   :  { %v4022_v22 = vpop.f32.mrf.mxu3 }
 0x355   :  { %v4023_v42 = vadd.f32 %v4022_v22, %v8681_v14  ;;  %v6371_v14 = vld [vmem:[%s9078_s0 + $0x5d8] sm:$0xf0]  ;;  %v5315_v22 = vor.u32 %v6385_v24, %v5312_v26 }
 0x356   :  { %v4169_v27 = vpop.f32.mrf.mxu2  ;;  %v4073_v63 = vpop.f32.mrf.mxu0  ;;  %v5203_v45 = vor.u32 %v6371_v14, %v5202_v37 }
 0x357   :  { %v4072_v32 = vadd.f32 %v4071_v21, %v4023_v42 }
 0x358   :  { %v4122_v33 = vpop.f32.mrf.mxu1 }
 0x359   :  { %v4121_v54 = vadd.f32 %v4120_v18, %v4072_v32 }
 0x35b   :  { %v8921_v39 = vadd.f32 %v4169_v27, %v4121_v54 }
 0x35c   :  { %v4024_v48 = vpop.f32.mrf.mxu3 }
 0x35d   :  { %v4025_v4 = vadd.f32 %v4024_v48, %v8693_v38 }
 0x35e   :  { %v4171_v60 = vpop.f32.mrf.mxu2  ;;  %v4076_v49 = vpop.f32.mrf.mxu0 }
 0x35f   :  { %v4074_v5 = vadd.f32 %v4073_v63, %v4025_v4 }
 0x360   :  { %v4125_v51 = vpop.f32.mrf.mxu1 }
 0x361   :  { %v4123_v31 = vadd.f32 %v4122_v33, %v4074_v5  ;;  %4222 = vmatmul.bf16.gmra.mxu3 %v5199_v23  ;;  %4271 = vmatmul.bf16.gmra.mxu0 %v5203_v45 }
 0x363   :  { %4369 = vmatmul.bf16.gmra.mxu2 %v5211_v8  ;;  %4320 = vmatmul.bf16.gmra.mxu1 %v5207_v52  ;;  %v8933_v58 = vadd.f32 %v4171_v60, %v4123_v31 }
 0x364   :  { %v4027_v62 = vpop.f32.mrf.mxu3 }
 0x365   :  { %v4028_v20 = vadd.f32 %v4027_v62, %v8711_v57  ;;  %v6398_v57 = vld [vmem:[%s9078_s0 + $0x6b0] sm:$0xf0]  ;;  %v8975_v62 = vld [vmem:[%s9079_s2] ss:$0 sm:$0xff] }
 0x366   :  { %v4174_v0 = vpop.f32.mrf.mxu2  ;;  %v4078_v38 = vpop.f32.mrf.mxu0  ;;  %v5311_v34 = vor.u32 %v6398_v57, %v5310_v46 }
 0x367   :  { %v4077_v61 = vadd.f32 %v4076_v49, %v4028_v20  ;;  %v8980_v20 = vld [vmem:[%s9080_s3] ss:$0 sm:$0xff] }
 0x368   :  { %v4127_v17 = vpop.f32.mrf.mxu1 }
 0x369   :  { %v4126_v19 = vadd.f32 %v4125_v51, %v4077_v61 }
 0x36b   :  { %v8951_v11 = vadd.f32 %v4174_v0, %v4126_v19 }
 0x36c   :  { %v4029_v12 = vpop.f32.mrf.mxu3 }
 0x36d   :  { %v4030_v21 = vadd.f32 %v4029_v12, %v8723_v3 }
 0x36e   :  { %v4176_v35 = vpop.f32.mrf.mxu2  ;;  %v4081_v18 = vpop.f32.mrf.mxu0 }
 0x36f   :  { %v4079_v42 = vadd.f32 %v4078_v38, %v4030_v21 }
 0x370   :  { %v4130_v27 = vpop.f32.mrf.mxu1 }
 0x371   :  { %v4128_v63 = vadd.f32 %v4127_v17, %v4079_v42  ;;  %4227 = vmatmul.bf16.gmra.mxu3 %v5307_v30  ;;  %4276 = vmatmul.bf16.gmra.mxu0 %v5311_v34 }
 0x373   :  { %4374 = vmatmul.bf16.gmra.mxu2 %v5319_v47  ;;  %4325 = vmatmul.bf16.gmra.mxu1 %v5315_v22  ;;  %v8963_v32 = vadd.f32 %v4176_v35, %v4128_v63 }
 0x374   :  { %v4032_v33 = vpop.f32.mrf.mxu3 }
 0x375   :  { %v4033_v54 = vadd.f32 %v4032_v33, %v8741_v59 }
 0x376   :  { %v4179_v13 = vpop.f32.mrf.mxu2  ;;  %v4083_v3 = vpop.f32.mrf.mxu0 }
 0x377   :  { %v4082_v16 = vadd.f32 %v4081_v18, %v4033_v54 }
 0x378   :  { %v4132_v37 = vpop.f32.mrf.mxu1 }
 0x379   :  { %v4131_v14 = vadd.f32 %v4130_v27, %v4082_v16 }
 0x37b   :  { %v8966_v53 = vadd.f32 %v4179_v13, %v4131_v14 }
 0x37c   :  { %v4034_v36 = vpop.f32.mrf.mxu3 }
 0x37d   :  { %v4035_v44 = vadd.f32 %v4034_v36, %v8753_v40 }
 0x37e   :  { %v4181_v43 = vpop.f32.mrf.mxu2  ;;  %v4242_v48 = vpop.f32.mrf.mxu0 }
 0x37f   :  { %v4084_v4 = vadd.f32 %v4083_v3, %v4035_v44 }
 0x380   :  { %v4291_v60 = vpop.f32.mrf.mxu1 }
 0x381   :  { %v4133_v23 = vadd.f32 %v4132_v37, %v4084_v4 }
 0x383   :  { %v8969_v45 = vadd.f32 %v4181_v43, %v4133_v23 }
 0x384   :  { %v4193_v49 = vpop.f32.mrf.mxu3 }
 0x385   :  { %v4194_v59 = vadd.f32 %v4193_v49, %v8771_v50 }
 0x386   :  { %v4340_v8 = vpop.f32.mrf.mxu2  ;;  %v4244_v52 = vpop.f32.mrf.mxu0 }
 0x387   :  { %v4243_v5 = vadd.f32 %v4242_v48, %v4194_v59 }
 0x388   :  { %v4293_v51 = vpop.f32.mrf.mxu1 }
 0x389   :  { %v4292_v31 = vadd.f32 %v4291_v60, %v4243_v5 }
 0x38b   :  { %v4341_v40 = vadd.f32 %v4340_v8, %v4292_v31 }
 0x38c   :  { %v4195_v0 = vpop.f32.mrf.mxu3 }
 0x38d   :  { %v4384_v38 = vmul.f32 %v8975_v62, %v4341_v40  ;;  %v4196_v50 = vadd.f32 %v4195_v0, %v8783_v1 }
 0x38e   :  { %v4342_v61 = vpop.f32.mrf.mxu2  ;;  %v4247_v17 = vpop.f32.mrf.mxu0 }
 0x38f   :  { %v4404_v19 = vadd.f32 %v8980_v20, %v4384_v38  ;;  %v4245_v2 = vadd.f32 %v4244_v52, %v4196_v50 }
 0x390   :  { %v4296_v9 = vpop.f32.mrf.mxu1 }
 0x391   :  { %v4420_v46 = vmax.f32 %v4404_v19, 0.0  ;;  %v4294_v57 = vadd.f32 %v4293_v51, %v4245_v2 }
 0x393   :  { %4436 = vst [vmem:[%s9081_s4] sm:$0xff] %v4420_v46  ;;  %v4343_v10 = vadd.f32 %v4342_v61, %v4294_v57 }
 0x394   :  { %v4198_v15 = vpop.f32.mrf.mxu3 }
 0x395   :  { %v4385_v24 = vmul.f32 %v8975_v62, %v4343_v10  ;;  %v4199_v26 = vadd.f32 %v4198_v15, %v8801_v29 }
 0x396   :  { %v4345_v12 = vpop.f32.mrf.mxu2  ;;  %v4249_v1 = vpop.f32.mrf.mxu0 }
 0x397   :  { %v4405_v21 = vadd.f32 %v8980_v20, %v4385_v24  ;;  %v4248_v35 = vadd.f32 %v4247_v17, %v4199_v26 }
 0x398   :  { %v4298_v30 = vpop.f32.mrf.mxu1 }
 0x399   :  { %v4421_v34 = vmax.f32 %v4405_v21, 0.0  ;;  %v4297_v18 = vadd.f32 %v4296_v9, %v4248_v35 }
 0x39b   :  { %4437 = vst [vmem:[%s9081_s4 + $0x8] sm:$0xff] %v4421_v34  ;;  %v4346_v47 = vadd.f32 %v4345_v12, %v4297_v18 }
 0x39c   :  { %v4200_v22 = vpop.f32.mrf.mxu3 }
 0x39d   :  { %v4386_v42 = vmul.f32 %v8975_v62, %v4346_v47  ;;  %v4201_v27 = vadd.f32 %v4200_v22, %v8813_v41 }
 0x39e   :  { %v4347_v63 = vpop.f32.mrf.mxu2  ;;  %v4252_v29 = vpop.f32.mrf.mxu0 }
 0x39f   :  { %v4406_v33 = vadd.f32 %v8980_v20, %v4386_v42  ;;  %v4250_v54 = vadd.f32 %v4249_v1, %v4201_v27 }
 0x3a0   :  { %v4301_v13 = vpop.f32.mrf.mxu1 }
 0x3a1   :  { %v4422_v3 = vmax.f32 %v4406_v33, 0.0  ;;  %v4299_v16 = vadd.f32 %v4298_v30, %v4250_v54 }
 0x3a3   :  { %4438 = vst [vmem:[%s9081_s4 + $0x10] sm:$0xff] %v4422_v3  ;;  %v4348_v37 = vadd.f32 %v4347_v63, %v4299_v16 }
 0x3a4   :  { %v4203_v14 = vpop.f32.mrf.mxu3 }
 0x3a5   :  { %v4387_v36 = vmul.f32 %v8975_v62, %v4348_v37  ;;  %v4204_v44 = vadd.f32 %v4203_v14, %v8831_v28 }
 0x3a6   :  { %v4350_v43 = vpop.f32.mrf.mxu2  ;;  %v4254_v41 = vpop.f32.mrf.mxu0 }
 0x3a7   :  { %v4407_v48 = vadd.f32 %v8980_v20, %v4387_v36  ;;  %v4253_v4 = vadd.f32 %v4252_v29, %v4204_v44 }
 0x3a8   :  { %v4303_v60 = vpop.f32.mrf.mxu1 }
 0x3a9   :  { %v4423_v23 = vmax.f32 %v4407_v48, 0.0  ;;  %v4302_v49 = vadd.f32 %v4301_v13, %v4253_v4 }
 0x3ab   :  { %4439 = vst [vmem:[%s9081_s4 + $0x18] sm:$0xff] %v4423_v23  ;;  %v4351_v59 = vadd.f32 %v4350_v43, %v4302_v49 }
 0x3ac   :  { %v4205_v8 = vpop.f32.mrf.mxu3 }
 0x3ad   :  { %v4388_v52 = vmul.f32 %v8975_v62, %v4351_v59  ;;  %v4206_v5 = vadd.f32 %v4205_v8, %v8843_v7 }
 0x3ae   :  { %v4352_v51 = vpop.f32.mrf.mxu2  ;;  %v4257_v28 = vpop.f32.mrf.mxu0 }
 0x3af   :  { %v4408_v31 = vadd.f32 %v8980_v20, %v4388_v52  ;;  %v4255_v40 = vadd.f32 %v4254_v41, %v4206_v5 }
 0x3b0   :  { %v4306_v0 = vpop.f32.mrf.mxu1 }
 0x3b1   :  { %v4424_v38 = vmax.f32 %v4408_v31, 0.0  ;;  %v4304_v50 = vadd.f32 %v4303_v60, %v4255_v40 }
 0x3b3   :  { %4440 = vst [vmem:[%s9081_s4 + $0x20] sm:$0xff] %v4424_v38  ;;  %v4353_v61 = vadd.f32 %v4352_v51, %v4304_v50 }
 0x3b4   :  { %v4208_v17 = vpop.f32.mrf.mxu3 }
 0x3b5   :  { %v4389_v19 = vmul.f32 %v8975_v62, %v4353_v61  ;;  %v4209_v2 = vadd.f32 %v4208_v17, %v8861_v56 }
 0x3b6   :  { %v4355_v9 = vpop.f32.mrf.mxu2  ;;  %v4259_v7 = vpop.f32.mrf.mxu0 }
 0x3b7   :  { %v4409_v46 = vadd.f32 %v8980_v20, %v4389_v19  ;;  %v4258_v57 = vadd.f32 %v4257_v28, %v4209_v2 }
 0x3b8   :  { %v4308_v10 = vpop.f32.mrf.mxu1 }
 0x3b9   :  { %v4425_v15 = vmax.f32 %v4409_v46, 0.0  ;;  %v4307_v24 = vadd.f32 %v4306_v0, %v4258_v57 }
 0x3bb   :  { %4441 = vst [vmem:[%s9081_s4 + $0x28] sm:$0xff] %v4425_v15  ;;  %v4356_v26 = vadd.f32 %v4355_v9, %v4307_v24 }
 0x3bc   :  { %v4210_v12 = vpop.f32.mrf.mxu3 }
 0x3bd   :  { %v4390_v1 = vmul.f32 %v8975_v62, %v4356_v26  ;;  %v4211_v21 = vadd.f32 %v4210_v12, %v8873_v55 }
 0x3be   :  { %v4357_v35 = vpop.f32.mrf.mxu2  ;;  %v4262_v56 = vpop.f32.mrf.mxu0 }
 0x3bf   :  { %v4410_v30 = vadd.f32 %v8980_v20, %v4390_v1  ;;  %v4260_v34 = vadd.f32 %v4259_v7, %v4211_v21 }
 0x3c0   :  { %v4311_v18 = vpop.f32.mrf.mxu1 }
 0x3c1   :  { %v4426_v47 = vmax.f32 %v4410_v30, 0.0  ;;  %v4309_v22 = vadd.f32 %v4308_v10, %v4260_v34 }
 0x3c3   :  { %4442 = vst [vmem:[%s9081_s4 + $0x30] sm:$0xff] %v4426_v47  ;;  %v4358_v42 = vadd.f32 %v4357_v35, %v4309_v22 }
 0x3c4   :  { %v4213_v27 = vpop.f32.mrf.mxu3 }
 0x3c5   :  { %v4391_v63 = vmul.f32 %v8975_v62, %v4358_v42  ;;  %v4214_v29 = vadd.f32 %v4213_v27, %v8891_v6 }
 0x3c6   :  { %v4360_v33 = vpop.f32.mrf.mxu2  ;;  %v4264_v55 = vpop.f32.mrf.mxu0 }
 0x3c7   :  { %v4411_v54 = vadd.f32 %v8980_v20, %v4391_v63  ;;  %v4263_v13 = vadd.f32 %v4262_v56, %v4214_v29 }
 0x3c8   :  { %v4313_v3 = vpop.f32.mrf.mxu1 }
 0x3c9   :  { %v4427_v16 = vmax.f32 %v4411_v54, 0.0  ;;  %v4312_v37 = vadd.f32 %v4311_v18, %v4263_v13 }
 0x3cb   :  { %4443 = vst [vmem:[%s9081_s4 + $0x38] sm:$0xff] %v4427_v16  ;;  %v4361_v14 = vadd.f32 %v4360_v33, %v4312_v37 }
 0x3cc   :  { %v4215_v36 = vpop.f32.mrf.mxu3 }
 0x3cd   :  { %v4392_v44 = vmul.f32 %v8975_v62, %v4361_v14  ;;  %v4216_v43 = vadd.f32 %v4215_v36, %v8903_v25 }
 0x3ce   :  { %v4362_v41 = vpop.f32.mrf.mxu2  ;;  %v4267_v6 = vpop.f32.mrf.mxu0 }
 0x3cf   :  { %v4412_v48 = vadd.f32 %v8980_v20, %v4392_v44  ;;  %v4265_v4 = vadd.f32 %v4264_v55, %v4216_v43 }
 0x3d0   :  { %v4316_v60 = vpop.f32.mrf.mxu1 }
 0x3d1   :  { %v4428_v23 = vmax.f32 %v4412_v48, 0.0  ;;  %v4314_v49 = vadd.f32 %v4313_v3, %v4265_v4 }
 0x3d3   :  { %4444 = vst [vmem:[%s9081_s4 + $0x40] sm:$0xff] %v4428_v23  ;;  %v4363_v59 = vadd.f32 %v4362_v41, %v4314_v49 }
 0x3d4   :  { %v4218_v8 = vpop.f32.mrf.mxu3 }
 0x3d5   :  { %v4393_v52 = vmul.f32 %v8975_v62, %v4363_v59  ;;  %v4219_v5 = vadd.f32 %v4218_v8, %v8921_v39 }
 0x3d6   :  { %v4365_v51 = vpop.f32.mrf.mxu2  ;;  %v4269_v25 = vpop.f32.mrf.mxu0 }
 0x3d7   :  { %v4413_v28 = vadd.f32 %v8980_v20, %v4393_v52  ;;  %v4268_v31 = vadd.f32 %v4267_v6, %v4219_v5 }
 0x3d8   :  { %v4318_v40 = vpop.f32.mrf.mxu1 }
 0x3d9   :  { %v4429_v0 = vmax.f32 %v4413_v28, 0.0  ;;  %v4317_v38 = vadd.f32 %v4316_v60, %v4268_v31 }
 0x3db   :  { %4445 = vst [vmem:[%s9081_s4 + $0x48] sm:$0xff] %v4429_v0  ;;  %v4366_v50 = vadd.f32 %v4365_v51, %v4317_v38 }
 0x3dc   :  { %v4220_v61 = vpop.f32.mrf.mxu3 }
 0x3dd   :  { %v4394_v17 = vmul.f32 %v8975_v62, %v4366_v50  ;;  %v4221_v19 = vadd.f32 %v4220_v61, %v8933_v58 }
 0x3de   :  { %v4367_v2 = vpop.f32.mrf.mxu2  ;;  %v4272_v7 = vpop.f32.mrf.mxu0 }
 0x3df   :  { %v4414_v39 = vadd.f32 %v8980_v20, %v4394_v17  ;;  %v4270_v9 = vadd.f32 %v4269_v25, %v4221_v19 }
 0x3e0   :  { %v4321_v10 = vpop.f32.mrf.mxu1 }
 0x3e1   :  { %v4430_v46 = vmax.f32 %v4414_v39, 0.0  ;;  %v4319_v57 = vadd.f32 %v4318_v40, %v4270_v9 }
 0x3e3   :  { %4446 = vst [vmem:[%s9081_s4 + $0x50] sm:$0xff] %v4430_v46  ;;  %v4368_v15 = vadd.f32 %v4367_v2, %v4319_v57 }
 0x3e4   :  { %v4223_v24 = vpop.f32.mrf.mxu3 }
 0x3e5   :  { %v4395_v26 = vmul.f32 %v8975_v62, %v4368_v15  ;;  %v4224_v12 = vadd.f32 %v4223_v24, %v8951_v11 }
 0x3e6   :  { %v4370_v1 = vpop.f32.mrf.mxu2  ;;  %v4274_v30 = vpop.f32.mrf.mxu0 }
 0x3e7   :  { %v4415_v58 = vadd.f32 %v8980_v20, %v4395_v26  ;;  %v4273_v21 = vadd.f32 %v4272_v7, %v4224_v12 }
 0x3e8   :  { %v4323_v18 = vpop.f32.mrf.mxu1 }
 0x3e9   :  { %v4431_v35 = vmax.f32 %v4415_v58, 0.0  ;;  %v4322_v56 = vadd.f32 %v4321_v10, %v4273_v21 }
 0x3eb   :  { %4447 = vst [vmem:[%s9081_s4 + $0x58] sm:$0xff] %v4431_v35  ;;  %v4371_v34 = vadd.f32 %v4370_v1, %v4322_v56 }
 0x3ec   :  { %v4225_v47 = vpop.f32.mrf.mxu3 }
 0x3ed   :  { %v4396_v22 = vmul.f32 %v8975_v62, %v4371_v34  ;;  %v4226_v42 = vadd.f32 %v4225_v47, %v8963_v32 }
 0x3ee   :  { %v4372_v27 = vpop.f32.mrf.mxu2  ;;  %v4277_v54 = vpop.f32.mrf.mxu0 }
 0x3ef   :  { %v4416_v11 = vadd.f32 %v8980_v20, %v4396_v22  ;;  %v4275_v63 = vadd.f32 %v4274_v30, %v4226_v42 }
 0x3f0   :  { %v4326_v37 = vpop.f32.mrf.mxu1 }
 0x3f1   :  { %v4432_v29 = vmax.f32 %v4416_v11, 0.0  ;;  %v4324_v33 = vadd.f32 %v4323_v18, %v4275_v63 }
 0x3f3   :  { %4448 = vst [vmem:[%s9081_s4 + $0x60] sm:$0xff] %v4432_v29  ;;  %v4373_v55 = vadd.f32 %v4372_v27, %v4324_v33 }
 0x3f4   :  { %v4228_v13 = vpop.f32.mrf.mxu3 }
 0x3f5   :  { %v4397_v3 = vmul.f32 %v8975_v62, %v4373_v55  ;;  %v4229_v16 = vadd.f32 %v4228_v13, %v8966_v53 }
 0x3f6   :  { %v4375_v36 = vpop.f32.mrf.mxu2  ;;  %v4279_v60 = vpop.f32.mrf.mxu0 }
 0x3f7   :  { %v4417_v32 = vadd.f32 %v8980_v20, %v4397_v3  ;;  %v4278_v14 = vadd.f32 %v4277_v54, %v4229_v16 }
 0x3f8   :  { %v4328_v49 = vpop.f32.mrf.mxu1 }
 0x3f9   :  { %v4433_v44 = vmax.f32 %v4417_v32, 0.0  ;;  %v4327_v43 = vadd.f32 %v4326_v37, %v4278_v14 }
 0x3fb   :  { %4449 = vst [vmem:[%s9081_s4 + $0x68] sm:$0xff] %v4433_v44  ;;  %v4376_v41 = vadd.f32 %v4375_v36, %v4327_v43 }
 0x3fc   :  { %v4230_v6 = vpop.f32.mrf.mxu3 }
 0x3fd   :  { %v4398_v48 = vmul.f32 %v8975_v62, %v4376_v41  ;;  %v4231_v4 = vadd.f32 %v4230_v6, %v8969_v45 }
 0x3fe   :  { %v4377_v52 = vpop.f32.mrf.mxu2 }
 0x3ff   :  { %v4418_v53 = vadd.f32 %v8980_v20, %v4398_v48  ;;  %v4280_v23 = vadd.f32 %v4279_v60, %v4231_v4 }
 0x401   :  { %v4434_v59 = vmax.f32 %v4418_v53, 0.0  ;;  %v4329_v8 = vadd.f32 %v4328_v49, %v4280_v23 }
 0x403   :  { %4450 = vst [vmem:[%s9081_s4 + $0x70] sm:$0xff] %v4434_v59  ;;  %v4378_v5 = vadd.f32 %v4377_v52, %v4329_v8 }
 0x405   :  { %v4399_v51 = vmul.f32 %v8975_v62, %v4378_v5 }
 0x407   :  { %v4419_v25 = vadd.f32 %v8980_v20, %v4399_v51 }
 0x409   :  { %v4435_v28 = vmax.f32 %v4419_v25, 0.0 }
 0x40b   :  { %4451 = vst [vmem:[%s9081_s4 + $0x78] sm:$0xff] %v4435_v28 }

</bundles_post_ra>
